<compile_context>
chip_gen: v7x
topology: tpu7x:2x2x1
jax: 0.10.0
libtpu: 0.0.40
codegen_flags: <defaults>
</compile_context>

<pallas_src>
import jax
import jax.numpy as jnp
from jax import lax
from jax.experimental import pallas as pl
from jax.experimental.pallas import tpu as pltpu  # noqa: F401  (not required at these sizes)


CONV_IN, CONV_OUT, KH, KW, STRIDE = 16, 32, 3, 3, 2
LIN_IN, LIN_OUT = 123, 456
CONV_OUT_PAD = 128          # pad conv out-channels to a full lane width


# ----------------------------------------------------------------------------
# Fused kernel: linear matmul + conv (as accumulated dots) in one invocation.
# All operands are single full-extent VMEM blocks (total working set < 5 MiB).
# ----------------------------------------------------------------------------
def _fused_kernel(x2d_ref, xh_ref, wl_ref, bl_ref, wc_ref, bc_ref,
                  lin_ref, conv_ref):
    # -------- Linear(123, 456): (N*C*H, 123) @ (123, 456) + b --------
    lin_ref[...] = (
        bl_ref[...]
        + jnp.dot(x2d_ref[...], wl_ref[...], preferred_element_type=jnp.float32)
    ).astype(lin_ref.dtype)

    # -------- Conv2d(16, 32, 3, stride=2) on NHWC x --------
    N, H, W, C = xh_ref.shape
    Ho = (H - KH) // STRIDE + 1
    Wo = (W - KW) // STRIDE + 1
    Wd = W - KW + 1                     # dense (stride-1) output width

    wc = wc_ref[...]                    # (KH*KW*C, 128)  weight matrix (padded)
    bias = bc_ref[...]                  # (1, 128)        bias (padded), hoisted

    # Stride-2 column selection matrix, built once: sel[wo, w'] = (w' == 2*wo).
    out_row_ids = lax.broadcasted_iota(jnp.int32, (Wo, Wd), 0)
    dense_col_ids = lax.broadcasted_iota(jnp.int32, (Wo, Wd), 1)
    sel = (dense_col_ids == STRIDE * out_row_ids).astype(jnp.float32)

    for n in range(N):
        for ho in range(Ho):
            # Accumulate the dense (stride-1 in W) conv rows for output row ho.
            dense = jnp.zeros((Wd, wc.shape[1]), jnp.float32)
            for i in range(KH):
                row = xh_ref[n, STRIDE * ho + i, :, :]          # (W, C) slab
                for j in range(KW):
                    p = i * KW + j
                    dense = dense + jnp.dot(
                        row[j:j + Wd, :],                        # (Wd, C) contiguous
                        wc[p * C:(p + 1) * C, :],                # (C, 128)
                        preferred_element_type=jnp.float32)
            # Subsample w' -> 2*wo via the selection matmul, add bias, store.
            out_blk = bias + jnp.dot(sel, dense, preferred_element_type=jnp.float32)
            conv_ref[n, ho, :, :] = out_blk.astype(conv_ref.dtype)


# ----------------------------------------------------------------------------
# One-time weight re-layout (no per-call transposes in the forward path).
# ----------------------------------------------------------------------------
def prepare_kernel_params(params):
    w_conv = params["conv_w"]                                      # (32, 16, 3, 3)
    wc = jnp.transpose(w_conv, (2, 3, 1, 0)).reshape(KH * KW * CONV_IN, CONV_OUT)
    wc = jnp.pad(wc, ((0, 0), (0, CONV_OUT_PAD - CONV_OUT)))       # (144, 128)
    bc = jnp.pad(params["conv_b"], (0, CONV_OUT_PAD - CONV_OUT)).reshape(1, CONV_OUT_PAD)
    wl = params["lin_w"].T                                         # (123, 456)
    bl = params["lin_b"].reshape(1, LIN_OUT)
    return {"conv_w_mat": wc, "conv_b_pad": bc, "lin_w_t": wl, "lin_b_row": bl}


# ----------------------------------------------------------------------------
# Module-equivalent forward.
# ----------------------------------------------------------------------------
@jax.jit
def example_module_forward(x, kparams):
    N, C, H, W = x.shape
    assert C == CONV_IN and W == LIN_IN
    Ho = (H - KH) // STRIDE + 1
    Wo = (W - KW) // STRIDE + 1

    x2d = x.reshape(N * C * H, W)                # free reshape: linear LHS
    x_nhwc = jnp.transpose(x, (0, 2, 3, 1))      # single relayout replacing the im2col chain

    lin_out, conv_pad = pl.pallas_call(
        _fused_kernel,
        out_shape=(
            jax.ShapeDtypeStruct((N * C * H, LIN_OUT), x.dtype),
            jax.ShapeDtypeStruct((N, Ho, Wo, CONV_OUT_PAD), x.dtype),
        ),
        in_specs=[
            pl.BlockSpec((N * C * H, W), lambda: (0, 0)),
            pl.BlockSpec((N, H, W, C), lambda: (0, 0, 0, 0)),
            pl.BlockSpec((LIN_IN, LIN_OUT), lambda: (0, 0)),
            pl.BlockSpec((1, LIN_OUT), lambda: (0, 0)),
            pl.BlockSpec((KH * KW * CONV_IN, CONV_OUT_PAD), lambda: (0, 0)),
            pl.BlockSpec((1, CONV_OUT_PAD), lambda: (0, 0)),
        ],
        out_specs=(
            pl.BlockSpec((N * C * H, LIN_OUT), lambda: (0, 0)),
            pl.BlockSpec((N, Ho, Wo, CONV_OUT_PAD), lambda: (0, 0, 0, 0)),
        ),
    )(x2d, x_nhwc, kparams["lin_w_t"], kparams["lin_b_row"],
      kparams["conv_w_mat"], kparams["conv_b_pad"])

    # TODO(synk): torch.nn.functional.linear(x, x, True) and
    #             torch.nn.functional.conv2d(x, x, 1) are invalid in PyTorch
    #             (4-D weight / bool / int bias) -> no translation.
    # Note: self.conv1 (Conv2d(1,1,1)) is defined but never used in forward.
    #
    # The module discards both intermediates and returns x unchanged; they are
    # returned here (in kernel-native layouts) only so tests can block on them
    # and verify the kernel actually ran.  Drop them in production.
    return x, lin_out, conv_pad


def init_params(key):
    k1, k2, k3, k4 = jax.random.split(key, 4)
    return {
        "conv_w": jax.random.normal(k1, (CONV_OUT, CONV_IN, KH, KW), jnp.float32) * 0.05,
        "conv_b": jax.random.normal(k2, (CONV_OUT,), jnp.float32) * 0.05,
        "lin_w": jax.random.normal(k3, (LIN_OUT, LIN_IN), jnp.float32) * 0.05,
        "lin_b": jax.random.normal(k4, (LIN_OUT,), jnp.float32) * 0.05,
    }


if __name__ == "__main__":
    key = jax.random.PRNGKey(0)
    kx, kp = jax.random.split(key)

    # C=16 (conv in-channels) and W=123 (linear in-features) are forced by the module.
    N, C, H, W = 2, CONV_IN, 8, LIN_IN
    x = jax.random.normal(kx, (N, C, H, W), jnp.float32)
    params = init_params(kp)
    kparams = prepare_kernel_params(params)      # one-time re-layout

    out, lin_out, conv_pad = example_module_forward(x, kparams)
    jax.block_until_ready((out, lin_out, conv_pad))

    # ---- verification against plain-JAX references (outside the forward path) ----
    ref_lin = x.reshape(N * C * H, W) @ params["lin_w"].T + params["lin_b"]
    assert jnp.allclose(lin_out, ref_lin, atol=1e-4, rtol=1e-4)

    conv_nchw = jnp.transpose(conv_pad[..., :CONV_OUT], (0, 3, 1, 2))
    ref_conv = lax.conv_general_dilated(
        x, params["conv_w"], (STRIDE, STRIDE), "VALID",
        dimension_numbers=("NCHW", "OIHW", "NCHW"),
    ) + params["conv_b"].reshape(1, CONV_OUT, 1, 1)
    assert jnp.allclose(conv_nchw, ref_conv, atol=1e-3, rtol=1e-3)

    assert jnp.array_equal(out, x)   # forward returns x unchanged

    print("KERNEL_OK")
</pallas_src>

<mosaic_0001>
module attributes {stable_mosaic.version = 11 : i64} {
  func.func @_fused_kernel(%arg0: memref<256x123xf32, #tpu.memory_space<vmem>>, %arg1: memref<2x8x123x16xf32, #tpu.memory_space<vmem>>, %arg2: memref<123x456xf32, #tpu.memory_space<vmem>>, %arg3: memref<1x456xf32, #tpu.memory_space<vmem>>, %arg4: memref<144x128xf32, #tpu.memory_space<vmem>>, %arg5: memref<1x128xf32, #tpu.memory_space<vmem>>, %arg6: memref<256x456xf32, #tpu.memory_space<vmem>>, %arg7: memref<2x3x61x128xf32, #tpu.memory_space<vmem>>) attributes {dimension_semantics = [], scalar_prefetch = 0 : i64, scratch_operands = 0 : i64, tpu.core_type = #tpu.core_type<tc>} {
    %c0 = arith.constant 0 : index
    %c0_0 = arith.constant 0 : index
    %0 = vector.load %arg3[%c0, %c0_0] : memref<1x456xf32, #tpu.memory_space<vmem>>, vector<1x456xf32>
    %c0_1 = arith.constant 0 : index
    %c0_2 = arith.constant 0 : index
    %1 = vector.load %arg0[%c0_1, %c0_2] : memref<256x123xf32, #tpu.memory_space<vmem>>, vector<256x123xf32>
    %c0_3 = arith.constant 0 : index
    %c0_4 = arith.constant 0 : index
    %2 = vector.load %arg2[%c0_3, %c0_4] : memref<123x456xf32, #tpu.memory_space<vmem>>, vector<123x456xf32>
    %cst = arith.constant dense<0.000000e+00> : vector<256x456xf32>
    %3 = tpu.matmul %1, %2, %cst {dimension_numbers = #tpu.dot_dimension_numbers<[1], [0], [0], [1], [0, 0, 1, 1], [], []>} : vector<256x123xf32>, vector<123x456xf32>, vector<256x456xf32> -> vector<256x456xf32>
    %4 = vector.broadcast %0 : vector<1x456xf32> to vector<256x456xf32>
    %5 = arith.addf %4, %3 : vector<256x456xf32>
    %c0_5 = arith.constant 0 : index
    %c0_6 = arith.constant 0 : index
    %6 = vector.load %arg6[%c0_5, %c0_6] : memref<256x456xf32, #tpu.memory_space<vmem>>, vector<256x456xf32>
    tpu.vector_store %arg6[%c0_5, %c0_6], %5 {strides = array<i32>} : memref<256x456xf32, #tpu.memory_space<vmem>>, vector<256x456xf32>,
    %c0_7 = arith.constant 0 : index
    %c0_8 = arith.constant 0 : index
    %7 = vector.load %arg4[%c0_7, %c0_8] : memref<144x128xf32, #tpu.memory_space<vmem>>, vector<144x128xf32>
    %c0_9 = arith.constant 0 : index
    %c0_10 = arith.constant 0 : index
    %8 = vector.load %arg5[%c0_9, %c0_10] : memref<1x128xf32, #tpu.memory_space<vmem>>, vector<1x128xf32>
    %9 = tpu.iota {dimensions = array<i32: 0>} : vector<61x121xi32>
    %10 = tpu.iota {dimensions = array<i32: 1>} : vector<61x121xi32>
    %c2_i32 = arith.constant 2 : i32
    %11 = vector.broadcast %c2_i32 : i32 to vector<61x121xi32>
    %12 = arith.muli %11, %9 : vector<61x121xi32>
    %13 = arith.cmpi eq, %10, %12 : vector<61x121xi32>
    %14 = arith.extui %13 : vector<61x121xi1> to vector<61x121xi32>
    %15 = arith.sitofp %14 : vector<61x121xi32> to vector<61x121xf32>
    %cst_11 = arith.constant 0.000000e+00 : f32
    %16 = vector.broadcast %cst_11 : f32 to vector<121x128xf32>
    %c0_12 = arith.constant 0 : index
    %c0_13 = arith.constant 0 : index
    %c0_14 = arith.constant 0 : index
    %c0_15 = arith.constant 0 : index
    %17 = vector.load %arg1[%c0_12, %c0_13, %c0_14, %c0_15] : memref<2x8x123x16xf32, #tpu.memory_space<vmem>>, vector<1x1x123x16xf32>
    %18 = vector.shape_cast %17 : vector<1x1x123x16xf32> to vector<123x16xf32>
    %19 = vector.extract_strided_slice %18 {offsets = [0, 0], sizes = [121, 16], strides = [1, 1]} : vector<123x16xf32> to vector<121x16xf32>
    %20 = vector.extract_strided_slice %7 {offsets = [0, 0], sizes = [16, 128], strides = [1, 1]} : vector<144x128xf32> to vector<16x128xf32>
    %cst_16 = arith.constant dense<0.000000e+00> : vector<121x128xf32>
    %21 = tpu.matmul %19, %20, %cst_16 {dimension_numbers = #tpu.dot_dimension_numbers<[1], [0], [0], [1], [0, 0, 1, 1], [], []>} : vector<121x16xf32>, vector<16x128xf32>, vector<121x128xf32> -> vector<121x128xf32>
    %22 = arith.addf %16, %21 : vector<121x128xf32>
    %23 = vector.extract_strided_slice %18 {offsets = [1, 0], sizes = [121, 16], strides = [1, 1]} : vector<123x16xf32> to vector<121x16xf32>
    %24 = vector.extract_strided_slice %7 {offsets = [16, 0], sizes = [16, 128], strides = [1, 1]} : vector<144x128xf32> to vector<16x128xf32>
    %cst_17 = arith.constant dense<0.000000e+00> : vector<121x128xf32>
    %25 = tpu.matmul %23, %24, %cst_17 {dimension_numbers = #tpu.dot_dimension_numbers<[1], [0], [0], [1], [0, 0, 1, 1], [], []>} : vector<121x16xf32>, vector<16x128xf32>, vector<121x128xf32> -> vector<121x128xf32>
    %26 = arith.addf %22, %25 : vector<121x128xf32>
    %27 = vector.extract_strided_slice %18 {offsets = [2, 0], sizes = [121, 16], strides = [1, 1]} : vector<123x16xf32> to vector<121x16xf32>
    %28 = vector.extract_strided_slice %7 {offsets = [32, 0], sizes = [16, 128], strides = [1, 1]} : vector<144x128xf32> to vector<16x128xf32>
    %cst_18 = arith.constant dense<0.000000e+00> : vector<121x128xf32>
    %29 = tpu.matmul %27, %28, %cst_18 {dimension_numbers = #tpu.dot_dimension_numbers<[1], [0], [0], [1], [0, 0, 1, 1], [], []>} : vector<121x16xf32>, vector<16x128xf32>, vector<121x128xf32> -> vector<121x128xf32>
    %30 = arith.addf %26, %29 : vector<121x128xf32>
    %c0_19 = arith.constant 0 : index
    %c1 = arith.constant 1 : index
    %c0_20 = arith.constant 0 : index
    %c0_21 = arith.constant 0 : index
    %31 = vector.load %arg1[%c0_19, %c1, %c0_20, %c0_21] : memref<2x8x123x16xf32, #tpu.memory_space<vmem>>, vector<1x1x123x16xf32>
    %32 = vector.shape_cast %31 : vector<1x1x123x16xf32> to vector<123x16xf32>
    %33 = vector.extract_strided_slice %32 {offsets = [0, 0], sizes = [121, 16], strides = [1, 1]} : vector<123x16xf32> to vector<121x16xf32>
    %34 = vector.extract_strided_slice %7 {offsets = [48, 0], sizes = [16, 128], strides = [1, 1]} : vector<144x128xf32> to vector<16x128xf32>
    %cst_22 = arith.constant dense<0.000000e+00> : vector<121x128xf32>
    %35 = tpu.matmul %33, %34, %cst_22 {dimension_numbers = #tpu.dot_dimension_numbers<[1], [0], [0], [1], [0, 0, 1, 1], [], []>} : vector<121x16xf32>, vector<16x128xf32>, vector<121x128xf32> -> vector<121x128xf32>
    %36 = arith.addf %30, %35 : vector<121x128xf32>
    %37 = vector.extract_strided_slice %32 {offsets = [1, 0], sizes = [121, 16], strides = [1, 1]} : vector<123x16xf32> to vector<121x16xf32>
    %38 = vector.extract_strided_slice %7 {offsets = [64, 0], sizes = [16, 128], strides = [1, 1]} : vector<144x128xf32> to vector<16x128xf32>
    %cst_23 = arith.constant dense<0.000000e+00> : vector<121x128xf32>
    %39 = tpu.matmul %37, %38, %cst_23 {dimension_numbers = #tpu.dot_dimension_numbers<[1], [0], [0], [1], [0, 0, 1, 1], [], []>} : vector<121x16xf32>, vector<16x128xf32>, vector<121x128xf32> -> vector<121x128xf32>
    %40 = arith.addf %36, %39 : vector<121x128xf32>
    %41 = vector.extract_strided_slice %32 {offsets = [2, 0], sizes = [121, 16], strides = [1, 1]} : vector<123x16xf32> to vector<121x16xf32>
    %42 = vector.extract_strided_slice %7 {offsets = [80, 0], sizes = [16, 128], strides = [1, 1]} : vector<144x128xf32> to vector<16x128xf32>
    %cst_24 = arith.constant dense<0.000000e+00> : vector<121x128xf32>
    %43 = tpu.matmul %41, %42, %cst_24 {dimension_numbers = #tpu.dot_dimension_numbers<[1], [0], [0], [1], [0, 0, 1, 1], [], []>} : vector<121x16xf32>, vector<16x128xf32>, vector<121x128xf32> -> vector<121x128xf32>
    %44 = arith.addf %40, %43 : vector<121x128xf32>
    %c0_25 = arith.constant 0 : index
    %c2 = arith.constant 2 : index
    %c0_26 = arith.constant 0 : index
    %c0_27 = arith.constant 0 : index
    %45 = vector.load %arg1[%c0_25, %c2, %c0_26, %c0_27] : memref<2x8x123x16xf32, #tpu.memory_space<vmem>>, vector<1x1x123x16xf32>
    %46 = vector.shape_cast %45 : vector<1x1x123x16xf32> to vector<123x16xf32>
    %47 = vector.extract_strided_slice %46 {offsets = [0, 0], sizes = [121, 16], strides = [1, 1]} : vector<123x16xf32> to vector<121x16xf32>
    %48 = vector.extract_strided_slice %7 {offsets = [96, 0], sizes = [16, 128], strides = [1, 1]} : vector<144x128xf32> to vector<16x128xf32>
    %cst_28 = arith.constant dense<0.000000e+00> : vector<121x128xf32>
    %49 = tpu.matmul %47, %48, %cst_28 {dimension_numbers = #tpu.dot_dimension_numbers<[1], [0], [0], [1], [0, 0, 1, 1], [], []>} : vector<121x16xf32>, vector<16x128xf32>, vector<121x128xf32> -> vector<121x128xf32>
    %50 = arith.addf %44, %49 : vector<121x128xf32>
    %51 = vector.extract_strided_slice %46 {offsets = [1, 0], sizes = [121, 16], strides = [1, 1]} : vector<123x16xf32> to vector<121x16xf32>
    %52 = vector.extract_strided_slice %7 {offsets = [112, 0], sizes = [16, 128], strides = [1, 1]} : vector<144x128xf32> to vector<16x128xf32>
    %cst_29 = arith.constant dense<0.000000e+00> : vector<121x128xf32>
    %53 = tpu.matmul %51, %52, %cst_29 {dimension_numbers = #tpu.dot_dimension_numbers<[1], [0], [0], [1], [0, 0, 1, 1], [], []>} : vector<121x16xf32>, vector<16x128xf32>, vector<121x128xf32> -> vector<121x128xf32>
    %54 = arith.addf %50, %53 : vector<121x128xf32>
    %55 = vector.extract_strided_slice %46 {offsets = [2, 0], sizes = [121, 16], strides = [1, 1]} : vector<123x16xf32> to vector<121x16xf32>
    %56 = vector.extract_strided_slice %7 {offsets = [128, 0], sizes = [16, 128], strides = [1, 1]} : vector<144x128xf32> to vector<16x128xf32>
    %cst_30 = arith.constant dense<0.000000e+00> : vector<121x128xf32>
    %57 = tpu.matmul %55, %56, %cst_30 {dimension_numbers = #tpu.dot_dimension_numbers<[1], [0], [0], [1], [0, 0, 1, 1], [], []>} : vector<121x16xf32>, vector<16x128xf32>, vector<121x128xf32> -> vector<121x128xf32>
    %58 = arith.addf %54, %57 : vector<121x128xf32>
    %cst_31 = arith.constant dense<0.000000e+00> : vector<61x128xf32>
    %59 = tpu.matmul %15, %58, %cst_31 {dimension_numbers = #tpu.dot_dimension_numbers<[1], [0], [0], [1], [0, 0, 1, 1], [], []>} : vector<61x121xf32>, vector<121x128xf32>, vector<61x128xf32> -> vector<61x128xf32>
    %60 = vector.broadcast %8 : vector<1x128xf32> to vector<61x128xf32>
    %61 = arith.addf %60, %59 : vector<61x128xf32>
    %c0_32 = arith.constant 0 : index
    %c0_33 = arith.constant 0 : index
    %c0_34 = arith.constant 0 : index
    %c0_35 = arith.constant 0 : index
    %62 = vector.load %arg7[%c0_32, %c0_33, %c0_34, %c0_35] : memref<2x3x61x128xf32, #tpu.memory_space<vmem>>, vector<1x1x61x128xf32>
    %63 = vector.shape_cast %62 : vector<1x1x61x128xf32> to vector<61x128xf32>
    %64 = vector.shape_cast %61 : vector<61x128xf32> to vector<1x1x61x128xf32>
    tpu.vector_store %arg7[%c0_32, %c0_33, %c0_34, %c0_35], %64 {strides = array<i32>} : memref<2x3x61x128xf32, #tpu.memory_space<vmem>>, vector<1x1x61x128xf32>,
    %cst_36 = arith.constant 0.000000e+00 : f32
    %65 = vector.broadcast %cst_36 : f32 to vector<121x128xf32>
    %c0_37 = arith.constant 0 : index
    %c2_38 = arith.constant 2 : index
    %c0_39 = arith.constant 0 : index
    %c0_40 = arith.constant 0 : index
    %66 = vector.load %arg1[%c0_37, %c2_38, %c0_39, %c0_40] : memref<2x8x123x16xf32, #tpu.memory_space<vmem>>, vector<1x1x123x16xf32>
    %67 = vector.shape_cast %66 : vector<1x1x123x16xf32> to vector<123x16xf32>
    %68 = vector.extract_strided_slice %67 {offsets = [0, 0], sizes = [121, 16], strides = [1, 1]} : vector<123x16xf32> to vector<121x16xf32>
    %69 = vector.extract_strided_slice %7 {offsets = [0, 0], sizes = [16, 128], strides = [1, 1]} : vector<144x128xf32> to vector<16x128xf32>
    %cst_41 = arith.constant dense<0.000000e+00> : vector<121x128xf32>
    %70 = tpu.matmul %68, %69, %cst_41 {dimension_numbers = #tpu.dot_dimension_numbers<[1], [0], [0], [1], [0, 0, 1, 1], [], []>} : vector<121x16xf32>, vector<16x128xf32>, vector<121x128xf32> -> vector<121x128xf32>
    %71 = arith.addf %65, %70 : vector<121x128xf32>
    %72 = vector.extract_strided_slice %67 {offsets = [1, 0], sizes = [121, 16], strides = [1, 1]} : vector<123x16xf32> to vector<121x16xf32>
    %73 = vector.extract_strided_slice %7 {offsets = [16, 0], sizes = [16, 128], strides = [1, 1]} : vector<144x128xf32> to vector<16x128xf32>
    %cst_42 = arith.constant dense<0.000000e+00> : vector<121x128xf32>
    %74 = tpu.matmul %72, %73, %cst_42 {dimension_numbers = #tpu.dot_dimension_numbers<[1], [0], [0], [1], [0, 0, 1, 1], [], []>} : vector<121x16xf32>, vector<16x128xf32>, vector<121x128xf32> -> vector<121x128xf32>
    %75 = arith.addf %71, %74 : vector<121x128xf32>
    %76 = vector.extract_strided_slice %67 {offsets = [2, 0], sizes = [121, 16], strides = [1, 1]} : vector<123x16xf32> to vector<121x16xf32>
    %77 = vector.extract_strided_slice %7 {offsets = [32, 0], sizes = [16, 128], strides = [1, 1]} : vector<144x128xf32> to vector<16x128xf32>
    %cst_43 = arith.constant dense<0.000000e+00> : vector<121x128xf32>
    %78 = tpu.matmul %76, %77, %cst_43 {dimension_numbers = #tpu.dot_dimension_numbers<[1], [0], [0], [1], [0, 0, 1, 1], [], []>} : vector<121x16xf32>, vector<16x128xf32>, vector<121x128xf32> -> vector<121x128xf32>
    %79 = arith.addf %75, %78 : vector<121x128xf32>
    %c0_44 = arith.constant 0 : index
    %c3 = arith.constant 3 : index
    %c0_45 = arith.constant 0 : index
    %c0_46 = arith.constant 0 : index
    %80 = vector.load %arg1[%c0_44, %c3, %c0_45, %c0_46] : memref<2x8x123x16xf32, #tpu.memory_space<vmem>>, vector<1x1x123x16xf32>
    %81 = vector.shape_cast %80 : vector<1x1x123x16xf32> to vector<123x16xf32>
    %82 = vector.extract_strided_slice %81 {offsets = [0, 0], sizes = [121, 16], strides = [1, 1]} : vector<123x16xf32> to vector<121x16xf32>
    %83 = vector.extract_strided_slice %7 {offsets = [48, 0], sizes = [16, 128], strides = [1, 1]} : vector<144x128xf32> to vector<16x128xf32>
    %cst_47 = arith.constant dense<0.000000e+00> : vector<121x128xf32>
    %84 = tpu.matmul %82, %83, %cst_47 {dimension_numbers = #tpu.dot_dimension_numbers<[1], [0], [0], [1], [0, 0, 1, 1], [], []>} : vector<121x16xf32>, vector<16x128xf32>, vector<121x128xf32> -> vector<121x128xf32>
    %85 = arith.addf %79, %84 : vector<121x128xf32>
    %86 = vector.extract_strided_slice %81 {offsets = [1, 0], sizes = [121, 16], strides = [1, 1]} : vector<123x16xf32> to vector<121x16xf32>
    %87 = vector.extract_strided_slice %7 {offsets = [64, 0], sizes = [16, 128], strides = [1, 1]} : vector<144x128xf32> to vector<16x128xf32>
    %cst_48 = arith.constant dense<0.000000e+00> : vector<121x128xf32>
    %88 = tpu.matmul %86, %87, %cst_48 {dimension_numbers = #tpu.dot_dimension_numbers<[1], [0], [0], [1], [0, 0, 1, 1], [], []>} : vector<121x16xf32>, vector<16x128xf32>, vector<121x128xf32> -> vector<121x128xf32>
    %89 = arith.addf %85, %88 : vector<121x128xf32>
    %90 = vector.extract_strided_slice %81 {offsets = [2, 0], sizes = [121, 16], strides = [1, 1]} : vector<123x16xf32> to vector<121x16xf32>
    %91 = vector.extract_strided_slice %7 {offsets = [80, 0], sizes = [16, 128], strides = [1, 1]} : vector<144x128xf32> to vector<16x128xf32>
    %cst_49 = arith.constant dense<0.000000e+00> : vector<121x128xf32>
    %92 = tpu.matmul %90, %91, %cst_49 {dimension_numbers = #tpu.dot_dimension_numbers<[1], [0], [0], [1], [0, 0, 1, 1], [], []>} : vector<121x16xf32>, vector<16x128xf32>, vector<121x128xf32> -> vector<121x128xf32>
    %93 = arith.addf %89, %92 : vector<121x128xf32>
    %c0_50 = arith.constant 0 : index
    %c4 = arith.constant 4 : index
    %c0_51 = arith.constant 0 : index
    %c0_52 = arith.constant 0 : index
    %94 = vector.load %arg1[%c0_50, %c4, %c0_51, %c0_52] : memref<2x8x123x16xf32, #tpu.memory_space<vmem>>, vector<1x1x123x16xf32>
    %95 = vector.shape_cast %94 : vector<1x1x123x16xf32> to vector<123x16xf32>
    %96 = vector.extract_strided_slice %95 {offsets = [0, 0], sizes = [121, 16], strides = [1, 1]} : vector<123x16xf32> to vector<121x16xf32>
    %97 = vector.extract_strided_slice %7 {offsets = [96, 0], sizes = [16, 128], strides = [1, 1]} : vector<144x128xf32> to vector<16x128xf32>
    %cst_53 = arith.constant dense<0.000000e+00> : vector<121x128xf32>
    %98 = tpu.matmul %96, %97, %cst_53 {dimension_numbers = #tpu.dot_dimension_numbers<[1], [0], [0], [1], [0, 0, 1, 1], [], []>} : vector<121x16xf32>, vector<16x128xf32>, vector<121x128xf32> -> vector<121x128xf32>
    %99 = arith.addf %93, %98 : vector<121x128xf32>
    %100 = vector.extract_strided_slice %95 {offsets = [1, 0], sizes = [121, 16], strides = [1, 1]} : vector<123x16xf32> to vector<121x16xf32>
    %101 = vector.extract_strided_slice %7 {offsets = [112, 0], sizes = [16, 128], strides = [1, 1]} : vector<144x128xf32> to vector<16x128xf32>
    %cst_54 = arith.constant dense<0.000000e+00> : vector<121x128xf32>
    %102 = tpu.matmul %100, %101, %cst_54 {dimension_numbers = #tpu.dot_dimension_numbers<[1], [0], [0], [1], [0, 0, 1, 1], [], []>} : vector<121x16xf32>, vector<16x128xf32>, vector<121x128xf32> -> vector<121x128xf32>
    %103 = arith.addf %99, %102 : vector<121x128xf32>
    %104 = vector.extract_strided_slice %95 {offsets = [2, 0], sizes = [121, 16], strides = [1, 1]} : vector<123x16xf32> to vector<121x16xf32>
    %105 = vector.extract_strided_slice %7 {offsets = [128, 0], sizes = [16, 128], strides = [1, 1]} : vector<144x128xf32> to vector<16x128xf32>
    %cst_55 = arith.constant dense<0.000000e+00> : vector<121x128xf32>
    %106 = tpu.matmul %104, %105, %cst_55 {dimension_numbers = #tpu.dot_dimension_numbers<[1], [0], [0], [1], [0, 0, 1, 1], [], []>} : vector<121x16xf32>, vector<16x128xf32>, vector<121x128xf32> -> vector<121x128xf32>
    %107 = arith.addf %103, %106 : vector<121x128xf32>
    %cst_56 = arith.constant dense<0.000000e+00> : vector<61x128xf32>
    %108 = tpu.matmul %15, %107, %cst_56 {dimension_numbers = #tpu.dot_dimension_numbers<[1], [0], [0], [1], [0, 0, 1, 1], [], []>} : vector<61x121xf32>, vector<121x128xf32>, vector<61x128xf32> -> vector<61x128xf32>
    %109 = vector.broadcast %8 : vector<1x128xf32> to vector<61x128xf32>
    %110 = arith.addf %109, %108 : vector<61x128xf32>
    %c0_57 = arith.constant 0 : index
    %c1_58 = arith.constant 1 : index
    %c0_59 = arith.constant 0 : index
    %c0_60 = arith.constant 0 : index
    %111 = vector.load %arg7[%c0_57, %c1_58, %c0_59, %c0_60] : memref<2x3x61x128xf32, #tpu.memory_space<vmem>>, vector<1x1x61x128xf32>
    %112 = vector.shape_cast %111 : vector<1x1x61x128xf32> to vector<61x128xf32>
    %113 = vector.shape_cast %110 : vector<61x128xf32> to vector<1x1x61x128xf32>
    tpu.vector_store %arg7[%c0_57, %c1_58, %c0_59, %c0_60], %113 {strides = array<i32>} : memref<2x3x61x128xf32, #tpu.memory_space<vmem>>, vector<1x1x61x128xf32>,
    %cst_61 = arith.constant 0.000000e+00 : f32
    %114 = vector.broadcast %cst_61 : f32 to vector<121x128xf32>
    %c0_62 = arith.constant 0 : index
    %c4_63 = arith.constant 4 : index
    %c0_64 = arith.constant 0 : index
    %c0_65 = arith.constant 0 : index
    %115 = vector.load %arg1[%c0_62, %c4_63, %c0_64, %c0_65] : memref<2x8x123x16xf32, #tpu.memory_space<vmem>>, vector<1x1x123x16xf32>
    %116 = vector.shape_cast %115 : vector<1x1x123x16xf32> to vector<123x16xf32>
    %117 = vector.extract_strided_slice %116 {offsets = [0, 0], sizes = [121, 16], strides = [1, 1]} : vector<123x16xf32> to vector<121x16xf32>
    %118 = vector.extract_strided_slice %7 {offsets = [0, 0], sizes = [16, 128], strides = [1, 1]} : vector<144x128xf32> to vector<16x128xf32>
    %cst_66 = arith.constant dense<0.000000e+00> : vector<121x128xf32>
    %119 = tpu.matmul %117, %118, %cst_66 {dimension_numbers = #tpu.dot_dimension_numbers<[1], [0], [0], [1], [0, 0, 1, 1], [], []>} : vector<121x16xf32>, vector<16x128xf32>, vector<121x128xf32> -> vector<121x128xf32>
    %120 = arith.addf %114, %119 : vector<121x128xf32>
    %121 = vector.extract_strided_slice %116 {offsets = [1, 0], sizes = [121, 16], strides = [1, 1]} : vector<123x16xf32> to vector<121x16xf32>
    %122 = vector.extract_strided_slice %7 {offsets = [16, 0], sizes = [16, 128], strides = [1, 1]} : vector<144x128xf32> to vector<16x128xf32>
    %cst_67 = arith.constant dense<0.000000e+00> : vector<121x128xf32>
    %123 = tpu.matmul %121, %122, %cst_67 {dimension_numbers = #tpu.dot_dimension_numbers<[1], [0], [0], [1], [0, 0, 1, 1], [], []>} : vector<121x16xf32>, vector<16x128xf32>, vector<121x128xf32> -> vector<121x128xf32>
    %124 = arith.addf %120, %123 : vector<121x128xf32>
    %125 = vector.extract_strided_slice %116 {offsets = [2, 0], sizes = [121, 16], strides = [1, 1]} : vector<123x16xf32> to vector<121x16xf32>
    %126 = vector.extract_strided_slice %7 {offsets = [32, 0], sizes = [16, 128], strides = [1, 1]} : vector<144x128xf32> to vector<16x128xf32>
    %cst_68 = arith.constant dense<0.000000e+00> : vector<121x128xf32>
    %127 = tpu.matmul %125, %126, %cst_68 {dimension_numbers = #tpu.dot_dimension_numbers<[1], [0], [0], [1], [0, 0, 1, 1], [], []>} : vector<121x16xf32>, vector<16x128xf32>, vector<121x128xf32> -> vector<121x128xf32>
    %128 = arith.addf %124, %127 : vector<121x128xf32>
    %c0_69 = arith.constant 0 : index
    %c5 = arith.constant 5 : index
    %c0_70 = arith.constant 0 : index
    %c0_71 = arith.constant 0 : index
    %129 = vector.load %arg1[%c0_69, %c5, %c0_70, %c0_71] : memref<2x8x123x16xf32, #tpu.memory_space<vmem>>, vector<1x1x123x16xf32>
    %130 = vector.shape_cast %129 : vector<1x1x123x16xf32> to vector<123x16xf32>
    %131 = vector.extract_strided_slice %130 {offsets = [0, 0], sizes = [121, 16], strides = [1, 1]} : vector<123x16xf32> to vector<121x16xf32>
    %132 = vector.extract_strided_slice %7 {offsets = [48, 0], sizes = [16, 128], strides = [1, 1]} : vector<144x128xf32> to vector<16x128xf32>
    %cst_72 = arith.constant dense<0.000000e+00> : vector<121x128xf32>
    %133 = tpu.matmul %131, %132, %cst_72 {dimension_numbers = #tpu.dot_dimension_numbers<[1], [0], [0], [1], [0, 0, 1, 1], [], []>} : vector<121x16xf32>, vector<16x128xf32>, vector<121x128xf32> -> vector<121x128xf32>
    %134 = arith.addf %128, %133 : vector<121x128xf32>
    %135 = vector.extract_strided_slice %130 {offsets = [1, 0], sizes = [121, 16], strides = [1, 1]} : vector<123x16xf32> to vector<121x16xf32>
    %136 = vector.extract_strided_slice %7 {offsets = [64, 0], sizes = [16, 128], strides = [1, 1]} : vector<144x128xf32> to vector<16x128xf32>
    %cst_73 = arith.constant dense<0.000000e+00> : vector<121x128xf32>
    %137 = tpu.matmul %135, %136, %cst_73 {dimension_numbers = #tpu.dot_dimension_numbers<[1], [0], [0], [1], [0, 0, 1, 1], [], []>} : vector<121x16xf32>, vector<16x128xf32>, vector<121x128xf32> -> vector<121x128xf32>
    %138 = arith.addf %134, %137 : vector<121x128xf32>
    %139 = vector.extract_strided_slice %130 {offsets = [2, 0], sizes = [121, 16], strides = [1, 1]} : vector<123x16xf32> to vector<121x16xf32>
    %140 = vector.extract_strided_slice %7 {offsets = [80, 0], sizes = [16, 128], strides = [1, 1]} : vector<144x128xf32> to vector<16x128xf32>
    %cst_74 = arith.constant dense<0.000000e+00> : vector<121x128xf32>
    %141 = tpu.matmul %139, %140, %cst_74 {dimension_numbers = #tpu.dot_dimension_numbers<[1], [0], [0], [1], [0, 0, 1, 1], [], []>} : vector<121x16xf32>, vector<16x128xf32>, vector<121x128xf32> -> vector<121x128xf32>
    %142 = arith.addf %138, %141 : vector<121x128xf32>
    %c0_75 = arith.constant 0 : index
    %c6 = arith.constant 6 : index
    %c0_76 = arith.constant 0 : index
    %c0_77 = arith.constant 0 : index
    %143 = vector.load %arg1[%c0_75, %c6, %c0_76, %c0_77] : memref<2x8x123x16xf32, #tpu.memory_space<vmem>>, vector<1x1x123x16xf32>
    %144 = vector.shape_cast %143 : vector<1x1x123x16xf32> to vector<123x16xf32>
    %145 = vector.extract_strided_slice %144 {offsets = [0, 0], sizes = [121, 16], strides = [1, 1]} : vector<123x16xf32> to vector<121x16xf32>
    %146 = vector.extract_strided_slice %7 {offsets = [96, 0], sizes = [16, 128], strides = [1, 1]} : vector<144x128xf32> to vector<16x128xf32>
    %cst_78 = arith.constant dense<0.000000e+00> : vector<121x128xf32>
    %147 = tpu.matmul %145, %146, %cst_78 {dimension_numbers = #tpu.dot_dimension_numbers<[1], [0], [0], [1], [0, 0, 1, 1], [], []>} : vector<121x16xf32>, vector<16x128xf32>, vector<121x128xf32> -> vector<121x128xf32>
    %148 = arith.addf %142, %147 : vector<121x128xf32>
    %149 = vector.extract_strided_slice %144 {offsets = [1, 0], sizes = [121, 16], strides = [1, 1]} : vector<123x16xf32> to vector<121x16xf32>
    %150 = vector.extract_strided_slice %7 {offsets = [112, 0], sizes = [16, 128], strides = [1, 1]} : vector<144x128xf32> to vector<16x128xf32>
    %cst_79 = arith.constant dense<0.000000e+00> : vector<121x128xf32>
    %151 = tpu.matmul %149, %150, %cst_79 {dimension_numbers = #tpu.dot_dimension_numbers<[1], [0], [0], [1], [0, 0, 1, 1], [], []>} : vector<121x16xf32>, vector<16x128xf32>, vector<121x128xf32> -> vector<121x128xf32>
    %152 = arith.addf %148, %151 : vector<121x128xf32>
    %153 = vector.extract_strided_slice %144 {offsets = [2, 0], sizes = [121, 16], strides = [1, 1]} : vector<123x16xf32> to vector<121x16xf32>
    %154 = vector.extract_strided_slice %7 {offsets = [128, 0], sizes = [16, 128], strides = [1, 1]} : vector<144x128xf32> to vector<16x128xf32>
    %cst_80 = arith.constant dense<0.000000e+00> : vector<121x128xf32>
    %155 = tpu.matmul %153, %154, %cst_80 {dimension_numbers = #tpu.dot_dimension_numbers<[1], [0], [0], [1], [0, 0, 1, 1], [], []>} : vector<121x16xf32>, vector<16x128xf32>, vector<121x128xf32> -> vector<121x128xf32>
    %156 = arith.addf %152, %155 : vector<121x128xf32>
    %cst_81 = arith.constant dense<0.000000e+00> : vector<61x128xf32>
    %157 = tpu.matmul %15, %156, %cst_81 {dimension_numbers = #tpu.dot_dimension_numbers<[1], [0], [0], [1], [0, 0, 1, 1], [], []>} : vector<61x121xf32>, vector<121x128xf32>, vector<61x128xf32> -> vector<61x128xf32>
    %158 = vector.broadcast %8 : vector<1x128xf32> to vector<61x128xf32>
    %159 = arith.addf %158, %157 : vector<61x128xf32>
    %c0_82 = arith.constant 0 : index
    %c2_83 = arith.constant 2 : index
    %c0_84 = arith.constant 0 : index
    %c0_85 = arith.constant 0 : index
    %160 = vector.load %arg7[%c0_82, %c2_83, %c0_84, %c0_85] : memref<2x3x61x128xf32, #tpu.memory_space<vmem>>, vector<1x1x61x128xf32>
    %161 = vector.shape_cast %160 : vector<1x1x61x128xf32> to vector<61x128xf32>
    %162 = vector.shape_cast %159 : vector<61x128xf32> to vector<1x1x61x128xf32>
    tpu.vector_store %arg7[%c0_82, %c2_83, %c0_84, %c0_85], %162 {strides = array<i32>} : memref<2x3x61x128xf32, #tpu.memory_space<vmem>>, vector<1x1x61x128xf32>,
    %cst_86 = arith.constant 0.000000e+00 : f32
    %163 = vector.broadcast %cst_86 : f32 to vector<121x128xf32>
    %c1_87 = arith.constant 1 : index
    %c0_88 = arith.constant 0 : index
    %c0_89 = arith.constant 0 : index
    %c0_90 = arith.constant 0 : index
    %164 = vector.load %arg1[%c1_87, %c0_88, %c0_89, %c0_90] : memref<2x8x123x16xf32, #tpu.memory_space<vmem>>, vector<1x1x123x16xf32>
    %165 = vector.shape_cast %164 : vector<1x1x123x16xf32> to vector<123x16xf32>
    %166 = vector.extract_strided_slice %165 {offsets = [0, 0], sizes = [121, 16], strides = [1, 1]} : vector<123x16xf32> to vector<121x16xf32>
    %167 = vector.extract_strided_slice %7 {offsets = [0, 0], sizes = [16, 128], strides = [1, 1]} : vector<144x128xf32> to vector<16x128xf32>
    %cst_91 = arith.constant dense<0.000000e+00> : vector<121x128xf32>
    %168 = tpu.matmul %166, %167, %cst_91 {dimension_numbers = #tpu.dot_dimension_numbers<[1], [0], [0], [1], [0, 0, 1, 1], [], []>} : vector<121x16xf32>, vector<16x128xf32>, vector<121x128xf32> -> vector<121x128xf32>
    %169 = arith.addf %163, %168 : vector<121x128xf32>
    %170 = vector.extract_strided_slice %165 {offsets = [1, 0], sizes = [121, 16], strides = [1, 1]} : vector<123x16xf32> to vector<121x16xf32>
    %171 = vector.extract_strided_slice %7 {offsets = [16, 0], sizes = [16, 128], strides = [1, 1]} : vector<144x128xf32> to vector<16x128xf32>
    %cst_92 = arith.constant dense<0.000000e+00> : vector<121x128xf32>
    %172 = tpu.matmul %170, %171, %cst_92 {dimension_numbers = #tpu.dot_dimension_numbers<[1], [0], [0], [1], [0, 0, 1, 1], [], []>} : vector<121x16xf32>, vector<16x128xf32>, vector<121x128xf32> -> vector<121x128xf32>
    %173 = arith.addf %169, %172 : vector<121x128xf32>
    %174 = vector.extract_strided_slice %165 {offsets = [2, 0], sizes = [121, 16], strides = [1, 1]} : vector<123x16xf32> to vector<121x16xf32>
    %175 = vector.extract_strided_slice %7 {offsets = [32, 0], sizes = [16, 128], strides = [1, 1]} : vector<144x128xf32> to vector<16x128xf32>
    %cst_93 = arith.constant dense<0.000000e+00> : vector<121x128xf32>
    %176 = tpu.matmul %174, %175, %cst_93 {dimension_numbers = #tpu.dot_dimension_numbers<[1], [0], [0], [1], [0, 0, 1, 1], [], []>} : vector<121x16xf32>, vector<16x128xf32>, vector<121x128xf32> -> vector<121x128xf32>
    %177 = arith.addf %173, %176 : vector<121x128xf32>
    %c1_94 = arith.constant 1 : index
    %c1_95 = arith.constant 1 : index
    %c0_96 = arith.constant 0 : index
    %c0_97 = arith.constant 0 : index
    %178 = vector.load %arg1[%c1_94, %c1_95, %c0_96, %c0_97] : memref<2x8x123x16xf32, #tpu.memory_space<vmem>>, vector<1x1x123x16xf32>
    %179 = vector.shape_cast %178 : vector<1x1x123x16xf32> to vector<123x16xf32>
    %180 = vector.extract_strided_slice %179 {offsets = [0, 0], sizes = [121, 16], strides = [1, 1]} : vector<123x16xf32> to vector<121x16xf32>
    %181 = vector.extract_strided_slice %7 {offsets = [48, 0], sizes = [16, 128], strides = [1, 1]} : vector<144x128xf32> to vector<16x128xf32>
    %cst_98 = arith.constant dense<0.000000e+00> : vector<121x128xf32>
    %182 = tpu.matmul %180, %181, %cst_98 {dimension_numbers = #tpu.dot_dimension_numbers<[1], [0], [0], [1], [0, 0, 1, 1], [], []>} : vector<121x16xf32>, vector<16x128xf32>, vector<121x128xf32> -> vector<121x128xf32>
    %183 = arith.addf %177, %182 : vector<121x128xf32>
    %184 = vector.extract_strided_slice %179 {offsets = [1, 0], sizes = [121, 16], strides = [1, 1]} : vector<123x16xf32> to vector<121x16xf32>
    %185 = vector.extract_strided_slice %7 {offsets = [64, 0], sizes = [16, 128], strides = [1, 1]} : vector<144x128xf32> to vector<16x128xf32>
    %cst_99 = arith.constant dense<0.000000e+00> : vector<121x128xf32>
    %186 = tpu.matmul %184, %185, %cst_99 {dimension_numbers = #tpu.dot_dimension_numbers<[1], [0], [0], [1], [0, 0, 1, 1], [], []>} : vector<121x16xf32>, vector<16x128xf32>, vector<121x128xf32> -> vector<121x128xf32>
    %187 = arith.addf %183, %186 : vector<121x128xf32>
    %188 = vector.extract_strided_slice %179 {offsets = [2, 0], sizes = [121, 16], strides = [1, 1]} : vector<123x16xf32> to vector<121x16xf32>
    %189 = vector.extract_strided_slice %7 {offsets = [80, 0], sizes = [16, 128], strides = [1, 1]} : vector<144x128xf32> to vector<16x128xf32>
    %cst_100 = arith.constant dense<0.000000e+00> : vector<121x128xf32>
    %190 = tpu.matmul %188, %189, %cst_100 {dimension_numbers = #tpu.dot_dimension_numbers<[1], [0], [0], [1], [0, 0, 1, 1], [], []>} : vector<121x16xf32>, vector<16x128xf32>, vector<121x128xf32> -> vector<121x128xf32>
    %191 = arith.addf %187, %190 : vector<121x128xf32>
    %c1_101 = arith.constant 1 : index
    %c2_102 = arith.constant 2 : index
    %c0_103 = arith.constant 0 : index
    %c0_104 = arith.constant 0 : index
    %192 = vector.load %arg1[%c1_101, %c2_102, %c0_103, %c0_104] : memref<2x8x123x16xf32, #tpu.memory_space<vmem>>, vector<1x1x123x16xf32>
    %193 = vector.shape_cast %192 : vector<1x1x123x16xf32> to vector<123x16xf32>
    %194 = vector.extract_strided_slice %193 {offsets = [0, 0], sizes = [121, 16], strides = [1, 1]} : vector<123x16xf32> to vector<121x16xf32>
    %195 = vector.extract_strided_slice %7 {offsets = [96, 0], sizes = [16, 128], strides = [1, 1]} : vector<144x128xf32> to vector<16x128xf32>
    %cst_105 = arith.constant dense<0.000000e+00> : vector<121x128xf32>
    %196 = tpu.matmul %194, %195, %cst_105 {dimension_numbers = #tpu.dot_dimension_numbers<[1], [0], [0], [1], [0, 0, 1, 1], [], []>} : vector<121x16xf32>, vector<16x128xf32>, vector<121x128xf32> -> vector<121x128xf32>
    %197 = arith.addf %191, %196 : vector<121x128xf32>
    %198 = vector.extract_strided_slice %193 {offsets = [1, 0], sizes = [121, 16], strides = [1, 1]} : vector<123x16xf32> to vector<121x16xf32>
    %199 = vector.extract_strided_slice %7 {offsets = [112, 0], sizes = [16, 128], strides = [1, 1]} : vector<144x128xf32> to vector<16x128xf32>
    %cst_106 = arith.constant dense<0.000000e+00> : vector<121x128xf32>
    %200 = tpu.matmul %198, %199, %cst_106 {dimension_numbers = #tpu.dot_dimension_numbers<[1], [0], [0], [1], [0, 0, 1, 1], [], []>} : vector<121x16xf32>, vector<16x128xf32>, vector<121x128xf32> -> vector<121x128xf32>
    %201 = arith.addf %197, %200 : vector<121x128xf32>
    %202 = vector.extract_strided_slice %193 {offsets = [2, 0], sizes = [121, 16], strides = [1, 1]} : vector<123x16xf32> to vector<121x16xf32>
    %203 = vector.extract_strided_slice %7 {offsets = [128, 0], sizes = [16, 128], strides = [1, 1]} : vector<144x128xf32> to vector<16x128xf32>
    %cst_107 = arith.constant dense<0.000000e+00> : vector<121x128xf32>
    %204 = tpu.matmul %202, %203, %cst_107 {dimension_numbers = #tpu.dot_dimension_numbers<[1], [0], [0], [1], [0, 0, 1, 1], [], []>} : vector<121x16xf32>, vector<16x128xf32>, vector<121x128xf32> -> vector<121x128xf32>
    %205 = arith.addf %201, %204 : vector<121x128xf32>
    %cst_108 = arith.constant dense<0.000000e+00> : vector<61x128xf32>
    %206 = tpu.matmul %15, %205, %cst_108 {dimension_numbers = #tpu.dot_dimension_numbers<[1], [0], [0], [1], [0, 0, 1, 1], [], []>} : vector<61x121xf32>, vector<121x128xf32>, vector<61x128xf32> -> vector<61x128xf32>
    %207 = vector.broadcast %8 : vector<1x128xf32> to vector<61x128xf32>
    %208 = arith.addf %207, %206 : vector<61x128xf32>
    %c1_109 = arith.constant 1 : index
    %c0_110 = arith.constant 0 : index
    %c0_111 = arith.constant 0 : index
    %c0_112 = arith.constant 0 : index
    %209 = vector.load %arg7[%c1_109, %c0_110, %c0_111, %c0_112] : memref<2x3x61x128xf32, #tpu.memory_space<vmem>>, vector<1x1x61x128xf32>
    %210 = vector.shape_cast %209 : vector<1x1x61x128xf32> to vector<61x128xf32>
    %211 = vector.shape_cast %208 : vector<61x128xf32> to vector<1x1x61x128xf32>
    tpu.vector_store %arg7[%c1_109, %c0_110, %c0_111, %c0_112], %211 {strides = array<i32>} : memref<2x3x61x128xf32, #tpu.memory_space<vmem>>, vector<1x1x61x128xf32>,
    %cst_113 = arith.constant 0.000000e+00 : f32
    %212 = vector.broadcast %cst_113 : f32 to vector<121x128xf32>
    %c1_114 = arith.constant 1 : index
    %c2_115 = arith.constant 2 : index
    %c0_116 = arith.constant 0 : index
    %c0_117 = arith.constant 0 : index
    %213 = vector.load %arg1[%c1_114, %c2_115, %c0_116, %c0_117] : memref<2x8x123x16xf32, #tpu.memory_space<vmem>>, vector<1x1x123x16xf32>
    %214 = vector.shape_cast %213 : vector<1x1x123x16xf32> to vector<123x16xf32>
    %215 = vector.extract_strided_slice %214 {offsets = [0, 0], sizes = [121, 16], strides = [1, 1]} : vector<123x16xf32> to vector<121x16xf32>
    %216 = vector.extract_strided_slice %7 {offsets = [0, 0], sizes = [16, 128], strides = [1, 1]} : vector<144x128xf32> to vector<16x128xf32>
    %cst_118 = arith.constant dense<0.000000e+00> : vector<121x128xf32>
    %217 = tpu.matmul %215, %216, %cst_118 {dimension_numbers = #tpu.dot_dimension_numbers<[1], [0], [0], [1], [0, 0, 1, 1], [], []>} : vector<121x16xf32>, vector<16x128xf32>, vector<121x128xf32> -> vector<121x128xf32>
    %218 = arith.addf %212, %217 : vector<121x128xf32>
    %219 = vector.extract_strided_slice %214 {offsets = [1, 0], sizes = [121, 16], strides = [1, 1]} : vector<123x16xf32> to vector<121x16xf32>
    %220 = vector.extract_strided_slice %7 {offsets = [16, 0], sizes = [16, 128], strides = [1, 1]} : vector<144x128xf32> to vector<16x128xf32>
    %cst_119 = arith.constant dense<0.000000e+00> : vector<121x128xf32>
    %221 = tpu.matmul %219, %220, %cst_119 {dimension_numbers = #tpu.dot_dimension_numbers<[1], [0], [0], [1], [0, 0, 1, 1], [], []>} : vector<121x16xf32>, vector<16x128xf32>, vector<121x128xf32> -> vector<121x128xf32>
    %222 = arith.addf %218, %221 : vector<121x128xf32>
    %223 = vector.extract_strided_slice %214 {offsets = [2, 0], sizes = [121, 16], strides = [1, 1]} : vector<123x16xf32> to vector<121x16xf32>
    %224 = vector.extract_strided_slice %7 {offsets = [32, 0], sizes = [16, 128], strides = [1, 1]} : vector<144x128xf32> to vector<16x128xf32>
    %cst_120 = arith.constant dense<0.000000e+00> : vector<121x128xf32>
    %225 = tpu.matmul %223, %224, %cst_120 {dimension_numbers = #tpu.dot_dimension_numbers<[1], [0], [0], [1], [0, 0, 1, 1], [], []>} : vector<121x16xf32>, vector<16x128xf32>, vector<121x128xf32> -> vector<121x128xf32>
    %226 = arith.addf %222, %225 : vector<121x128xf32>
    %c1_121 = arith.constant 1 : index
    %c3_122 = arith.constant 3 : index
    %c0_123 = arith.constant 0 : index
    %c0_124 = arith.constant 0 : index
    %227 = vector.load %arg1[%c1_121, %c3_122, %c0_123, %c0_124] : memref<2x8x123x16xf32, #tpu.memory_space<vmem>>, vector<1x1x123x16xf32>
    %228 = vector.shape_cast %227 : vector<1x1x123x16xf32> to vector<123x16xf32>
    %229 = vector.extract_strided_slice %228 {offsets = [0, 0], sizes = [121, 16], strides = [1, 1]} : vector<123x16xf32> to vector<121x16xf32>
    %230 = vector.extract_strided_slice %7 {offsets = [48, 0], sizes = [16, 128], strides = [1, 1]} : vector<144x128xf32> to vector<16x128xf32>
    %cst_125 = arith.constant dense<0.000000e+00> : vector<121x128xf32>
    %231 = tpu.matmul %229, %230, %cst_125 {dimension_numbers = #tpu.dot_dimension_numbers<[1], [0], [0], [1], [0, 0, 1, 1], [], []>} : vector<121x16xf32>, vector<16x128xf32>, vector<121x128xf32> -> vector<121x128xf32>
    %232 = arith.addf %226, %231 : vector<121x128xf32>
    %233 = vector.extract_strided_slice %228 {offsets = [1, 0], sizes = [121, 16], strides = [1, 1]} : vector<123x16xf32> to vector<121x16xf32>
    %234 = vector.extract_strided_slice %7 {offsets = [64, 0], sizes = [16, 128], strides = [1, 1]} : vector<144x128xf32> to vector<16x128xf32>
    %cst_126 = arith.constant dense<0.000000e+00> : vector<121x128xf32>
    %235 = tpu.matmul %233, %234, %cst_126 {dimension_numbers = #tpu.dot_dimension_numbers<[1], [0], [0], [1], [0, 0, 1, 1], [], []>} : vector<121x16xf32>, vector<16x128xf32>, vector<121x128xf32> -> vector<121x128xf32>
    %236 = arith.addf %232, %235 : vector<121x128xf32>
    %237 = vector.extract_strided_slice %228 {offsets = [2, 0], sizes = [121, 16], strides = [1, 1]} : vector<123x16xf32> to vector<121x16xf32>
    %238 = vector.extract_strided_slice %7 {offsets = [80, 0], sizes = [16, 128], strides = [1, 1]} : vector<144x128xf32> to vector<16x128xf32>
    %cst_127 = arith.constant dense<0.000000e+00> : vector<121x128xf32>
    %239 = tpu.matmul %237, %238, %cst_127 {dimension_numbers = #tpu.dot_dimension_numbers<[1], [0], [0], [1], [0, 0, 1, 1], [], []>} : vector<121x16xf32>, vector<16x128xf32>, vector<121x128xf32> -> vector<121x128xf32>
    %240 = arith.addf %236, %239 : vector<121x128xf32>
    %c1_128 = arith.constant 1 : index
    %c4_129 = arith.constant 4 : index
    %c0_130 = arith.constant 0 : index
    %c0_131 = arith.constant 0 : index
    %241 = vector.load %arg1[%c1_128, %c4_129, %c0_130, %c0_131] : memref<2x8x123x16xf32, #tpu.memory_space<vmem>>, vector<1x1x123x16xf32>
    %242 = vector.shape_cast %241 : vector<1x1x123x16xf32> to vector<123x16xf32>
    %243 = vector.extract_strided_slice %242 {offsets = [0, 0], sizes = [121, 16], strides = [1, 1]} : vector<123x16xf32> to vector<121x16xf32>
    %244 = vector.extract_strided_slice %7 {offsets = [96, 0], sizes = [16, 128], strides = [1, 1]} : vector<144x128xf32> to vector<16x128xf32>
    %cst_132 = arith.constant dense<0.000000e+00> : vector<121x128xf32>
    %245 = tpu.matmul %243, %244, %cst_132 {dimension_numbers = #tpu.dot_dimension_numbers<[1], [0], [0], [1], [0, 0, 1, 1], [], []>} : vector<121x16xf32>, vector<16x128xf32>, vector<121x128xf32> -> vector<121x128xf32>
    %246 = arith.addf %240, %245 : vector<121x128xf32>
    %247 = vector.extract_strided_slice %242 {offsets = [1, 0], sizes = [121, 16], strides = [1, 1]} : vector<123x16xf32> to vector<121x16xf32>
    %248 = vector.extract_strided_slice %7 {offsets = [112, 0], sizes = [16, 128], strides = [1, 1]} : vector<144x128xf32> to vector<16x128xf32>
    %cst_133 = arith.constant dense<0.000000e+00> : vector<121x128xf32>
    %249 = tpu.matmul %247, %248, %cst_133 {dimension_numbers = #tpu.dot_dimension_numbers<[1], [0], [0], [1], [0, 0, 1, 1], [], []>} : vector<121x16xf32>, vector<16x128xf32>, vector<121x128xf32> -> vector<121x128xf32>
    %250 = arith.addf %246, %249 : vector<121x128xf32>
    %251 = vector.extract_strided_slice %242 {offsets = [2, 0], sizes = [121, 16], strides = [1, 1]} : vector<123x16xf32> to vector<121x16xf32>
    %252 = vector.extract_strided_slice %7 {offsets = [128, 0], sizes = [16, 128], strides = [1, 1]} : vector<144x128xf32> to vector<16x128xf32>
    %cst_134 = arith.constant dense<0.000000e+00> : vector<121x128xf32>
    %253 = tpu.matmul %251, %252, %cst_134 {dimension_numbers = #tpu.dot_dimension_numbers<[1], [0], [0], [1], [0, 0, 1, 1], [], []>} : vector<121x16xf32>, vector<16x128xf32>, vector<121x128xf32> -> vector<121x128xf32>
    %254 = arith.addf %250, %253 : vector<121x128xf32>
    %cst_135 = arith.constant dense<0.000000e+00> : vector<61x128xf32>
    %255 = tpu.matmul %15, %254, %cst_135 {dimension_numbers = #tpu.dot_dimension_numbers<[1], [0], [0], [1], [0, 0, 1, 1], [], []>} : vector<61x121xf32>, vector<121x128xf32>, vector<61x128xf32> -> vector<61x128xf32>
    %256 = vector.broadcast %8 : vector<1x128xf32> to vector<61x128xf32>
    %257 = arith.addf %256, %255 : vector<61x128xf32>
    %c1_136 = arith.constant 1 : index
    %c1_137 = arith.constant 1 : index
    %c0_138 = arith.constant 0 : index
    %c0_139 = arith.constant 0 : index
    %258 = vector.load %arg7[%c1_136, %c1_137, %c0_138, %c0_139] : memref<2x3x61x128xf32, #tpu.memory_space<vmem>>, vector<1x1x61x128xf32>
    %259 = vector.shape_cast %258 : vector<1x1x61x128xf32> to vector<61x128xf32>
    %260 = vector.shape_cast %257 : vector<61x128xf32> to vector<1x1x61x128xf32>
    tpu.vector_store %arg7[%c1_136, %c1_137, %c0_138, %c0_139], %260 {strides = array<i32>} : memref<2x3x61x128xf32, #tpu.memory_space<vmem>>, vector<1x1x61x128xf32>,
    %cst_140 = arith.constant 0.000000e+00 : f32
    %261 = vector.broadcast %cst_140 : f32 to vector<121x128xf32>
    %c1_141 = arith.constant 1 : index
    %c4_142 = arith.constant 4 : index
    %c0_143 = arith.constant 0 : index
    %c0_144 = arith.constant 0 : index
    %262 = vector.load %arg1[%c1_141, %c4_142, %c0_143, %c0_144] : memref<2x8x123x16xf32, #tpu.memory_space<vmem>>, vector<1x1x123x16xf32>
    %263 = vector.shape_cast %262 : vector<1x1x123x16xf32> to vector<123x16xf32>
    %264 = vector.extract_strided_slice %263 {offsets = [0, 0], sizes = [121, 16], strides = [1, 1]} : vector<123x16xf32> to vector<121x16xf32>
    %265 = vector.extract_strided_slice %7 {offsets = [0, 0], sizes = [16, 128], strides = [1, 1]} : vector<144x128xf32> to vector<16x128xf32>
    %cst_145 = arith.constant dense<0.000000e+00> : vector<121x128xf32>
    %266 = tpu.matmul %264, %265, %cst_145 {dimension_numbers = #tpu.dot_dimension_numbers<[1], [0], [0], [1], [0, 0, 1, 1], [], []>} : vector<121x16xf32>, vector<16x128xf32>, vector<121x128xf32> -> vector<121x128xf32>
    %267 = arith.addf %261, %266 : vector<121x128xf32>
    %268 = vector.extract_strided_slice %263 {offsets = [1, 0], sizes = [121, 16], strides = [1, 1]} : vector<123x16xf32> to vector<121x16xf32>
    %269 = vector.extract_strided_slice %7 {offsets = [16, 0], sizes = [16, 128], strides = [1, 1]} : vector<144x128xf32> to vector<16x128xf32>
    %cst_146 = arith.constant dense<0.000000e+00> : vector<121x128xf32>
    %270 = tpu.matmul %268, %269, %cst_146 {dimension_numbers = #tpu.dot_dimension_numbers<[1], [0], [0], [1], [0, 0, 1, 1], [], []>} : vector<121x16xf32>, vector<16x128xf32>, vector<121x128xf32> -> vector<121x128xf32>
    %271 = arith.addf %267, %270 : vector<121x128xf32>
    %272 = vector.extract_strided_slice %263 {offsets = [2, 0], sizes = [121, 16], strides = [1, 1]} : vector<123x16xf32> to vector<121x16xf32>
    %273 = vector.extract_strided_slice %7 {offsets = [32, 0], sizes = [16, 128], strides = [1, 1]} : vector<144x128xf32> to vector<16x128xf32>
    %cst_147 = arith.constant dense<0.000000e+00> : vector<121x128xf32>
    %274 = tpu.matmul %272, %273, %cst_147 {dimension_numbers = #tpu.dot_dimension_numbers<[1], [0], [0], [1], [0, 0, 1, 1], [], []>} : vector<121x16xf32>, vector<16x128xf32>, vector<121x128xf32> -> vector<121x128xf32>
    %275 = arith.addf %271, %274 : vector<121x128xf32>
    %c1_148 = arith.constant 1 : index
    %c5_149 = arith.constant 5 : index
    %c0_150 = arith.constant 0 : index
    %c0_151 = arith.constant 0 : index
    %276 = vector.load %arg1[%c1_148, %c5_149, %c0_150, %c0_151] : memref<2x8x123x16xf32, #tpu.memory_space<vmem>>, vector<1x1x123x16xf32>
    %277 = vector.shape_cast %276 : vector<1x1x123x16xf32> to vector<123x16xf32>
    %278 = vector.extract_strided_slice %277 {offsets = [0, 0], sizes = [121, 16], strides = [1, 1]} : vector<123x16xf32> to vector<121x16xf32>
    %279 = vector.extract_strided_slice %7 {offsets = [48, 0], sizes = [16, 128], strides = [1, 1]} : vector<144x128xf32> to vector<16x128xf32>
    %cst_152 = arith.constant dense<0.000000e+00> : vector<121x128xf32>
    %280 = tpu.matmul %278, %279, %cst_152 {dimension_numbers = #tpu.dot_dimension_numbers<[1], [0], [0], [1], [0, 0, 1, 1], [], []>} : vector<121x16xf32>, vector<16x128xf32>, vector<121x128xf32> -> vector<121x128xf32>
    %281 = arith.addf %275, %280 : vector<121x128xf32>
    %282 = vector.extract_strided_slice %277 {offsets = [1, 0], sizes = [121, 16], strides = [1, 1]} : vector<123x16xf32> to vector<121x16xf32>
    %283 = vector.extract_strided_slice %7 {offsets = [64, 0], sizes = [16, 128], strides = [1, 1]} : vector<144x128xf32> to vector<16x128xf32>
    %cst_153 = arith.constant dense<0.000000e+00> : vector<121x128xf32>
    %284 = tpu.matmul %282, %283, %cst_153 {dimension_numbers = #tpu.dot_dimension_numbers<[1], [0], [0], [1], [0, 0, 1, 1], [], []>} : vector<121x16xf32>, vector<16x128xf32>, vector<121x128xf32> -> vector<121x128xf32>
    %285 = arith.addf %281, %284 : vector<121x128xf32>
    %286 = vector.extract_strided_slice %277 {offsets = [2, 0], sizes = [121, 16], strides = [1, 1]} : vector<123x16xf32> to vector<121x16xf32>
    %287 = vector.extract_strided_slice %7 {offsets = [80, 0], sizes = [16, 128], strides = [1, 1]} : vector<144x128xf32> to vector<16x128xf32>
    %cst_154 = arith.constant dense<0.000000e+00> : vector<121x128xf32>
    %288 = tpu.matmul %286, %287, %cst_154 {dimension_numbers = #tpu.dot_dimension_numbers<[1], [0], [0], [1], [0, 0, 1, 1], [], []>} : vector<121x16xf32>, vector<16x128xf32>, vector<121x128xf32> -> vector<121x128xf32>
    %289 = arith.addf %285, %288 : vector<121x128xf32>
    %c1_155 = arith.constant 1 : index
    %c6_156 = arith.constant 6 : index
    %c0_157 = arith.constant 0 : index
    %c0_158 = arith.constant 0 : index
    %290 = vector.load %arg1[%c1_155, %c6_156, %c0_157, %c0_158] : memref<2x8x123x16xf32, #tpu.memory_space<vmem>>, vector<1x1x123x16xf32>
    %291 = vector.shape_cast %290 : vector<1x1x123x16xf32> to vector<123x16xf32>
    %292 = vector.extract_strided_slice %291 {offsets = [0, 0], sizes = [121, 16], strides = [1, 1]} : vector<123x16xf32> to vector<121x16xf32>
    %293 = vector.extract_strided_slice %7 {offsets = [96, 0], sizes = [16, 128], strides = [1, 1]} : vector<144x128xf32> to vector<16x128xf32>
    %cst_159 = arith.constant dense<0.000000e+00> : vector<121x128xf32>
    %294 = tpu.matmul %292, %293, %cst_159 {dimension_numbers = #tpu.dot_dimension_numbers<[1], [0], [0], [1], [0, 0, 1, 1], [], []>} : vector<121x16xf32>, vector<16x128xf32>, vector<121x128xf32> -> vector<121x128xf32>
    %295 = arith.addf %289, %294 : vector<121x128xf32>
    %296 = vector.extract_strided_slice %291 {offsets = [1, 0], sizes = [121, 16], strides = [1, 1]} : vector<123x16xf32> to vector<121x16xf32>
    %297 = vector.extract_strided_slice %7 {offsets = [112, 0], sizes = [16, 128], strides = [1, 1]} : vector<144x128xf32> to vector<16x128xf32>
    %cst_160 = arith.constant dense<0.000000e+00> : vector<121x128xf32>
    %298 = tpu.matmul %296, %297, %cst_160 {dimension_numbers = #tpu.dot_dimension_numbers<[1], [0], [0], [1], [0, 0, 1, 1], [], []>} : vector<121x16xf32>, vector<16x128xf32>, vector<121x128xf32> -> vector<121x128xf32>
    %299 = arith.addf %295, %298 : vector<121x128xf32>
    %300 = vector.extract_strided_slice %291 {offsets = [2, 0], sizes = [121, 16], strides = [1, 1]} : vector<123x16xf32> to vector<121x16xf32>
    %301 = vector.extract_strided_slice %7 {offsets = [128, 0], sizes = [16, 128], strides = [1, 1]} : vector<144x128xf32> to vector<16x128xf32>
    %cst_161 = arith.constant dense<0.000000e+00> : vector<121x128xf32>
    %302 = tpu.matmul %300, %301, %cst_161 {dimension_numbers = #tpu.dot_dimension_numbers<[1], [0], [0], [1], [0, 0, 1, 1], [], []>} : vector<121x16xf32>, vector<16x128xf32>, vector<121x128xf32> -> vector<121x128xf32>
    %303 = arith.addf %299, %302 : vector<121x128xf32>
    %cst_162 = arith.constant dense<0.000000e+00> : vector<61x128xf32>
    %304 = tpu.matmul %15, %303, %cst_162 {dimension_numbers = #tpu.dot_dimension_numbers<[1], [0], [0], [1], [0, 0, 1, 1], [], []>} : vector<61x121xf32>, vector<121x128xf32>, vector<61x128xf32> -> vector<61x128xf32>
    %305 = vector.broadcast %8 : vector<1x128xf32> to vector<61x128xf32>
    %306 = arith.addf %305, %304 : vector<61x128xf32>
    %c1_163 = arith.constant 1 : index
    %c2_164 = arith.constant 2 : index
    %c0_165 = arith.constant 0 : index
    %c0_166 = arith.constant 0 : index
    %307 = vector.load %arg7[%c1_163, %c2_164, %c0_165, %c0_166] : memref<2x3x61x128xf32, #tpu.memory_space<vmem>>, vector<1x1x61x128xf32>
    %308 = vector.shape_cast %307 : vector<1x1x61x128xf32> to vector<61x128xf32>
    %309 = vector.shape_cast %306 : vector<61x128xf32> to vector<1x1x61x128xf32>
    tpu.vector_store %arg7[%c1_163, %c2_164, %c0_165, %c0_166], %309 {strides = array<i32>} : memref<2x3x61x128xf32, #tpu.memory_space<vmem>>, vector<1x1x61x128xf32>,
    return
  }
}

</mosaic_0001>

<bundles_post_ra>
// kernel: example_module_forward.1
= control target key start
LH: loop header
LB: loop body
LE: loop exit
PB: predicated region body
PF: predicated region fallthrough
CT: control target
= control target key end

     0   :  { %v24747_v3 = vmov 0.0   ;;  %vm219_vm0 = vcmask 1042432   ;;  %vm19306_vm1 = vmmov 1   ;;  %vm122_vm3 = vcmask 1006592   ;;  %s24739_s2 = inlined_call_operand.vmem [shape: f32[123,456], index: 2, kind: input, shape index: {}]   ;;  %s24740_s4 = inlined_call_operand.vmem [shape: f32[144,128], index: 4, kind: input, shape index: {}]   ;;  %s24741_s0 = inlined_call_operand.vmem [shape: f32[256,123], index: 0, kind: input, shape index: {}]   ;;  %s24742_s1 = inlined_call_operand.vmem [shape: f32[2,8,123,16], index: 1, kind: input, shape index: {}]   ;;  %s24743_s3 = inlined_call_operand.vmem [shape: f32[1,456], index: 3, kind: input, shape index: {}]   ;;  %s24744_s6 = inlined_call_operand.vmem [shape: f32[256,456], index: 6, kind: output, shape index: {0}]   ;;  %s24745_s5 = inlined_call_operand.vmem [shape: f32[1,128], index: 5, kind: input, shape index: {}]   ;;  %s24746_s7 = inlined_call_operand.vmem [shape: f32[2,3,61,128], index: 7, kind: output, shape index: {1}]  }
   0x1   :  { %v59_v0 = vld [vmem:[%s24739_s2 + $0x8] sm:$0xff]  ;;  %v58_v2 = vld [vmem:[%s24739_s2] sm:$0xff]  ;;  %296 = vmatprep.mubr.f32.mxu0 %v24747_v3  ;;  %553 = vmatprep.mubr.f32.mxu1 %v24747_v3  ;;  %vm19446_vm2 = vmpackc.low %vm219_vm0, %vm19306_vm1  ;;  %vm1505_vm4 = vcmask 1045504   ;;  %vm1118_vm5 = vcmask 1046528   ;;  %vm1150_vm6 = vcmask 130048   ;;  %vm3078_vm8 = vcmask 990208  }
   0x2   :  { %v63_v1 = vld [vmem:[%s24739_s2 + $0x28] sm:$0xff]  ;;  %v62_v5 = vld [vmem:[%s24739_s2 + $0x20] sm:$0xff]  ;;  %v1026_v49 = vld [vmem:[%s24740_s4 + $0x10] sm:$0xff]  ;;  %vm898_vm9 = vcmask 588800   ;;  %vm3103_vm10 = vcmask 1040384  }
   0x3   :  { %v18012_v4 = vpack.c.bf16 %v63_v1, %v59_v0  ;;  %v67_v6 = vld [vmem:[%s24739_s2 + $0x48] sm:$0xff]  ;;  %v18014_v8 = vpack.c.bf16 %v62_v5, %v58_v2  ;;  %v66_v10 = vld [vmem:[%s24739_s2 + $0x40] sm:$0xff]  ;;  %v1027_v50 = vld [vmem:[%s24740_s4 + $0x18] sm:$0xff] }
   0x4   :  { %v71_v7 = vld [vmem:[%s24739_s2 + $0x68] sm:$0xff]  ;;  %v70_v11 = vld [vmem:[%s24739_s2 + $0x60] sm:$0xff]  ;;  %v19458_v52 = vpack.c.bf16 %v1027_v50, %v1026_v49  ;;  %v28_v55 = vld [vmem:[%s24741_s0 + $0x10] sm:$0xff] }
   0x5   :  { %v18016_v9 = vpack.c.bf16 %v71_v7, %v67_v6  ;;  %v75_v12 = vld [vmem:[%s24739_s2 + $0x88] sm:$0xff]  ;;  %18013 = vmatprep.subr.bf16.mxu0 %v18012_v4  ;;  %v18018_v14 = vpack.c.bf16 %v70_v11, %v66_v10  ;;  %v74_v16 = vld [vmem:[%s24739_s2 + $0x80] sm:$0xff]  ;;  %v29_v56 = vld [vmem:[%s24741_s0 + $0x18] sm:$0xff] }
   0x6   :  { %v79_v13 = vld [vmem:[%s24739_s2 + $0xa8] sm:$0xff]  ;;  %18015 = vmatpush1.bf16.msra.mxu0 %v18014_v8  ;;  %v78_v17 = vld [vmem:[%s24739_s2 + $0xa0] sm:$0xff]  ;;  %v32_v59 = vld [vmem:[%s24741_s0 + $0x30] sm:$0xff] }
   0x7   :  { %18017 = vmatprep.subr.bf16.mxu0 %v18016_v9  ;;  %v18020_v15 = vpack.c.bf16 %v79_v13, %v75_v12  ;;  %v83_v18 = vld [vmem:[%s24739_s2 + $0xc8] sm:$0xff]  ;;  %v18022_v20 = vpack.c.bf16 %v78_v17, %v74_v16  ;;  %v82_v22 = vld [vmem:[%s24739_s2 + $0xc0] sm:$0xff]  ;;  %v33_v60 = vld [vmem:[%s24741_s0 + $0x38] sm:$0xff] }
   0x8   :  { %v87_v19 = vld [vmem:[%s24739_s2 + $0xe8] sm:$0xff]  ;;  %v86_v23 = vld [vmem:[%s24739_s2 + $0xe0] sm:$0xff]  ;;  %v36_v2 = vld [vmem:[%s24741_s0 + $0x50] sm:$0xff] }
   0x9   :  { %v18024_v21 = vpack.c.bf16 %v87_v19, %v83_v18  ;;  %v91_v24 = vld [vmem:[%s24739_s2 + $0x108] sm:$0xff]  ;;  %v18026_v26 = vpack.c.bf16 %v86_v23, %v82_v22  ;;  %v90_v28 = vld [vmem:[%s24739_s2 + $0x100] sm:$0xff]  ;;  %v37_v4 = vld [vmem:[%s24741_s0 + $0x58] sm:$0xff] }
   0xa   :  { %18019 = vmatpush1.bf16.msra.mxu0 %v18018_v14  ;;  %v95_v25 = vld [vmem:[%s24739_s2 + $0x128] sm:$0xff]  ;;  %v94_v29 = vld [vmem:[%s24739_s2 + $0x120] sm:$0xff]  ;;  %v40_v7 = vld [vmem:[%s24741_s0 + $0x70] sm:$0xff] }
   0xb   :  { %18021 = vmatprep.subr.bf16.mxu0 %v18020_v15  ;;  %v18028_v27 = vpack.c.bf16 %v95_v25, %v91_v24  ;;  %v99_v30 = vld [vmem:[%s24739_s2 + $0x148] sm:$0xff]  ;;  %v18030_v32 = vpack.c.bf16 %v94_v29, %v90_v28  ;;  %v98_v34 = vld [vmem:[%s24739_s2 + $0x140] sm:$0xff]  ;;  %v41_v8 = vld [vmem:[%s24741_s0 + $0x78] sm:$0xff] }
   0xc   :  { %v103_v31 = vld [vmem:[%s24739_s2 + $0x168] sm:$0xff]  ;;  %v102_v35 = vld [vmem:[%s24739_s2 + $0x160] sm:$0xff]  ;;  %v19565_v11 = vld [vmem:[%s24742_s1 + $0x10] sm:$0xff] }
   0xd   :  { %v18032_v33 = vpack.c.bf16 %v103_v31, %v99_v30  ;;  %v107_v36 = vld [vmem:[%s24739_s2 + $0x188] sm:$0xff]  ;;  %v18034_v38 = vpack.c.bf16 %v102_v35, %v98_v34  ;;  %v106_v40 = vld [vmem:[%s24739_s2 + $0x180] sm:$0xff]  ;;  %v1509_v15 = vrot.slane %v19565_v11, 2  ;;  %v19580_v17 = vld [vmem:[%s24742_s1 + $0x18] sm:$0xff] }
   0xe   :  { %18023 = vmatpush1.bf16.msra.mxu0 %v18022_v20  ;;  %v111_v37 = vld [vmem:[%s24739_s2 + $0x1a8] sm:$0xff]  ;;  %v110_v41 = vld [vmem:[%s24739_s2 + $0x1a0] sm:$0xff]  ;;  %v1511_v20 = vrot.slane %v19580_v17, 2  ;;  %v44_v28 = vld [vmem:[%s24741_s0 + $0x90] sm:$0xff] }
   0xf   :  { %18025 = vmatprep.subr.bf16.mxu0 %v18024_v21  ;;  %v18036_v39 = vpack.c.bf16 %v111_v37, %v107_v36  ;;  %v115_v42 = vld [vmem:[%s24739_s2 + $0x1c8] sm:$0xff]  ;;  %v18038_v44 = vpack.c.bf16 %v110_v41, %v106_v40  ;;  %v114_v46 = vld [vmem:[%s24739_s2 + $0x1c0] sm:$0xff]  ;;  %v19626_v31 = vld [vmem:[%s24742_s1 + $0x38] sm:$0xff] }
  0x10   :  { %v119_v43 = vld [vmem:[%s24739_s2 + $0x1e8] sm:$0x7]  ;;  %v118_v47 = vld [vmem:[%s24739_s2 + $0x1e0] sm:$0x7]  ;;  %v19598_v23 = vsel %vm1505_vm4, %v1509_v15, %v1511_v20  ;;  %v1519_v34 = vrot.slane %v19626_v31, 2  ;;  %v45_v35 = vld [vmem:[%s24741_s0 + $0x98] sm:$0xff] }
  0x11   :  { %v18040_v45 = vpack.c.bf16 %v119_v43, %v115_v42  ;;  %v18043_v51 = vpack.c.bf16 %v118_v47, %v114_v46  ;;  %v26_v53 = vld [vmem:[%s24741_s0] sm:$0xff]  ;;  %v27_v54 = vld [vmem:[%s24741_s0 + $0x8] sm:$0xff]  ;;  %v19658_v40 = vld [vmem:[%s24742_s1 + $0x50] sm:$0xff] }
  0x12   :  { %18027 = vmatpush1.bf16.msra.mxu0 %v18026_v26  ;;  %v30_v57 = vld [vmem:[%s24741_s0 + $0x20] sm:$0xff]  ;;  %v31_v58 = vld [vmem:[%s24741_s0 + $0x28] sm:$0xff]  ;;  %v19612_v26 = vld [vmem:[%s24742_s1 + $0x30] sm:$0xff]  ;;  %v1525_v43 = vrot.slane %v19658_v40, 2 }
  0x13   :  { %18029 = vmatprep.subr.bf16.mxu0 %v18028_v27  ;;  %v1024_v61 = vld [vmem:[%s24740_s4] sm:$0xff]  ;;  %v1025_v62 = vld [vmem:[%s24740_s4 + $0x8] sm:$0xff]  ;;  %v1517_v29 = vrot.slane %v19612_v26, 2  ;;  %vm21098_vm11 = vmpackc.low %vm3103_vm10, %vm19306_vm1 }
  0x14   :  { %v19508_v63 = vpack.c.bf16 %v1025_v62, %v1024_v61  ;;  %v34_v0 = vld [vmem:[%s24741_s0 + $0x40] sm:$0xff]  ;;  %v35_v1 = vld [vmem:[%s24741_s0 + $0x48] sm:$0xff]  ;;  %v19718_v61 = vld [vmem:[%s24742_s1 + $0x78] sm:$0x7] }
  0x15   :  { %v38_v5 = vld [vmem:[%s24741_s0 + $0x60] sm:$0xff]  ;;  %v39_v6 = vld [vmem:[%s24741_s0 + $0x68] sm:$0xff]  ;;  %v19644_v37 = vsel %vm1505_vm4, %v1517_v29, %v1519_v34 }
  0x16   :  { %18031 = vmatpush1.bf16.msra.mxu0 %v18030_v32  ;;  %v19554_v9 = vld [vmem:[%s24742_s1] sm:$0xff]  ;;  %v19559_v10 = vld [vmem:[%s24742_s1 + $0x8] sm:$0xff] }
  0x17   :  { %18033 = vmatprep.subr.bf16.mxu0 %v18032_v33  ;;  %v1506_v12 = vrot.slane %v19554_v9, 2  ;;  %v1507_v13 = vrot.slane %v19559_v10, 2  ;;  %v42_v14 = vld [vmem:[%s24741_s0 + $0x80] sm:$0xff]  ;;  %v43_v21 = vld [vmem:[%s24741_s0 + $0x88] sm:$0xff] }
  0x18   :  { %v19589_v19 = vld [vmem:[%s24742_s1 + $0x20] sm:$0xff]  ;;  %v19603_v24 = vld [vmem:[%s24742_s1 + $0x28] sm:$0xff] }
  0x19   :  { %v19575_v16 = vsel %vm1505_vm4, %v1506_v12, %v1507_v13  ;;  %v19583_v18 = vsel %vm1505_vm4, %v1507_v13, %v1509_v15  ;;  %v1513_v22 = vrot.slane %v19589_v19, 2  ;;  %v1515_v27 = vrot.slane %v19603_v24, 2  ;;  %v19635_v33 = vld [vmem:[%s24742_s1 + $0x40] sm:$0xff]  ;;  %v47_v50 = vld [vmem:[%s24741_s0 + $0xa8] sm:$0xff]  ;;  %v56_v13 = vld [vmem:[%s24741_s0 + $0xf0] sm:$0xff] }
  0x1a   :  { %18035 = vmatpush1.bf16.msra.mxu0 %v18034_v38  ;;  %v1521_v36 = vrot.slane %v19635_v33, 2  ;;  %v19649_v38 = vld [vmem:[%s24742_s1 + $0x48] sm:$0xff]  ;;  %v46_v42 = vld [vmem:[%s24741_s0 + $0xa0] sm:$0xff]  ;;  %v1120_v15 = vrot.slane %v19559_v10, 1 }
  0x1b   :  { %18037 = vmatprep.subr.bf16.mxu0 %v18036_v39  ;;  %v19606_v25 = vsel %vm1505_vm4, %v1511_v20, %v1513_v22  ;;  %v19621_v30 = vsel %vm1505_vm4, %v1513_v22, %v1515_v27  ;;  %v19629_v32 = vsel %vm1505_vm4, %v1515_v27, %v1517_v29  ;;  %v1523_v41 = vrot.slane %v19649_v38, 2  ;;  %v19681_v47 = vld [vmem:[%s24742_s1 + $0x60] sm:$0xff]  ;;  %v55_v12 = vld [vmem:[%s24741_s0 + $0xe8] sm:$0xff]  ;;  %v57_v20 = vld [vmem:[%s24741_s0 + $0xf8] sm:$0xff] }
  0x1c   :  { %v19652_v39 = vsel %vm1505_vm4, %v1519_v34, %v1521_v36  ;;  %v1124_v27 = vrot.slane %v19580_v17, 1  ;;  %v1029_v29 = vld [vmem:[%s24740_s4 + $0x28] sm:$0xff] }
  0x1d   :  { %v19675_v46 = vsel %vm1505_vm4, %v1523_v41, %v1525_v43 }
  0x1e   :  { %18039 = vmatpush1.bf16.msra.mxu0 %v18038_v44  ;;  %v19667_v44 = vsel %vm1505_vm4, %v1521_v36, %v1523_v41  ;;  %v1128_v41 = vrot.slane %v19603_v24, 1 }
  0x1f   :  { %18042 = vmatprep.subr.msk.bf16.mxu0 %vm19446_vm2, %v18040_v45  ;;  %v19672_v45 = vld [vmem:[%s24742_s1 + $0x58] sm:$0xff] }
  0x20   :  { %v1527_v49 = vrot.slane %v19672_v45, 2 }
  0x22   :  { %18045 = vmatpush1.bf16.msk.msra.mxu0 %vm19446_vm2, %v18043_v51  ;;  %v1529_v51 = vrot.slane %v19681_v47, 2 }
  0x23   :  { %18081 = vmatprep.subr.bf16.mxu0 %v19458_v52 }
  0x25   :  { %13815 = vmatmul.mubr.msk.f32.vlgmr.msra.gmra.mrb[0].mxu0 %vm122_vm3, %v26_v53  ;;  %v19690_v53 = vsel %vm1505_vm4, %v1525_v43, %v1527_v49 }
  0x26   :  { %302 = vmatprep.mubr.f32.mxu0 %v24747_v3  ;;  %18083 = vmatpush3.bf16.msra.mxu0 %v19458_v52 }
  0x27   :  { %18085 = vmatprep.subr.bf16.mxu0 %v19508_v63 }
  0x29   :  { %13816 = vmatmul.mubr.msk.f32.gmra.mrb[2].mxu0 %vm122_vm3, %v27_v54  ;;  %v19695_v54 = vld [vmem:[%s24742_s1 + $0x68] sm:$0xff] }
  0x2a   :  { %308 = vmatprep.mubr.f32.mxu0 %v24747_v3 }
  0x2d   :  { %13817 = vmatmul.mubr.msk.f32.gmra.mrb[4].mxu0 %vm122_vm3, %v28_v55  ;;  %v19698_v55 = vsel %vm1505_vm4, %v1527_v49, %v1529_v51  ;;  %v1130_v49 = vrot.slane %v19612_v26, 1 }
  0x2e   :  { %314 = vmatprep.mubr.f32.mxu0 %v24747_v3 }
  0x31   :  { %13818 = vmatmul.mubr.msk.f32.gmra.mrb[6].mxu0 %vm122_vm3, %v29_v56  ;;  %v19704_v56 = vld [vmem:[%s24742_s1 + $0x70] sm:$0xff] }
  0x32   :  { %320 = vmatprep.mubr.f32.mxu0 %v24747_v3 }
  0x35   :  { %13819 = vmatmul.mubr.msk.f32.gmra.mrb[8].mxu0 %vm122_vm3, %v30_v57  ;;  %v1531_v57 = vrot.slane %v19695_v54, 2 }
  0x36   :  { %326 = vmatprep.mubr.f32.mxu0 %v24747_v3 }
  0x39   :  { %13820 = vmatmul.mubr.msk.f32.gmra.mrb[10].mxu0 %vm122_vm3, %v31_v58  ;;  %v48_v58 = vld [vmem:[%s24741_s0 + $0xb0] sm:$0xff] }
  0x3a   :  { %332 = vmatprep.mubr.f32.mxu0 %v24747_v3 }
  0x3d   :  { %13821 = vmatmul.mubr.msk.f32.gmra.mrb[12].mxu0 %vm122_vm3, %v32_v59  ;;  %v1533_v59 = vrot.slane %v19704_v56, 2 }
  0x3e   :  { %338 = vmatprep.mubr.f32.mxu0 %v24747_v3 }
  0x3f   :  { %v19721_v62 = vsel %vm1505_vm4, %v1531_v57, %v1533_v59 }
  0x41   :  { %13822 = vmatmul.mubr.msk.f32.gmra.mrb[14].mxu0 %vm122_vm3, %v33_v60  ;;  %v19713_v60 = vsel %vm1505_vm4, %v1529_v51, %v1531_v57  ;;  %v1132_v51 = vrot.slane %v19626_v31, 1  ;;  %v1131_v57 = vsel %vm1118_vm5, %v1128_v41, %v1130_v49 }
  0x42   :  { %344 = vmatprep.mubr.f32.mxu0 %v24747_v3 }
  0x45   :  { %13823 = vmatmul.mubr.msk.f32.gmra.mrb[16].mxu0 %vm122_vm3, %v34_v0  ;;  %v1535_v0 = vrot.slane %v19718_v61, 2 }
  0x46   :  { %350 = vmatprep.mubr.f32.mxu0 %v24747_v3 }
  0x49   :  { %13824 = vmatmul.mubr.msk.f32.gmra.mrb[18].mxu0 %vm122_vm3, %v35_v1  ;;  %v49_v1 = vld [vmem:[%s24741_s0 + $0xb8] sm:$0xff] }
  0x4a   :  { %356 = vmatprep.mubr.f32.mxu0 %v24747_v3 }
  0x4d   :  { %13825 = vmatmul.mubr.msk.f32.gmra.mrb[20].mxu0 %vm122_vm3, %v36_v2  ;;  %v19732_v2 = vsel %vm1505_vm4, %v1533_v59, %v1535_v0  ;;  %v1133_v59 = vsel %vm1118_vm5, %v1130_v49, %v1132_v51 }
  0x4e   :  { %362 = vmatprep.mubr.f32.mxu0 %v24747_v3 }
  0x51   :  { %13826 = vmatmul.mubr.msk.f32.gmra.mrb[22].mxu0 %vm122_vm3, %v37_v4  ;;  %v50_v4 = vld [vmem:[%s24741_s0 + $0xc0] sm:$0xff] }
  0x52   :  { %368 = vmatprep.mubr.f32.mxu0 %v24747_v3 }
  0x55   :  { %13827 = vmatmul.mubr.msk.f32.gmra.mrb[24].mxu0 %vm122_vm3, %v38_v5  ;;  %v51_v5 = vld [vmem:[%s24741_s0 + $0xc8] sm:$0xff] }
  0x56   :  { %374 = vmatprep.mubr.f32.mxu0 %v24747_v3 }
  0x59   :  { %13828 = vmatmul.mubr.msk.f32.gmra.mrb[26].mxu0 %vm122_vm3, %v39_v6  ;;  %v52_v6 = vld [vmem:[%s24741_s0 + $0xd0] sm:$0xff] }
  0x5a   :  { %380 = vmatprep.mubr.f32.mxu0 %v24747_v3 }
  0x5d   :  { %13829 = vmatmul.mubr.msk.f32.gmra.mrb[28].mxu0 %vm122_vm3, %v40_v7  ;;  %v53_v7 = vld [vmem:[%s24741_s0 + $0xd8] sm:$0xff] }
  0x5e   :  { %386 = vmatprep.mubr.f32.mxu0 %v24747_v3 }
  0x61   :  { %13830 = vmatmul.mubr.msk.f32.gmra.mrb[30].mxu0 %vm122_vm3, %v41_v8  ;;  %v54_v8 = vld [vmem:[%s24741_s0 + $0xe0] sm:$0xff] }
  0x62   :  { %392 = vmatprep.mubr.f32.mxu0 %v24747_v3 }
  0x65   :  { %13831 = vmatmul.mubr.msk.f32.gmra.mrb[32].mxu0 %vm122_vm3, %v42_v14  ;;  %v1119_v14 = vrot.slane %v19554_v9, 1 }
  0x66   :  { %398 = vmatprep.mubr.f32.mxu0 %v24747_v3 }
  0x67   :  { %v1121_v22 = vsel %vm1118_vm5, %v1119_v14, %v1120_v15  ;;  %v1144_v14 = vrot.slane %v19695_v54, 1 }
  0x69   :  { %13832 = vmatmul.mubr.msk.f32.gmra.mrb[34].mxu0 %vm122_vm3, %v43_v21  ;;  %v1122_v21 = vrot.slane %v19565_v11, 1 }
  0x6a   :  { %404 = vmatprep.mubr.f32.mxu0 %v24747_v3 }
  0x6b   :  { %v1123_v34 = vsel %vm1118_vm5, %v1120_v15, %v1122_v21  ;;  %v1125_v36 = vsel %vm1118_vm5, %v1122_v21, %v1124_v27 }
  0x6d   :  { %13833 = vmatmul.mubr.msk.f32.gmra.mrb[36].mxu0 %vm122_vm3, %v44_v28  ;;  %v1028_v28 = vld [vmem:[%s24740_s4 + $0x20] sm:$0xff] }
  0x6e   :  { %410 = vmatprep.mubr.f32.mxu0 %v24747_v3 }
  0x71   :  { %13834 = vmatmul.mubr.msk.f32.gmra.mrb[38].mxu0 %vm122_vm3, %v45_v35  ;;  %v1126_v35 = vrot.slane %v19589_v19, 1 }
  0x72   :  { %416 = vmatprep.mubr.f32.mxu0 %v24747_v3 }
  0x73   :  { %v1127_v43 = vsel %vm1118_vm5, %v1124_v27, %v1126_v35 }
  0x75   :  { %13835 = vmatmul.mubr.msk.f32.gmra.mrb[40].mxu0 %vm122_vm3, %v46_v42  ;;  %v19791_v42 = vpack.c.bf16 %v1029_v29, %v1028_v28  ;;  %v1030_v29 = vld [vmem:[%s24740_s4 + $0x30] sm:$0xff] }
  0x76   :  { %422 = vmatprep.mubr.f32.mxu0 %v24747_v3 }
  0x79   :  { %13836 = vmatmul.mubr.msk.f32.gmra.mrb[42].mxu0 %vm122_vm3, %v47_v50  ;;  %v1129_v50 = vsel %vm1118_vm5, %v1126_v35, %v1128_v41  ;;  %v19996_v41 = vld [vmem:[%s24742_s1 + $0xa0] sm:$0xff] }
  0x7a   :  { %428 = vmatprep.mubr.f32.mxu0 %v24747_v3 }
  0x7d   :  { %13837 = vmatmul.mubr.msk.f32.gmra.mrb[44].mxu0 %vm122_vm3, %v48_v58  ;;  %v1134_v58 = vrot.slane %v19635_v33, 1 }
  0x7e   :  { %434 = vmatprep.mubr.f32.mxu0 %v24747_v3 }
  0x81   :  { %13838 = vmatmul.mubr.msk.f32.gmra.mrb[46].mxu0 %vm122_vm3, %v49_v1  ;;  %v1136_v1 = vrot.slane %v19649_v38, 1 }
  0x82   :  { %440 = vmatprep.mubr.f32.mxu0 %v24747_v3 }
  0x85   :  { %13839 = vmatmul.mubr.msk.f32.gmra.mrb[48].mxu0 %vm122_vm3, %v50_v4  ;;  %v1135_v4 = vsel %vm1118_vm5, %v1132_v51, %v1134_v58 }
  0x86   :  { %446 = vmatprep.mubr.f32.mxu0 %v24747_v3 }
  0x89   :  { %13840 = vmatmul.mubr.msk.f32.gmra.mrb[50].mxu0 %vm122_vm3, %v51_v5  ;;  %v1138_v5 = vrot.slane %v19658_v40, 1 }
  0x8a   :  { %452 = vmatprep.mubr.f32.mxu0 %v24747_v3 }
  0x8d   :  { %13841 = vmatmul.mubr.msk.f32.gmra.mrb[52].mxu0 %vm122_vm3, %v52_v6  ;;  %v1137_v6 = vsel %vm1118_vm5, %v1134_v58, %v1136_v1  ;;  %v20019_v58 = vld [vmem:[%s24742_s1 + $0xb0] sm:$0xff] }
  0x8e   :  { %458 = vmatprep.mubr.f32.mxu0 %v24747_v3 }
  0x91   :  { %13842 = vmatmul.mubr.msk.f32.gmra.mrb[54].mxu0 %vm122_vm3, %v53_v7  ;;  %v1140_v7 = vrot.slane %v19672_v45, 1 }
  0x92   :  { %464 = vmatprep.mubr.f32.mxu0 %v24747_v3 }
  0x95   :  { %13843 = vmatmul.mubr.msk.f32.gmra.mrb[56].mxu0 %vm122_vm3, %v54_v8  ;;  %v1139_v8 = vsel %vm1118_vm5, %v1136_v1, %v1138_v5 }
  0x96   :  { %470 = vmatprep.mubr.f32.mxu0 %v24747_v3 }
  0x99   :  { %13844 = vmatmul.mubr.msk.f32.gmra.mrb[58].mxu0 %vm122_vm3, %v55_v12  ;;  %v1142_v12 = vrot.slane %v19681_v47, 1 }
  0x9a   :  { %476 = vmatprep.mubr.f32.mxu0 %v24747_v3 }
  0x9b   :  { %v1143_v15 = vsel %vm1118_vm5, %v1140_v7, %v1142_v12  ;;  %v1145_v21 = vsel %vm1118_vm5, %v1142_v12, %v1144_v14 }
  0x9d   :  { %13845 = vmatmul.mubr.msk.f32.gmra.mrb[60].mxu0 %vm122_vm3, %v56_v13  ;;  %v1141_v13 = vsel %vm1118_vm5, %v1138_v5, %v1140_v7  ;;  %v20041_v7 = vld [vmem:[%s24742_s1 + $0xc0] sm:$0xff] }
  0x9e   :  { %482 = vmatprep.mubr.f32.mxu0 %v24747_v3 }
  0xa1   :  { %13846 = vmatmul.mubr.msk.f32.gmra.mrb[62].mxu0 %vm122_vm3, %v57_v20  ;;  %v1146_v20 = vrot.slane %v19704_v56, 1 }
  0xa2   :  { %16240 = vmatprep.mubr.msk.f32.mxu0 %vm1150_vm6, %v1121_v22  ;;  %v1148_v22 = vrot.slane %v19718_v61, 1 }
  0xa3   :  { %v1147_v27 = vsel %vm1118_vm5, %v1144_v14, %v1146_v20 }
  0xa4   :  { %v1149_v28 = vsel %vm1118_vm5, %v1146_v20, %v1148_v22  ;;  %v20063_v20 = vld [vmem:[%s24742_s1 + $0xd0] sm:$0xff] }
  0xa5   :  { %16241 = vmatmul.mubr.msk.f32.vlgmr.msra.gmra.mrb[64].mxu0 %vm1150_vm6, %v1123_v34  ;;  %v1031_v34 = vld [vmem:[%s24740_s4 + $0x38] sm:$0xff] }
  0xa6   :  { %16243 = vmatprep.mubr.msk.f32.mxu0 %vm1150_vm6, %v1125_v36  ;;  %18087 = vmatpush3.bf16.msra.mxu0 %v19508_v63  ;;  %v19840_v35 = vpack.c.bf16 %v1031_v34, %v1030_v29  ;;  %v19987_v36 = vld [vmem:[%s24742_s1 + $0x98] sm:$0xff]  ;;  %v20085_v34 = vld [vmem:[%s24742_s1 + $0xe0] sm:$0xff] }
  0xa7   :  { %18089 = vmatprep.subr.bf16.mxu0 %v19791_v42  ;;  %v20077_v29 = vld [vmem:[%s24742_s1 + $0xd8] sm:$0xff] }
  0xa9   :  { %16244 = vmatmul.mubr.msk.f32.gmra.mrb[66].mxu0 %vm1150_vm6, %v1127_v43 }
  0xaa   :  { %16246 = vmatprep.mubr.msk.f32.mxu0 %vm1150_vm6, %v1129_v50 }
  0xad   :  { %16247 = vmatmul.mubr.msk.f32.gmra.mrb[68].mxu0 %vm1150_vm6, %v1131_v57  ;;  %v20011_v57 = vld [vmem:[%s24742_s1 + $0xa8] sm:$0xff] }
  0xae   :  { %16249 = vmatprep.mubr.msk.f32.mxu0 %vm1150_vm6, %v1133_v59 }
  0xb1   :  { %16250 = vmatmul.mubr.msk.f32.gmra.mrb[70].mxu0 %vm1150_vm6, %v1135_v4 }
  0xb2   :  { %16252 = vmatprep.mubr.msk.f32.mxu0 %vm1150_vm6, %v1137_v6  ;;  %v20033_v6 = vld [vmem:[%s24742_s1 + $0xb8] sm:$0xff] }
  0xb5   :  { %16253 = vmatmul.mubr.msk.f32.gmra.mrb[72].mxu0 %vm1150_vm6, %v1139_v8 }
  0xb6   :  { %16255 = vmatprep.mubr.msk.f32.mxu0 %vm1150_vm6, %v1141_v13 }
  0xb9   :  { %16256 = vmatmul.mubr.msk.f32.gmra.mrb[74].mxu0 %vm1150_vm6, %v1143_v15  ;;  %v20055_v15 = vld [vmem:[%s24742_s1 + $0xc8] sm:$0xff] }
  0xba   :  { %16258 = vmatprep.mubr.msk.f32.mxu0 %vm1150_vm6, %v1145_v21 }
  0xbd   :  { %16259 = vmatmul.mubr.msk.f32.gmra.mrb[76].mxu0 %vm1150_vm6, %v1147_v27 }
  0xbe   :  { %16261 = vmatprep.mubr.msk.f32.mxu0 %vm1150_vm6, %v1149_v28 }
  0xc1   :  { %16262 = vmatmul.mubr.msk.f32.gmra.mrb[78].mxu0 %vm1150_vm6, %v1148_v22 }
  0xc2   :  { %16268 = vmatprep.mubr.msk.f32.mxu0 %vm1150_vm6, %v19554_v9  ;;  %v1032_v9 = vld [vmem:[%s24740_s4 + $0x40] sm:$0xff] }
  0xc5   :  { %16269 = vmatmul.mubr.msk.f32.vlgmr.msra.gmra.mrb[64].mxu0 %vm1150_vm6, %v19559_v10  ;;  %v1033_v10 = vld [vmem:[%s24740_s4 + $0x48] sm:$0xff] }
  0xc6   :  { %16271 = vmatprep.mubr.msk.f32.mxu0 %vm1150_vm6, %v19565_v11  ;;  %18091 = vmatpush3.bf16.msra.mxu0 %v19791_v42  ;;  %v19882_v11 = vpack.c.bf16 %v1033_v10, %v1032_v9 }
  0xc7   :  { %18093 = vmatprep.subr.bf16.mxu0 %v19840_v35 }
  0xc9   :  { %16272 = vmatmul.mubr.msk.f32.gmra.mrb[66].mxu0 %vm1150_vm6, %v19580_v17  ;;  %v747_v17 = vlaneseq }
  0xca   :  { %16274 = vmatprep.mubr.msk.f32.mxu0 %vm1150_vm6, %v19589_v19  ;;  %v25_v19 = vld [vmem:[%s24743_s3] sm:$0xf] }
  0xcd   :  { %16275 = vmatmul.mubr.msk.f32.gmra.mrb[68].mxu0 %vm1150_vm6, %v19603_v24 }
  0xce   :  { %16277 = vmatprep.mubr.msk.f32.mxu0 %vm1150_vm6, %v19612_v26 }
  0xd1   :  { %16278 = vmatmul.mubr.msk.f32.gmra.mrb[70].mxu0 %vm1150_vm6, %v19626_v31 }
  0xd2   :  { %16280 = vmatprep.mubr.msk.f32.mxu0 %vm1150_vm6, %v19635_v33 }
  0xd5   :  { %16281 = vmatmul.mubr.msk.f32.gmra.mrb[72].mxu0 %vm1150_vm6, %v19649_v38 }
  0xd6   :  { %16283 = vmatprep.mubr.msk.f32.mxu0 %vm1150_vm6, %v19658_v40  ;;  %v19942_v40 = vld [vmem:[%s24742_s1 + $0x80] sm:$0xff] }
  0xd9   :  { %16284 = vmatmul.mubr.msk.f32.gmra.mrb[74].mxu0 %vm1150_vm6, %v19672_v45  ;;  %v1034_v45 = vld [vmem:[%s24740_s4 + $0x50] sm:$0xff] }
  0xda   :  { %16286 = vmatprep.mubr.msk.f32.mxu0 %vm1150_vm6, %v19681_v47 }
  0xdd   :  { %16287 = vmatmul.mubr.msk.f32.gmra.mrb[76].mxu0 %vm1150_vm6, %v19695_v54 }
  0xde   :  { %16289 = vmatprep.mubr.msk.f32.mxu0 %vm1150_vm6, %v19704_v56  ;;  %v19971_v56 = vld [vmem:[%s24742_s1 + $0x90] sm:$0xff] }
  0xe1   :  { %16290 = vmatmul.mubr.msk.f32.gmra.mrb[78].mxu0 %vm1150_vm6, %v19718_v61 }
  0xe2   :  { %16296 = vmatprep.mubr.msk.f32.mxu0 %vm1150_vm6, %v19575_v16  ;;  %v19897_v16 = vshrl.u32 %v747_v17, 7 }
  0xe5   :  { %16297 = vmatmul.mubr.msk.f32.vlgmr.msra.gmra.mrb[64].mxu0 %vm1150_vm6, %v19583_v18  ;;  %v749_v18 = vsub.s32 0, %v19897_v16 }
  0xe6   :  { %16299 = vmatprep.mubr.msk.f32.mxu0 %vm1150_vm6, %v19598_v23  ;;  %18095 = vmatpush3.bf16.msra.mxu0 %v19840_v35  ;;  %v753_v23 = vsub.s32 1, %v19897_v16 }
  0xe7   :  { %18097 = vmatprep.subr.bf16.mxu0 %v19882_v11  ;;  %v19912_v24 = vrot.slane %v25_v19, %v749_v18 }
  0xe9   :  { %16300 = vmatmul.mubr.msk.f32.gmra.mrb[66].mxu0 %vm1150_vm6, %v19606_v25  ;;  %v19916_v25 = vrot.slane %v25_v19, %v753_v23  ;;  %v20099_v23 = vld [vmem:[%s24742_s1 + $0xe8] sm:$0xff] }
  0xea   :  { %16302 = vmatprep.mubr.msk.f32.mxu0 %vm1150_vm6, %v19621_v30 }
  0xed   :  { %16303 = vmatmul.mubr.msk.f32.gmra.mrb[68].mxu0 %vm1150_vm6, %v19629_v32 }
  0xee   :  { %16305 = vmatprep.mubr.msk.f32.mxu0 %vm1150_vm6, %v19644_v37 }
  0xf1   :  { %16306 = vmatmul.mubr.msk.f32.gmra.mrb[70].mxu0 %vm1150_vm6, %v19652_v39 }
  0xf2   :  { %16308 = vmatprep.mubr.msk.f32.mxu0 %vm1150_vm6, %v19667_v44 }
  0xf5   :  { %16309 = vmatmul.mubr.msk.f32.gmra.mrb[72].mxu0 %vm1150_vm6, %v19675_v46  ;;  %v1035_v46 = vld [vmem:[%s24740_s4 + $0x58] sm:$0xff] }
  0xf6   :  { %16311 = vmatprep.mubr.msk.f32.mxu0 %vm1150_vm6, %v19690_v53 }
  0xf8   :  { %v298_v26 = vpop.f32.mrb[0].mxu0 }
  0xf9   :  { %v767_v30 = vadd.f32 %v19912_v24, %v298_v26  ;;  %v300_v31 = vpop.f32.mrb[1].mxu0  ;;  %16312 = vmatmul.mubr.msk.f32.gmra.mrb[74].mxu0 %vm1150_vm6, %v19698_v55  ;;  %v19963_v55 = vld [vmem:[%s24742_s1 + $0x88] sm:$0xff]  ;;  %v1956_v26 = vrot.slane %v19942_v40, 1 }
  0xfa   :  { %v768_v32 = vadd.f32 %v19916_v25, %v300_v31  ;;  %16314 = vmatprep.mubr.msk.f32.mxu0 %vm1150_vm6, %v19713_v60  ;;  %v19973_v60 = vpack.c.bf16 %v1035_v46, %v1034_v45  ;;  %v1957_v31 = vrot.slane %v19963_v55, 1  ;;  %v1961_v45 = vrot.slane %v19987_v36, 1 }
  0xfb   :  { %895 = vst [vmem:[%s24744_s6] sm:$0xff] %v767_v30  ;;  %v20108_v30 = vld [vmem:[%s24742_s1 + $0xf0] sm:$0xff] }
  0xfc   :  { %896 = vst [vmem:[%s24744_s6 + $0x8] sm:$0xff] %v768_v32  ;;  %v304_v33 = vpop.f32.mrb[2].mxu0  ;;  %24810 = vst [vmem:[#allocation2_spill] sm:$0xff] %v19973_v60  ;;  %v1958_v46 = vsel %vm1118_vm5, %v1956_v26, %v1957_v31 }
  0xfd   :  { %v771_v37 = vadd.f32 %v19912_v24, %v304_v33  ;;  %v306_v38 = vpop.f32.mrb[3].mxu0  ;;  %16315 = vmatmul.mubr.msk.f32.gmra.mrb[76].mxu0 %vm1150_vm6, %v19721_v62 }
  0xfe   :  { %v772_v39 = vadd.f32 %v19916_v25, %v306_v38  ;;  %16317 = vmatprep.mubr.msk.f32.mxu0 %vm1150_vm6, %v19732_v2  ;;  %v1959_v38 = vrot.slane %v19971_v56, 1 }
  0xff   :  { %900 = vst [vmem:[%s24744_s6 + $0x20] sm:$0xff] %v771_v37 }
 0x100   :  { %901 = vst [vmem:[%s24744_s6 + $0x28] sm:$0xff] %v772_v39  ;;  %v310_v44 = vpop.f32.mrb[4].mxu0 }
 0x101   :  { %v775_v47 = vadd.f32 %v19912_v24, %v310_v44  ;;  %v312_v53 = vpop.f32.mrb[5].mxu0  ;;  %16318 = vmatmul.mubr.msk.f32.gmra.mrb[78].mxu0 %vm1150_vm6, %v1535_v0  ;;  %v20124_v44 = vld [vmem:[%s24742_s1 + $0xf8] sm:$0x7] }
 0x102   :  { %v776_v54 = vadd.f32 %v19916_v25, %v312_v53  ;;  %16324 = vmatprep.mubr.msk.f32.mxu0 %vm1150_vm6, %v19942_v40  ;;  %v1036_v53 = vld [vmem:[%s24740_s4 + $0x60] sm:$0xff] }
 0x103   :  { %904 = vst [vmem:[%s24744_s6 + $0x40] sm:$0xff] %v775_v47 }
 0x104   :  { %905 = vst [vmem:[%s24744_s6 + $0x48] sm:$0xff] %v776_v54  ;;  %v316_v61 = vpop.f32.mrb[6].mxu0  ;;  %v1037_v54 = vld [vmem:[%s24740_s4 + $0x68] sm:$0xff] }
 0x105   :  { %v779_v62 = vadd.f32 %v19912_v24, %v316_v61  ;;  %v318_v0 = vpop.f32.mrb[7].mxu0  ;;  %16325 = vmatmul.mubr.msk.f32.vlgmr.msra.gmra.mrb[64].mxu0 %vm1150_vm6, %v19963_v55 }
 0x106   :  { %v780_v2 = vadd.f32 %v19916_v25, %v318_v0  ;;  %16327 = vmatprep.mubr.msk.f32.mxu0 %vm1150_vm6, %v19971_v56  ;;  %18099 = vmatpush3.bf16.msra.mxu0 %v19882_v11  ;;  %v1963_v0 = vrot.slane %v19996_v41, 1 }
 0x107   :  { %908 = vst [vmem:[%s24744_s6 + $0x60] sm:$0xff] %v779_v62  ;;  %18101 = vmatprep.subr.bf16.mxu0 %v19973_v60 }
 0x108   :  { %909 = vst [vmem:[%s24744_s6 + $0x68] sm:$0xff] %v780_v2  ;;  %v322_v43 = vpop.f32.mrb[8].mxu0 }
 0x109   :  { %v783_v49 = vadd.f32 %v19912_v24, %v322_v43  ;;  %v324_v50 = vpop.f32.mrb[9].mxu0  ;;  %16328 = vmatmul.mubr.msk.f32.gmra.mrb[66].mxu0 %vm1150_vm6, %v19987_v36  ;;  %v1960_v43 = vsel %vm1118_vm5, %v1957_v31, %v1959_v38 }
 0x10a   :  { %v784_v51 = vadd.f32 %v19916_v25, %v324_v50  ;;  %16330 = vmatprep.mubr.msk.f32.mxu0 %vm1150_vm6, %v19996_v41  ;;  %v1962_v50 = vsel %vm1118_vm5, %v1959_v38, %v1961_v45 }
 0x10b   :  { %912 = vst [vmem:[%s24744_s6 + $0x80] sm:$0xff] %v783_v49  ;;  %v1965_v49 = vrot.slane %v20011_v57, 1 }
 0x10c   :  { %913 = vst [vmem:[%s24744_s6 + $0x88] sm:$0xff] %v784_v51  ;;  %v328_v59 = vpop.f32.mrb[10].mxu0  ;;  %v20152_v51 = vpack.c.bf16 %v1037_v54, %v1036_v53  ;;  %v1979_v54 = vrot.slane %v20085_v34, 1 }
 0x10d   :  { %v787_v1 = vadd.f32 %v19912_v24, %v328_v59  ;;  %v330_v4 = vpop.f32.mrb[11].mxu0  ;;  %16331 = vmatmul.mubr.msk.f32.gmra.mrb[68].mxu0 %vm1150_vm6, %v20011_v57 }
 0x10e   :  { %v788_v5 = vadd.f32 %v19916_v25, %v330_v4  ;;  %16333 = vmatprep.mubr.msk.f32.mxu0 %vm1150_vm6, %v20019_v58  ;;  %24811 = vst [vmem:[#allocation3_spill] sm:$0xff] %v20152_v51 }
 0x10f   :  { %916 = vst [vmem:[%s24744_s6 + $0xa0] sm:$0xff] %v787_v1 }
 0x110   :  { %917 = vst [vmem:[%s24744_s6 + $0xa8] sm:$0xff] %v788_v5  ;;  %v334_v8 = vpop.f32.mrb[12].mxu0  ;;  %v1967_v5 = vrot.slane %v20019_v58, 1 }
 0x111   :  { %v791_v12 = vadd.f32 %v19912_v24, %v334_v8  ;;  %v336_v13 = vpop.f32.mrb[13].mxu0  ;;  %16334 = vmatmul.mubr.msk.f32.gmra.mrb[70].mxu0 %vm1150_vm6, %v20033_v6 }
 0x112   :  { %v792_v14 = vadd.f32 %v19916_v25, %v336_v13  ;;  %16336 = vmatprep.mubr.msk.f32.mxu0 %vm1150_vm6, %v20041_v7  ;;  %v1969_v13 = vrot.slane %v20033_v6, 1 }
 0x113   :  { %920 = vst [vmem:[%s24744_s6 + $0xc0] sm:$0xff] %v791_v12  ;;  %v1964_v12 = vsel %vm1118_vm5, %v1961_v45, %v1963_v0 }
 0x114   :  { %921 = vst [vmem:[%s24744_s6 + $0xc8] sm:$0xff] %v792_v14  ;;  %v340_v21 = vpop.f32.mrb[14].mxu0  ;;  %v1966_v14 = vsel %vm1118_vm5, %v1963_v0, %v1965_v49  ;;  %v1981_v0 = vrot.slane %v20099_v23, 1 }
 0x115   :  { %v795_v22 = vadd.f32 %v19912_v24, %v340_v21  ;;  %v342_v27 = vpop.f32.mrb[15].mxu0  ;;  %16337 = vmatmul.mubr.msk.f32.gmra.mrb[72].mxu0 %vm1150_vm6, %v20055_v15 }
 0x116   :  { %v796_v28 = vadd.f32 %v19916_v25, %v342_v27  ;;  %16339 = vmatprep.mubr.msk.f32.mxu0 %vm1150_vm6, %v20063_v20 }
 0x117   :  { %924 = vst [vmem:[%s24744_s6 + $0xe0] sm:$0xff] %v795_v22 }
 0x118   :  { %925 = vst [vmem:[%s24744_s6 + $0xe8] sm:$0xff] %v796_v28  ;;  %v346_v9 = vpop.f32.mrb[16].mxu0  ;;  %v1971_v28 = vrot.slane %v20041_v7, 1 }
 0x119   :  { %v799_v10 = vadd.f32 %v19912_v24, %v346_v9  ;;  %v348_v18 = vpop.f32.mrb[17].mxu0  ;;  %16340 = vmatmul.mubr.msk.f32.gmra.mrb[74].mxu0 %vm1150_vm6, %v20077_v29 }
 0x11a   :  { %v800_v19 = vadd.f32 %v19916_v25, %v348_v18  ;;  %16342 = vmatprep.mubr.msk.f32.mxu0 %vm1150_vm6, %v20085_v34  ;;  %v1973_v18 = vrot.slane %v20055_v15, 1  ;;  %v1972_v38 = vsel %vm1118_vm5, %v1969_v13, %v1971_v28 }
 0x11b   :  { %928 = vst [vmem:[%s24744_s6 + $0x100] sm:$0xff] %v799_v10  ;;  %v1968_v10 = vsel %vm1118_vm5, %v1965_v49, %v1967_v5 }
 0x11c   :  { %929 = vst [vmem:[%s24744_s6 + $0x108] sm:$0xff] %v800_v19  ;;  %v352_v32 = vpop.f32.mrb[18].mxu0  ;;  %v1970_v19 = vsel %vm1118_vm5, %v1967_v5, %v1969_v13  ;;  %v1974_v45 = vsel %vm1118_vm5, %v1971_v28, %v1973_v18  ;;  %v1985_v5 = vrot.slane %v20124_v44, 1 }
 0x11d   :  { %v803_v33 = vadd.f32 %v19912_v24, %v352_v32  ;;  %v354_v37 = vpop.f32.mrb[19].mxu0  ;;  %16343 = vmatmul.mubr.msk.f32.gmra.mrb[76].mxu0 %vm1150_vm6, %v20099_v23 }
 0x11e   :  { %v804_v39 = vadd.f32 %v19916_v25, %v354_v37  ;;  %16345 = vmatprep.mubr.msk.f32.mxu0 %vm1150_vm6, %v20108_v30 }
 0x11f   :  { %932 = vst [vmem:[%s24744_s6 + $0x120] sm:$0xff] %v803_v33  ;;  %v1975_v33 = vrot.slane %v20063_v20, 1 }
 0x120   :  { %933 = vst [vmem:[%s24744_s6 + $0x128] sm:$0xff] %v804_v39  ;;  %v358_v47 = vpop.f32.mrb[20].mxu0  ;;  %v1977_v39 = vrot.slane %v20077_v29, 1 }
 0x121   :  { %v807_v61 = vadd.f32 %v19912_v24, %v358_v47  ;;  %v360_v62 = vpop.f32.mrb[21].mxu0  ;;  %16346 = vmatmul.mubr.msk.f32.gmra.mrb[78].mxu0 %vm1150_vm6, %v20124_v44 }
 0x122   :  { %v808_v2 = vadd.f32 %v19916_v25, %v360_v62  ;;  %16352 = vmatprep.mubr.msk.f32.mxu0 %vm1150_vm6, %v1958_v46  ;;  %v1976_v62 = vsel %vm1118_vm5, %v1973_v18, %v1975_v33 }
 0x123   :  { %936 = vst [vmem:[%s24744_s6 + $0x140] sm:$0xff] %v807_v61 }
 0x124   :  { %937 = vst [vmem:[%s24744_s6 + $0x148] sm:$0xff] %v808_v2  ;;  %v364_v59 = vpop.f32.mrb[22].mxu0  ;;  %v1978_v2 = vsel %vm1118_vm5, %v1975_v33, %v1977_v39  ;;  %v1039_v33 = vld [vmem:[%s24740_s4 + $0x78] sm:$0xff] }
 0x125   :  { %v811_v1 = vadd.f32 %v19912_v24, %v364_v59  ;;  %v366_v4 = vpop.f32.mrb[23].mxu0  ;;  %16353 = vmatmul.mubr.msk.f32.vlgmr.msra.gmra.mrb[64].mxu0 %vm1150_vm6, %v1960_v43  ;;  %v1983_v59 = vrot.slane %v20108_v30, 1 }
 0x126   :  { %v812_v8 = vadd.f32 %v19916_v25, %v366_v4  ;;  %16355 = vmatprep.mubr.msk.f32.mxu0 %vm1150_vm6, %v1962_v50  ;;  %18103 = vmatpush3.bf16.msra.mxu0 %v19973_v60  ;;  %v1980_v4 = vsel %vm1118_vm5, %v1977_v39, %v1979_v54  ;;  %v61_v39 = vld [vmem:[%s24739_s2 + $0x18] sm:$0xff] }
 0x127   :  { %940 = vst [vmem:[%s24744_s6 + $0x160] sm:$0xff] %v811_v1  ;;  %18105 = vmatprep.subr.bf16.mxu0 %v20152_v51  ;;  %v1986_v28 = vsel %vm1118_vm5, %v1983_v59, %v1985_v5 }
 0x128   :  { %941 = vst [vmem:[%s24744_s6 + $0x168] sm:$0xff] %v812_v8  ;;  %v370_v21 = vpop.f32.mrb[24].mxu0  ;;  %v1982_v8 = vsel %vm1118_vm5, %v1979_v54, %v1981_v0 }
 0x129   :  { %v815_v22 = vadd.f32 %v19912_v24, %v370_v21  ;;  %v372_v27 = vpop.f32.mrb[25].mxu0  ;;  %16356 = vmatmul.mubr.msk.f32.gmra.mrb[66].mxu0 %vm1150_vm6, %v1964_v12 }
 0x12a   :  { %v816_v9 = vadd.f32 %v19916_v25, %v372_v27  ;;  %16358 = vmatprep.mubr.msk.f32.mxu0 %vm1150_vm6, %v1966_v14  ;;  %v2180_v27 = vrot.slane %v19942_v40, 2  ;;  %v2183_v40 = vrot.slane %v19971_v56, 2  ;;  %v1038_v56 = vld [vmem:[%s24740_s4 + $0x70] sm:$0xff] }
 0x12b   :  { %944 = vst [vmem:[%s24744_s6 + $0x180] sm:$0xff] %v815_v22  ;;  %v1984_v22 = vsel %vm1118_vm5, %v1981_v0, %v1983_v59  ;;  %v73_v0 = vld [vmem:[%s24739_s2 + $0x78] sm:$0xff]  ;;  %v72_v59 = vld [vmem:[%s24739_s2 + $0x70] sm:$0xff] }
 0x12c   :  { %945 = vst [vmem:[%s24744_s6 + $0x188] sm:$0xff] %v816_v9  ;;  %v376_v26 = vpop.f32.mrb[26].mxu0  ;;  %v2181_v9 = vrot.slane %v19963_v55, 2 }
 0x12d   :  { %v819_v31 = vadd.f32 %v19912_v24, %v376_v26  ;;  %v378_v32 = vpop.f32.mrb[27].mxu0  ;;  %16359 = vmatmul.mubr.msk.f32.gmra.mrb[68].mxu0 %vm1150_vm6, %v1968_v10 }
 0x12e   :  { %v820_v37 = vadd.f32 %v19916_v25, %v378_v32  ;;  %16361 = vmatprep.mubr.msk.f32.mxu0 %vm1150_vm6, %v1970_v19  ;;  %v2182_v55 = vsel %vm1505_vm4, %v2180_v27, %v2181_v9 }
 0x12f   :  { %948 = vst [vmem:[%s24744_s6 + $0x1a0] sm:$0xff] %v819_v31  ;;  %v2185_v31 = vrot.slane %v19987_v36, 2  ;;  %v2187_v36 = vrot.slane %v19996_v41, 2 }
 0x130   :  { %949 = vst [vmem:[%s24744_s6 + $0x1a8] sm:$0xff] %v820_v37  ;;  %v382_v46 = vpop.f32.mrb[28].mxu0 }
 0x131   :  { %v823_v47 = vadd.f32 %v19912_v24, %v382_v46  ;;  %v384_v53 = vpop.f32.mrb[29].mxu0  ;;  %16362 = vmatmul.mubr.msk.f32.gmra.mrb[70].mxu0 %vm1150_vm6, %v1972_v38  ;;  %v60_v46 = vld [vmem:[%s24739_s2 + $0x10] sm:$0xff] }
 0x132   :  { %v824_v61 = vadd.f32 %v19916_v25, %v384_v53  ;;  %16364 = vmatprep.mubr.msk.f32.mxu0 %vm1150_vm6, %v1974_v45  ;;  %v65_v45 = vld [vmem:[%s24739_s2 + $0x38] sm:$0xff]  ;;  %v2184_v53 = vsel %vm1505_vm4, %v2181_v9, %v2183_v40  ;;  %v80_v9 = vld [vmem:[%s24739_s2 + $0xb0] sm:$0xff] }
 0x133   :  { %952 = vst [vmem:[%s24744_s6 + $0x1c0] sm:$0xff] %v823_v47  ;;  %v2189_v47 = vrot.slane %v20011_v57, 2  ;;  %v18046_v54 = vpack.c.bf16 %v65_v45, %v61_v39  ;;  %v2186_v57 = vsel %vm1505_vm4, %v2183_v40, %v2185_v31  ;;  %v93_v39 = vld [vmem:[%s24739_s2 + $0x118] sm:$0xff] }
 0x134   :  { %953 = vst [vmem:[%s24744_s6 + $0x1c8] sm:$0xff] %v824_v61  ;;  %v388_v43 = vpop.f32.mrb[30].mxu0  ;;  %v64_v61 = vld [vmem:[%s24739_s2 + $0x30] sm:$0xff]  ;;  %v97_v45 = vld [vmem:[%s24739_s2 + $0x138] sm:$0xff] }
 0x135   :  { %v827_v49 = vadd.f32 %v19912_v24, %v388_v43  ;;  %v390_v50 = vpop.f32.mrb[31].mxu0  ;;  %16365 = vmatmul.mubr.msk.f32.gmra.mrb[72].mxu0 %vm1150_vm6, %v1976_v62  ;;  %v69_v62 = vld [vmem:[%s24739_s2 + $0x58] sm:$0xff]  ;;  %v18048_v43 = vpack.c.bf16 %v64_v61, %v60_v46  ;;  %18047 = vmatprep.subr.bf16.mxu1 %v18046_v54 }
 0x136   :  { %v828_v1 = vadd.f32 %v19916_v25, %v390_v50  ;;  %16367 = vmatprep.mubr.msk.f32.mxu0 %vm1150_vm6, %v1978_v2  ;;  %v20291_v2 = vpack.c.bf16 %v1039_v33, %v1038_v56  ;;  %v68_v50 = vld [vmem:[%s24739_s2 + $0x50] sm:$0xff] }
 0x137   :  { %956 = vst [vmem:[%s24744_s6 + $0x1e0] sm:$0xff] %v827_v49  ;;  %v18050_v49 = vpack.c.bf16 %v73_v0, %v69_v62  ;;  %18049 = vmatpush1.bf16.msra.mxu1 %v18048_v43  ;;  %v18062_v62 = vpack.c.bf16 %v97_v45, %v93_v39  ;;  %v92_v0 = vld [vmem:[%s24739_s2 + $0x110] sm:$0xff]  ;;  %v2201_v43 = vrot.slane %v20077_v29, 2 }
 0x138   :  { %957 = vst [vmem:[%s24744_s6 + $0x1e8] sm:$0xff] %v828_v1  ;;  %v394_v12 = vpop.f32.mrb[32].mxu0  ;;  %24812 = vst [vmem:[#allocation4_spill] sm:$0xff] %v20291_v2  ;;  %v77_v1 = vld [vmem:[%s24739_s2 + $0x98] sm:$0xff]  ;;  %v116_v45 = vld [vmem:[%s24739_s2 + $0x1d0] sm:$0xff] }
 0x139   :  { %v831_v13 = vadd.f32 %v19912_v24, %v394_v12  ;;  %v396_v14 = vpop.f32.mrb[33].mxu0  ;;  %16368 = vmatmul.mubr.msk.f32.gmra.mrb[74].mxu0 %vm1150_vm6, %v1980_v4  ;;  %18051 = vmatprep.subr.bf16.mxu1 %v18050_v49  ;;  %v101_v49 = vld [vmem:[%s24739_s2 + $0x158] sm:$0xff] }
 0x13a   :  { %v832_v21 = vadd.f32 %v19916_v25, %v396_v14  ;;  %16370 = vmatprep.mubr.msk.f32.mxu0 %vm1150_vm6, %v1982_v8  ;;  %v2191_v14 = vrot.slane %v20019_v58, 2  ;;  %v2190_v58 = vsel %vm1505_vm4, %v2187_v36, %v2189_v47 }
 0x13b   :  { %960 = vst [vmem:[%s24744_s6 + $0x200] sm:$0xff] %v831_v13  ;;  %v18052_v13 = vpack.c.bf16 %v72_v59, %v68_v50  ;;  %v105_v50 = vld [vmem:[%s24739_s2 + $0x178] sm:$0xff] }
 0x13c   :  { %961 = vst [vmem:[%s24744_s6 + $0x208] sm:$0xff] %v832_v21  ;;  %v400_v10 = vpop.f32.mrb[34].mxu0  ;;  %v2192_v56 = vsel %vm1505_vm4, %v2189_v47, %v2191_v14 }
 0x13d   :  { %v835_v18 = vadd.f32 %v19912_v24, %v400_v10  ;;  %v402_v19 = vpop.f32.mrb[35].mxu0  ;;  %16371 = vmatmul.mubr.msk.f32.gmra.mrb[76].mxu0 %vm1150_vm6, %v1984_v22  ;;  %v2188_v22 = vsel %vm1505_vm4, %v2185_v31, %v2187_v36  ;;  %v2193_v10 = vrot.slane %v20033_v6, 2  ;;  %18053 = vmatpush1.bf16.msra.mxu1 %v18052_v13  ;;  %v84_v36 = vld [vmem:[%s24739_s2 + $0xd0] sm:$0xff]  ;;  %v18066_v13 = vpack.c.bf16 %v105_v50, %v101_v49 }
 0x13e   :  { %v836_v26 = vadd.f32 %v19916_v25, %v402_v19  ;;  %16373 = vmatprep.mubr.msk.f32.mxu0 %vm1150_vm6, %v1986_v28  ;;  %v76_v28 = vld [vmem:[%s24739_s2 + $0x90] sm:$0xff]  ;;  %v89_v19 = vld [vmem:[%s24739_s2 + $0xf8] sm:$0xff] }
 0x13f   :  { %964 = vst [vmem:[%s24744_s6 + $0x220] sm:$0xff] %v835_v18  ;;  %v85_v18 = vld [vmem:[%s24739_s2 + $0xd8] sm:$0xff]  ;;  %v18056_v31 = vpack.c.bf16 %v80_v9, %v76_v28 }
 0x140   :  { %965 = vst [vmem:[%s24744_s6 + $0x228] sm:$0xff] %v836_v26  ;;  %v406_v32 = vpop.f32.mrb[36].mxu0  ;;  %v18058_v33 = vpack.c.bf16 %v89_v19, %v85_v18  ;;  %v113_v28 = vld [vmem:[%s24739_s2 + $0x1b8] sm:$0xff]  ;;  %v2207_v18 = vrot.slane %v20108_v30, 2 }
 0x141   :  { %v839_v37 = vadd.f32 %v19912_v24, %v406_v32  ;;  %v408_v38 = vpop.f32.mrb[37].mxu0  ;;  %16374 = vmatmul.mubr.msk.f32.gmra.mrb[78].mxu0 %vm1150_vm6, %v1985_v5  ;;  %v81_v5 = vld [vmem:[%s24739_s2 + $0xb8] sm:$0xff] }
 0x142   :  { %v840_v41 = vadd.f32 %v19916_v25, %v408_v38  ;;  %16380 = vmatprep.mubr.msk.f32.mxu0 %vm1150_vm6, %v2182_v55  ;;  %v18054_v27 = vpack.c.bf16 %v81_v5, %v77_v1  ;;  %v2195_v55 = vrot.slane %v20041_v7, 2  ;;  %v2197_v38 = vrot.slane %v20055_v15, 2 }
 0x143   :  { %968 = vst [vmem:[%s24744_s6 + $0x240] sm:$0xff] %v839_v37  ;;  %v88_v37 = vld [vmem:[%s24739_s2 + $0xf0] sm:$0xff]  ;;  %v2194_v7 = vsel %vm1505_vm4, %v2191_v14, %v2193_v10  ;;  %v2203_v5 = vrot.slane %v20085_v34, 2 }
 0x144   :  { %969 = vst [vmem:[%s24744_s6 + $0x248] sm:$0xff] %v840_v41  ;;  %v412_v4 = vpop.f32.mrb[38].mxu0  ;;  %18055 = vmatprep.subr.bf16.mxu1 %v18054_v27  ;;  %v18060_v41 = vpack.c.bf16 %v88_v37, %v84_v36  ;;  %v2196_v61 = vsel %vm1505_vm4, %v2193_v10, %v2195_v55  ;;  %v100_v14 = vld [vmem:[%s24739_s2 + $0x150] sm:$0xff]  ;;  %v109_v27 = vld [vmem:[%s24739_s2 + $0x198] sm:$0xff] }
 0x145   :  { %v843_v8 = vadd.f32 %v19912_v24, %v412_v4  ;;  %v414_v12 = vpop.f32.mrb[39].mxu0  ;;  %16381 = vmatmul.mubr.msk.f32.vlgmr.msra.gmra.mrb[64].mxu0 %vm1150_vm6, %v2184_v53  ;;  %18057 = vmatpush1.bf16.msra.mxu1 %v18056_v31  ;;  %v2199_v53 = vrot.slane %v20063_v20, 2  ;;  %v2198_v20 = vsel %vm1505_vm4, %v2195_v55, %v2197_v38  ;;  %v112_v31 = vld [vmem:[%s24739_s2 + $0x1b0] sm:$0xff]  ;;  %v2209_v55 = vrot.slane %v20124_v44, 2 }
 0x146   :  { %v844_v21 = vadd.f32 %v19916_v25, %v414_v12  ;;  %16383 = vmatprep.mubr.msk.f32.mxu0 %vm1150_vm6, %v2186_v57  ;;  %18107 = vmatpush3.bf16.msra.mxu0 %v20152_v51  ;;  %v96_v57 = vld [vmem:[%s24739_s2 + $0x130] sm:$0xff] }
 0x147   :  { %972 = vst [vmem:[%s24744_s6 + $0x260] sm:$0xff] %v843_v8  ;;  %18109 = vmatprep.subr.bf16.mxu0 %v20291_v2  ;;  %18059 = vmatprep.subr.bf16.mxu1 %v18058_v33  ;;  %v18064_v4 = vpack.c.bf16 %v96_v57, %v92_v0  ;;  %v2200_v12 = vsel %vm1505_vm4, %v2197_v38, %v2199_v53  ;;  %v1040_v57 = vld [vmem:[%s24740_s4 + $0x80] sm:$0xff] }
 0x148   :  { %973 = vst [vmem:[%s24744_s6 + $0x268] sm:$0xff] %v844_v21  ;;  %v418_v6 = vpop.f32.mrb[40].mxu0  ;;  %v104_v21 = vld [vmem:[%s24739_s2 + $0x170] sm:$0xff]  ;;  %v2202_v34 = vsel %vm1505_vm4, %v2199_v53, %v2201_v43 }
 0x149   :  { %v847_v40 = vadd.f32 %v19912_v24, %v418_v6  ;;  %v420_v26 = vpop.f32.mrb[41].mxu0  ;;  %16384 = vmatmul.mubr.msk.f32.gmra.mrb[66].mxu0 %vm1150_vm6, %v2188_v22  ;;  %18061 = vmatpush1.bf16.msra.mxu1 %v18060_v41  ;;  %v2205_v22 = vrot.slane %v20099_v23, 2  ;;  %v2204_v6 = vsel %vm1505_vm4, %v2201_v43, %v2203_v5  ;;  %v1041_v43 = vld [vmem:[%s24740_s4 + $0x88] sm:$0xff] }
 0x14a   :  { %v848_v32 = vadd.f32 %v19916_v25, %v420_v26  ;;  %16386 = vmatprep.mubr.msk.f32.mxu0 %vm1150_vm6, %v2190_v58  ;;  %18063 = vmatprep.subr.bf16.mxu1 %v18062_v62  ;;  %v18068_v58 = vpack.c.bf16 %v104_v21, %v100_v14  ;;  %v108_v26 = vld [vmem:[%s24739_s2 + $0x190] sm:$0xff]  ;;  %v20470_v62 = vld [vmem:[%s24742_s1 + $0x100] sm:$0xff]  ;;  %v20501_v48 = vpack.c.bf16 %v1041_v43, %v1040_v57  ;;  %v19277_v43 = vld [vmem:[%s24741_s0 + $0x38] sm:$0xff] }
 0x14b   :  { %976 = vst [vmem:[%s24744_s6 + $0x280] sm:$0xff] %v847_v40  ;;  %v18070_v40 = vpack.c.bf16 %v113_v28, %v109_v27  ;;  %v2206_v30 = vsel %vm1505_vm4, %v2203_v5, %v2205_v22  ;;  %v18072_v37 = vpack.c.bf16 %v112_v31, %v108_v26  ;;  %v20529_v14 = vld [vmem:[%s24742_s1 + $0x120] sm:$0xff] }
 0x14c   :  { %977 = vst [vmem:[%s24744_s6 + $0x288] sm:$0xff] %v848_v32  ;;  %v424_v46 = vpop.f32.mrb[42].mxu0  ;;  %v117_v32 = vld [vmem:[%s24739_s2 + $0x1d8] sm:$0xff]  ;;  %24813 = vst [vmem:[#allocation5_spill] sm:$0xff] %v20501_v48  ;;  %v20584_v26 = vld [vmem:[%s24742_s1 + $0x140] sm:$0xff] }
 0x14d   :  { %v851_v15 = vadd.f32 %v19912_v24, %v424_v46  ;;  %v426_v47 = vpop.f32.mrb[43].mxu0  ;;  %16387 = vmatmul.mubr.msk.f32.gmra.mrb[68].mxu0 %vm1150_vm6, %v2192_v56  ;;  %18065 = vmatpush1.bf16.msra.mxu1 %v18064_v4  ;;  %v121_v56 = vld [vmem:[%s24739_s2 + $0x1f8] sm:$0x7]  ;;  %v120_v46 = vld [vmem:[%s24739_s2 + $0x1f0] sm:$0x7]  ;;  %v19270_v4 = vld [vmem:[%s24741_s0] sm:$0xff] }
 0x14e   :  { %v852_v54 = vadd.f32 %v19916_v25, %v426_v47  ;;  %16389 = vmatprep.mubr.msk.f32.mxu0 %vm1150_vm6, %v2194_v7  ;;  %18067 = vmatprep.subr.bf16.mxu1 %v18066_v13  ;;  %v2208_v7 = vsel %vm1505_vm4, %v2205_v22, %v2207_v18  ;;  %v18074_v39 = vpack.c.bf16 %v121_v56, %v117_v32  ;;  %v20520_v13 = vld [vmem:[%s24742_s1 + $0x118] sm:$0xff]  ;;  %v19271_v22 = vld [vmem:[%s24741_s0 + $0x8] sm:$0xff] }
 0x14f   :  { %980 = vst [vmem:[%s24744_s6 + $0x2a0] sm:$0xff] %v851_v15  ;;  %v2210_v15 = vsel %vm1505_vm4, %v2207_v18, %v2209_v55 }
 0x150   :  { %981 = vst [vmem:[%s24744_s6 + $0x2a8] sm:$0xff] %v852_v54  ;;  %v430_v59 = vpop.f32.mrb[44].mxu0  ;;  %v18077_v54 = vpack.c.bf16 %v120_v46, %v116_v45  ;;  %v20630_v45 = vld [vmem:[%s24742_s1 + $0x158] sm:$0xff]  ;;  %v20655_v46 = vld [vmem:[%s24742_s1 + $0x168] sm:$0xff] }
 0x151   :  { %v855_v29 = vadd.f32 %v19912_v24, %v430_v59  ;;  %v432_v1 = vpop.f32.mrb[45].mxu0  ;;  %16390 = vmatmul.mubr.msk.f32.gmra.mrb[70].mxu0 %vm1150_vm6, %v2196_v61  ;;  %18069 = vmatpush1.bf16.msra.mxu1 %v18068_v58  ;;  %v20491_v59 = vld [vmem:[%s24742_s1 + $0x108] sm:$0xff]  ;;  %v19272_v58 = vld [vmem:[%s24741_s0 + $0x10] sm:$0xff] }
 0x152   :  { %v856_v8 = vadd.f32 %v19916_v25, %v432_v1  ;;  %16392 = vmatprep.mubr.msk.f32.mxu0 %vm1150_vm6, %v2198_v20  ;;  %18071 = vmatprep.subr.bf16.mxu1 %v18070_v40  ;;  %v20576_v40 = vld [vmem:[%s24742_s1 + $0x138] sm:$0xff] }
 0x153   :  { %984 = vst [vmem:[%s24744_s6 + $0x2c0] sm:$0xff] %v855_v29  ;;  %v20499_v29 = vld [vmem:[%s24742_s1 + $0x110] sm:$0xff] }
 0x154   :  { %985 = vst [vmem:[%s24744_s6 + $0x2c8] sm:$0xff] %v856_v8  ;;  %v436_v9 = vpop.f32.mrb[46].mxu0 }
 0x155   :  { %v859_v23 = vadd.f32 %v19912_v24, %v436_v9  ;;  %v438_v10 = vpop.f32.mrb[47].mxu0  ;;  %16393 = vmatmul.mubr.msk.f32.gmra.mrb[72].mxu0 %vm1150_vm6, %v2200_v12  ;;  %18073 = vmatpush1.bf16.msra.mxu1 %v18072_v37  ;;  %v20549_v9 = vld [vmem:[%s24742_s1 + $0x128] sm:$0xff]  ;;  %v19274_v37 = vld [vmem:[%s24741_s0 + $0x20] sm:$0xff] }
 0x156   :  { %v860_v19 = vadd.f32 %v19916_v25, %v438_v10  ;;  %16395 = vmatprep.mubr.msk.f32.mxu0 %vm1150_vm6, %v2202_v34  ;;  %18076 = vmatprep.subr.msk.bf16.mxu1 %vm19446_vm2, %v18074_v39 }
 0x157   :  { %988 = vst [vmem:[%s24744_s6 + $0x2e0] sm:$0xff] %v859_v23  ;;  %v20557_v23 = vld [vmem:[%s24742_s1 + $0x130] sm:$0xff] }
 0x158   :  { %989 = vst [vmem:[%s24744_s6 + $0x2e8] sm:$0xff] %v860_v19  ;;  %v442_v33 = vpop.f32.mrb[48].mxu0 }
 0x159   :  { %v863_v44 = vadd.f32 %v19912_v24, %v442_v33  ;;  %v444_v36 = vpop.f32.mrb[49].mxu0  ;;  %16396 = vmatmul.mubr.msk.f32.gmra.mrb[74].mxu0 %vm1150_vm6, %v2204_v6  ;;  %18079 = vmatpush1.bf16.msk.msra.mxu1 %vm19446_vm2, %v18077_v54  ;;  %v20603_v33 = vld [vmem:[%s24742_s1 + $0x148] sm:$0xff]  ;;  %v2633_v54 = vrot.slane %v20499_v29, 1 }
 0x15a   :  { %v864_v38 = vadd.f32 %v19916_v25, %v444_v36  ;;  %16398 = vmatprep.mubr.msk.f32.mxu0 %vm1150_vm6, %v2206_v30 }
 0x15b   :  { %992 = vst [vmem:[%s24744_s6 + $0x300] sm:$0xff] %v863_v44  ;;  %v20611_v44 = vld [vmem:[%s24742_s1 + $0x150] sm:$0xff] }
 0x15c   :  { %993 = vst [vmem:[%s24744_s6 + $0x308] sm:$0xff] %v864_v38  ;;  %v448_v47 = vpop.f32.mrb[50].mxu0  ;;  %13849 = vmatmul.mubr.msk.f32.vlgmr.msra.gmra.mrb[0].mxu1 %vm122_vm3, %v19270_v4  ;;  %v19278_v4 = vld [vmem:[%s24741_s0 + $0x40] sm:$0xff] }
 0x15d   :  { %v867_v41 = vadd.f32 %v19912_v24, %v448_v47  ;;  %v450_v53 = vpop.f32.mrb[51].mxu0  ;;  %16399 = vmatmul.mubr.msk.f32.gmra.mrb[76].mxu0 %vm1150_vm6, %v2208_v7  ;;  %559 = vmatprep.mubr.f32.mxu1 %v24747_v3  ;;  %v20661_v47 = vld [vmem:[%s24742_s1 + $0x170] sm:$0xff] }
 0x15e   :  { %v868_v61 = vadd.f32 %v19916_v25, %v450_v53  ;;  %16401 = vmatprep.mubr.msk.f32.mxu0 %vm1150_vm6, %v2210_v15  ;;  %v2630_v15 = vrot.slane %v20470_v62, 1  ;;  %v19276_v53 = vld [vmem:[%s24741_s0 + $0x30] sm:$0xff] }
 0x15f   :  { %996 = vst [vmem:[%s24744_s6 + $0x320] sm:$0xff] %v867_v41  ;;  %v2631_v41 = vrot.slane %v20491_v59, 1 }
 0x160   :  { %997 = vst [vmem:[%s24744_s6 + $0x328] sm:$0xff] %v868_v61  ;;  %v454_v0 = vpop.f32.mrb[52].mxu0  ;;  %13850 = vmatmul.mubr.msk.f32.gmra.mrb[2].mxu1 %vm122_vm3, %v19271_v22  ;;  %v20677_v61 = vld [vmem:[%s24742_s1 + $0x178] sm:$0x7]  ;;  %v19279_v22 = vld [vmem:[%s24741_s0 + $0x48] sm:$0xff] }
 0x161   :  { %v871_v20 = vadd.f32 %v19912_v24, %v454_v0  ;;  %v456_v49 = vpop.f32.mrb[53].mxu0  ;;  %16402 = vmatmul.mubr.msk.f32.gmra.mrb[78].mxu0 %vm1150_vm6, %v2209_v55  ;;  %565 = vmatprep.mubr.f32.mxu1 %v24747_v3  ;;  %v19273_v55 = vld [vmem:[%s24741_s0 + $0x18] sm:$0xff]  ;;  %v2635_v0 = vrot.slane %v20520_v13, 1  ;;  %v20681_v57 = vsel %vm1118_vm5, %v2630_v15, %v2631_v41  ;;  %v19283_v15 = vld [vmem:[%s24741_s0 + $0x68] sm:$0xff] }
 0x162   :  { %v872_v50 = vadd.f32 %v19916_v25, %v456_v49  ;;  %16408 = vmatprep.mubr.msk.f32.mxu0 %vm1150_vm6, %v20470_v62  ;;  %v20694_v49 = vsel %vm1118_vm5, %v2631_v41, %v2633_v54 }
 0x163   :  { %1000 = vst [vmem:[%s24744_s6 + $0x340] sm:$0xff] %v871_v20  ;;  %v2637_v20 = vrot.slane %v20529_v14, 1 }
 0x164   :  { %1001 = vst [vmem:[%s24744_s6 + $0x348] sm:$0xff] %v872_v50  ;;  %v460_v1 = vpop.f32.mrb[54].mxu0  ;;  %13851 = vmatmul.mubr.msk.f32.gmra.mrb[4].mxu1 %vm122_vm3, %v19272_v58  ;;  %v2639_v50 = vrot.slane %v20549_v9, 1  ;;  %v19280_v58 = vld [vmem:[%s24741_s0 + $0x50] sm:$0xff] }
 0x165   :  { %v875_v5 = vadd.f32 %v19912_v24, %v460_v1  ;;  %v462_v8 = vpop.f32.mrb[55].mxu0  ;;  %16409 = vmatmul.mubr.msk.f32.vlgmr.msra.gmra.mrb[64].mxu0 %vm1150_vm6, %v20491_v59  ;;  %571 = vmatprep.mubr.f32.mxu1 %v24747_v3  ;;  %v20698_v1 = vsel %vm1118_vm5, %v2633_v54, %v2635_v0 }
 0x166   :  { %v876_v12 = vadd.f32 %v19916_v25, %v462_v8  ;;  %16411 = vmatprep.mubr.msk.f32.mxu0 %vm1150_vm6, %v20499_v29  ;;  %18111 = vmatpush3.bf16.msra.mxu0 %v20291_v2  ;;  %v20711_v8 = vsel %vm1118_vm5, %v2635_v0, %v2637_v20  ;;  %v2855_v0 = vrot.slane %v20491_v59, 2 }
 0x167   :  { %1004 = vst [vmem:[%s24744_s6 + $0x360] sm:$0xff] %v875_v5  ;;  %18113 = vmatprep.subr.bf16.mxu0 %v20501_v48  ;;  %v2641_v5 = vrot.slane %v20557_v23, 1 }
 0x168   :  { %1005 = vst [vmem:[%s24744_s6 + $0x368] sm:$0xff] %v876_v12  ;;  %v466_v21 = vpop.f32.mrb[56].mxu0  ;;  %13852 = vmatmul.mubr.msk.f32.gmra.mrb[6].mxu1 %vm122_vm3, %v19273_v55  ;;  %v2643_v12 = vrot.slane %v20576_v40, 1  ;;  %v19281_v55 = vld [vmem:[%s24741_s0 + $0x58] sm:$0xff] }
 0x169   :  { %v879_v34 = vadd.f32 %v19912_v24, %v466_v21  ;;  %v468_v27 = vpop.f32.mrb[57].mxu0  ;;  %16412 = vmatmul.mubr.msk.f32.gmra.mrb[66].mxu0 %vm1150_vm6, %v20520_v13  ;;  %577 = vmatprep.mubr.f32.mxu1 %v24747_v3  ;;  %v20716_v21 = vsel %vm1118_vm5, %v2637_v20, %v2639_v50  ;;  %v2857_v20 = vrot.slane %v20499_v29, 2 }
 0x16a   :  { %v880_v28 = vadd.f32 %v19916_v25, %v468_v27  ;;  %16414 = vmatprep.mubr.msk.f32.mxu0 %vm1150_vm6, %v20529_v14  ;;  %v20729_v27 = vsel %vm1118_vm5, %v2639_v50, %v2641_v5  ;;  %v2859_v50 = vrot.slane %v20520_v13, 2 }
 0x16b   :  { %1008 = vst [vmem:[%s24744_s6 + $0x380] sm:$0xff] %v879_v34  ;;  %v2645_v34 = vrot.slane %v20584_v26, 1 }
 0x16c   :  { %1009 = vst [vmem:[%s24744_s6 + $0x388] sm:$0xff] %v880_v28  ;;  %v472_v10 = vpop.f32.mrb[58].mxu0  ;;  %13853 = vmatmul.mubr.msk.f32.gmra.mrb[8].mxu1 %vm122_vm3, %v19274_v37  ;;  %v2647_v28 = vrot.slane %v20603_v33, 1  ;;  %v19282_v37 = vld [vmem:[%s24741_s0 + $0x60] sm:$0xff] }
 0x16d   :  { %v883_v18 = vadd.f32 %v19912_v24, %v472_v10  ;;  %v474_v19 = vpop.f32.mrb[59].mxu0  ;;  %16415 = vmatmul.mubr.msk.f32.gmra.mrb[68].mxu0 %vm1150_vm6, %v20549_v9  ;;  %583 = vmatprep.mubr.f32.mxu1 %v24747_v3  ;;  %v20733_v10 = vsel %vm1118_vm5, %v2641_v5, %v2643_v12  ;;  %v19285_v5 = vld [vmem:[%s24741_s0 + $0x78] sm:$0xff] }
 0x16e   :  { %v884_v6 = vadd.f32 %v19916_v25, %v474_v19  ;;  %16417 = vmatprep.mubr.msk.f32.mxu0 %vm1150_vm6, %v20557_v23  ;;  %v20746_v19 = vsel %vm1118_vm5, %v2643_v12, %v2645_v34  ;;  %v2861_v12 = vrot.slane %v20529_v14, 2 }
 0x16f   :  { %1012 = vst [vmem:[%s24744_s6 + $0x3a0] sm:$0xff] %v883_v18  ;;  %v2649_v18 = vrot.slane %v20611_v44, 1 }
 0x170   :  { %1013 = vst [vmem:[%s24744_s6 + $0x3a8] sm:$0xff] %v884_v6  ;;  %v478_v31 = vpop.f32.mrb[60].mxu0  ;;  %v2651_v6 = vrot.slane %v20630_v45, 1 }
 0x171   :  { %v887_v30 = vadd.f32 %v19912_v24, %v478_v31  ;;  %v480_v32 = vpop.f32.mrb[61].mxu0  ;;  %16418 = vmatmul.mubr.msk.f32.gmra.mrb[70].mxu0 %vm1150_vm6, %v20576_v40  ;;  %v20750_v31 = vsel %vm1118_vm5, %v2645_v34, %v2647_v28  ;;  %v2863_v34 = vrot.slane %v20549_v9, 2 }
 0x172   :  { %v888_v56 = vadd.f32 %v19916_v25, %v480_v32  ;;  %16420 = vmatprep.mubr.msk.f32.mxu0 %vm1150_vm6, %v20584_v26  ;;  %v20763_v32 = vsel %vm1118_vm5, %v2647_v28, %v2649_v18  ;;  %v20832_v28 = vsel %vm1505_vm4, %v2857_v20, %v2859_v50 }
 0x173   :  { %1016 = vst [vmem:[%s24744_s6 + $0x3c0] sm:$0xff] %v887_v30 }
 0x174   :  { %1017 = vst [vmem:[%s24744_s6 + $0x3c8] sm:$0xff] %v888_v56  ;;  %v484_v36 = vpop.f32.mrb[62].mxu0  ;;  %v2655_v56 = vrot.slane %v20655_v46, 1 }
 0x175   :  { %v891_v38 = vadd.f32 %v19912_v24, %v484_v36  ;;  %v486_v7 = vpop.f32.mrb[63].mxu0  ;;  %16421 = vmatmul.mubr.msk.f32.gmra.mrb[72].mxu0 %vm1150_vm6, %v20603_v33  ;;  %v20638_v24 = vld [vmem:[%s24742_s1 + $0x160] sm:$0xff]  ;;  %v20767_v36 = vsel %vm1118_vm5, %v2649_v18, %v2651_v6  ;;  %v2865_v18 = vrot.slane %v20557_v23, 2 }
 0x176   :  { %v892_v39 = vadd.f32 %v19916_v25, %v486_v7  ;;  %16423 = vmatprep.mubr.msk.f32.mxu0 %vm1150_vm6, %v20611_v44  ;;  %v19275_v25 = vld [vmem:[%s24741_s0 + $0x28] sm:$0xff]  ;;  %v2653_v30 = vrot.slane %v20638_v24, 1 }
 0x177   :  { %1020 = vst [vmem:[%s24744_s6 + $0x3e0] sm:$0xff] %v891_v38  ;;  %13854 = vmatmul.mubr.msk.f32.gmra.mrb[10].mxu1 %vm122_vm3, %v19275_v25  ;;  %v20777_v38 = vrot.slane %v20661_v47, 1 }
 0x178   :  { %1021 = vst [vmem:[%s24744_s6 + $0x3e8] sm:$0xff] %v892_v39  ;;  %589 = vmatprep.mubr.f32.mxu1 %v24747_v3  ;;  %v20782_v7 = vsel %vm1118_vm5, %v2651_v6, %v2653_v30  ;;  %v2659_v39 = vrot.slane %v20677_v61, 1  ;;  %v20786_v25 = vsel %vm1118_vm5, %v2653_v30, %v2655_v56  ;;  %v20845_v6 = vsel %vm1505_vm4, %v2859_v50, %v2861_v12 }
 0x179   :  { %16424 = vmatmul.mubr.msk.f32.gmra.mrb[74].mxu0 %vm1150_vm6, %v20630_v45  ;;  %v20799_v41 = vsel %vm1118_vm5, %v2655_v56, %v20777_v38  ;;  %v20849_v30 = vsel %vm1505_vm4, %v2861_v12, %v2863_v34  ;;  %v19287_v56 = vld [vmem:[%s24741_s0 + $0x88] sm:$0xff]  ;;  %v2877_v12 = vrot.slane %v20638_v24, 2 }
 0x17a   :  { %16426 = vmatprep.mubr.msk.f32.mxu0 %vm1150_vm6, %v20638_v24  ;;  %v2660_v54 = vsel %vm1118_vm5, %v20777_v38, %v2659_v39 }
 0x17b   :  { %13855 = vmatmul.mubr.msk.f32.gmra.mrb[12].mxu1 %vm122_vm3, %v19276_v53  ;;  %v2854_v53 = vrot.slane %v20470_v62, 2 }
 0x17c   :  { %595 = vmatprep.mubr.f32.mxu1 %v24747_v3 }
 0x17d   :  { %16427 = vmatmul.mubr.msk.f32.gmra.mrb[76].mxu0 %vm1150_vm6, %v20655_v46 }
 0x17e   :  { %16429 = vmatprep.mubr.msk.f32.mxu0 %vm1150_vm6, %v20661_v47 }
 0x17f   :  { %13856 = vmatmul.mubr.msk.f32.gmra.mrb[14].mxu1 %vm122_vm3, %v19277_v43  ;;  %v19284_v43 = vld [vmem:[%s24741_s0 + $0x70] sm:$0xff] }
 0x180   :  { %601 = vmatprep.mubr.f32.mxu1 %v24747_v3 }
 0x181   :  { %16430 = vmatmul.mubr.msk.f32.gmra.mrb[78].mxu0 %vm1150_vm6, %v20677_v61 }
 0x182   :  { %16436 = vmatprep.mubr.msk.f32.mxu0 %vm1150_vm6, %v20681_v57 }
 0x183   :  { %13857 = vmatmul.mubr.msk.f32.gmra.mrb[16].mxu1 %vm122_vm3, %v19278_v4  ;;  %v20816_v4 = vsel %vm1505_vm4, %v2854_v53, %v2855_v0 }
 0x184   :  { %607 = vmatprep.mubr.f32.mxu1 %v24747_v3 }
 0x185   :  { %16437 = vmatmul.mubr.msk.f32.vlgmr.msra.gmra.mrb[64].mxu0 %vm1150_vm6, %v20694_v49 }
 0x186   :  { %16439 = vmatprep.mubr.msk.f32.mxu0 %vm1150_vm6, %v20698_v1  ;;  %18115 = vmatpush3.bf16.msra.mxu0 %v20501_v48 }
 0x187   :  { %13858 = vmatmul.mubr.msk.f32.gmra.mrb[18].mxu1 %vm122_vm3, %v19279_v22  ;;  %v20828_v22 = vsel %vm1505_vm4, %v2855_v0, %v2857_v20  ;;  %v2873_v0 = vrot.slane %v20611_v44, 2  ;;  %v2875_v20 = vrot.slane %v20630_v45, 2 }
 0x188   :  { %613 = vmatprep.mubr.f32.mxu1 %v24747_v3 }
 0x189   :  { %16440 = vmatmul.mubr.msk.f32.gmra.mrb[66].mxu0 %vm1150_vm6, %v20711_v8 }
 0x18a   :  { %16442 = vmatprep.mubr.msk.f32.mxu0 %vm1150_vm6, %v20716_v21 }
 0x18b   :  { %13859 = vmatmul.mubr.msk.f32.gmra.mrb[20].mxu1 %vm122_vm3, %v19280_v58  ;;  %v19286_v58 = vld [vmem:[%s24741_s0 + $0x80] sm:$0xff] }
 0x18c   :  { %619 = vmatprep.mubr.f32.mxu1 %v24747_v3 }
 0x18d   :  { %16443 = vmatmul.mubr.msk.f32.gmra.mrb[68].mxu0 %vm1150_vm6, %v20729_v27 }
 0x18e   :  { %16445 = vmatprep.mubr.msk.f32.mxu0 %vm1150_vm6, %v20733_v10 }
 0x18f   :  { %13860 = vmatmul.mubr.msk.f32.gmra.mrb[22].mxu1 %vm122_vm3, %v19281_v55  ;;  %v2867_v55 = vrot.slane %v20576_v40, 2 }
 0x190   :  { %625 = vmatprep.mubr.f32.mxu1 %v24747_v3 }
 0x191   :  { %16446 = vmatmul.mubr.msk.f32.gmra.mrb[70].mxu0 %vm1150_vm6, %v20746_v19  ;;  %v20866_v53 = vsel %vm1505_vm4, %v2865_v18, %v2867_v55 }
 0x192   :  { %16448 = vmatprep.mubr.msk.f32.mxu0 %vm1150_vm6, %v20750_v31 }
 0x193   :  { %13861 = vmatmul.mubr.msk.f32.gmra.mrb[24].mxu1 %vm122_vm3, %v19282_v37  ;;  %v2869_v37 = vrot.slane %v20584_v26, 2 }
 0x194   :  { %631 = vmatprep.mubr.f32.mxu1 %v24747_v3 }
 0x195   :  { %16449 = vmatmul.mubr.msk.f32.gmra.mrb[72].mxu0 %vm1150_vm6, %v20763_v32 }
 0x196   :  { %16451 = vmatprep.mubr.msk.f32.mxu0 %vm1150_vm6, %v20767_v36 }
 0x197   :  { %13862 = vmatmul.mubr.msk.f32.gmra.mrb[26].mxu1 %vm122_vm3, %v19283_v15  ;;  %v2871_v15 = vrot.slane %v20603_v33, 2 }
 0x198   :  { %637 = vmatprep.mubr.f32.mxu1 %v24747_v3 }
 0x199   :  { %16452 = vmatmul.mubr.msk.f32.gmra.mrb[74].mxu0 %vm1150_vm6, %v20782_v7  ;;  %v20883_v50 = vsel %vm1505_vm4, %v2869_v37, %v2871_v15 }
 0x19a   :  { %16454 = vmatprep.mubr.msk.f32.mxu0 %vm1150_vm6, %v20786_v25 }
 0x19b   :  { %13863 = vmatmul.mubr.msk.f32.gmra.mrb[28].mxu1 %vm122_vm3, %v19284_v43  ;;  %v20879_v43 = vsel %vm1505_vm4, %v2867_v55, %v2869_v37  ;;  %v19290_v55 = vld [vmem:[%s24741_s0 + $0xa0] sm:$0xff]  ;;  %v20915_v37 = vsel %vm1505_vm4, %v2875_v20, %v2877_v12 }
 0x19c   :  { %643 = vmatprep.mubr.f32.mxu1 %v24747_v3  ;;  %24816 = vst [vmem:[#allocation8_spill] sm:$0xff] %v20915_v37 }
 0x19d   :  { %16455 = vmatmul.mubr.msk.f32.gmra.mrb[76].mxu0 %vm1150_vm6, %v20799_v41 }
 0x19e   :  { %16457 = vmatprep.mubr.msk.f32.mxu0 %vm1150_vm6, %v2660_v54  ;;  %v19288_v54 = vld [vmem:[%s24741_s0 + $0x90] sm:$0xff] }
 0x19f   :  { %13864 = vmatmul.mubr.msk.f32.gmra.mrb[30].mxu1 %vm122_vm3, %v19285_v5  ;;  %v19289_v5 = vld [vmem:[%s24741_s0 + $0x98] sm:$0xff] }
 0x1a0   :  { %649 = vmatprep.mubr.f32.mxu1 %v24747_v3 }
 0x1a1   :  { %16458 = vmatmul.mubr.msk.f32.gmra.mrb[78].mxu0 %vm1150_vm6, %v2659_v39  ;;  %v20862_v39 = vsel %vm1505_vm4, %v2863_v34, %v2865_v18  ;;  %v20896_v34 = vsel %vm1505_vm4, %v2871_v15, %v2873_v0  ;;  %v20900_v18 = vsel %vm1505_vm4, %v2873_v0, %v2875_v20  ;;  %v2883_v15 = vrot.slane %v20677_v61, 2  ;;  %v19291_v0 = vld [vmem:[%s24741_s0 + $0xa8] sm:$0xff] }
 0x1a2   :  { %16464 = vmatprep.mubr.msk.f32.mxu0 %vm1150_vm6, %v20816_v4  ;;  %24814 = vst [vmem:[#allocation6_spill] sm:$0xff] %v20900_v18 }
 0x1a3   :  { %13865 = vmatmul.mubr.msk.f32.gmra.mrb[32].mxu1 %vm122_vm3, %v19286_v58  ;;  %v2879_v58 = vrot.slane %v20655_v46, 2 }
 0x1a4   :  { %655 = vmatprep.mubr.f32.mxu1 %v24747_v3 }
 0x1a5   :  { %16465 = vmatmul.mubr.msk.f32.vlgmr.msra.gmra.mrb[64].mxu0 %vm1150_vm6, %v20828_v22 }
 0x1a6   :  { %16467 = vmatprep.mubr.msk.f32.mxu0 %vm1150_vm6, %v20832_v28 }
 0x1a7   :  { %13866 = vmatmul.mubr.msk.f32.gmra.mrb[34].mxu1 %vm122_vm3, %v19287_v56  ;;  %v20910_v56 = vrot.slane %v20661_v47, 2 }
 0x1a8   :  { %661 = vmatprep.mubr.f32.mxu1 %v24747_v3 }
 0x1a9   :  { %16468 = vmatmul.mubr.msk.f32.gmra.mrb[66].mxu0 %vm1150_vm6, %v20845_v6  ;;  %24815 = vst [vmem:[#allocation7_spill] sm:$0xff] %v20910_v56  ;;  %v20932_v61 = vsel %vm1505_vm4, %v2879_v58, %v20910_v56  ;;  %v2884_v20 = vsel %vm1505_vm4, %v20910_v56, %v2883_v15 }
 0x1aa   :  { %16470 = vmatprep.mubr.msk.f32.mxu0 %vm1150_vm6, %v20849_v30  ;;  %24818 = vst [vmem:[#allocation10_spill] sm:$0xff] %v20932_v61 }
 0x1ab   :  { %13867 = vmatmul.mubr.msk.f32.gmra.mrb[36].mxu1 %vm122_vm3, %v19288_v54  ;;  %v20919_v54 = vsel %vm1505_vm4, %v2877_v12, %v2879_v58  ;;  %v19293_v12 = vld [vmem:[%s24741_s0 + $0xb8] sm:$0xff]  ;;  %v19294_v58 = vld [vmem:[%s24741_s0 + $0xc0] sm:$0xff] }
 0x1ac   :  { %667 = vmatprep.mubr.f32.mxu1 %v24747_v3  ;;  %24817 = vst [vmem:[#allocation9_spill] sm:$0xff] %v20919_v54 }
 0x1ad   :  { %16471 = vmatmul.mubr.msk.f32.gmra.mrb[68].mxu0 %vm1150_vm6, %v20862_v39 }
 0x1ae   :  { %16473 = vmatprep.mubr.msk.f32.mxu0 %vm1150_vm6, %v20866_v53 }
 0x1af   :  { %13868 = vmatmul.mubr.msk.f32.gmra.mrb[38].mxu1 %vm122_vm3, %v19289_v5  ;;  %v19292_v5 = vld [vmem:[%s24741_s0 + $0xb0] sm:$0xff] }
 0x1b0   :  { %673 = vmatprep.mubr.f32.mxu1 %v24747_v3 }
 0x1b1   :  { %16474 = vmatmul.mubr.msk.f32.gmra.mrb[70].mxu0 %vm1150_vm6, %v20879_v43 }
 0x1b2   :  { %16476 = vmatprep.mubr.msk.f32.mxu0 %vm1150_vm6, %v20883_v50 }
 0x1b3   :  { %13869 = vmatmul.mubr.msk.f32.gmra.mrb[40].mxu1 %vm122_vm3, %v19290_v55  ;;  %v19295_v55 = vld [vmem:[%s24741_s0 + $0xc8] sm:$0xff] }
 0x1b4   :  { %679 = vmatprep.mubr.f32.mxu1 %v24747_v3 }
 0x1b5   :  { %16477 = vmatmul.mubr.msk.f32.gmra.mrb[72].mxu0 %vm1150_vm6, %v20896_v34 }
 0x1b6   :  { %16479 = vmatprep.mubr.msk.f32.mxu0 %vm1150_vm6, %v20900_v18 }
 0x1b7   :  { %13870 = vmatmul.mubr.msk.f32.gmra.mrb[42].mxu1 %vm122_vm3, %v19291_v0  ;;  %v19297_v0 = vld [vmem:[%s24741_s0 + $0xd8] sm:$0xff] }
 0x1b8   :  { %685 = vmatprep.mubr.f32.mxu1 %v24747_v3 }
 0x1b9   :  { %16480 = vmatmul.mubr.msk.f32.gmra.mrb[74].mxu0 %vm1150_vm6, %v20915_v37 }
 0x1ba   :  { %16482 = vmatprep.mubr.msk.f32.mxu0 %vm1150_vm6, %v20919_v54  ;;  %v1047_v54 = vadd.s32 24, %v19897_v16 }
 0x1bb   :  { %13871 = vmatmul.mubr.msk.f32.gmra.mrb[44].mxu1 %vm122_vm3, %v19292_v5  ;;  %v19299_v5 = vld [vmem:[%s24741_s0 + $0xe8] sm:$0xff] }
 0x1bc   :  { %691 = vmatprep.mubr.f32.mxu1 %v24747_v3 }
 0x1bd   :  { %16483 = vmatmul.mubr.msk.f32.gmra.mrb[76].mxu0 %vm1150_vm6, %v20932_v61 }
 0x1be   :  { %16485 = vmatprep.mubr.msk.f32.mxu0 %vm1150_vm6, %v2884_v20  ;;  %v19298_v20 = vld [vmem:[%s24741_s0 + $0xe0] sm:$0xff] }
 0x1bf   :  { %13872 = vmatmul.mubr.msk.f32.gmra.mrb[46].mxu1 %vm122_vm3, %v19293_v12  ;;  %v19300_v12 = vld [vmem:[%s24741_s0 + $0xf0] sm:$0xff] }
 0x1c0   :  { %697 = vmatprep.mubr.f32.mxu1 %v24747_v3 }
 0x1c1   :  { %16486 = vmatmul.mubr.msk.f32.gmra.mrb[78].mxu0 %vm1150_vm6, %v2883_v15  ;;  %v19296_v15 = vld [vmem:[%s24741_s0 + $0xd0] sm:$0xff] }
 0x1c3   :  { %13873 = vmatmul.mubr.msk.f32.gmra.mrb[48].mxu1 %vm122_vm3, %v19294_v58  ;;  %v19301_v58 = vld [vmem:[%s24741_s0 + $0xf8] sm:$0xff] }
 0x1c4   :  { %703 = vmatprep.mubr.f32.mxu1 %v24747_v3 }
 0x1c7   :  { %13874 = vmatmul.mubr.msk.f32.gmra.mrb[50].mxu1 %vm122_vm3, %v19295_v55  ;;  %v20990_v55 = vand.u32 127, %v747_v17 }
 0x1c8   :  { %709 = vmatprep.mubr.f32.mxu1 %v24747_v3 }
 0x1cb   :  { %13875 = vmatmul.mubr.msk.f32.gmra.mrb[52].mxu1 %vm122_vm3, %v19296_v15  ;;  %v1054_v15 = vmul.u32 2, %v19897_v16 }
 0x1cc   :  { %715 = vmatprep.mubr.f32.mxu1 %v24747_v3 }
 0x1cd   :  { %vm1062_vm7 = vcmp.eq.s32.totalorder %v20990_v55, %v1054_v15 }
 0x1cf   :  { %13876 = vmatmul.mubr.msk.f32.gmra.mrb[54].mxu1 %vm122_vm3, %v19297_v0  ;;  %v20995_v0 = vsel %vm1062_vm7, 1.0, %v24747_v3 }
 0x1d0   :  { %721 = vmatprep.mubr.f32.mxu1 %v24747_v3  ;;  %24819 = vst [vmem:[#allocation11_spill] sm:$0xff] %v20995_v0  ;;  %16816 = vmatprep.mubr.msk.f32.mxu0 %vm3078_vm8, %v20995_v0 }
 0x1d3   :  { %13877 = vmatmul.mubr.msk.f32.gmra.mrb[56].mxu1 %vm122_vm3, %v19298_v20  ;;  %v757_v20 = vsub.s32 2, %v19897_v16 }
 0x1d4   :  { %727 = vmatprep.mubr.f32.mxu1 %v24747_v3 }
 0x1d7   :  { %13878 = vmatmul.mubr.msk.f32.gmra.mrb[58].mxu1 %vm122_vm3, %v19299_v5  ;;  %v761_v5 = vsub.s32 3, %v19897_v16 }
 0x1d8   :  { %733 = vmatprep.mubr.f32.mxu1 %v24747_v3 }
 0x1db   :  { %13879 = vmatmul.mubr.msk.f32.gmra.mrb[60].mxu1 %vm122_vm3, %v19300_v12  ;;  %v19302_v12 = vld [vmem:[%s24743_s3] sm:$0xf] }
 0x1dc   :  { %739 = vmatprep.mubr.f32.mxu1 %v24747_v3  ;;  %v21008_v15 = vrot.slane %v19302_v12, %v761_v5 }
 0x1df   :  { %13880 = vmatmul.mubr.msk.f32.gmra.mrb[62].mxu1 %vm122_vm3, %v19301_v58  ;;  %v21006_v58 = vrot.slane %v19302_v12, %v757_v20 }
 0x1e0   :  { %16520 = vmatprep.mubr.msk.f32.mxu1 %vm3078_vm8, %v20995_v0 }
 0x22f   :  { %v555_v17 = vpop.f32.mrb[0].mxu1 }
 0x230   :  { %v557_v3 = vpop.f32.mrb[1].mxu1  ;;  %v769_v48 = vadd.f32 %v21006_v58, %v555_v17 }
 0x231   :  { %v770_v2 = vadd.f32 %v21008_v15, %v557_v3 }
 0x232   :  { %897 = vst [vmem:[%s24744_s6 + $0x10] sm:$0xff] %v769_v48 }
 0x233   :  { %899 = vst.msk [vmem:[%s24744_s6 + $0x18] sm:$0xff] %vm898_vm9, %v770_v2  ;;  %v561_v0 = vpop.f32.mrb[2].mxu1 }
 0x234   :  { %v563_v20 = vpop.f32.mrb[3].mxu1  ;;  %v773_v5 = vadd.f32 %v21006_v58, %v561_v0 }
 0x235   :  { %v774_v12 = vadd.f32 %v21008_v15, %v563_v20 }
 0x236   :  { %902 = vst [vmem:[%s24744_s6 + $0x30] sm:$0xff] %v773_v5 }
 0x237   :  { %903 = vst.msk [vmem:[%s24744_s6 + $0x38] sm:$0xff] %vm898_vm9, %v774_v12  ;;  %v567_v3 = vpop.f32.mrb[4].mxu1 }
 0x238   :  { %v569_v48 = vpop.f32.mrb[5].mxu1  ;;  %v777_v2 = vadd.f32 %v21006_v58, %v567_v3 }
 0x239   :  { %v778_v51 = vadd.f32 %v21008_v15, %v569_v48 }
 0x23a   :  { %906 = vst [vmem:[%s24744_s6 + $0x50] sm:$0xff] %v777_v2 }
 0x23b   :  { %907 = vst.msk [vmem:[%s24744_s6 + $0x58] sm:$0xff] %vm898_vm9, %v778_v51  ;;  %v573_v20 = vpop.f32.mrb[6].mxu1 }
 0x23c   :  { %v575_v5 = vpop.f32.mrb[7].mxu1  ;;  %v781_v61 = vadd.f32 %v21006_v58, %v573_v20 }
 0x23d   :  { %v782_v3 = vadd.f32 %v21008_v15, %v575_v5 }
 0x23e   :  { %910 = vst [vmem:[%s24744_s6 + $0x70] sm:$0xff] %v781_v61 }
 0x23f   :  { %911 = vst.msk [vmem:[%s24744_s6 + $0x78] sm:$0xff] %vm898_vm9, %v782_v3  ;;  %v579_v51 = vpop.f32.mrb[8].mxu1 }
 0x240   :  { %v785_v20 = vadd.f32 %v21006_v58, %v579_v51 }
 0x242   :  { %914 = vst [vmem:[%s24744_s6 + $0x90] sm:$0xff] %v785_v20 }
 0x278   :  { %v16466_v17 = vpop.f32.mrb[64].mxu0 }
 0x279   :  { %v2983_v60 = vpop.f32.mrb[65].mxu0 }
 0x27a   :  { %v18116_v0 = vpack.c.bf16 %v16466_v17, %v2983_v60  ;;  %v581_v17 = vpop.f32.mrb[9].mxu1 }
 0x27b   :  { %v786_v5 = vadd.f32 %v21008_v15, %v581_v17  ;;  %v585_v61 = vpop.f32.mrb[10].mxu1 }
 0x27c   :  { %v16469_v12 = vpop.f32.mrb[66].mxu0  ;;  %18117 = vmatprep.subr.bf16.mxu1 %v18116_v0 }
 0x27d   :  { %v2993_v48 = vpop.f32.mrb[67].mxu0  ;;  %18119 = vmatpush3.bf16.msra.mxu1 %v18116_v0  ;;  %915 = vst.msk [vmem:[%s24744_s6 + $0x98] sm:$0xff] %vm898_vm9, %v786_v5 }
 0x27e   :  { %v18120_v60 = vpack.c.bf16 %v16469_v12, %v2993_v48  ;;  %v587_v12 = vpop.f32.mrb[11].mxu1  ;;  %v789_v48 = vadd.f32 %v21006_v58, %v585_v61 }
 0x27f   :  { %v790_v51 = vadd.f32 %v21008_v15, %v587_v12 }
 0x280   :  { %v16472_v2 = vpop.f32.mrb[68].mxu0  ;;  %18121 = vmatprep.subr.bf16.mxu1 %v18120_v60  ;;  %918 = vst [vmem:[%s24744_s6 + $0xb0] sm:$0xff] %v789_v48 }
 0x281   :  { %v3003_v56 = vpop.f32.mrb[69].mxu0  ;;  %18123 = vmatpush3.bf16.msra.mxu1 %v18120_v60  ;;  %919 = vst.msk [vmem:[%s24744_s6 + $0xb8] sm:$0xff] %vm898_vm9, %v790_v51  ;;  %v591_v60 = vpop.f32.mrb[12].mxu1 }
 0x282   :  { %v18124_v0 = vpack.c.bf16 %v16472_v2, %v3003_v56  ;;  %v593_v2 = vpop.f32.mrb[13].mxu1  ;;  %v793_v5 = vadd.f32 %v21006_v58, %v591_v60 }
 0x283   :  { %v794_v61 = vadd.f32 %v21008_v15, %v593_v2 }
 0x284   :  { %v16475_v3 = vpop.f32.mrb[70].mxu0  ;;  %18125 = vmatprep.subr.bf16.mxu1 %v18124_v0  ;;  %922 = vst [vmem:[%s24744_s6 + $0xd0] sm:$0xff] %v793_v5 }
 0x285   :  { %v3013_v17 = vpop.f32.mrb[71].mxu0  ;;  %18127 = vmatpush3.bf16.msra.mxu1 %v18124_v0  ;;  %923 = vst.msk [vmem:[%s24744_s6 + $0xd8] sm:$0xff] %vm898_vm9, %v794_v61  ;;  %v1046_v61 = vadd.s32 16, %v19897_v16 }
 0x286   :  { %v18128_v56 = vpack.c.bf16 %v16475_v3, %v3013_v17  ;;  %v597_v3 = vpop.f32.mrb[14].mxu1 }
 0x287   :  { %v599_v48 = vpop.f32.mrb[15].mxu1  ;;  %v797_v17 = vadd.f32 %v21006_v58, %v597_v3 }
 0x288   :  { %v16478_v20 = vpop.f32.mrb[72].mxu0  ;;  %18129 = vmatprep.subr.bf16.mxu1 %v18128_v56  ;;  %v798_v60 = vadd.f32 %v21008_v15, %v599_v48  ;;  %v603_v5 = vpop.f32.mrb[16].mxu1 }
 0x289   :  { %v3023_v12 = vpop.f32.mrb[73].mxu0  ;;  %18131 = vmatpush3.bf16.msra.mxu1 %v18128_v56  ;;  %926 = vst [vmem:[%s24744_s6 + $0xf0] sm:$0xff] %v797_v17 }
 0x28a   :  { %v18132_v0 = vpack.c.bf16 %v16478_v20, %v3023_v12  ;;  %v1045_v20 = vadd.s32 8, %v19897_v16  ;;  %927 = vst.msk [vmem:[%s24744_s6 + $0xf8] sm:$0xff] %vm898_vm9, %v798_v60  ;;  %v605_v12 = vpop.f32.mrb[17].mxu1 }
 0x28b   :  { %v802_v48 = vadd.f32 %v21008_v15, %v605_v12  ;;  %v609_v60 = vpop.f32.mrb[18].mxu1  ;;  %v1048_v12 = vadd.s32 32, %v19897_v16 }
 0x28c   :  { %v16481_v51 = vpop.f32.mrb[74].mxu0  ;;  %18133 = vmatprep.subr.bf16.mxu1 %v18132_v0  ;;  %v1055_v17 = vmul.u32 2, %v1045_v20  ;;  %v611_v37 = vpop.f32.mrb[19].mxu1  ;;  %v805_v20 = vadd.f32 %v21006_v58, %v609_v60 }
 0x28d   :  { %v3033_v2 = vpop.f32.mrb[75].mxu0  ;;  %18135 = vmatpush3.bf16.msra.mxu1 %v18132_v0  ;;  %v801_v0 = vadd.f32 %v21006_v58, %v603_v5  ;;  %931 = vst.msk [vmem:[%s24744_s6 + $0x118] sm:$0xff] %vm898_vm9, %v802_v48  ;;  %v1056_v5 = vmul.u32 2, %v1046_v61  ;;  %v1057_v61 = vmul.u32 2, %v1047_v54  ;;  %v1049_v48 = vadd.s32 40, %v19897_v16 }
 0x28e   :  { %v18136_v56 = vpack.c.bf16 %v16481_v51, %v3033_v2  ;;  %vm1063_vm12 = vcmp.eq.s32.totalorder %v20990_v55, %v1055_v17  ;;  %934 = vst [vmem:[%s24744_s6 + $0x130] sm:$0xff] %v805_v20  ;;  %v1058_v60 = vmul.u32 2, %v1048_v12  ;;  %v24822_v20 = vmov 0.0  }
 0x28f   :  { %930 = vst [vmem:[%s24744_s6 + $0x110] sm:$0xff] %v801_v0  ;;  %vm1064_vm13 = vcmp.eq.s32.totalorder %v20990_v55, %v1056_v5  ;;  %vm1065_vm14 = vcmp.eq.s32.totalorder %v20990_v55, %v1057_v61  ;;  %v1059_v5 = vmul.u32 2, %v1049_v48  ;;  %v1051_v12 = vadd.s32 56, %v19897_v16 }
 0x290   :  { %v16484_v3 = vpop.f32.mrb[76].mxu0  ;;  %18137 = vmatprep.subr.bf16.mxu1 %v18136_v56  ;;  %vm1066_vm15 = vcmp.eq.s32.totalorder %v20990_v55, %v1058_v60  ;;  %v21143_v48 = vsel %vm1065_vm14, 1.0, %v24822_v20 }
 0x291   :  { %v3043_v51 = vpop.f32.mrb[77].mxu0  ;;  %18139 = vmatpush3.bf16.msra.mxu1 %v18136_v56  ;;  %vm1067_vm0 = vcmp.eq.s32.totalorder %v20990_v55, %v1059_v5  ;;  %v1061_v60 = vmul.u32 2, %v1051_v12 }
 0x292   :  { %v18140_v2 = vpack.c.bf16 %v16484_v3, %v3043_v51  ;;  %v806_v3 = vadd.f32 %v21008_v15, %v611_v37  ;;  %v615_v37 = vpop.f32.mrb[20].mxu1 }
 0x293   :  { %v809_v54 = vadd.f32 %v21006_v58, %v615_v37  ;;  %vm1069_vm2 = vcmp.eq.s32.totalorder %v20990_v55, %v1061_v60 }
 0x294   :  { %v16487_v56 = vpop.f32.mrb[78].mxu0  ;;  %18141 = vmatprep.subr.bf16.mxu1 %v18140_v2  ;;  %935 = vst.msk [vmem:[%s24744_s6 + $0x138] sm:$0xff] %vm898_vm9, %v806_v3  ;;  %v21123_v3 = vsel %vm1064_vm13, 1.0, %v24822_v20 }
 0x295   :  { %v3053_v0 = vpop.f32.mrb[79].mxu0  ;;  %18143 = vmatpush3.bf16.msra.mxu1 %v18140_v2  ;;  %v1050_v2 = vadd.s32 48, %v19897_v16  ;;  %938 = vst [vmem:[%s24744_s6 + $0x150] sm:$0xff] %v809_v54  ;;  %v21147_v54 = vsel %vm1066_vm15, 1.0, %v24822_v20 }
 0x296   :  { %v18144_v18 = vpack.c.bf16 %v16487_v56, %v3053_v0  ;;  %v617_v56 = vpop.f32.mrb[21].mxu1  ;;  %v21120_v0 = vsel %vm1063_vm12, 1.0, %v24822_v20 }
 0x297   :  { %v810_v17 = vadd.f32 %v21008_v15, %v617_v56  ;;  %v1060_v37 = vmul.u32 2, %v1050_v2 }
 0x298   :  { %18146 = vmatprep.subr.msk.bf16.mxu1 %vm21098_vm11, %v18144_v18 }
 0x299   :  { %18149 = vmatpush3.bf16.msk.msra.mxu1 %vm21098_vm11, %v18144_v18  ;;  %939 = vst.msk [vmem:[%s24744_s6 + $0x158] sm:$0xff] %vm898_vm9, %v810_v17  ;;  %v621_v18 = vpop.f32.mrb[22].mxu1  ;;  %vm1068_vm1 = vcmp.eq.s32.totalorder %v20990_v55, %v1060_v37  ;;  %v21186_v55 = vsel %vm1069_vm2, 1.0, %v24822_v20 }
 0x29a   :  { %18151 = vmatprep.subr.bf16.mxu1 %v19458_v52  ;;  %v623_v56 = vpop.f32.mrb[23].mxu1  ;;  %v813_v16 = vadd.f32 %v21006_v58, %v621_v18  ;;  %v21166_v18 = vsel %vm1067_vm0, 1.0, %v24822_v20 }
 0x29b   :  { %v814_v61 = vadd.f32 %v21008_v15, %v623_v56  ;;  %v627_v2 = vpop.f32.mrb[24].mxu1  ;;  %v21169_v56 = vsel %vm1068_vm1, 1.0, %v24822_v20 }
 0x29c   :  { %16521 = vmatmul.mubr.msk.f32.vlgmr.msra.gmra.mrb[64].mxu1 %vm3078_vm8, %v21120_v0  ;;  %942 = vst [vmem:[%s24744_s6 + $0x170] sm:$0xff] %v813_v16  ;;  %v629_v17 = vpop.f32.mrb[25].mxu1  ;;  %v817_v5 = vadd.f32 %v21006_v58, %v627_v2 }
 0x29d   :  { %16523 = vmatprep.mubr.msk.f32.mxu1 %vm3078_vm8, %v21123_v3  ;;  %18153 = vmatpush3.bf16.msra.mxu1 %v19458_v52  ;;  %943 = vst.msk [vmem:[%s24744_s6 + $0x178] sm:$0xff] %vm898_vm9, %v814_v61  ;;  %v818_v12 = vadd.f32 %v21008_v15, %v629_v17  ;;  %v633_v37 = vpop.f32.mrb[26].mxu1 }
 0x29e   :  { %18155 = vmatprep.subr.bf16.mxu1 %v19508_v63  ;;  %946 = vst [vmem:[%s24744_s6 + $0x190] sm:$0xff] %v817_v5  ;;  %v635_v16 = vpop.f32.mrb[27].mxu1  ;;  %v821_v61 = vadd.f32 %v21006_v58, %v633_v37 }
 0x29f   :  { %947 = vst.msk [vmem:[%s24744_s6 + $0x198] sm:$0xff] %vm898_vm9, %v818_v12  ;;  %v822_v2 = vadd.f32 %v21008_v15, %v635_v16  ;;  %v639_v60 = vpop.f32.mrb[28].mxu1 }
 0x2a0   :  { %16524 = vmatmul.mubr.msk.f32.gmra.mrb[66].mxu1 %vm3078_vm8, %v21143_v48  ;;  %950 = vst [vmem:[%s24744_s6 + $0x1b0] sm:$0xff] %v821_v61  ;;  %v641_v17 = vpop.f32.mrb[29].mxu1  ;;  %v825_v5 = vadd.f32 %v21006_v58, %v639_v60 }
 0x2a1   :  { %16526 = vmatprep.mubr.msk.f32.mxu1 %vm3078_vm8, %v21147_v54  ;;  %951 = vst.msk [vmem:[%s24744_s6 + $0x1b8] sm:$0xff] %vm898_vm9, %v822_v2  ;;  %v826_v20 = vadd.f32 %v21008_v15, %v641_v17  ;;  %v645_v12 = vpop.f32.mrb[30].mxu1 }
 0x2a2   :  { %954 = vst [vmem:[%s24744_s6 + $0x1d0] sm:$0xff] %v825_v5  ;;  %v647_v37 = vpop.f32.mrb[31].mxu1  ;;  %v829_v16 = vadd.f32 %v21006_v58, %v645_v12 }
 0x2a3   :  { %955 = vst.msk [vmem:[%s24744_s6 + $0x1d8] sm:$0xff] %vm898_vm9, %v826_v20 }
 0x2a4   :  { %16527 = vmatmul.mubr.msk.f32.gmra.mrb[68].mxu1 %vm3078_vm8, %v21166_v18  ;;  %958 = vst [vmem:[%s24744_s6 + $0x1f0] sm:$0xff] %v829_v16 }
 0x2a5   :  { %16529 = vmatprep.mubr.msk.f32.mxu1 %vm3078_vm8, %v21169_v56 }
 0x2a8   :  { %16530 = vmatmul.mubr.msk.f32.gmra.mrb[70].mxu1 %vm3078_vm8, %v21186_v55 }
 0x2a9   :  { %16536 = vmatprep.mubr.msk.f32.mxu1 %vm1150_vm6, %v20681_v57  ;;  %v830_v57 = vadd.f32 %v21008_v15, %v647_v37 }
 0x2ab   :  { %959 = vst.msk [vmem:[%s24744_s6 + $0x1f8] sm:$0xff] %vm898_vm9, %v830_v57 }
 0x2ac   :  { %16537 = vmatmul.mubr.msk.f32.vlgmr.msra.gmra.mrb[72].mxu1 %vm1150_vm6, %v20694_v49  ;;  %v651_v49 = vpop.f32.mrb[32].mxu1 }
 0x2ad   :  { %16539 = vmatprep.mubr.msk.f32.mxu1 %vm1150_vm6, %v20698_v1  ;;  %18157 = vmatpush3.bf16.msra.mxu1 %v19508_v63  ;;  %v653_v61 = vpop.f32.mrb[33].mxu1  ;;  %v833_v1 = vadd.f32 %v21006_v58, %v651_v49 }
 0x2ae   :  { %18159 = vmatprep.subr.bf16.mxu1 %v19791_v42  ;;  %v834_v2 = vadd.f32 %v21008_v15, %v653_v61  ;;  %v657_v60 = vpop.f32.mrb[34].mxu1 }
 0x2af   :  { %962 = vst [vmem:[%s24744_s6 + $0x210] sm:$0xff] %v833_v1  ;;  %v659_v17 = vpop.f32.mrb[35].mxu1 }
 0x2b0   :  { %16540 = vmatmul.mubr.msk.f32.gmra.mrb[74].mxu1 %vm1150_vm6, %v20711_v8  ;;  %963 = vst.msk [vmem:[%s24744_s6 + $0x218] sm:$0xff] %vm898_vm9, %v834_v2  ;;  %v837_v8 = vadd.f32 %v21006_v58, %v657_v60  ;;  %v838_v5 = vadd.f32 %v21008_v15, %v659_v17 }
 0x2b1   :  { %16542 = vmatprep.mubr.msk.f32.mxu1 %vm1150_vm6, %v20716_v21  ;;  %v663_v21 = vpop.f32.mrb[36].mxu1 }
 0x2b2   :  { %966 = vst [vmem:[%s24744_s6 + $0x230] sm:$0xff] %v837_v8  ;;  %967 = vst.msk [vmem:[%s24744_s6 + $0x238] sm:$0xff] %vm898_vm9, %v838_v5  ;;  %v665_v20 = vpop.f32.mrb[37].mxu1 }
 0x2b3   :  { %v842_v12 = vadd.f32 %v21008_v15, %v665_v20 }
 0x2b4   :  { %16543 = vmatmul.mubr.msk.f32.gmra.mrb[76].mxu1 %vm1150_vm6, %v20729_v27  ;;  %v841_v27 = vadd.f32 %v21006_v58, %v663_v21 }
 0x2b5   :  { %16545 = vmatprep.mubr.msk.f32.mxu1 %vm1150_vm6, %v20733_v10  ;;  %971 = vst.msk [vmem:[%s24744_s6 + $0x258] sm:$0xff] %vm898_vm9, %v842_v12  ;;  %v669_v10 = vpop.f32.mrb[38].mxu1 }
 0x2b6   :  { %970 = vst [vmem:[%s24744_s6 + $0x250] sm:$0xff] %v841_v27  ;;  %v671_v37 = vpop.f32.mrb[39].mxu1 }
 0x2b7   :  { %v846_v16 = vadd.f32 %v21008_v15, %v671_v37  ;;  %v675_v49 = vpop.f32.mrb[40].mxu1 }
 0x2b8   :  { %16546 = vmatmul.mubr.msk.f32.gmra.mrb[78].mxu1 %vm1150_vm6, %v20746_v19  ;;  %v21265_v19 = vld [vmem:[%s24742_s1 + $0x178] sm:$0x7]  ;;  %v849_v61 = vadd.f32 %v21006_v58, %v675_v49 }
 0x2b9   :  { %16548 = vmatprep.mubr.msk.f32.mxu1 %vm1150_vm6, %v20750_v31  ;;  %v845_v31 = vadd.f32 %v21006_v58, %v669_v10  ;;  %v3295_v57 = vrot.slane %v21265_v19, 1  ;;  %975 = vst.msk [vmem:[%s24744_s6 + $0x278] sm:$0xff] %vm898_vm9, %v846_v16 }
 0x2ba   :  { %978 = vst [vmem:[%s24744_s6 + $0x290] sm:$0xff] %v849_v61 }
 0x2bb   :  { %974 = vst [vmem:[%s24744_s6 + $0x270] sm:$0xff] %v845_v31  ;;  %v3296_v1 = vsel %vm1118_vm5, %v20777_v38, %v3295_v57 }
 0x2bc   :  { %16549 = vmatmul.mubr.msk.f32.gmra.mrb[80].mxu1 %vm1150_vm6, %v20763_v32  ;;  %v677_v32 = vpop.f32.mrb[41].mxu1 }
 0x2bd   :  { %16551 = vmatprep.mubr.msk.f32.mxu1 %vm1150_vm6, %v20767_v36  ;;  %v850_v36 = vadd.f32 %v21008_v15, %v677_v32 }
 0x2bf   :  { %979 = vst.msk [vmem:[%s24744_s6 + $0x298] sm:$0xff] %vm898_vm9, %v850_v36 }
 0x2c0   :  { %16552 = vmatmul.mubr.msk.f32.gmra.mrb[82].mxu1 %vm1150_vm6, %v20782_v7  ;;  %v681_v7 = vpop.f32.mrb[42].mxu1 }
 0x2c1   :  { %16554 = vmatprep.mubr.msk.f32.mxu1 %vm1150_vm6, %v20786_v25  ;;  %v683_v2 = vpop.f32.mrb[43].mxu1  ;;  %v853_v60 = vadd.f32 %v21006_v58, %v681_v7 }
 0x2c2   :  { %v854_v25 = vadd.f32 %v21008_v15, %v683_v2  ;;  %v687_v38 = vpop.f32.mrb[44].mxu1 }
 0x2c3   :  { %982 = vst [vmem:[%s24744_s6 + $0x2b0] sm:$0xff] %v853_v60  ;;  %v689_v17 = vpop.f32.mrb[45].mxu1 }
 0x2c4   :  { %16555 = vmatmul.mubr.msk.f32.gmra.mrb[84].mxu1 %vm1150_vm6, %v20799_v41  ;;  %983 = vst.msk [vmem:[%s24744_s6 + $0x2b8] sm:$0xff] %vm898_vm9, %v854_v25  ;;  %v857_v41 = vadd.f32 %v21006_v58, %v687_v38  ;;  %v858_v8 = vadd.f32 %v21008_v15, %v689_v17  ;;  %v693_v5 = vpop.f32.mrb[46].mxu1 }
 0x2c5   :  { %16557 = vmatprep.mubr.msk.f32.mxu1 %vm1150_vm6, %v3296_v1  ;;  %v695_v21 = vpop.f32.mrb[47].mxu1  ;;  %v861_v20 = vadd.f32 %v21006_v58, %v693_v5  ;;  %v21522_v5 = vld [vmem:[%s24742_s1 + $0x1b8] sm:$0xff] }
 0x2c6   :  { %986 = vst [vmem:[%s24744_s6 + $0x2d0] sm:$0xff] %v857_v41  ;;  %987 = vst.msk [vmem:[%s24744_s6 + $0x2d8] sm:$0xff] %vm898_vm9, %v858_v8  ;;  %v862_v27 = vadd.f32 %v21008_v15, %v695_v21  ;;  %v21508_v41 = vld [vmem:[%s24742_s1 + $0x1a8] sm:$0xff]  ;;  %v21513_v8 = vld [vmem:[%s24742_s1 + $0x1b0] sm:$0xff] }
 0x2c7   :  { %990 = vst [vmem:[%s24744_s6 + $0x2f0] sm:$0xff] %v861_v20  ;;  %v21527_v21 = vld [vmem:[%s24742_s1 + $0x1c0] sm:$0xff]  ;;  %v21536_v20 = vld [vmem:[%s24742_s1 + $0x1c8] sm:$0xff] }
 0x2c8   :  { %16558 = vmatmul.mubr.msk.f32.gmra.mrb[86].mxu1 %vm1150_vm6, %v3295_v57  ;;  %991 = vst.msk [vmem:[%s24744_s6 + $0x2f8] sm:$0xff] %vm898_vm9, %v862_v27  ;;  %v21541_v27 = vld [vmem:[%s24742_s1 + $0x1d0] sm:$0xff] }
 0x2c9   :  { %16564 = vmatprep.mubr.msk.f32.mxu1 %vm1150_vm6, %v20470_v62  ;;  %v699_v62 = vpop.f32.mrb[48].mxu1 }
 0x2cc   :  { %16565 = vmatmul.mubr.msk.f32.vlgmr.msra.gmra.mrb[72].mxu1 %vm1150_vm6, %v20491_v59  ;;  %v701_v59 = vpop.f32.mrb[49].mxu1 }
 0x2cd   :  { %16567 = vmatprep.mubr.msk.f32.mxu1 %vm1150_vm6, %v20499_v29  ;;  %18161 = vmatpush3.bf16.msra.mxu1 %v19791_v42  ;;  %v865_v29 = vadd.f32 %v21006_v58, %v699_v62  ;;  %v866_v12 = vadd.f32 %v21008_v15, %v701_v59  ;;  %v705_v10 = vpop.f32.mrb[50].mxu1  ;;  %v21550_v62 = vld [vmem:[%s24742_s1 + $0x1d8] sm:$0xff]  ;;  %v21555_v59 = vld [vmem:[%s24742_s1 + $0x1e0] sm:$0xff] }
 0x2ce   :  { %18163 = vmatprep.subr.bf16.mxu1 %v19840_v35  ;;  %v707_v37 = vpop.f32.mrb[51].mxu1 }
 0x2cf   :  { %994 = vst [vmem:[%s24744_s6 + $0x310] sm:$0xff] %v865_v29  ;;  %995 = vst.msk [vmem:[%s24744_s6 + $0x318] sm:$0xff] %vm898_vm9, %v866_v12  ;;  %v870_v31 = vadd.f32 %v21008_v15, %v707_v37  ;;  %v21564_v29 = vld [vmem:[%s24742_s1 + $0x1e8] sm:$0xff] }
 0x2d0   :  { %16568 = vmatmul.mubr.msk.f32.gmra.mrb[74].mxu1 %vm1150_vm6, %v20520_v13  ;;  %v869_v13 = vadd.f32 %v21006_v58, %v705_v10  ;;  %v21570_v10 = vld [vmem:[%s24742_s1 + $0x1f0] sm:$0xff] }
 0x2d1   :  { %16570 = vmatprep.mubr.msk.f32.mxu1 %vm1150_vm6, %v20529_v14  ;;  %999 = vst.msk [vmem:[%s24744_s6 + $0x338] sm:$0xff] %vm898_vm9, %v870_v31  ;;  %v711_v14 = vpop.f32.mrb[52].mxu1  ;;  %v21581_v31 = vld [vmem:[%s24742_s1 + $0x1f8] sm:$0x7] }
 0x2d2   :  { %998 = vst [vmem:[%s24744_s6 + $0x330] sm:$0xff] %v869_v13  ;;  %v713_v16 = vpop.f32.mrb[53].mxu1 }
 0x2d3   :  { %v874_v57 = vadd.f32 %v21008_v15, %v713_v16 }
 0x2d4   :  { %16571 = vmatmul.mubr.msk.f32.gmra.mrb[76].mxu1 %vm1150_vm6, %v20549_v9  ;;  %v873_v9 = vadd.f32 %v21006_v58, %v711_v14 }
 0x2d5   :  { %16573 = vmatprep.mubr.msk.f32.mxu1 %vm1150_vm6, %v20557_v23  ;;  %1003 = vst.msk [vmem:[%s24744_s6 + $0x358] sm:$0xff] %vm898_vm9, %v874_v57  ;;  %v717_v23 = vpop.f32.mrb[54].mxu1 }
 0x2d6   :  { %1002 = vst [vmem:[%s24744_s6 + $0x350] sm:$0xff] %v873_v9  ;;  %v719_v49 = vpop.f32.mrb[55].mxu1 }
 0x2d7   :  { %v878_v32 = vadd.f32 %v21008_v15, %v719_v49 }
 0x2d8   :  { %16574 = vmatmul.mubr.msk.f32.gmra.mrb[78].mxu1 %vm1150_vm6, %v20576_v40  ;;  %v877_v40 = vadd.f32 %v21006_v58, %v717_v23  ;;  %v4110_v23 = vrot.slane %v21508_v41, 1 }
 0x2d9   :  { %16576 = vmatprep.mubr.msk.f32.mxu1 %vm1150_vm6, %v20584_v26  ;;  %1007 = vst.msk [vmem:[%s24744_s6 + $0x378] sm:$0xff] %vm898_vm9, %v878_v32  ;;  %v723_v26 = vpop.f32.mrb[56].mxu1 }
 0x2da   :  { %1006 = vst [vmem:[%s24744_s6 + $0x370] sm:$0xff] %v877_v40  ;;  %v725_v61 = vpop.f32.mrb[57].mxu1  ;;  %v4112_v40 = vrot.slane %v21513_v8, 1 }
 0x2db   :  { %v882_v36 = vadd.f32 %v21008_v15, %v725_v61 }
 0x2dc   :  { %16577 = vmatmul.mubr.msk.f32.gmra.mrb[80].mxu1 %vm1150_vm6, %v20603_v33  ;;  %v881_v33 = vadd.f32 %v21006_v58, %v723_v26  ;;  %v4114_v26 = vrot.slane %v21522_v5, 1 }
 0x2dd   :  { %16579 = vmatprep.mubr.msk.f32.mxu1 %vm1150_vm6, %v20611_v44  ;;  %1011 = vst.msk [vmem:[%s24744_s6 + $0x398] sm:$0xff] %vm898_vm9, %v882_v36  ;;  %v729_v44 = vpop.f32.mrb[58].mxu1  ;;  %v4116_v36 = vrot.slane %v21527_v21, 1 }
 0x2de   :  { %1010 = vst [vmem:[%s24744_s6 + $0x390] sm:$0xff] %v881_v33  ;;  %v731_v1 = vpop.f32.mrb[59].mxu1  ;;  %v24829_v33 = vld [vmem:[#allocation3_spill] sm:$0xff] }
 0x2df   :  { %v886_v7 = vadd.f32 %v21008_v15, %v731_v1  ;;  %v4118_v1 = vrot.slane %v21536_v20, 1 }
 0x2e0   :  { %16580 = vmatmul.mubr.msk.f32.gmra.mrb[82].mxu1 %vm1150_vm6, %v20630_v45  ;;  %v885_v45 = vadd.f32 %v21006_v58, %v729_v44  ;;  %v4113_v44 = vsel %vm1118_vm5, %v4110_v23, %v4112_v40 }
 0x2e1   :  { %16582 = vmatprep.mubr.msk.f32.mxu1 %vm1150_vm6, %v20638_v24  ;;  %1015 = vst.msk [vmem:[%s24744_s6 + $0x3b8] sm:$0xff] %vm898_vm9, %v886_v7  ;;  %v735_v24 = vpop.f32.mrb[60].mxu1  ;;  %v4120_v7 = vrot.slane %v21541_v27, 1 }
 0x2e2   :  { %1014 = vst [vmem:[%s24744_s6 + $0x3b0] sm:$0xff] %v885_v45  ;;  %v737_v2 = vpop.f32.mrb[61].mxu1  ;;  %v4115_v45 = vsel %vm1118_vm5, %v4112_v40, %v4114_v26 }
 0x2e3   :  { %v890_v60 = vadd.f32 %v21008_v15, %v737_v2  ;;  %v4122_v2 = vrot.slane %v21550_v62, 1 }
 0x2e4   :  { %16583 = vmatmul.mubr.msk.f32.gmra.mrb[84].mxu1 %vm1150_vm6, %v20655_v46  ;;  %v889_v46 = vadd.f32 %v21006_v58, %v735_v24  ;;  %v4117_v24 = vsel %vm1118_vm5, %v4114_v26, %v4116_v36  ;;  %v4348_v26 = vrot.slane %v21555_v59, 2 }
 0x2e5   :  { %16585 = vmatprep.mubr.msk.f32.mxu1 %vm1150_vm6, %v20661_v47  ;;  %1019 = vst.msk [vmem:[%s24744_s6 + $0x3d8] sm:$0xff] %vm898_vm9, %v890_v60  ;;  %v741_v47 = vpop.f32.mrb[62].mxu1  ;;  %v4124_v60 = vrot.slane %v21555_v59, 1 }
 0x2e6   :  { %1018 = vst [vmem:[%s24744_s6 + $0x3d0] sm:$0xff] %v889_v46  ;;  %v743_v25 = vpop.f32.mrb[63].mxu1  ;;  %v893_v38 = vadd.f32 %v21006_v58, %v741_v47  ;;  %v21492_v58 = vld [vmem:[%s24742_s1 + $0x198] sm:$0xff]  ;;  %v4119_v46 = vsel %vm1118_vm5, %v4116_v36, %v4118_v1  ;;  %v4121_v47 = vsel %vm1118_vm5, %v4118_v1, %v4120_v7  ;;  %v4352_v36 = vrot.slane %v21570_v10, 2 }
 0x2e7   :  { %v894_v17 = vadd.f32 %v21008_v15, %v743_v25  ;;  %v21498_v15 = vld [vmem:[%s24742_s1 + $0x1a0] sm:$0xff]  ;;  %v4106_v14 = vrot.slane %v21492_v58, 1  ;;  %v4126_v25 = vrot.slane %v21564_v29, 1 }
 0x2e8   :  { %16586 = vmatmul.mubr.msk.f32.gmra.mrb[86].mxu1 %vm1150_vm6, %v21265_v19  ;;  %1022 = vst [vmem:[%s24744_s6 + $0x3f0] sm:$0xff] %v893_v38  ;;  %v4108_v9 = vrot.slane %v21498_v15, 1  ;;  %v4123_v38 = vsel %vm1118_vm5, %v4120_v7, %v4122_v2  ;;  %v21704_v7 = vld [vmem:[%s24742_s1 + $0x218] sm:$0xff] }
 0x2e9   :  { %16592 = vmatprep.mubr.msk.f32.mxu1 %vm1150_vm6, %v20816_v4  ;;  %1023 = vst.msk [vmem:[%s24744_s6 + $0x3f8] sm:$0xff] %vm898_vm9, %v894_v17  ;;  %v24823_v4 = vld [vmem:[#allocation6_spill] sm:$0xff]  ;;  %v4128_v17 = vrot.slane %v21570_v10, 1 }
 0x2ea   :  { %v4109_v32 = vsel %vm1118_vm5, %v4106_v14, %v4108_v9  ;;  %v4111_v61 = vsel %vm1118_vm5, %v4108_v9, %v4110_v23  ;;  %v4342_v23 = vrot.slane %v21536_v20, 2 }
 0x2ec   :  { %16593 = vmatmul.mubr.msk.f32.vlgmr.msra.gmra.mrb[72].mxu1 %vm1150_vm6, %v20828_v22  ;;  %v3680_v22 = vrot.slane %v21265_v19, 2  ;;  %v24828_v19 = vld [vmem:[#allocation2_spill] sm:$0xff] }
 0x2ed   :  { %16595 = vmatprep.mubr.msk.f32.mxu1 %vm1150_vm6, %v20832_v28  ;;  %18165 = vmatpush3.bf16.msra.mxu1 %v19840_v35  ;;  %v24824_v28 = vld [vmem:[#allocation8_spill] sm:$0xff] }
 0x2ee   :  { %18167 = vmatprep.subr.bf16.mxu1 %v19882_v11 }
 0x2f0   :  { %16596 = vmatmul.mubr.msk.f32.gmra.mrb[74].mxu1 %vm1150_vm6, %v20845_v6  ;;  %v24825_v6 = vld [vmem:[#allocation9_spill] sm:$0xff] }
 0x2f1   :  { %16598 = vmatprep.mubr.msk.f32.mxu1 %vm1150_vm6, %v20849_v30  ;;  %v24826_v30 = vld [vmem:[#allocation7_spill] sm:$0xff] }
 0x2f4   :  { %16599 = vmatmul.mubr.msk.f32.gmra.mrb[76].mxu1 %vm1150_vm6, %v20862_v39  ;;  %v3681_v39 = vsel %vm1505_vm4, %v24826_v30, %v3680_v22 }
 0x2f5   :  { %16601 = vmatprep.mubr.msk.f32.mxu1 %vm1150_vm6, %v20866_v53  ;;  %v24827_v53 = vld [vmem:[#allocation10_spill] sm:$0xff] }
 0x2f8   :  { %16602 = vmatmul.mubr.msk.f32.gmra.mrb[78].mxu1 %vm1150_vm6, %v20879_v43  ;;  %v21470_v43 = vld [vmem:[%s24742_s1 + $0x180] sm:$0xff] }
 0x2f9   :  { %16604 = vmatprep.mubr.msk.f32.mxu1 %vm1150_vm6, %v20883_v50  ;;  %v21478_v50 = vld [vmem:[%s24742_s1 + $0x188] sm:$0xff]  ;;  %v4101_v12 = vrot.slane %v21470_v43, 1  ;;  %v4325_v30 = vrot.slane %v21470_v43, 2 }
 0x2fa   :  { %v4102_v37 = vrot.slane %v21478_v50, 1 }
 0x2fc   :  { %16605 = vmatmul.mubr.msk.f32.gmra.mrb[80].mxu1 %vm1150_vm6, %v20896_v34  ;;  %v21483_v34 = vld [vmem:[%s24742_s1 + $0x190] sm:$0xff]  ;;  %v4103_v16 = vsel %vm1118_vm5, %v4101_v12, %v4102_v37 }
 0x2fd   :  { %16607 = vmatprep.mubr.msk.f32.mxu1 %vm1150_vm6, %v24823_v4  ;;  %v4104_v13 = vrot.slane %v21483_v34, 1  ;;  %v4125_v4 = vsel %vm1118_vm5, %v4122_v2, %v4124_v60  ;;  %v4328_v12 = vrot.slane %v21483_v34, 2  ;;  %v21715_v2 = vld [vmem:[%s24742_s1 + $0x220] sm:$0xff] }
 0x2ff   :  { %v4105_v57 = vsel %vm1118_vm5, %v4102_v37, %v4104_v13  ;;  %v4107_v49 = vsel %vm1118_vm5, %v4104_v13, %v4106_v14  ;;  %v4330_v37 = vrot.slane %v21492_v58, 2  ;;  %v4332_v14 = vrot.slane %v21498_v15, 2 }
 0x300   :  { %16608 = vmatmul.mubr.msk.f32.gmra.mrb[82].mxu1 %vm1150_vm6, %v24824_v28  ;;  %v4127_v28 = vsel %vm1118_vm5, %v4124_v60, %v4126_v25 }
 0x301   :  { %16610 = vmatprep.mubr.msk.f32.mxu1 %vm1150_vm6, %v24825_v6  ;;  %v4129_v6 = vsel %vm1118_vm5, %v4126_v25, %v4128_v17 }
 0x304   :  { %16611 = vmatmul.mubr.msk.f32.gmra.mrb[84].mxu1 %vm1150_vm6, %v24827_v53  ;;  %v4326_v53 = vrot.slane %v21478_v50, 2 }
 0x305   :  { %16613 = vmatprep.mubr.msk.f32.mxu1 %vm1150_vm6, %v3681_v39 }
 0x306   :  { %v4327_v13 = vsel %vm1505_vm4, %v4325_v30, %v4326_v53  ;;  %v21748_v30 = vld [vmem:[%s24742_s1 + $0x238] sm:$0xff] }
 0x308   :  { %16614 = vmatmul.mubr.msk.f32.gmra.mrb[86].mxu1 %vm1150_vm6, %v3680_v22  ;;  %v4130_v22 = vrot.slane %v21581_v31, 1 }
 0x309   :  { %16620 = vmatprep.mubr.msk.f32.mxu1 %vm1150_vm6, %v21470_v43  ;;  %v4329_v43 = vsel %vm1505_vm4, %v4326_v53, %v4328_v12  ;;  %v21754_v53 = vld [vmem:[%s24742_s1 + $0x240] sm:$0xff] }
 0x30a   :  { %v4131_v39 = vsel %vm1118_vm5, %v4128_v17, %v4130_v22 }
 0x30c   :  { %16621 = vmatmul.mubr.msk.f32.vlgmr.msra.gmra.mrb[72].mxu1 %vm1150_vm6, %v21478_v50  ;;  %v4334_v50 = vrot.slane %v21508_v41, 2 }
 0x30d   :  { %16623 = vmatprep.mubr.msk.f32.mxu1 %vm1150_vm6, %v21483_v34  ;;  %18169 = vmatpush3.bf16.msra.mxu1 %v19882_v11  ;;  %v4336_v34 = vrot.slane %v21513_v8, 2 }
 0x30e   :  { %18171 = vmatprep.subr.bf16.mxu1 %v24828_v19  ;;  %v4335_v9 = vsel %vm1505_vm4, %v4332_v14, %v4334_v50 }
 0x310   :  { %16624 = vmatmul.mubr.msk.f32.gmra.mrb[74].mxu1 %vm1150_vm6, %v21492_v58  ;;  %v4333_v58 = vsel %vm1505_vm4, %v4330_v37, %v4332_v14  ;;  %v21770_v14 = vld [vmem:[%s24742_s1 + $0x248] sm:$0xff] }
 0x311   :  { %16626 = vmatprep.mubr.msk.f32.mxu1 %vm1150_vm6, %v21498_v15  ;;  %v4338_v15 = vrot.slane %v21522_v5, 2 }
 0x314   :  { %16627 = vmatmul.mubr.msk.f32.gmra.mrb[76].mxu1 %vm1150_vm6, %v21508_v41  ;;  %v4340_v41 = vrot.slane %v21527_v21, 2 }
 0x315   :  { %16629 = vmatprep.mubr.msk.f32.mxu1 %vm1150_vm6, %v21513_v8  ;;  %v4337_v8 = vsel %vm1505_vm4, %v4334_v50, %v4336_v34  ;;  %v21776_v50 = vld [vmem:[%s24742_s1 + $0x250] sm:$0xff] }
 0x316   :  { %v4341_v40 = vsel %vm1505_vm4, %v4338_v15, %v4340_v41 }
 0x318   :  { %16630 = vmatmul.mubr.msk.f32.gmra.mrb[78].mxu1 %vm1150_vm6, %v21522_v5  ;;  %v4344_v5 = vrot.slane %v21541_v27, 2 }
 0x319   :  { %16632 = vmatprep.mubr.msk.f32.mxu1 %vm1150_vm6, %v21527_v21  ;;  %v4343_v21 = vsel %vm1505_vm4, %v4340_v41, %v4342_v23  ;;  %v21798_v41 = vld [vmem:[%s24742_s1 + $0x260] sm:$0xff] }
 0x31c   :  { %16633 = vmatmul.mubr.msk.f32.gmra.mrb[80].mxu1 %vm1150_vm6, %v21536_v20  ;;  %v4345_v20 = vsel %vm1505_vm4, %v4342_v23, %v4344_v5 }
 0x31d   :  { %16635 = vmatprep.mubr.msk.f32.mxu1 %vm1150_vm6, %v21541_v27 }
 0x320   :  { %16636 = vmatmul.mubr.msk.f32.gmra.mrb[82].mxu1 %vm1150_vm6, %v21550_v62 }
 0x321   :  { %16638 = vmatprep.mubr.msk.f32.mxu1 %vm1150_vm6, %v21555_v59 }
 0x324   :  { %16639 = vmatmul.mubr.msk.f32.gmra.mrb[84].mxu1 %vm1150_vm6, %v21564_v29 }
 0x325   :  { %16641 = vmatprep.mubr.msk.f32.mxu1 %vm1150_vm6, %v21570_v10  ;;  %v21682_v10 = vld [vmem:[%s24742_s1 + $0x200] sm:$0xff] }
 0x326   :  { %v4775_v23 = vrot.slane %v21682_v10, 1 }
 0x328   :  { %16642 = vmatmul.mubr.msk.f32.gmra.mrb[86].mxu1 %vm1150_vm6, %v21581_v31 }
 0x329   :  { %16648 = vmatprep.mubr.msk.f32.mxu1 %vm1150_vm6, %v4103_v16  ;;  %v4331_v16 = vsel %vm1505_vm4, %v4328_v12, %v4330_v37 }
 0x32c   :  { %16649 = vmatmul.mubr.msk.f32.vlgmr.msra.gmra.mrb[72].mxu1 %vm1150_vm6, %v4105_v57  ;;  %v24830_v57 = vld [vmem:[#allocation4_spill] sm:$0xff] }
 0x32d   :  { %16651 = vmatprep.mubr.msk.f32.mxu1 %vm1150_vm6, %v4107_v49  ;;  %18173 = vmatpush3.bf16.msra.mxu1 %v24828_v19  ;;  %v4339_v49 = vsel %vm1505_vm4, %v4336_v34, %v4338_v15  ;;  %v21792_v15 = vld [vmem:[%s24742_s1 + $0x258] sm:$0xff] }
 0x32e   :  { %18175 = vmatprep.subr.bf16.mxu1 %v24829_v33 }
 0x330   :  { %16652 = vmatmul.mubr.msk.f32.gmra.mrb[74].mxu1 %vm1150_vm6, %v4109_v32  ;;  %v4346_v32 = vrot.slane %v21550_v62, 2 }
 0x331   :  { %16654 = vmatprep.mubr.msk.f32.mxu1 %vm1150_vm6, %v4111_v61  ;;  %v4350_v61 = vrot.slane %v21564_v29, 2 }
 0x332   :  { %v4347_v27 = vsel %vm1505_vm4, %v4344_v5, %v4346_v32  ;;  %v4349_v62 = vsel %vm1505_vm4, %v4346_v32, %v4348_v26  ;;  %v21830_v32 = vld [vmem:[%s24742_s1 + $0x278] sm:$0x7] }
 0x333   :  { %v4351_v59 = vsel %vm1505_vm4, %v4348_v26, %v4350_v61  ;;  %v4353_v29 = vsel %vm1505_vm4, %v4350_v61, %v4352_v36 }
 0x334   :  { %16655 = vmatmul.mubr.msk.f32.gmra.mrb[76].mxu1 %vm1150_vm6, %v4113_v44  ;;  %v4354_v44 = vrot.slane %v21581_v31, 2  ;;  %v21690_v31 = vld [vmem:[%s24742_s1 + $0x208] sm:$0xff] }
 0x335   :  { %16657 = vmatprep.mubr.msk.f32.mxu1 %vm1150_vm6, %v4115_v45  ;;  %v21695_v45 = vld [vmem:[%s24742_s1 + $0x210] sm:$0xff]  ;;  %v4776_v5 = vrot.slane %v21690_v31, 1 }
 0x336   :  { %v4355_v1 = vsel %vm1505_vm4, %v4352_v36, %v4354_v44 }
 0x337   :  { %v21834_v26 = vsel %vm1118_vm5, %v4775_v23, %v4776_v5  ;;  %v4999_v23 = vrot.slane %v21682_v10, 2 }
 0x338   :  { %16658 = vmatmul.mubr.msk.f32.gmra.mrb[78].mxu1 %vm1150_vm6, %v4117_v24  ;;  %v21710_v24 = vld [vmem:[%s24745_s5] ss:$0 sm:$0xff] }
 0x339   :  { %16660 = vmatprep.mubr.msk.f32.mxu1 %vm1150_vm6, %v4119_v46  ;;  %24831 = vst [vmem:[#allocation6_spill] sm:$0xff] %v21710_v24  ;;  %v24832_v46 = vld [vmem:[#allocation5_spill] sm:$0xff] }
 0x33c   :  { %16661 = vmatmul.mubr.msk.f32.gmra.mrb[80].mxu1 %vm1150_vm6, %v4121_v47 }
 0x33d   :  { %16663 = vmatprep.mubr.msk.f32.mxu1 %vm1150_vm6, %v4123_v38  ;;  %v21726_v38 = vld [vmem:[%s24742_s1 + $0x228] sm:$0xff] }
 0x340   :  { %16664 = vmatmul.mubr.msk.f32.gmra.mrb[82].mxu1 %vm1150_vm6, %v4125_v4  ;;  %v21732_v4 = vld [vmem:[%s24742_s1 + $0x230] sm:$0xff] }
 0x341   :  { %16666 = vmatprep.mubr.msk.f32.mxu1 %vm1150_vm6, %v4127_v28 }
 0x344   :  { %16667 = vmatmul.mubr.msk.f32.gmra.mrb[84].mxu1 %vm1150_vm6, %v4129_v6 }
 0x345   :  { %16669 = vmatprep.mubr.msk.f32.mxu1 %vm1150_vm6, %v4131_v39 }
 0x348   :  { %16670 = vmatmul.mubr.msk.f32.gmra.mrb[86].mxu1 %vm1150_vm6, %v4130_v22 }
 0x349   :  { %16676 = vmatprep.mubr.msk.f32.mxu1 %vm1150_vm6, %v4327_v13 }
 0x34c   :  { %16677 = vmatmul.mubr.msk.f32.vlgmr.msra.gmra.mrb[72].mxu1 %vm1150_vm6, %v4329_v43 }
 0x34d   :  { %16679 = vmatprep.mubr.msk.f32.mxu1 %vm1150_vm6, %v4331_v16  ;;  %18177 = vmatpush3.bf16.msra.mxu1 %v24829_v33 }
 0x34e   :  { %18179 = vmatprep.subr.bf16.mxu1 %v24830_v57 }
 0x350   :  { %16680 = vmatmul.mubr.msk.f32.gmra.mrb[74].mxu1 %vm1150_vm6, %v4333_v58 }
 0x351   :  { %16682 = vmatprep.mubr.msk.f32.mxu1 %vm1150_vm6, %v4335_v9 }
 0x354   :  { %16683 = vmatmul.mubr.msk.f32.gmra.mrb[76].mxu1 %vm1150_vm6, %v4337_v8  ;;  %v21813_v8 = vld [vmem:[%s24742_s1 + $0x268] sm:$0xff] }
 0x355   :  { %16685 = vmatprep.mubr.msk.f32.mxu1 %vm1150_vm6, %v4339_v49  ;;  %v21819_v49 = vld [vmem:[%s24742_s1 + $0x270] sm:$0xff] }
 0x358   :  { %16686 = vmatmul.mubr.msk.f32.gmra.mrb[78].mxu1 %vm1150_vm6, %v4341_v40  ;;  %v4778_v40 = vrot.slane %v21695_v45, 1 }
 0x359   :  { %16688 = vmatprep.mubr.msk.f32.mxu1 %vm1150_vm6, %v4343_v21  ;;  %v4780_v21 = vrot.slane %v21704_v7, 1 }
 0x35a   :  { %v21842_v61 = vsel %vm1118_vm5, %v4776_v5, %v4778_v40 }
 0x35b   :  { %v21846_v36 = vsel %vm1118_vm5, %v4778_v40, %v4780_v21  ;;  %v5000_v40 = vrot.slane %v21690_v31, 2 }
 0x35c   :  { %16689 = vmatmul.mubr.msk.f32.gmra.mrb[80].mxu1 %vm1150_vm6, %v4345_v20  ;;  %v4782_v20 = vrot.slane %v21715_v2, 1 }
 0x35d   :  { %16691 = vmatprep.mubr.msk.f32.mxu1 %vm1150_vm6, %v4347_v27  ;;  %v4784_v27 = vrot.slane %v21726_v38, 1 }
 0x360   :  { %16692 = vmatmul.mubr.msk.f32.gmra.mrb[82].mxu1 %vm1150_vm6, %v4349_v62  ;;  %v4786_v62 = vrot.slane %v21732_v4, 1 }
 0x361   :  { %16694 = vmatprep.mubr.msk.f32.mxu1 %vm1150_vm6, %v4351_v59  ;;  %v4788_v59 = vrot.slane %v21748_v30, 1 }
 0x364   :  { %16695 = vmatmul.mubr.msk.f32.gmra.mrb[84].mxu1 %vm1150_vm6, %v4353_v29  ;;  %v21859_v29 = vsel %vm1118_vm5, %v4782_v20, %v4784_v27 }
 0x365   :  { %16697 = vmatprep.mubr.msk.f32.mxu1 %vm1150_vm6, %v4355_v1  ;;  %v4790_v1 = vrot.slane %v21754_v53, 1 }
 0x368   :  { %16698 = vmatmul.mubr.msk.f32.gmra.mrb[86].mxu1 %vm1150_vm6, %v4354_v44  ;;  %v21854_v44 = vsel %vm1118_vm5, %v4780_v21, %v4782_v20  ;;  %v5002_v21 = vrot.slane %v21695_v45, 2  ;;  %v5004_v20 = vrot.slane %v21704_v7, 2 }
 0x369   :  { %16704 = vmatprep.mubr.msk.f32.mxu1 %vm1150_vm6, %v21682_v10 }
 0x36c   :  { %16705 = vmatmul.mubr.msk.f32.vlgmr.msra.gmra.mrb[72].mxu1 %vm1150_vm6, %v21690_v31 }
 0x36d   :  { %16707 = vmatprep.mubr.msk.f32.mxu1 %vm1150_vm6, %v21695_v45  ;;  %18181 = vmatpush3.bf16.msra.mxu1 %v24830_v57 }
 0x36e   :  { %18183 = vmatprep.subr.bf16.mxu1 %v24832_v46 }
 0x36f   :  { %v16522_v60 = vpop.f32.mrb[64].mxu1 }
 0x370   :  { %16708 = vmatmul.mubr.msk.f32.gmra.mrb[74].mxu1 %vm1150_vm6, %v21704_v7  ;;  %v3219_v47 = vadd.f32 %v16522_v60, %v21710_v24  ;;  %v3173_v25 = vpop.f32.mrb[65].mxu1  ;;  %v21867_v60 = vsel %vm1118_vm5, %v4784_v27, %v4786_v62  ;;  %v21929_v27 = vsel %vm1505_vm4, %v4999_v23, %v5000_v40 }
 0x371   :  { %16710 = vmatprep.mubr.msk.f32.mxu1 %vm1150_vm6, %v21715_v2  ;;  %v3218_v17 = vadd.f32 %v21710_v24, %v3173_v25  ;;  %v21871_v25 = vsel %vm1118_vm5, %v4786_v62, %v4788_v59  ;;  %v5006_v62 = vrot.slane %v21715_v2, 2 }
 0x372   :  { %3227 = vst [vmem:[%s24746_s7 + $0x8] sm:$0xff] %v3219_v47  ;;  %v4792_v47 = vrot.slane %v21770_v14, 1 }
 0x373   :  { %3226 = vst [vmem:[%s24746_s7] sm:$0xff] %v3218_v17  ;;  %v16525_v22 = vpop.f32.mrb[66].mxu1  ;;  %v4794_v17 = vrot.slane %v21776_v50, 1 }
 0x374   :  { %16711 = vmatmul.mubr.msk.f32.gmra.mrb[76].mxu1 %vm1150_vm6, %v21726_v38  ;;  %v3221_v28 = vadd.f32 %v16525_v22, %v21710_v24  ;;  %v3183_v6 = vpop.f32.mrb[67].mxu1  ;;  %v21879_v22 = vsel %vm1118_vm5, %v4788_v59, %v4790_v1  ;;  %v21936_v59 = vsel %vm1505_vm4, %v5000_v40, %v5002_v21 }
 0x375   :  { %16713 = vmatprep.mubr.msk.f32.mxu1 %vm1150_vm6, %v21732_v4  ;;  %v3220_v39 = vadd.f32 %v21710_v24, %v3183_v6  ;;  %v21883_v6 = vsel %vm1118_vm5, %v4790_v1, %v4792_v47  ;;  %v5008_v1 = vrot.slane %v21726_v38, 2 }
 0x376   :  { %3229 = vst [vmem:[%s24746_s7 + $0x18] sm:$0xff] %v3221_v28  ;;  %v4796_v28 = vrot.slane %v21792_v15, 1 }
 0x377   :  { %3228 = vst [vmem:[%s24746_s7 + $0x10] sm:$0xff] %v3220_v39  ;;  %v16528_v12 = vpop.f32.mrb[68].mxu1  ;;  %v4798_v39 = vrot.slane %v21798_v41, 1 }
 0x378   :  { %16714 = vmatmul.mubr.msk.f32.gmra.mrb[78].mxu1 %vm1150_vm6, %v21748_v30  ;;  %v3223_v37 = vadd.f32 %v16528_v12, %v21710_v24  ;;  %v3193_v13 = vpop.f32.mrb[69].mxu1  ;;  %v21891_v12 = vsel %vm1118_vm5, %v4792_v47, %v4794_v17  ;;  %v21940_v47 = vsel %vm1505_vm4, %v5002_v21, %v5004_v20  ;;  %v5018_v21 = vrot.slane %v21776_v50, 2 }
 0x379   :  { %16716 = vmatprep.mubr.msk.f32.mxu1 %vm1150_vm6, %v21754_v53  ;;  %v3222_v43 = vadd.f32 %v21710_v24, %v3193_v13  ;;  %v21895_v13 = vsel %vm1118_vm5, %v4794_v17, %v4796_v28  ;;  %v5010_v17 = vrot.slane %v21732_v4, 2 }
 0x37a   :  { %3231 = vst [vmem:[%s24746_s7 + $0x28] sm:$0xff] %v3223_v37  ;;  %v4800_v37 = vrot.slane %v21813_v8, 1 }
 0x37b   :  { %3230 = vst [vmem:[%s24746_s7 + $0x20] sm:$0xff] %v3222_v43  ;;  %v16531_v16 = vpop.f32.mrb[70].mxu1  ;;  %v21900_v43 = vrot.slane %v21819_v49, 1  ;;  %v21960_v23 = vsel %vm1505_vm4, %v5008_v1, %v5010_v17 }
 0x37c   :  { %16717 = vmatmul.mubr.msk.f32.gmra.mrb[80].mxu1 %vm1150_vm6, %v21770_v14  ;;  %v3225_v34 = vadd.f32 %v16531_v16, %v21710_v24  ;;  %v3203_v58 = vpop.f32.mrb[71].mxu1  ;;  %v21905_v16 = vsel %vm1118_vm5, %v4796_v28, %v4798_v39  ;;  %v21948_v28 = vsel %vm1505_vm4, %v5004_v20, %v5006_v62 }
 0x37d   :  { %16719 = vmatprep.mubr.msk.f32.mxu1 %vm1150_vm6, %v21776_v50  ;;  %v3224_v9 = vadd.f32 %v21710_v24, %v3203_v58  ;;  %v21909_v58 = vsel %vm1118_vm5, %v4798_v39, %v4800_v37  ;;  %v5012_v39 = vrot.slane %v21748_v30, 2 }
 0x37e   :  { %3233 = vst [vmem:[%s24746_s7 + $0x38] sm:$0x1f] %v3225_v34  ;;  %v4804_v34 = vrot.slane %v21830_v32, 1 }
 0x37f   :  { %3232 = vst [vmem:[%s24746_s7 + $0x30] sm:$0xff] %v3224_v9  ;;  %v21917_v9 = vsel %vm1118_vm5, %v4800_v37, %v21900_v43  ;;  %v21952_v37 = vsel %vm1505_vm4, %v5006_v62, %v5008_v1  ;;  %v21964_v40 = vsel %vm1505_vm4, %v5010_v17, %v5012_v39  ;;  %v5020_v62 = vrot.slane %v21792_v15, 2 }
 0x380   :  { %16720 = vmatmul.mubr.msk.f32.gmra.mrb[82].mxu1 %vm1150_vm6, %v21792_v15  ;;  %v4805_v5 = vsel %vm1118_vm5, %v21900_v43, %v4804_v34  ;;  %24833 = vst [vmem:[#allocation8_spill] sm:$0xff] %v21964_v40  ;;  %v5022_v17 = vrot.slane %v21798_v41, 2 }
 0x381   :  { %16722 = vmatprep.mubr.msk.f32.mxu1 %vm1150_vm6, %v21798_v41 }
 0x382   :  { %v21998_v57 = vsel %vm1505_vm4, %v5020_v62, %v5022_v17 }
 0x383   :  { %24839 = vst [vmem:[#allocation14_spill] sm:$0xff] %v21998_v57 }
 0x384   :  { %16723 = vmatmul.mubr.msk.f32.gmra.mrb[84].mxu1 %vm1150_vm6, %v21813_v8 }
 0x385   :  { %16725 = vmatprep.mubr.msk.f32.mxu1 %vm1150_vm6, %v21819_v49 }
 0x388   :  { %16726 = vmatmul.mubr.msk.f32.gmra.mrb[86].mxu1 %vm1150_vm6, %v21830_v32 }
 0x389   :  { %16732 = vmatprep.mubr.msk.f32.mxu1 %vm1150_vm6, %v21834_v26 }
 0x38c   :  { %16733 = vmatmul.mubr.msk.f32.vlgmr.msra.gmra.mrb[72].mxu1 %vm1150_vm6, %v21842_v61 }
 0x38d   :  { %16735 = vmatprep.mubr.msk.f32.mxu1 %vm1150_vm6, %v21846_v36  ;;  %18185 = vmatpush3.bf16.msra.mxu1 %v24832_v46  ;;  %v5024_v46 = vrot.slane %v21813_v8, 2 }
 0x38f   :  { %v22002_v33 = vsel %vm1505_vm4, %v5022_v17, %v5024_v46 }
 0x390   :  { %16736 = vmatmul.mubr.msk.f32.gmra.mrb[74].mxu1 %vm1150_vm6, %v21854_v44  ;;  %24840 = vst [vmem:[#allocation15_spill] sm:$0xff] %v22002_v33 }
 0x391   :  { %16738 = vmatprep.mubr.msk.f32.mxu1 %vm1150_vm6, %v21859_v29 }
 0x394   :  { %16739 = vmatmul.mubr.msk.f32.gmra.mrb[76].mxu1 %vm1150_vm6, %v21867_v60 }
 0x395   :  { %16741 = vmatprep.mubr.msk.f32.mxu1 %vm1150_vm6, %v21871_v25 }
 0x398   :  { %16742 = vmatmul.mubr.msk.f32.gmra.mrb[78].mxu1 %vm1150_vm6, %v21879_v22 }
 0x399   :  { %16744 = vmatprep.mubr.msk.f32.mxu1 %vm1150_vm6, %v21883_v6 }
 0x39c   :  { %16745 = vmatmul.mubr.msk.f32.gmra.mrb[80].mxu1 %vm1150_vm6, %v21891_v12 }
 0x39d   :  { %16747 = vmatprep.mubr.msk.f32.mxu1 %vm1150_vm6, %v21895_v13 }
 0x3a0   :  { %16748 = vmatmul.mubr.msk.f32.gmra.mrb[82].mxu1 %vm1150_vm6, %v21905_v16 }
 0x3a1   :  { %16750 = vmatprep.mubr.msk.f32.mxu1 %vm1150_vm6, %v21909_v58 }
 0x3a4   :  { %16751 = vmatmul.mubr.msk.f32.gmra.mrb[84].mxu1 %vm1150_vm6, %v21917_v9 }
 0x3a5   :  { %16753 = vmatprep.mubr.msk.f32.mxu1 %vm1150_vm6, %v4805_v5  ;;  %v5016_v5 = vrot.slane %v21770_v14, 2 }
 0x3a7   :  { %v21984_v24 = vsel %vm1505_vm4, %v5016_v5, %v5018_v21 }
 0x3a8   :  { %16754 = vmatmul.mubr.msk.f32.gmra.mrb[86].mxu1 %vm1150_vm6, %v4804_v34  ;;  %v5014_v34 = vrot.slane %v21754_v53, 2  ;;  %24836 = vst [vmem:[#allocation10_spill] sm:$0xff] %v21984_v24 }
 0x3a9   :  { %16760 = vmatprep.mubr.msk.f32.mxu1 %vm1150_vm6, %v21929_v27 }
 0x3aa   :  { %v21972_v20 = vsel %vm1505_vm4, %v5012_v39, %v5014_v34  ;;  %v21976_v1 = vsel %vm1505_vm4, %v5014_v34, %v5016_v5  ;;  %v21988_v39 = vsel %vm1505_vm4, %v5018_v21, %v5020_v62  ;;  %v21993_v34 = vrot.slane %v21819_v49, 2 }
 0x3ab   :  { %24834 = vst [vmem:[#allocation9_spill] sm:$0xff] %v21972_v20  ;;  %24835 = vst [vmem:[#allocation7_spill] sm:$0xff] %v21976_v1  ;;  %v5028_v5 = vrot.slane %v21830_v32, 2  ;;  %v24842_v32 = vld [vmem:[#allocation11_spill] sm:$0xff] }
 0x3ac   :  { %16761 = vmatmul.mubr.msk.f32.vlgmr.msra.gmra.mrb[72].mxu1 %vm1150_vm6, %v21936_v59  ;;  %24837 = vst [vmem:[#allocation12_spill] sm:$0xff] %v21988_v39  ;;  %24838 = vst [vmem:[#allocation13_spill] sm:$0xff] %v21993_v34  ;;  %v22010_v21 = vsel %vm1505_vm4, %v5024_v46, %v21993_v34 }
 0x3ad   :  { %16763 = vmatprep.mubr.msk.f32.mxu1 %vm1150_vm6, %v21940_v47  ;;  %24841 = vst [vmem:[#allocation16_spill] sm:$0xff] %v22010_v21  ;;  %v5029_v19 = vsel %vm1505_vm4, %v21993_v34, %v5028_v5 }
 0x3b0   :  { %16764 = vmatmul.mubr.msk.f32.gmra.mrb[74].mxu1 %vm1150_vm6, %v21948_v28 }
 0x3b1   :  { %16766 = vmatprep.mubr.msk.f32.mxu1 %vm1150_vm6, %v21952_v37 }
 0x3b4   :  { %16767 = vmatmul.mubr.msk.f32.gmra.mrb[76].mxu1 %vm1150_vm6, %v21960_v23 }
 0x3b5   :  { %16769 = vmatprep.mubr.msk.f32.mxu1 %vm1150_vm6, %v21964_v40 }
 0x3b8   :  { %16770 = vmatmul.mubr.msk.f32.gmra.mrb[78].mxu1 %vm1150_vm6, %v21972_v20 }
 0x3b9   :  { %16772 = vmatprep.mubr.msk.f32.mxu1 %vm1150_vm6, %v21976_v1 }
 0x3bc   :  { %16773 = vmatmul.mubr.msk.f32.gmra.mrb[80].mxu1 %vm1150_vm6, %v21984_v24 }
 0x3bd   :  { %16775 = vmatprep.mubr.msk.f32.mxu1 %vm1150_vm6, %v21988_v39 }
 0x3c0   :  { %16776 = vmatmul.mubr.msk.f32.gmra.mrb[82].mxu1 %vm1150_vm6, %v21998_v57 }
 0x3c1   :  { %16778 = vmatprep.mubr.msk.f32.mxu1 %vm1150_vm6, %v22002_v33 }
 0x3c4   :  { %16779 = vmatmul.mubr.msk.f32.gmra.mrb[84].mxu1 %vm1150_vm6, %v22010_v21 }
 0x3c5   :  { %16781 = vmatprep.mubr.msk.f32.mxu1 %vm1150_vm6, %v5029_v19 }
 0x3c8   :  { %16782 = vmatmul.mubr.msk.f32.gmra.mrb[86].mxu1 %vm1150_vm6, %v5028_v5 }
 0x3c9   :  { %17112 = vmatprep.mubr.msk.f32.mxu1 %vm3078_vm8, %v24842_v32 }
 0x47f   :  { %v16762_v62 = vpop.f32.mrb[72].mxu1 }
 0x480   :  { %v5128_v17 = vpop.f32.mrb[73].mxu1 }
 0x481   :  { %v18186_v33 = vpack.c.bf16 %v16762_v62, %v5128_v17 }
 0x483   :  { %v16765_v57 = vpop.f32.mrb[74].mxu1  ;;  %18187 = vmatprep.subr.bf16.mxu0 %v18186_v33 }
 0x484   :  { %v5138_v46 = vpop.f32.mrb[75].mxu1  ;;  %18189 = vmatpush3.bf16.msra.mxu0 %v18186_v33 }
 0x485   :  { %v18190_v39 = vpack.c.bf16 %v16765_v57, %v5138_v46 }
 0x487   :  { %v16768_v24 = vpop.f32.mrb[76].mxu1  ;;  %18191 = vmatprep.subr.bf16.mxu0 %v18190_v39 }
 0x488   :  { %v5148_v34 = vpop.f32.mrb[77].mxu1  ;;  %18193 = vmatpush3.bf16.msra.mxu0 %v18190_v39 }
 0x489   :  { %v18194_v21 = vpack.c.bf16 %v16768_v24, %v5148_v34 }
 0x48b   :  { %v16771_v1 = vpop.f32.mrb[78].mxu1  ;;  %18195 = vmatprep.subr.bf16.mxu0 %v18194_v21 }
 0x48c   :  { %v5158_v19 = vpop.f32.mrb[79].mxu1  ;;  %18197 = vmatpush3.bf16.msra.mxu0 %v18194_v21 }
 0x48d   :  { %v18198_v5 = vpack.c.bf16 %v16771_v1, %v5158_v19 }
 0x48f   :  { %v16774_v20 = vpop.f32.mrb[80].mxu1  ;;  %18199 = vmatprep.subr.bf16.mxu0 %v18198_v5 }
 0x490   :  { %v5168_v32 = vpop.f32.mrb[81].mxu1  ;;  %18201 = vmatpush3.bf16.msra.mxu0 %v18198_v5 }
 0x491   :  { %v18202_v62 = vpack.c.bf16 %v16774_v20, %v5168_v32 }
 0x493   :  { %v16777_v17 = vpop.f32.mrb[82].mxu1  ;;  %18203 = vmatprep.subr.bf16.mxu0 %v18202_v62 }
 0x494   :  { %v5178_v40 = vpop.f32.mrb[83].mxu1  ;;  %18205 = vmatpush3.bf16.msra.mxu0 %v18202_v62 }
 0x495   :  { %v18206_v33 = vpack.c.bf16 %v16777_v17, %v5178_v40 }
 0x497   :  { %v16780_v57 = vpop.f32.mrb[84].mxu1  ;;  %18207 = vmatprep.subr.bf16.mxu0 %v18206_v33 }
 0x498   :  { %v5188_v46 = vpop.f32.mrb[85].mxu1  ;;  %18209 = vmatpush3.bf16.msra.mxu0 %v18206_v33  ;;  %v24853_v33 = vld [vmem:[#allocation3_spill] sm:$0xff] }
 0x499   :  { %v18210_v24 = vpack.c.bf16 %v16780_v57, %v5188_v46 }
 0x49b   :  { %v16783_v39 = vpop.f32.mrb[86].mxu1  ;;  %18211 = vmatprep.subr.bf16.mxu0 %v18210_v24 }
 0x49c   :  { %v5198_v34 = vpop.f32.mrb[87].mxu1  ;;  %18213 = vmatpush3.bf16.msra.mxu0 %v18210_v24 }
 0x49d   :  { %v18214_v1 = vpack.c.bf16 %v16783_v39, %v5198_v34 }
 0x49f   :  { %18216 = vmatprep.subr.msk.bf16.mxu0 %vm21098_vm11, %v18214_v1 }
 0x4a0   :  { %18219 = vmatpush3.bf16.msk.msra.mxu0 %vm21098_vm11, %v18214_v1 }
 0x4a1   :  { %18221 = vmatprep.subr.bf16.mxu0 %v19458_v52 }
 0x4a3   :  { %16817 = vmatmul.mubr.msk.f32.vlgmr.msra.gmra.mrb[80].mxu0 %vm3078_vm8, %v21120_v0 }
 0x4a4   :  { %16819 = vmatprep.mubr.msk.f32.mxu0 %vm3078_vm8, %v21123_v3  ;;  %18223 = vmatpush3.bf16.msra.mxu0 %v19458_v52 }
 0x4a5   :  { %18225 = vmatprep.subr.bf16.mxu0 %v19508_v63 }
 0x4a7   :  { %16820 = vmatmul.mubr.msk.f32.gmra.mrb[82].mxu0 %vm3078_vm8, %v21143_v48 }
 0x4a8   :  { %16822 = vmatprep.mubr.msk.f32.mxu0 %vm3078_vm8, %v21147_v54 }
 0x4ab   :  { %16823 = vmatmul.mubr.msk.f32.gmra.mrb[84].mxu0 %vm3078_vm8, %v21166_v18 }
 0x4ac   :  { %16825 = vmatprep.mubr.msk.f32.mxu0 %vm3078_vm8, %v21169_v56 }
 0x4af   :  { %16826 = vmatmul.mubr.msk.f32.gmra.mrb[86].mxu0 %vm3078_vm8, %v21186_v55 }
 0x4b0   :  { %16832 = vmatprep.mubr.msk.f32.mxu0 %vm1150_vm6, %v21834_v26  ;;  %v14299_v26 = vld [vmem:[%s24742_s1 + $0x278] sm:$0x7] }
 0x4b3   :  { %16833 = vmatmul.mubr.msk.f32.vlgmr.msra.gmra.mrb[88].mxu0 %vm1150_vm6, %v21842_v61  ;;  %v5409_v61 = vrot.slane %v14299_v26, 1 }
 0x4b4   :  { %16835 = vmatprep.mubr.msk.f32.mxu0 %vm1150_vm6, %v21846_v36  ;;  %18227 = vmatpush3.bf16.msra.mxu0 %v19508_v63 }
 0x4b5   :  { %18229 = vmatprep.subr.bf16.mxu0 %v19791_v42  ;;  %v5410_v36 = vsel %vm1118_vm5, %v21900_v43, %v5409_v61  ;;  %v22227_v43 = vld [vmem:[%s24742_s1 + $0x2d8] sm:$0xff] }
 0x4b7   :  { %16836 = vmatmul.mubr.msk.f32.gmra.mrb[90].mxu0 %vm1150_vm6, %v21854_v44  ;;  %v22175_v44 = vld [vmem:[%s24742_s1 + $0x2a0] sm:$0xff] }
 0x4b8   :  { %16838 = vmatprep.mubr.msk.f32.mxu0 %vm1150_vm6, %v21859_v29  ;;  %v24852_v29 = vld [vmem:[#allocation2_spill] sm:$0xff]  ;;  %v6222_v40 = vrot.slane %v22175_v44, 1 }
 0x4bb   :  { %16839 = vmatmul.mubr.msk.f32.gmra.mrb[92].mxu0 %vm1150_vm6, %v21867_v60  ;;  %v22185_v60 = vld [vmem:[%s24742_s1 + $0x2a8] sm:$0xff] }
 0x4bc   :  { %16841 = vmatprep.mubr.msk.f32.mxu0 %vm1150_vm6, %v21871_v25  ;;  %v22190_v25 = vld [vmem:[%s24742_s1 + $0x2b0] sm:$0xff]  ;;  %v6224_v21 = vrot.slane %v22185_v60, 1 }
 0x4bd   :  { %v6226_v19 = vrot.slane %v22190_v25, 1 }
 0x4be   :  { %v6225_v17 = vsel %vm1118_vm5, %v6222_v40, %v6224_v21 }
 0x4bf   :  { %16842 = vmatmul.mubr.msk.f32.gmra.mrb[94].mxu0 %vm1150_vm6, %v21879_v22  ;;  %v22199_v22 = vld [vmem:[%s24742_s1 + $0x2b8] sm:$0xff]  ;;  %v6227_v46 = vsel %vm1118_vm5, %v6224_v21, %v6226_v19 }
 0x4c0   :  { %16844 = vmatprep.mubr.msk.f32.mxu0 %vm1150_vm6, %v21883_v6  ;;  %v22204_v6 = vld [vmem:[%s24742_s1 + $0x2c0] sm:$0xff]  ;;  %v6228_v62 = vrot.slane %v22199_v22, 1 }
 0x4c1   :  { %v6230_v57 = vrot.slane %v22204_v6, 1 }
 0x4c2   :  { %v6229_v39 = vsel %vm1118_vm5, %v6226_v19, %v6228_v62 }
 0x4c3   :  { %16845 = vmatmul.mubr.msk.f32.gmra.mrb[96].mxu0 %vm1150_vm6, %v21891_v12  ;;  %v22213_v12 = vld [vmem:[%s24742_s1 + $0x2c8] sm:$0xff]  ;;  %v6231_v1 = vsel %vm1118_vm5, %v6228_v62, %v6230_v57 }
 0x4c4   :  { %16847 = vmatprep.mubr.msk.f32.mxu0 %vm1150_vm6, %v21895_v13  ;;  %v22218_v13 = vld [vmem:[%s24742_s1 + $0x2d0] sm:$0xff]  ;;  %v6232_v24 = vrot.slane %v22213_v12, 1  ;;  %v6456_v21 = vrot.slane %v22213_v12, 2 }
 0x4c5   :  { %v6234_v34 = vrot.slane %v22218_v13, 1 }
 0x4c7   :  { %16848 = vmatmul.mubr.msk.f32.gmra.mrb[98].mxu0 %vm1150_vm6, %v21905_v16  ;;  %v22232_v16 = vld [vmem:[%s24742_s1 + $0x2e0] sm:$0xff] }
 0x4c8   :  { %16850 = vmatprep.mubr.msk.f32.mxu0 %vm1150_vm6, %v21909_v58  ;;  %v22241_v58 = vld [vmem:[%s24742_s1 + $0x2e8] sm:$0xff]  ;;  %v6462_v62 = vrot.slane %v22232_v16, 2 }
 0x4cb   :  { %16851 = vmatmul.mubr.msk.f32.gmra.mrb[100].mxu0 %vm1150_vm6, %v21917_v9 }
 0x4cc   :  { %16853 = vmatprep.mubr.msk.f32.mxu0 %vm1150_vm6, %v5410_v36  ;;  %v6238_v36 = vrot.slane %v22232_v16, 1 }
 0x4cf   :  { %16854 = vmatmul.mubr.msk.f32.gmra.mrb[102].mxu0 %vm1150_vm6, %v5409_v61  ;;  %v6233_v61 = vsel %vm1118_vm5, %v6230_v57, %v6232_v24 }
 0x4d0   :  { %16860 = vmatprep.mubr.msk.f32.mxu0 %vm1150_vm6, %v21682_v10  ;;  %v24843_v10 = vld [vmem:[#allocation8_spill] sm:$0xff] }
 0x4d3   :  { %16861 = vmatmul.mubr.msk.f32.vlgmr.msra.gmra.mrb[88].mxu0 %vm1150_vm6, %v21690_v31  ;;  %v24844_v31 = vld [vmem:[#allocation9_spill] sm:$0xff] }
 0x4d4   :  { %16863 = vmatprep.mubr.msk.f32.mxu0 %vm1150_vm6, %v21695_v45  ;;  %18231 = vmatpush3.bf16.msra.mxu0 %v19791_v42  ;;  %v24845_v45 = vld [vmem:[#allocation7_spill] sm:$0xff] }
 0x4d5   :  { %18233 = vmatprep.subr.bf16.mxu0 %v19840_v35 }
 0x4d7   :  { %16864 = vmatmul.mubr.msk.f32.gmra.mrb[90].mxu0 %vm1150_vm6, %v21704_v7  ;;  %v24846_v7 = vld [vmem:[#allocation10_spill] sm:$0xff] }
 0x4d8   :  { %16866 = vmatprep.mubr.msk.f32.mxu0 %vm1150_vm6, %v21715_v2  ;;  %v24847_v2 = vld [vmem:[#allocation12_spill] sm:$0xff] }
 0x4db   :  { %16867 = vmatmul.mubr.msk.f32.gmra.mrb[92].mxu0 %vm1150_vm6, %v21726_v38  ;;  %v5794_v38 = vrot.slane %v14299_v26, 2 }
 0x4dc   :  { %16869 = vmatprep.mubr.msk.f32.mxu0 %vm1150_vm6, %v21732_v4  ;;  %v24848_v4 = vld [vmem:[#allocation14_spill] sm:$0xff] }
 0x4df   :  { %16870 = vmatmul.mubr.msk.f32.gmra.mrb[94].mxu0 %vm1150_vm6, %v21748_v30  ;;  %v24849_v30 = vld [vmem:[#allocation15_spill] sm:$0xff] }
 0x4e0   :  { %16872 = vmatprep.mubr.msk.f32.mxu0 %vm1150_vm6, %v21754_v53  ;;  %v24850_v53 = vld [vmem:[#allocation13_spill] sm:$0xff] }
 0x4e3   :  { %16873 = vmatmul.mubr.msk.f32.gmra.mrb[96].mxu0 %vm1150_vm6, %v21770_v14  ;;  %v5795_v14 = vsel %vm1505_vm4, %v24850_v53, %v5794_v38 }
 0x4e4   :  { %16875 = vmatprep.mubr.msk.f32.mxu0 %vm1150_vm6, %v21776_v50  ;;  %v24851_v50 = vld [vmem:[#allocation16_spill] sm:$0xff] }
 0x4e7   :  { %16876 = vmatmul.mubr.msk.f32.gmra.mrb[98].mxu0 %vm1150_vm6, %v21792_v15  ;;  %v22147_v15 = vld [vmem:[%s24742_s1 + $0x280] sm:$0xff] }
 0x4e8   :  { %16878 = vmatprep.mubr.msk.f32.mxu0 %vm1150_vm6, %v21798_v41  ;;  %v22155_v41 = vld [vmem:[%s24742_s1 + $0x288] sm:$0xff]  ;;  %v6215_v9 = vrot.slane %v22147_v15, 1  ;;  %v6439_v53 = vrot.slane %v22147_v15, 2 }
 0x4eb   :  { %16879 = vmatmul.mubr.msk.f32.gmra.mrb[100].mxu0 %vm1150_vm6, %v21813_v8  ;;  %v22160_v8 = vld [vmem:[%s24742_s1 + $0x290] sm:$0xff] }
 0x4ec   :  { %16881 = vmatprep.mubr.msk.f32.mxu0 %vm1150_vm6, %v21819_v49  ;;  %v22169_v49 = vld [vmem:[%s24742_s1 + $0x298] sm:$0xff] }
 0x4ef   :  { %16882 = vmatmul.mubr.msk.f32.gmra.mrb[102].mxu0 %vm1150_vm6, %v14299_v26  ;;  %v6236_v26 = vrot.slane %v22227_v43, 1 }
 0x4f0   :  { %16888 = vmatprep.mubr.msk.f32.mxu0 %vm1150_vm6, %v21929_v27  ;;  %v22247_v27 = vld [vmem:[%s24742_s1 + $0x2f0] sm:$0xff] }
 0x4f1   :  { %v6466_v57 = vrot.slane %v22247_v27, 2 }
 0x4f3   :  { %16889 = vmatmul.mubr.msk.f32.vlgmr.msra.gmra.mrb[88].mxu0 %vm1150_vm6, %v21936_v59  ;;  %v6216_v59 = vrot.slane %v22155_v41, 1 }
 0x4f4   :  { %16891 = vmatprep.mubr.msk.f32.mxu0 %vm1150_vm6, %v21940_v47  ;;  %18235 = vmatpush3.bf16.msra.mxu0 %v19840_v35  ;;  %v6218_v47 = vrot.slane %v22160_v8, 1 }
 0x4f5   :  { %18237 = vmatprep.subr.bf16.mxu0 %v19882_v11 }
 0x4f6   :  { %v6219_v20 = vsel %vm1118_vm5, %v6216_v59, %v6218_v47 }
 0x4f7   :  { %16892 = vmatmul.mubr.msk.f32.gmra.mrb[90].mxu0 %vm1150_vm6, %v21948_v28  ;;  %v22258_v28 = vld [vmem:[%s24742_s1 + $0x2f8] sm:$0x7] }
 0x4f8   :  { %16894 = vmatprep.mubr.msk.f32.mxu0 %vm1150_vm6, %v21952_v37  ;;  %v6220_v37 = vrot.slane %v22169_v49, 1 }
 0x4fa   :  { %v6221_v32 = vsel %vm1118_vm5, %v6218_v47, %v6220_v37  ;;  %v6223_v5 = vsel %vm1118_vm5, %v6220_v37, %v6222_v40  ;;  %v6446_v37 = vrot.slane %v22175_v44, 2 }
 0x4fb   :  { %16895 = vmatmul.mubr.msk.f32.gmra.mrb[92].mxu0 %vm1150_vm6, %v21960_v23  ;;  %v6217_v23 = vsel %vm1118_vm5, %v6215_v9, %v6216_v59  ;;  %v6442_v9 = vrot.slane %v22160_v8, 2  ;;  %v6444_v59 = vrot.slane %v22169_v49, 2 }
 0x4fc   :  { %16897 = vmatprep.mubr.msk.f32.mxu0 %vm1150_vm6, %v24843_v10  ;;  %v6235_v10 = vsel %vm1118_vm5, %v6232_v24, %v6234_v34 }
 0x4ff   :  { %16898 = vmatmul.mubr.msk.f32.gmra.mrb[94].mxu0 %vm1150_vm6, %v24844_v31  ;;  %v6240_v31 = vrot.slane %v22241_v58, 1 }
 0x500   :  { %16900 = vmatprep.mubr.msk.f32.mxu0 %vm1150_vm6, %v24845_v45  ;;  %v6237_v45 = vsel %vm1118_vm5, %v6234_v34, %v6236_v26  ;;  %v22381_v34 = vld [vmem:[%s24742_s1 + $0x318] sm:$0xff] }
 0x503   :  { %16901 = vmatmul.mubr.msk.f32.gmra.mrb[96].mxu0 %vm1150_vm6, %v24846_v7  ;;  %v6242_v7 = vrot.slane %v22247_v27, 1 }
 0x504   :  { %16903 = vmatprep.mubr.msk.f32.mxu0 %vm1150_vm6, %v24847_v2  ;;  %v6239_v2 = vsel %vm1118_vm5, %v6236_v26, %v6238_v36  ;;  %v24855_v26 = vld [vmem:[#allocation5_spill] sm:$0xff] }
 0x507   :  { %16904 = vmatmul.mubr.msk.f32.gmra.mrb[98].mxu0 %vm1150_vm6, %v24848_v4  ;;  %v6241_v4 = vsel %vm1118_vm5, %v6238_v36, %v6240_v31  ;;  %v24856_v36 = vld [vmem:[#allocation6_spill] sm:$0xff] }
 0x508   :  { %16906 = vmatprep.mubr.msk.f32.mxu0 %vm1150_vm6, %v24849_v30  ;;  %v6243_v30 = vsel %vm1118_vm5, %v6240_v31, %v6242_v7 }
 0x50b   :  { %16907 = vmatmul.mubr.msk.f32.gmra.mrb[100].mxu0 %vm1150_vm6, %v24851_v50  ;;  %v6440_v50 = vrot.slane %v22155_v41, 2 }
 0x50c   :  { %16909 = vmatprep.mubr.msk.f32.mxu0 %vm1150_vm6, %v5795_v14 }
 0x50d   :  { %v6441_v47 = vsel %vm1505_vm4, %v6439_v53, %v6440_v50  ;;  %v22420_v53 = vld [vmem:[%s24742_s1 + $0x338] sm:$0xff] }
 0x50f   :  { %16910 = vmatmul.mubr.msk.f32.gmra.mrb[102].mxu0 %vm1150_vm6, %v5794_v38  ;;  %v6244_v38 = vrot.slane %v22258_v28, 1 }
 0x510   :  { %16916 = vmatprep.mubr.msk.f32.mxu0 %vm1150_vm6, %v22147_v15  ;;  %v6443_v15 = vsel %vm1505_vm4, %v6440_v50, %v6442_v9  ;;  %v22426_v50 = vld [vmem:[%s24742_s1 + $0x340] sm:$0xff] }
 0x511   :  { %v6245_v14 = vsel %vm1118_vm5, %v6242_v7, %v6244_v38 }
 0x513   :  { %16917 = vmatmul.mubr.msk.f32.vlgmr.msra.gmra.mrb[88].mxu0 %vm1150_vm6, %v22155_v41  ;;  %v6448_v41 = vrot.slane %v22185_v60, 2 }
 0x514   :  { %16919 = vmatprep.mubr.msk.f32.mxu0 %vm1150_vm6, %v22160_v8  ;;  %18239 = vmatpush3.bf16.msra.mxu0 %v19882_v11  ;;  %v6450_v8 = vrot.slane %v22190_v25, 2 }
 0x515   :  { %18241 = vmatprep.subr.bf16.mxu0 %v24852_v29  ;;  %v6449_v40 = vsel %vm1505_vm4, %v6446_v37, %v6448_v41 }
 0x517   :  { %16920 = vmatmul.mubr.msk.f32.gmra.mrb[90].mxu0 %vm1150_vm6, %v22169_v49  ;;  %v6447_v49 = vsel %vm1505_vm4, %v6444_v59, %v6446_v37  ;;  %v22442_v37 = vld [vmem:[%s24742_s1 + $0x348] sm:$0xff] }
 0x518   :  { %16922 = vmatprep.mubr.msk.f32.mxu0 %vm1150_vm6, %v22175_v44  ;;  %v6452_v44 = vrot.slane %v22199_v22, 2 }
 0x51b   :  { %16923 = vmatmul.mubr.msk.f32.gmra.mrb[92].mxu0 %vm1150_vm6, %v22185_v60  ;;  %v6454_v60 = vrot.slane %v22204_v6, 2 }
 0x51c   :  { %16925 = vmatprep.mubr.msk.f32.mxu0 %vm1150_vm6, %v22190_v25  ;;  %v6451_v25 = vsel %vm1505_vm4, %v6448_v41, %v6450_v8  ;;  %v22448_v41 = vld [vmem:[%s24742_s1 + $0x350] sm:$0xff] }
 0x51d   :  { %v6455_v19 = vsel %vm1505_vm4, %v6452_v44, %v6454_v60 }
 0x51f   :  { %16926 = vmatmul.mubr.msk.f32.gmra.mrb[94].mxu0 %vm1150_vm6, %v22199_v22  ;;  %v6458_v22 = vrot.slane %v22218_v13, 2 }
 0x520   :  { %16928 = vmatprep.mubr.msk.f32.mxu0 %vm1150_vm6, %v22204_v6  ;;  %v6457_v6 = vsel %vm1505_vm4, %v6454_v60, %v6456_v21  ;;  %v22470_v60 = vld [vmem:[%s24742_s1 + $0x360] sm:$0xff] }
 0x523   :  { %16929 = vmatmul.mubr.msk.f32.gmra.mrb[96].mxu0 %vm1150_vm6, %v22213_v12  ;;  %v6459_v12 = vsel %vm1505_vm4, %v6456_v21, %v6458_v22 }
 0x524   :  { %16931 = vmatprep.mubr.msk.f32.mxu0 %vm1150_vm6, %v22218_v13 }
 0x527   :  { %16932 = vmatmul.mubr.msk.f32.gmra.mrb[98].mxu0 %vm1150_vm6, %v22227_v43 }
 0x528   :  { %16934 = vmatprep.mubr.msk.f32.mxu0 %vm1150_vm6, %v22232_v16 }
 0x52b   :  { %16935 = vmatmul.mubr.msk.f32.gmra.mrb[100].mxu0 %vm1150_vm6, %v22241_v58 }
 0x52c   :  { %16937 = vmatprep.mubr.msk.f32.mxu0 %vm1150_vm6, %v22247_v27  ;;  %v22359_v27 = vld [vmem:[%s24742_s1 + $0x300] sm:$0xff] }
 0x52d   :  { %v6889_v21 = vrot.slane %v22359_v27, 1 }
 0x52f   :  { %16938 = vmatmul.mubr.msk.f32.gmra.mrb[102].mxu0 %vm1150_vm6, %v22258_v28 }
 0x530   :  { %16944 = vmatprep.mubr.msk.f32.mxu0 %vm1150_vm6, %v6217_v23  ;;  %v6445_v23 = vsel %vm1505_vm4, %v6442_v9, %v6444_v59 }
 0x533   :  { %16945 = vmatmul.mubr.msk.f32.vlgmr.msra.gmra.mrb[88].mxu0 %vm1150_vm6, %v6219_v20  ;;  %v24854_v20 = vld [vmem:[#allocation4_spill] sm:$0xff] }
 0x534   :  { %16947 = vmatprep.mubr.msk.f32.mxu0 %vm1150_vm6, %v6221_v32  ;;  %18243 = vmatpush3.bf16.msra.mxu0 %v24852_v29  ;;  %v6453_v32 = vsel %vm1505_vm4, %v6450_v8, %v6452_v44  ;;  %v22464_v44 = vld [vmem:[%s24742_s1 + $0x358] sm:$0xff] }
 0x535   :  { %18245 = vmatprep.subr.bf16.mxu0 %v24853_v33 }
 0x537   :  { %16948 = vmatmul.mubr.msk.f32.gmra.mrb[90].mxu0 %vm1150_vm6, %v6223_v5  ;;  %v6460_v5 = vrot.slane %v22227_v43, 2 }
 0x538   :  { %16950 = vmatprep.mubr.msk.f32.mxu0 %vm1150_vm6, %v6225_v17  ;;  %v6464_v17 = vrot.slane %v22241_v58, 2 }
 0x539   :  { %v6461_v13 = vsel %vm1505_vm4, %v6458_v22, %v6460_v5  ;;  %v6463_v43 = vsel %vm1505_vm4, %v6460_v5, %v6462_v62  ;;  %v22502_v5 = vld [vmem:[%s24742_s1 + $0x378] sm:$0x7] }
 0x53a   :  { %v6465_v16 = vsel %vm1505_vm4, %v6462_v62, %v6464_v17  ;;  %v6467_v58 = vsel %vm1505_vm4, %v6464_v17, %v6466_v57 }
 0x53b   :  { %16951 = vmatmul.mubr.msk.f32.gmra.mrb[92].mxu0 %vm1150_vm6, %v6227_v46  ;;  %v6468_v46 = vrot.slane %v22258_v28, 2  ;;  %v22367_v28 = vld [vmem:[%s24742_s1 + $0x308] sm:$0xff] }
 0x53c   :  { %16953 = vmatprep.mubr.msk.f32.mxu0 %vm1150_vm6, %v6229_v39  ;;  %v22372_v39 = vld [vmem:[%s24742_s1 + $0x310] sm:$0xff]  ;;  %v6890_v22 = vrot.slane %v22367_v28, 1 }
 0x53d   :  { %v6469_v24 = vsel %vm1505_vm4, %v6466_v57, %v6468_v46 }
 0x53e   :  { %v6891_v62 = vsel %vm1118_vm5, %v6889_v21, %v6890_v22 }
 0x53f   :  { %16954 = vmatmul.mubr.msk.f32.gmra.mrb[94].mxu0 %vm1150_vm6, %v6231_v1  ;;  %v22387_v1 = vld [vmem:[%s24742_s1 + $0x320] sm:$0xff] }
 0x540   :  { %16956 = vmatprep.mubr.msk.f32.mxu0 %vm1150_vm6, %v6233_v61 }
 0x543   :  { %16957 = vmatmul.mubr.msk.f32.gmra.mrb[96].mxu0 %vm1150_vm6, %v6235_v10 }
 0x544   :  { %16959 = vmatprep.mubr.msk.f32.mxu0 %vm1150_vm6, %v6237_v45  ;;  %v22398_v45 = vld [vmem:[%s24742_s1 + $0x328] sm:$0xff] }
 0x547   :  { %16960 = vmatmul.mubr.msk.f32.gmra.mrb[98].mxu0 %vm1150_vm6, %v6239_v2  ;;  %v22404_v2 = vld [vmem:[%s24742_s1 + $0x330] sm:$0xff] }
 0x548   :  { %16962 = vmatprep.mubr.msk.f32.mxu0 %vm1150_vm6, %v6241_v4 }
 0x54b   :  { %16963 = vmatmul.mubr.msk.f32.gmra.mrb[100].mxu0 %vm1150_vm6, %v6243_v30 }
 0x54c   :  { %16965 = vmatprep.mubr.msk.f32.mxu0 %vm1150_vm6, %v6245_v14 }
 0x54f   :  { %16966 = vmatmul.mubr.msk.f32.gmra.mrb[102].mxu0 %vm1150_vm6, %v6244_v38 }
 0x550   :  { %16972 = vmatprep.mubr.msk.f32.mxu0 %vm1150_vm6, %v6441_v47 }
 0x553   :  { %16973 = vmatmul.mubr.msk.f32.vlgmr.msra.gmra.mrb[88].mxu0 %vm1150_vm6, %v6443_v15 }
 0x554   :  { %16975 = vmatprep.mubr.msk.f32.mxu0 %vm1150_vm6, %v6445_v23  ;;  %18247 = vmatpush3.bf16.msra.mxu0 %v24853_v33 }
 0x555   :  { %18249 = vmatprep.subr.bf16.mxu0 %v24854_v20 }
 0x557   :  { %16976 = vmatmul.mubr.msk.f32.gmra.mrb[90].mxu0 %vm1150_vm6, %v6447_v49 }
 0x558   :  { %16978 = vmatprep.mubr.msk.f32.mxu0 %vm1150_vm6, %v6449_v40 }
 0x55b   :  { %16979 = vmatmul.mubr.msk.f32.gmra.mrb[92].mxu0 %vm1150_vm6, %v6451_v25  ;;  %v22485_v25 = vld [vmem:[%s24742_s1 + $0x368] sm:$0xff] }
 0x55c   :  { %16981 = vmatprep.mubr.msk.f32.mxu0 %vm1150_vm6, %v6453_v32  ;;  %v22491_v32 = vld [vmem:[%s24742_s1 + $0x370] sm:$0xff] }
 0x55f   :  { %16982 = vmatmul.mubr.msk.f32.gmra.mrb[94].mxu0 %vm1150_vm6, %v6455_v19  ;;  %v6892_v19 = vrot.slane %v22372_v39, 1 }
 0x560   :  { %16984 = vmatprep.mubr.msk.f32.mxu0 %vm1150_vm6, %v6457_v6  ;;  %v6894_v6 = vrot.slane %v22381_v34, 1 }
 0x561   :  { %v6893_v17 = vsel %vm1118_vm5, %v6890_v22, %v6892_v19  ;;  %v7114_v22 = vrot.slane %v22367_v28, 2 }
 0x562   :  { %v6895_v57 = vsel %vm1118_vm5, %v6892_v19, %v6894_v6  ;;  %v7116_v19 = vrot.slane %v22372_v39, 2 }
 0x563   :  { %16985 = vmatmul.mubr.msk.f32.gmra.mrb[96].mxu0 %vm1150_vm6, %v6459_v12  ;;  %v6896_v12 = vrot.slane %v22387_v1, 1 }
 0x564   :  { %16987 = vmatprep.mubr.msk.f32.mxu0 %vm1150_vm6, %v6461_v13  ;;  %v6898_v13 = vrot.slane %v22398_v45, 1 }
 0x567   :  { %16988 = vmatmul.mubr.msk.f32.gmra.mrb[98].mxu0 %vm1150_vm6, %v6463_v43  ;;  %v6900_v43 = vrot.slane %v22404_v2, 1 }
 0x568   :  { %16990 = vmatprep.mubr.msk.f32.mxu0 %vm1150_vm6, %v6465_v16  ;;  %v6902_v16 = vrot.slane %v22420_v53, 1 }
 0x56b   :  { %16991 = vmatmul.mubr.msk.f32.gmra.mrb[100].mxu0 %vm1150_vm6, %v6467_v58  ;;  %v6899_v58 = vsel %vm1118_vm5, %v6896_v12, %v6898_v13 }
 0x56c   :  { %16993 = vmatprep.mubr.msk.f32.mxu0 %vm1150_vm6, %v6469_v24  ;;  %v6904_v24 = vrot.slane %v22426_v50, 1 }
 0x56f   :  { %16994 = vmatmul.mubr.msk.f32.gmra.mrb[102].mxu0 %vm1150_vm6, %v6468_v46  ;;  %v6897_v46 = vsel %vm1118_vm5, %v6894_v6, %v6896_v12  ;;  %v7118_v6 = vrot.slane %v22381_v34, 2  ;;  %v7120_v12 = vrot.slane %v22387_v1, 2 }
 0x570   :  { %17000 = vmatprep.mubr.msk.f32.mxu0 %vm1150_vm6, %v22359_v27 }
 0x573   :  { %17001 = vmatmul.mubr.msk.f32.vlgmr.msra.gmra.mrb[88].mxu0 %vm1150_vm6, %v22367_v28  ;;  %v7122_v28 = vrot.slane %v22398_v45, 2 }
 0x574   :  { %17003 = vmatprep.mubr.msk.f32.mxu0 %vm1150_vm6, %v22372_v39  ;;  %18251 = vmatpush3.bf16.msra.mxu0 %v24854_v20  ;;  %v7124_v39 = vrot.slane %v22404_v2, 2 }
 0x575   :  { %18253 = vmatprep.subr.bf16.mxu0 %v24855_v26 }
 0x576   :  { %v16818_v61 = vpop.f32.mrb[80].mxu0 }
 0x577   :  { %17004 = vmatmul.mubr.msk.f32.gmra.mrb[90].mxu0 %vm1150_vm6, %v22381_v34  ;;  %v5332_v10 = vadd.f32 %v16818_v61, %v24856_v36  ;;  %v5292_v31 = vpop.f32.mrb[81].mxu0  ;;  %v6901_v61 = vsel %vm1118_vm5, %v6898_v13, %v6900_v43  ;;  %v7121_v34 = vsel %vm1505_vm4, %v7118_v6, %v7120_v12  ;;  %v7126_v13 = vrot.slane %v22420_v53, 2 }
 0x578   :  { %17006 = vmatprep.mubr.msk.f32.mxu0 %vm1150_vm6, %v22387_v1  ;;  %v5331_v7 = vadd.f32 %v24856_v36, %v5292_v31  ;;  %v6908_v31 = vrot.slane %v22448_v41, 1  ;;  %v7123_v1 = vsel %vm1505_vm4, %v7120_v12, %v7122_v28 }
 0x579   :  { %14277 = vst [vmem:[%s24746_s7 + $0x48] sm:$0xff] %v5332_v10  ;;  %v6903_v10 = vsel %vm1118_vm5, %v6900_v43, %v6902_v16  ;;  %v7130_v43 = vrot.slane %v22442_v37, 2 }
 0x57a   :  { %14276 = vst [vmem:[%s24746_s7 + $0x40] sm:$0xff] %v5331_v7  ;;  %v16821_v38 = vpop.f32.mrb[82].mxu0  ;;  %v6905_v7 = vsel %vm1118_vm5, %v6902_v16, %v6904_v24  ;;  %v7134_v16 = vrot.slane %v22464_v44, 2 }
 0x57b   :  { %17007 = vmatmul.mubr.msk.f32.gmra.mrb[92].mxu0 %vm1150_vm6, %v22398_v45  ;;  %v5334_v4 = vadd.f32 %v16821_v38, %v24856_v36  ;;  %v5302_v30 = vpop.f32.mrb[83].mxu0  ;;  %v6910_v38 = vrot.slane %v22464_v44, 1  ;;  %v7125_v45 = vsel %vm1505_vm4, %v7122_v28, %v7124_v39 }
 0x57c   :  { %17009 = vmatprep.mubr.msk.f32.mxu0 %vm1150_vm6, %v22404_v2  ;;  %v5333_v14 = vadd.f32 %v24856_v36, %v5302_v30  ;;  %v6912_v30 = vrot.slane %v22470_v60, 1  ;;  %v7127_v2 = vsel %vm1505_vm4, %v7124_v39, %v7126_v13 }
 0x57d   :  { %14279 = vst [vmem:[%s24746_s7 + $0x58] sm:$0xff] %v5334_v4 }
 0x57e   :  { %14278 = vst [vmem:[%s24746_s7 + $0x50] sm:$0xff] %v5333_v14  ;;  %v16824_v9 = vpop.f32.mrb[84].mxu0 }
 0x57f   :  { %17010 = vmatmul.mubr.msk.f32.gmra.mrb[94].mxu0 %vm1150_vm6, %v22420_v53  ;;  %v5336_v59 = vadd.f32 %v16824_v9, %v24856_v36  ;;  %v5312_v47 = vpop.f32.mrb[85].mxu0  ;;  %v6914_v9 = vrot.slane %v22485_v25, 1 }
 0x580   :  { %17012 = vmatprep.mubr.msk.f32.mxu0 %vm1150_vm6, %v22426_v50  ;;  %v5335_v15 = vadd.f32 %v24856_v36, %v5312_v47  ;;  %v6916_v47 = vrot.slane %v22491_v32, 1 }
 0x581   :  { %14281 = vst [vmem:[%s24746_s7 + $0x68] sm:$0xff] %v5336_v59  ;;  %v6911_v59 = vsel %vm1118_vm5, %v6908_v31, %v6910_v38 }
 0x582   :  { %14280 = vst [vmem:[%s24746_s7 + $0x60] sm:$0xff] %v5335_v15  ;;  %v16827_v23 = vpop.f32.mrb[86].mxu0  ;;  %v6913_v15 = vsel %vm1118_vm5, %v6910_v38, %v6912_v30 }
 0x583   :  { %17013 = vmatmul.mubr.msk.f32.gmra.mrb[96].mxu0 %vm1150_vm6, %v22442_v37  ;;  %v5338_v8 = vadd.f32 %v16827_v23, %v24856_v36  ;;  %v5322_v49 = vpop.f32.mrb[87].mxu0  ;;  %v6918_v23 = vrot.slane %v22502_v5, 1 }
 0x584   :  { %17015 = vmatprep.mubr.msk.f32.mxu0 %vm1150_vm6, %v22448_v41  ;;  %v5337_v40 = vadd.f32 %v24856_v36, %v5322_v49  ;;  %v6906_v36 = vrot.slane %v22442_v37, 1  ;;  %v6917_v49 = vsel %vm1118_vm5, %v6914_v9, %v6916_v47 }
 0x585   :  { %14283 = vst [vmem:[%s24746_s7 + $0x78] sm:$0x1f] %v5338_v8  ;;  %v6915_v8 = vsel %vm1118_vm5, %v6912_v30, %v6914_v9  ;;  %v6919_v21 = vsel %vm1118_vm5, %v6916_v47, %v6918_v23  ;;  %v22624_v9 = vld [vmem:[%s24742_s1 + $0x418] sm:$0xff]  ;;  %v22632_v47 = vld [vmem:[%s24742_s1 + $0x420] sm:$0xff] }
 0x586   :  { %14282 = vst [vmem:[%s24746_s7 + $0x70] sm:$0xff] %v5337_v40  ;;  %v6907_v4 = vsel %vm1118_vm5, %v6904_v24, %v6906_v36  ;;  %v6909_v14 = vsel %vm1118_vm5, %v6906_v36, %v6908_v31  ;;  %v7113_v40 = vrot.slane %v22359_v27, 2  ;;  %v7117_v27 = vsel %vm1505_vm4, %v7114_v22, %v7116_v19  ;;  %v22608_v31 = vld [vmem:[%s24742_s1 + $0x408] sm:$0xff] }
 0x587   :  { %17016 = vmatmul.mubr.msk.f32.gmra.mrb[98].mxu0 %vm1150_vm6, %v22464_v44  ;;  %v7138_v24 = vrot.slane %v22485_v25, 2  ;;  %v7142_v36 = vrot.slane %v22502_v5, 2 }
 0x588   :  { %17018 = vmatprep.mubr.msk.f32.mxu0 %vm1150_vm6, %v22470_v60 }
 0x58b   :  { %17019 = vmatmul.mubr.msk.f32.gmra.mrb[100].mxu0 %vm1150_vm6, %v22485_v25 }
 0x58c   :  { %17021 = vmatprep.mubr.msk.f32.mxu0 %vm1150_vm6, %v22491_v32 }
 0x58f   :  { %17022 = vmatmul.mubr.msk.f32.gmra.mrb[102].mxu0 %vm1150_vm6, %v22502_v5  ;;  %v22603_v5 = vld [vmem:[%s24742_s1 + $0x400] sm:$0xff] }
 0x590   :  { %17028 = vmatprep.mubr.msk.f32.mxu0 %vm1150_vm6, %v6891_v62  ;;  %v7115_v62 = vsel %vm1505_vm4, %v7113_v40, %v7114_v22  ;;  %v7880_v38 = vrot.slane %v22603_v5, 2 }
 0x593   :  { %17029 = vmatmul.mubr.msk.f32.vlgmr.msra.gmra.mrb[88].mxu0 %vm1150_vm6, %v6893_v17  ;;  %v7119_v17 = vsel %vm1505_vm4, %v7116_v19, %v7118_v6 }
 0x594   :  { %17031 = vmatprep.mubr.msk.f32.mxu0 %vm1150_vm6, %v6895_v57  ;;  %18255 = vmatpush3.bf16.msra.mxu0 %v24855_v26  ;;  %v7128_v57 = vrot.slane %v22426_v50, 2 }
 0x596   :  { %v7129_v53 = vsel %vm1505_vm4, %v7126_v13, %v7128_v57  ;;  %v7131_v50 = vsel %vm1505_vm4, %v7128_v57, %v7130_v43  ;;  %v22686_v57 = vld [vmem:[%s24742_s1 + $0x450] sm:$0xff] }
 0x597   :  { %17032 = vmatmul.mubr.msk.f32.gmra.mrb[90].mxu0 %vm1150_vm6, %v6897_v46  ;;  %v7132_v46 = vrot.slane %v22448_v41, 2 }
 0x598   :  { %17034 = vmatprep.mubr.msk.f32.mxu0 %vm1150_vm6, %v6899_v58  ;;  %v7136_v58 = vrot.slane %v22470_v60, 2 }
 0x599   :  { %v7133_v37 = vsel %vm1505_vm4, %v7130_v43, %v7132_v46  ;;  %v7135_v41 = vsel %vm1505_vm4, %v7132_v46, %v7134_v16 }
 0x59a   :  { %v7137_v44 = vsel %vm1505_vm4, %v7134_v16, %v7136_v58  ;;  %v7139_v60 = vsel %vm1505_vm4, %v7136_v58, %v7138_v24  ;;  %v22696_v16 = vld [vmem:[%s24742_s1 + $0x458] sm:$0xff] }
 0x59b   :  { %17035 = vmatmul.mubr.msk.f32.gmra.mrb[92].mxu0 %vm1150_vm6, %v6901_v61  ;;  %v7140_v61 = vrot.slane %v22491_v32, 2  ;;  %v24857_v32 = vld [vmem:[#allocation11_spill] sm:$0xff] }
 0x59c   :  { %17037 = vmatprep.mubr.msk.f32.mxu0 %vm1150_vm6, %v6903_v10 }
 0x59d   :  { %v7141_v25 = vsel %vm1505_vm4, %v7138_v24, %v7140_v61  ;;  %v7143_v10 = vsel %vm1505_vm4, %v7140_v61, %v7142_v36  ;;  %v7901_v24 = vrot.slane %v22696_v16, 2 }
 0x59f   :  { %17038 = vmatmul.mubr.msk.f32.gmra.mrb[94].mxu0 %vm1150_vm6, %v6905_v7  ;;  %v22613_v7 = vld [vmem:[%s24742_s1 + $0x410] sm:$0xff] }
 0x5a0   :  { %17040 = vmatprep.mubr.msk.f32.mxu0 %vm1150_vm6, %v6907_v4  ;;  %v7881_v4 = vrot.slane %v22608_v31, 2  ;;  %v7883_v30 = vrot.slane %v22613_v7, 2 }
 0x5a3   :  { %17041 = vmatmul.mubr.msk.f32.gmra.mrb[96].mxu0 %vm1150_vm6, %v6909_v14  ;;  %v22619_v14 = vsel %vm1505_vm4, %v7880_v38, %v7881_v4  ;;  %v22722_v38 = vld [vmem:[%s24742_s1 + $0x470] sm:$0xff] }
 0x5a4   :  { %17043 = vmatprep.mubr.msk.f32.mxu0 %vm1150_vm6, %v6911_v59  ;;  %v22627_v59 = vsel %vm1505_vm4, %v7881_v4, %v7883_v30 }
 0x5a7   :  { %17044 = vmatmul.mubr.msk.f32.gmra.mrb[98].mxu0 %vm1150_vm6, %v6913_v15  ;;  %v7885_v15 = vrot.slane %v22624_v9, 2 }
 0x5a8   :  { %17046 = vmatprep.mubr.msk.f32.mxu0 %vm1150_vm6, %v6915_v8 }
 0x5a9   :  { %v22637_v8 = vsel %vm1505_vm4, %v7883_v30, %v7885_v15 }
 0x5ab   :  { %17047 = vmatmul.mubr.msk.f32.gmra.mrb[100].mxu0 %vm1150_vm6, %v6917_v49  ;;  %v22642_v49 = vld [vmem:[%s24742_s1 + $0x428] sm:$0xff] }
 0x5ac   :  { %17049 = vmatprep.mubr.msk.f32.mxu0 %vm1150_vm6, %v6919_v21  ;;  %v22650_v21 = vld [vmem:[%s24742_s1 + $0x430] sm:$0xff]  ;;  %v7889_v22 = vrot.slane %v22642_v49, 2 }
 0x5ad   :  { %v7891_v19 = vrot.slane %v22650_v21, 2 }
 0x5af   :  { %17050 = vmatmul.mubr.msk.f32.gmra.mrb[102].mxu0 %vm1150_vm6, %v6918_v23  ;;  %v7887_v23 = vrot.slane %v22632_v47, 2  ;;  %v22663_v12 = vsel %vm1505_vm4, %v7889_v22, %v7891_v19 }
 0x5b0   :  { %17056 = vmatprep.mubr.msk.f32.mxu0 %vm1150_vm6, %v7115_v62  ;;  %v22660_v62 = vld [vmem:[%s24742_s1 + $0x438] sm:$0xff] }
 0x5b1   :  { %v22645_v40 = vsel %vm1505_vm4, %v7885_v15, %v7887_v23  ;;  %v22655_v6 = vsel %vm1505_vm4, %v7887_v23, %v7889_v22  ;;  %v7893_v28 = vrot.slane %v22660_v62, 2  ;;  %v7907_v15 = vrot.slane %v22722_v38, 2 }
 0x5b3   :  { %17057 = vmatmul.mubr.msk.f32.vlgmr.msra.gmra.mrb[88].mxu0 %vm1150_vm6, %v7117_v27  ;;  %v22668_v27 = vld [vmem:[%s24742_s1 + $0x440] sm:$0xff]  ;;  %v22673_v39 = vsel %vm1505_vm4, %v7891_v19, %v7893_v28  ;;  %v22732_v19 = vld [vmem:[%s24742_s1 + $0x478] sm:$0x7] }
 0x5b4   :  { %17059 = vmatprep.mubr.msk.f32.mxu0 %vm1150_vm6, %v7119_v17  ;;  %v7895_v17 = vrot.slane %v22668_v27, 2 }
 0x5b6   :  { %v22681_v13 = vsel %vm1505_vm4, %v7893_v28, %v7895_v17 }
 0x5b7   :  { %17060 = vmatmul.mubr.msk.f32.gmra.mrb[90].mxu0 %vm1150_vm6, %v7121_v34  ;;  %v22678_v34 = vld [vmem:[%s24742_s1 + $0x448] sm:$0xff] }
 0x5b8   :  { %17062 = vmatprep.mubr.msk.f32.mxu0 %vm1150_vm6, %v7123_v1 }
 0x5bb   :  { %17063 = vmatmul.mubr.msk.f32.gmra.mrb[92].mxu0 %vm1150_vm6, %v7125_v45  ;;  %v7897_v45 = vrot.slane %v22678_v34, 2 }
 0x5bc   :  { %17065 = vmatprep.mubr.msk.f32.mxu0 %vm1150_vm6, %v7127_v2  ;;  %v7899_v2 = vrot.slane %v22686_v57, 2 }
 0x5bf   :  { %17066 = vmatmul.mubr.msk.f32.gmra.mrb[94].mxu0 %vm1150_vm6, %v7129_v53  ;;  %v22691_v53 = vsel %vm1505_vm4, %v7895_v17, %v7897_v45 }
 0x5c0   :  { %17068 = vmatprep.mubr.msk.f32.mxu0 %vm1150_vm6, %v7131_v50  ;;  %v22699_v50 = vsel %vm1505_vm4, %v7897_v45, %v7899_v2 }
 0x5c3   :  { %17069 = vmatmul.mubr.msk.f32.gmra.mrb[96].mxu0 %vm1150_vm6, %v7133_v37  ;;  %v22704_v37 = vld [vmem:[%s24742_s1 + $0x460] sm:$0xff] }
 0x5c4   :  { %17071 = vmatprep.mubr.msk.f32.mxu0 %vm1150_vm6, %v7135_v41  ;;  %v7903_v61 = vrot.slane %v22704_v37, 2 }
 0x5c7   :  { %17072 = vmatmul.mubr.msk.f32.gmra.mrb[98].mxu0 %vm1150_vm6, %v7137_v44 }
 0x5c8   :  { %17074 = vmatprep.mubr.msk.f32.mxu0 %vm1150_vm6, %v7139_v60  ;;  %v22714_v60 = vld [vmem:[%s24742_s1 + $0x468] sm:$0xff] }
 0x5c9   :  { %v7905_v4 = vrot.slane %v22714_v60, 2 }
 0x5cb   :  { %17075 = vmatmul.mubr.msk.f32.gmra.mrb[100].mxu0 %vm1150_vm6, %v7141_v25  ;;  %v22717_v25 = vsel %vm1505_vm4, %v7901_v24, %v7903_v61  ;;  %v22727_v22 = vsel %vm1505_vm4, %v7903_v61, %v7905_v4  ;;  %v22735_v28 = vsel %vm1505_vm4, %v7905_v4, %v7907_v15 }
 0x5cc   :  { %17077 = vmatprep.mubr.msk.f32.mxu0 %vm1150_vm6, %v7143_v10 }
 0x5cf   :  { %17078 = vmatmul.mubr.msk.f32.gmra.mrb[102].mxu0 %vm1150_vm6, %v7142_v36  ;;  %v22709_v36 = vsel %vm1505_vm4, %v7899_v2, %v7901_v24 }
 0x5d0   :  { %17408 = vmatprep.mubr.msk.f32.mxu0 %vm3078_vm8, %v24857_v32 }
 0x686   :  { %v17058_v1 = vpop.f32.mrb[88].mxu0 }
 0x687   :  { %v7242_v43 = vpop.f32.mrb[89].mxu0 }
 0x688   :  { %v18256_v46 = vpack.c.bf16 %v17058_v1, %v7242_v43  ;;  %v7909_v1 = vrot.slane %v22732_v19, 2 }
 0x68a   :  { %v17061_v58 = vpop.f32.mrb[90].mxu0  ;;  %18257 = vmatprep.subr.bf16.mxu1 %v18256_v46  ;;  %v22741_v2 = vsel %vm1505_vm4, %v7907_v15, %v7909_v1 }
 0x68b   :  { %v7252_v41 = vpop.f32.mrb[91].mxu0  ;;  %18259 = vmatpush3.bf16.msra.mxu1 %v18256_v46 }
 0x68c   :  { %v18260_v44 = vpack.c.bf16 %v17061_v58, %v7252_v41 }
 0x68e   :  { %v17064_v10 = vpop.f32.mrb[92].mxu0  ;;  %18261 = vmatprep.subr.bf16.mxu1 %v18260_v44 }
 0x68f   :  { %v7262_v30 = vpop.f32.mrb[93].mxu0  ;;  %18263 = vmatpush3.bf16.msra.mxu1 %v18260_v44 }
 0x690   :  { %v18264_v23 = vpack.c.bf16 %v17064_v10, %v7262_v30 }
 0x692   :  { %v17067_v17 = vpop.f32.mrb[94].mxu0  ;;  %18265 = vmatprep.subr.bf16.mxu1 %v18264_v23 }
 0x693   :  { %v7272_v45 = vpop.f32.mrb[95].mxu0  ;;  %18267 = vmatpush3.bf16.msra.mxu1 %v18264_v23 }
 0x694   :  { %v18268_v43 = vpack.c.bf16 %v17067_v17, %v7272_v45  ;;  %v7495_v45 = vrot.slane %v22603_v5, 1 }
 0x696   :  { %v17070_v46 = vpop.f32.mrb[96].mxu0  ;;  %18269 = vmatprep.subr.bf16.mxu1 %v18268_v43 }
 0x697   :  { %v7282_v58 = vpop.f32.mrb[97].mxu0  ;;  %18271 = vmatpush3.bf16.msra.mxu1 %v18268_v43  ;;  %v7496_v43 = vrot.slane %v22608_v31, 1 }
 0x698   :  { %v18272_v24 = vpack.c.bf16 %v17070_v46, %v7282_v58  ;;  %v7498_v46 = vrot.slane %v22613_v7, 1 }
 0x699   :  { %v7497_v58 = vsel %vm1118_vm5, %v7495_v45, %v7496_v43  ;;  %v7510_v45 = vrot.slane %v22668_v27, 1 }
 0x69a   :  { %v17073_v41 = vpop.f32.mrb[98].mxu0  ;;  %18273 = vmatprep.subr.bf16.mxu1 %v18272_v24 }
 0x69b   :  { %v7292_v61 = vpop.f32.mrb[99].mxu0  ;;  %18275 = vmatpush3.bf16.msra.mxu1 %v18272_v24  ;;  %v7500_v24 = vrot.slane %v22624_v9, 1 }
 0x69c   :  { %v18276_v44 = vpack.c.bf16 %v17073_v41, %v7292_v61  ;;  %v7499_v41 = vsel %vm1118_vm5, %v7496_v43, %v7498_v46  ;;  %v7502_v61 = vrot.slane %v22632_v47, 1 }
 0x69e   :  { %v17076_v10 = vpop.f32.mrb[100].mxu0  ;;  %18277 = vmatprep.subr.bf16.mxu1 %v18276_v44 }
 0x69f   :  { %v7302_v4 = vpop.f32.mrb[101].mxu0  ;;  %18279 = vmatpush3.bf16.msra.mxu1 %v18276_v44  ;;  %v7501_v44 = vsel %vm1118_vm5, %v7498_v46, %v7500_v24  ;;  %v7512_v46 = vrot.slane %v22678_v34, 1 }
 0x6a0   :  { %v18280_v30 = vpack.c.bf16 %v17076_v10, %v7302_v4  ;;  %v7504_v10 = vrot.slane %v22642_v49, 1  ;;  %v7503_v4 = vsel %vm1118_vm5, %v7500_v24, %v7502_v61  ;;  %v7514_v24 = vrot.slane %v22686_v57, 1 }
 0x6a2   :  { %v17079_v23 = vpop.f32.mrb[102].mxu0  ;;  %18281 = vmatprep.subr.bf16.mxu1 %v18280_v30 }
 0x6a3   :  { %v7312_v17 = vpop.f32.mrb[103].mxu0  ;;  %18283 = vmatpush3.bf16.msra.mxu1 %v18280_v30  ;;  %v7506_v30 = vrot.slane %v22650_v21, 1 }
 0x6a4   :  { %v18284_v15 = vpack.c.bf16 %v17079_v23, %v7312_v17  ;;  %v7505_v23 = vsel %vm1118_vm5, %v7502_v61, %v7504_v10  ;;  %v7508_v17 = vrot.slane %v22660_v62, 1  ;;  %v7516_v61 = vrot.slane %v22696_v16, 1 }
 0x6a6   :  { %18286 = vmatprep.subr.msk.bf16.mxu1 %vm21098_vm11, %v18284_v15  ;;  %v7509_v43 = vsel %vm1118_vm5, %v7506_v30, %v7508_v17 }
 0x6a7   :  { %18289 = vmatpush3.bf16.msk.msra.mxu1 %vm21098_vm11, %v18284_v15  ;;  %v7507_v15 = vsel %vm1118_vm5, %v7504_v10, %v7506_v30  ;;  %v7518_v10 = vrot.slane %v22704_v37, 1  ;;  %v7520_v30 = vrot.slane %v22714_v60, 1 }
 0x6a8   :  { %18291 = vmatprep.subr.bf16.mxu1 %v19458_v52 }
 0x6aa   :  { %17113 = vmatmul.mubr.msk.f32.vlgmr.msra.gmra.mrb[88].mxu1 %vm3078_vm8, %v21120_v0 }
 0x6ab   :  { %17115 = vmatprep.mubr.msk.f32.mxu1 %vm3078_vm8, %v21123_v3  ;;  %18293 = vmatpush3.bf16.msra.mxu1 %v19458_v52 }
 0x6ac   :  { %18295 = vmatprep.subr.bf16.mxu1 %v19508_v63 }
 0x6ae   :  { %17116 = vmatmul.mubr.msk.f32.gmra.mrb[90].mxu1 %vm3078_vm8, %v21143_v48 }
 0x6af   :  { %17118 = vmatprep.mubr.msk.f32.mxu1 %vm3078_vm8, %v21147_v54 }
 0x6b2   :  { %17119 = vmatmul.mubr.msk.f32.gmra.mrb[92].mxu1 %vm3078_vm8, %v21166_v18 }
 0x6b3   :  { %17121 = vmatprep.mubr.msk.f32.mxu1 %vm3078_vm8, %v21169_v56 }
 0x6b6   :  { %17122 = vmatmul.mubr.msk.f32.gmra.mrb[94].mxu1 %vm3078_vm8, %v21186_v55 }
 0x6b7   :  { %17128 = vmatprep.mubr.msk.f32.mxu1 %vm1150_vm6, %v7497_v58  ;;  %v7511_v58 = vsel %vm1118_vm5, %v7508_v17, %v7510_v45  ;;  %v7522_v17 = vrot.slane %v22722_v38, 1 }
 0x6ba   :  { %17129 = vmatmul.mubr.msk.f32.vlgmr.msra.gmra.mrb[96].mxu1 %vm1150_vm6, %v7499_v41  ;;  %v7513_v41 = vsel %vm1118_vm5, %v7510_v45, %v7512_v46  ;;  %v7524_v45 = vrot.slane %v22732_v19, 1 }
 0x6bb   :  { %17131 = vmatprep.mubr.msk.f32.mxu1 %vm1150_vm6, %v7501_v44  ;;  %18297 = vmatpush3.bf16.msra.mxu1 %v19508_v63  ;;  %v7515_v44 = vsel %vm1118_vm5, %v7512_v46, %v7514_v24 }
 0x6bc   :  { %18299 = vmatprep.subr.bf16.mxu1 %v19791_v42  ;;  %v7525_v46 = vsel %vm1118_vm5, %v7522_v17, %v7524_v45 }
 0x6be   :  { %17132 = vmatmul.mubr.msk.f32.gmra.mrb[98].mxu1 %vm1150_vm6, %v7503_v4  ;;  %v7517_v4 = vsel %vm1118_vm5, %v7514_v24, %v7516_v61 }
 0x6bf   :  { %17134 = vmatprep.mubr.msk.f32.mxu1 %vm1150_vm6, %v7505_v23  ;;  %v7519_v23 = vsel %vm1118_vm5, %v7516_v61, %v7518_v10 }
 0x6c2   :  { %17135 = vmatmul.mubr.msk.f32.gmra.mrb[100].mxu1 %vm1150_vm6, %v7507_v15  ;;  %v7521_v15 = vsel %vm1118_vm5, %v7518_v10, %v7520_v30 }
 0x6c3   :  { %17137 = vmatprep.mubr.msk.f32.mxu1 %vm1150_vm6, %v7509_v43  ;;  %v7523_v43 = vsel %vm1118_vm5, %v7520_v30, %v7522_v17 }
 0x6c6   :  { %17138 = vmatmul.mubr.msk.f32.gmra.mrb[102].mxu1 %vm1150_vm6, %v7511_v58 }
 0x6c7   :  { %17140 = vmatprep.mubr.msk.f32.mxu1 %vm1150_vm6, %v7513_v41 }
 0x6ca   :  { %17141 = vmatmul.mubr.msk.f32.gmra.mrb[104].mxu1 %vm1150_vm6, %v7515_v44 }
 0x6cb   :  { %17143 = vmatprep.mubr.msk.f32.mxu1 %vm1150_vm6, %v7517_v4 }
 0x6ce   :  { %17144 = vmatmul.mubr.msk.f32.gmra.mrb[106].mxu1 %vm1150_vm6, %v7519_v23 }
 0x6cf   :  { %17146 = vmatprep.mubr.msk.f32.mxu1 %vm1150_vm6, %v7521_v15 }
 0x6d2   :  { %17147 = vmatmul.mubr.msk.f32.gmra.mrb[108].mxu1 %vm1150_vm6, %v7523_v43 }
 0x6d3   :  { %17149 = vmatprep.mubr.msk.f32.mxu1 %vm1150_vm6, %v7525_v46 }
 0x6d6   :  { %17150 = vmatmul.mubr.msk.f32.gmra.mrb[110].mxu1 %vm1150_vm6, %v7524_v45 }
 0x6d7   :  { %17156 = vmatprep.mubr.msk.f32.mxu1 %vm1150_vm6, %v22603_v5  ;;  %v22882_v5 = vld [vmem:[%s24742_s1 + $0x480] sm:$0xff] }
 0x6da   :  { %17157 = vmatmul.mubr.msk.f32.vlgmr.msra.gmra.mrb[96].mxu1 %vm1150_vm6, %v22608_v31  ;;  %v22892_v31 = vld [vmem:[%s24742_s1 + $0x488] sm:$0xff] }
 0x6db   :  { %17159 = vmatprep.mubr.msk.f32.mxu1 %vm1150_vm6, %v22613_v7  ;;  %18301 = vmatpush3.bf16.msra.mxu1 %v19791_v42  ;;  %v22897_v7 = vld [vmem:[%s24742_s1 + $0x490] sm:$0xff] }
 0x6dc   :  { %18303 = vmatprep.subr.bf16.mxu1 %v19840_v35 }
 0x6de   :  { %17160 = vmatmul.mubr.msk.f32.gmra.mrb[98].mxu1 %vm1150_vm6, %v22624_v9  ;;  %v22912_v9 = vld [vmem:[%s24742_s1 + $0x4a0] sm:$0xff] }
 0x6df   :  { %17162 = vmatprep.mubr.msk.f32.mxu1 %vm1150_vm6, %v22632_v47  ;;  %v22927_v47 = vld [vmem:[%s24742_s1 + $0x4b0] sm:$0xff] }
 0x6e2   :  { %17163 = vmatmul.mubr.msk.f32.gmra.mrb[100].mxu1 %vm1150_vm6, %v22642_v49  ;;  %v22941_v49 = vld [vmem:[%s24742_s1 + $0x4c0] sm:$0xff] }
 0x6e3   :  { %17165 = vmatprep.mubr.msk.f32.mxu1 %vm1150_vm6, %v22650_v21  ;;  %v22955_v21 = vld [vmem:[%s24742_s1 + $0x4d0] sm:$0xff] }
 0x6e4   :  { %v8349_v24 = vrot.slane %v22955_v21, 1 }
 0x6e6   :  { %17166 = vmatmul.mubr.msk.f32.gmra.mrb[102].mxu1 %vm1150_vm6, %v22660_v62  ;;  %v22969_v62 = vld [vmem:[%s24742_s1 + $0x4e0] sm:$0xff] }
 0x6e7   :  { %17168 = vmatprep.mubr.msk.f32.mxu1 %vm1150_vm6, %v22668_v27  ;;  %v8330_v27 = vrot.slane %v22882_v5, 1  ;;  %v8353_v10 = vrot.slane %v22969_v62, 1 }
 0x6ea   :  { %17169 = vmatmul.mubr.msk.f32.gmra.mrb[104].mxu1 %vm1150_vm6, %v22678_v34  ;;  %v8331_v34 = vrot.slane %v22892_v31, 1 }
 0x6eb   :  { %17171 = vmatprep.mubr.msk.f32.mxu1 %vm1150_vm6, %v22686_v57  ;;  %v22995_v57 = vld [vmem:[%s24742_s1 + $0x4f8] sm:$0x7] }
 0x6ec   :  { %v8359_v45 = vrot.slane %v22995_v57, 1 }
 0x6ee   :  { %17172 = vmatmul.mubr.msk.f32.gmra.mrb[106].mxu1 %vm1150_vm6, %v22696_v16  ;;  %v8332_v16 = vsel %vm1118_vm5, %v8330_v27, %v8331_v34  ;;  %v8554_v27 = vrot.slane %v22882_v5, 2 }
 0x6ef   :  { %17174 = vmatprep.mubr.msk.f32.mxu1 %vm1150_vm6, %v22704_v37 }
 0x6f2   :  { %17175 = vmatmul.mubr.msk.f32.gmra.mrb[108].mxu1 %vm1150_vm6, %v22714_v60 }
 0x6f3   :  { %17177 = vmatprep.mubr.msk.f32.mxu1 %vm1150_vm6, %v22722_v38 }
 0x6f6   :  { %17178 = vmatmul.mubr.msk.f32.gmra.mrb[110].mxu1 %vm1150_vm6, %v22732_v19 }
 0x6f7   :  { %17184 = vmatprep.mubr.msk.f32.mxu1 %vm1150_vm6, %v22619_v14  ;;  %v22906_v14 = vld [vmem:[%s24742_s1 + $0x498] sm:$0xff] }
 0x6fa   :  { %17185 = vmatmul.mubr.msk.f32.vlgmr.msra.gmra.mrb[96].mxu1 %vm1150_vm6, %v22627_v59  ;;  %v22922_v59 = vld [vmem:[%s24742_s1 + $0x4a8] sm:$0xff] }
 0x6fb   :  { %17187 = vmatprep.mubr.msk.f32.mxu1 %vm1150_vm6, %v22637_v8  ;;  %18305 = vmatpush3.bf16.msra.mxu1 %v19840_v35  ;;  %v22936_v8 = vld [vmem:[%s24742_s1 + $0x4b8] sm:$0xff] }
 0x6fc   :  { %18307 = vmatprep.subr.bf16.mxu1 %v19882_v11 }
 0x6fe   :  { %17188 = vmatmul.mubr.msk.f32.gmra.mrb[98].mxu1 %vm1150_vm6, %v22645_v40  ;;  %v22950_v40 = vld [vmem:[%s24742_s1 + $0x4c8] sm:$0xff] }
 0x6ff   :  { %17190 = vmatprep.mubr.msk.f32.mxu1 %vm1150_vm6, %v22655_v6  ;;  %v22964_v6 = vld [vmem:[%s24742_s1 + $0x4d8] sm:$0xff] }
 0x700   :  { %v8351_v61 = vrot.slane %v22964_v6, 1 }
 0x702   :  { %17191 = vmatmul.mubr.msk.f32.gmra.mrb[100].mxu1 %vm1150_vm6, %v22663_v12  ;;  %v22978_v12 = vld [vmem:[%s24742_s1 + $0x4e8] sm:$0xff]  ;;  %v8352_v23 = vsel %vm1118_vm5, %v8349_v24, %v8351_v61  ;;  %v8354_v15 = vsel %vm1118_vm5, %v8351_v61, %v8353_v10  ;;  %v23118_v61 = vld [vmem:[%s24742_s1 + $0x518] sm:$0xff] }
 0x703   :  { %17193 = vmatprep.mubr.msk.f32.mxu1 %vm1150_vm6, %v22673_v39  ;;  %v22984_v39 = vld [vmem:[%s24742_s1 + $0x4f0] sm:$0xff]  ;;  %v8355_v30 = vrot.slane %v22978_v12, 1 }
 0x704   :  { %v8357_v17 = vrot.slane %v22984_v39, 1 }
 0x705   :  { %v8356_v43 = vsel %vm1118_vm5, %v8353_v10, %v8355_v30 }
 0x706   :  { %17194 = vmatmul.mubr.msk.f32.gmra.mrb[102].mxu1 %vm1150_vm6, %v22681_v13  ;;  %v8333_v13 = vrot.slane %v22897_v7, 1  ;;  %v8358_v46 = vsel %vm1118_vm5, %v8355_v30, %v8357_v17 }
 0x707   :  { %17196 = vmatprep.mubr.msk.f32.mxu1 %vm1150_vm6, %v22691_v53  ;;  %v8335_v53 = vrot.slane %v22906_v14, 1 }
 0x708   :  { %v8334_v37 = vsel %vm1118_vm5, %v8331_v34, %v8333_v13  ;;  %v8360_v34 = vsel %vm1118_vm5, %v8357_v17, %v8359_v45  ;;  %v23140_v17 = vld [vmem:[%s24742_s1 + $0x528] sm:$0xff] }
 0x709   :  { %v8336_v60 = vsel %vm1118_vm5, %v8333_v13, %v8335_v53  ;;  %v8555_v13 = vrot.slane %v22892_v31, 2 }
 0x70a   :  { %17197 = vmatmul.mubr.msk.f32.gmra.mrb[104].mxu1 %vm1150_vm6, %v22699_v50  ;;  %v8337_v50 = vrot.slane %v22912_v9, 1 }
 0x70b   :  { %17199 = vmatprep.mubr.msk.f32.mxu1 %vm1150_vm6, %v22709_v36  ;;  %v8339_v36 = vrot.slane %v22922_v59, 1 }
 0x70c   :  { %v8338_v38 = vsel %vm1118_vm5, %v8335_v53, %v8337_v50  ;;  %v8557_v53 = vrot.slane %v22897_v7, 2 }
 0x70d   :  { %v8340_v19 = vsel %vm1118_vm5, %v8337_v50, %v8339_v36  ;;  %v8556_v50 = vsel %vm1505_vm4, %v8554_v27, %v8555_v13 }
 0x70e   :  { %17200 = vmatmul.mubr.msk.f32.gmra.mrb[106].mxu1 %vm1150_vm6, %v22717_v25  ;;  %v8341_v25 = vrot.slane %v22927_v47, 1 }
 0x70f   :  { %17202 = vmatprep.mubr.msk.f32.mxu1 %vm1150_vm6, %v22727_v22  ;;  %v8343_v22 = vrot.slane %v22936_v8, 1 }
 0x711   :  { %v8344_v58 = vsel %vm1118_vm5, %v8341_v25, %v8343_v22 }
 0x712   :  { %17203 = vmatmul.mubr.msk.f32.gmra.mrb[108].mxu1 %vm1150_vm6, %v22735_v28  ;;  %v8345_v28 = vrot.slane %v22941_v49, 1 }
 0x713   :  { %17205 = vmatprep.mubr.msk.f32.mxu1 %vm1150_vm6, %v22741_v2  ;;  %v8347_v2 = vrot.slane %v22950_v40, 1 }
 0x714   :  { %v8346_v41 = vsel %vm1118_vm5, %v8343_v22, %v8345_v28 }
 0x715   :  { %v8348_v44 = vsel %vm1118_vm5, %v8345_v28, %v8347_v2  ;;  %v8350_v4 = vsel %vm1118_vm5, %v8347_v2, %v8349_v24  ;;  %v8577_v28 = vrot.slane %v22969_v62, 2  ;;  %v8581_v2 = vrot.slane %v22984_v39, 2 }
 0x716   :  { %17206 = vmatmul.mubr.msk.f32.gmra.mrb[110].mxu1 %vm1150_vm6, %v7909_v1  ;;  %v8342_v1 = vsel %vm1118_vm5, %v8339_v36, %v8341_v25  ;;  %v8571_v25 = vrot.slane %v22950_v40, 2 }
 0x717   :  { %17212 = vmatprep.mubr.msk.f32.mxu1 %vm1150_vm6, %v22882_v5  ;;  %v8558_v5 = vsel %vm1505_vm4, %v8555_v13, %v8557_v53 }
 0x71a   :  { %17213 = vmatmul.mubr.msk.f32.vlgmr.msra.gmra.mrb[96].mxu1 %vm1150_vm6, %v22892_v31  ;;  %v8563_v31 = vrot.slane %v22922_v59, 2 }
 0x71b   :  { %17215 = vmatprep.mubr.msk.f32.mxu1 %vm1150_vm6, %v22897_v7  ;;  %18309 = vmatpush3.bf16.msra.mxu1 %v19882_v11  ;;  %v8565_v7 = vrot.slane %v22927_v47, 2 }
 0x71c   :  { %18311 = vmatprep.subr.bf16.mxu1 %v24852_v29 }
 0x71e   :  { %17216 = vmatmul.mubr.msk.f32.gmra.mrb[98].mxu1 %vm1150_vm6, %v22906_v14 }
 0x71f   :  { %17218 = vmatprep.mubr.msk.f32.mxu1 %vm1150_vm6, %v22912_v9 }
 0x722   :  { %17219 = vmatmul.mubr.msk.f32.gmra.mrb[100].mxu1 %vm1150_vm6, %v22922_v59  ;;  %v8569_v59 = vrot.slane %v22941_v49, 2 }
 0x723   :  { %17221 = vmatprep.mubr.msk.f32.mxu1 %vm1150_vm6, %v22927_v47  ;;  %v8566_v47 = vsel %vm1505_vm4, %v8563_v31, %v8565_v7 }
 0x726   :  { %17222 = vmatmul.mubr.msk.f32.gmra.mrb[102].mxu1 %vm1150_vm6, %v22936_v8 }
 0x727   :  { %17224 = vmatprep.mubr.msk.f32.mxu1 %vm1150_vm6, %v22941_v49  ;;  %v8572_v49 = vsel %vm1505_vm4, %v8569_v59, %v8571_v25 }
 0x72a   :  { %17225 = vmatmul.mubr.msk.f32.gmra.mrb[104].mxu1 %vm1150_vm6, %v22950_v40 }
 0x72b   :  { %17227 = vmatprep.mubr.msk.f32.mxu1 %vm1150_vm6, %v22955_v21 }
 0x72e   :  { %17228 = vmatmul.mubr.msk.f32.gmra.mrb[106].mxu1 %vm1150_vm6, %v22964_v6 }
 0x72f   :  { %17230 = vmatprep.mubr.msk.f32.mxu1 %vm1150_vm6, %v22969_v62 }
 0x732   :  { %17231 = vmatmul.mubr.msk.f32.gmra.mrb[108].mxu1 %vm1150_vm6, %v22978_v12 }
 0x733   :  { %17233 = vmatprep.mubr.msk.f32.mxu1 %vm1150_vm6, %v22984_v39  ;;  %v23096_v39 = vld [vmem:[%s24742_s1 + $0x500] sm:$0xff] }
 0x736   :  { %17234 = vmatmul.mubr.msk.f32.gmra.mrb[110].mxu1 %vm1150_vm6, %v22995_v57 }
 0x737   :  { %17240 = vmatprep.mubr.msk.f32.mxu1 %vm1150_vm6, %v8332_v16  ;;  %v8559_v16 = vrot.slane %v22906_v14, 2 }
 0x739   :  { %v8560_v36 = vsel %vm1505_vm4, %v8557_v53, %v8559_v16  ;;  %v23168_v53 = vld [vmem:[%s24742_s1 + $0x540] sm:$0xff] }
 0x73a   :  { %17241 = vmatmul.mubr.msk.f32.vlgmr.msra.gmra.mrb[96].mxu1 %vm1150_vm6, %v8334_v37  ;;  %v8561_v37 = vrot.slane %v22912_v9, 2  ;;  %v8567_v9 = vrot.slane %v22936_v8, 2  ;;  %v8573_v8 = vrot.slane %v22955_v21, 2 }
 0x73b   :  { %17243 = vmatprep.mubr.msk.f32.mxu1 %vm1150_vm6, %v8336_v60  ;;  %18313 = vmatpush3.bf16.msra.mxu1 %v24852_v29 }
 0x73c   :  { %18315 = vmatprep.subr.bf16.mxu1 %v24853_v33  ;;  %v8562_v14 = vsel %vm1505_vm4, %v8559_v16, %v8561_v37  ;;  %v8564_v60 = vsel %vm1505_vm4, %v8561_v37, %v8563_v31  ;;  %v8570_v22 = vsel %vm1505_vm4, %v8567_v9, %v8569_v59  ;;  %v8574_v40 = vsel %vm1505_vm4, %v8571_v25, %v8573_v8  ;;  %v23227_v25 = vld [vmem:[%s24742_s1 + $0x568] sm:$0xff] }
 0x73e   :  { %17244 = vmatmul.mubr.msk.f32.gmra.mrb[98].mxu1 %vm1150_vm6, %v8338_v38  ;;  %v8568_v38 = vsel %vm1505_vm4, %v8565_v7, %v8567_v9 }
 0x73f   :  { %17246 = vmatprep.mubr.msk.f32.mxu1 %vm1150_vm6, %v8340_v19  ;;  %v8575_v19 = vrot.slane %v22964_v6, 2 }
 0x741   :  { %v8576_v21 = vsel %vm1505_vm4, %v8573_v8, %v8575_v19  ;;  %v8578_v6 = vsel %vm1505_vm4, %v8575_v19, %v8577_v28  ;;  %v23233_v8 = vld [vmem:[%s24742_s1 + $0x570] sm:$0xff] }
 0x742   :  { %17247 = vmatmul.mubr.msk.f32.gmra.mrb[100].mxu1 %vm1150_vm6, %v8342_v1  ;;  %v8579_v1 = vrot.slane %v22978_v12, 2 }
 0x743   :  { %17249 = vmatprep.mubr.msk.f32.mxu1 %vm1150_vm6, %v8344_v58  ;;  %v8583_v58 = vrot.slane %v22995_v57, 2  ;;  %v23104_v57 = vld [vmem:[%s24742_s1 + $0x508] sm:$0xff] }
 0x744   :  { %v8580_v62 = vsel %vm1505_vm4, %v8577_v28, %v8579_v1  ;;  %v8582_v12 = vsel %vm1505_vm4, %v8579_v1, %v8581_v2  ;;  %v9009_v28 = vrot.slane %v23118_v61, 1 }
 0x745   :  { %v8584_v24 = vsel %vm1505_vm4, %v8581_v2, %v8583_v58  ;;  %v9013_v2 = vrot.slane %v23140_v17, 1 }
 0x746   :  { %17250 = vmatmul.mubr.msk.f32.gmra.mrb[102].mxu1 %vm1150_vm6, %v8346_v41  ;;  %v23109_v41 = vld [vmem:[%s24742_s1 + $0x510] sm:$0xff] }
 0x747   :  { %17252 = vmatprep.mubr.msk.f32.mxu1 %vm1150_vm6, %v8348_v44  ;;  %v23124_v44 = vld [vmem:[%s24742_s1 + $0x520] sm:$0xff]  ;;  %v9007_v19 = vrot.slane %v23109_v41, 1 }
 0x748   :  { %v9011_v1 = vrot.slane %v23124_v44, 1 }
 0x74a   :  { %17253 = vmatmul.mubr.msk.f32.gmra.mrb[104].mxu1 %vm1150_vm6, %v8350_v4  ;;  %v23132_v4 = vld [vmem:[%s24745_s5] ss:$0 sm:$0xff] }
 0x74b   :  { %17255 = vmatprep.mubr.msk.f32.mxu1 %vm1150_vm6, %v8352_v23  ;;  %24858 = vst [vmem:[#allocation8_spill] sm:$0xff] %v23132_v4 }
 0x74e   :  { %17256 = vmatmul.mubr.msk.f32.gmra.mrb[106].mxu1 %vm1150_vm6, %v8354_v15 }
 0x74f   :  { %17258 = vmatprep.mubr.msk.f32.mxu1 %vm1150_vm6, %v8356_v43 }
 0x752   :  { %17259 = vmatmul.mubr.msk.f32.gmra.mrb[108].mxu1 %vm1150_vm6, %v8358_v46 }
 0x753   :  { %17261 = vmatprep.mubr.msk.f32.mxu1 %vm1150_vm6, %v8360_v34  ;;  %v23162_v34 = vld [vmem:[%s24742_s1 + $0x538] sm:$0xff] }
 0x756   :  { %17262 = vmatmul.mubr.msk.f32.gmra.mrb[110].mxu1 %vm1150_vm6, %v8359_v45  ;;  %v23146_v45 = vld [vmem:[%s24742_s1 + $0x530] sm:$0xff] }
 0x757   :  { %17268 = vmatprep.mubr.msk.f32.mxu1 %vm1150_vm6, %v8556_v50 }
 0x75a   :  { %17269 = vmatmul.mubr.msk.f32.vlgmr.msra.gmra.mrb[96].mxu1 %vm1150_vm6, %v8558_v5  ;;  %v23184_v5 = vld [vmem:[%s24742_s1 + $0x548] sm:$0xff] }
 0x75b   :  { %17271 = vmatprep.mubr.msk.f32.mxu1 %vm1150_vm6, %v8560_v36  ;;  %18317 = vmatpush3.bf16.msra.mxu1 %v24853_v33  ;;  %v23190_v36 = vld [vmem:[%s24742_s1 + $0x550] sm:$0xff] }
 0x75c   :  { %18319 = vmatprep.subr.bf16.mxu1 %v24854_v20 }
 0x75e   :  { %17272 = vmatmul.mubr.msk.f32.gmra.mrb[98].mxu1 %vm1150_vm6, %v8562_v14 }
 0x75f   :  { %17274 = vmatprep.mubr.msk.f32.mxu1 %vm1150_vm6, %v8564_v60  ;;  %v23206_v60 = vld [vmem:[%s24742_s1 + $0x558] sm:$0xff] }
 0x762   :  { %17275 = vmatmul.mubr.msk.f32.gmra.mrb[100].mxu1 %vm1150_vm6, %v8566_v47  ;;  %v23212_v47 = vld [vmem:[%s24742_s1 + $0x560] sm:$0xff] }
 0x763   :  { %17277 = vmatprep.mubr.msk.f32.mxu1 %vm1150_vm6, %v8568_v38  ;;  %v9004_v38 = vrot.slane %v23096_v39, 1 }
 0x766   :  { %17278 = vmatmul.mubr.msk.f32.gmra.mrb[102].mxu1 %vm1150_vm6, %v8570_v22  ;;  %v9005_v22 = vrot.slane %v23104_v57, 1 }
 0x767   :  { %17280 = vmatprep.mubr.msk.f32.mxu1 %vm1150_vm6, %v8572_v49  ;;  %v23244_v49 = vld [vmem:[%s24742_s1 + $0x578] sm:$0x7] }
 0x76a   :  { %17281 = vmatmul.mubr.msk.f32.gmra.mrb[104].mxu1 %vm1150_vm6, %v8574_v40  ;;  %v23248_v40 = vsel %vm1118_vm5, %v9004_v38, %v9005_v22 }
 0x76b   :  { %17283 = vmatprep.mubr.msk.f32.mxu1 %vm1150_vm6, %v8576_v21  ;;  %v23256_v21 = vsel %vm1118_vm5, %v9005_v22, %v9007_v19  ;;  %v9228_v22 = vrot.slane %v23096_v39, 2 }
 0x76e   :  { %17284 = vmatmul.mubr.msk.f32.gmra.mrb[106].mxu1 %vm1150_vm6, %v8578_v6  ;;  %v23260_v6 = vsel %vm1118_vm5, %v9007_v19, %v9009_v28 }
 0x76f   :  { %17286 = vmatprep.mubr.msk.f32.mxu1 %vm1150_vm6, %v8580_v62  ;;  %v23268_v62 = vsel %vm1118_vm5, %v9009_v28, %v9011_v1  ;;  %v9229_v28 = vrot.slane %v23104_v57, 2 }
 0x772   :  { %17287 = vmatmul.mubr.msk.f32.gmra.mrb[108].mxu1 %vm1150_vm6, %v8582_v12  ;;  %v9017_v12 = vrot.slane %v23162_v34, 1 }
 0x773   :  { %17289 = vmatprep.mubr.msk.f32.mxu1 %vm1150_vm6, %v8584_v24  ;;  %v23273_v24 = vsel %vm1118_vm5, %v9011_v1, %v9013_v2  ;;  %v9231_v1 = vrot.slane %v23109_v41, 2 }
 0x776   :  { %17290 = vmatmul.mubr.msk.f32.gmra.mrb[110].mxu1 %vm1150_vm6, %v8583_v58  ;;  %v9015_v58 = vrot.slane %v23146_v45, 1 }
 0x777   :  { %17296 = vmatprep.mubr.msk.f32.mxu1 %vm1150_vm6, %v23096_v39 }
 0x77a   :  { %17297 = vmatmul.mubr.msk.f32.vlgmr.msra.gmra.mrb[96].mxu1 %vm1150_vm6, %v23104_v57 }
 0x77b   :  { %17299 = vmatprep.mubr.msk.f32.mxu1 %vm1150_vm6, %v23109_v41  ;;  %18321 = vmatpush3.bf16.msra.mxu1 %v24854_v20  ;;  %v9253_v20 = vrot.slane %v23227_v25, 2 }
 0x77c   :  { %18323 = vmatprep.subr.bf16.mxu1 %v24855_v26 }
 0x77d   :  { %v17114_v10 = vpop.f32.mrb[88].mxu1 }
 0x77e   :  { %17300 = vmatmul.mubr.msk.f32.gmra.mrb[98].mxu1 %vm1150_vm6, %v23118_v61  ;;  %v7446_v30 = vadd.f32 %v23132_v4, %v17114_v10  ;;  %v7406_v23 = vpop.f32.mrb[89].mxu1  ;;  %v9019_v10 = vrot.slane %v23168_v53, 1 }
 0x77f   :  { %17302 = vmatprep.mubr.msk.f32.mxu1 %vm1150_vm6, %v23124_v44  ;;  %v7445_v15 = vadd.f32 %v23132_v4, %v7406_v23  ;;  %v9021_v23 = vrot.slane %v23184_v5, 1 }
 0x780   :  { %14486 = vst [vmem:[%s24746_s7 + $0x88] sm:$0xff] %v7446_v30  ;;  %v23281_v30 = vsel %vm1118_vm5, %v9013_v2, %v9015_v58  ;;  %v9233_v2 = vrot.slane %v23118_v61, 2 }
 0x781   :  { %14485 = vst [vmem:[%s24746_s7 + $0x80] sm:$0xff] %v7445_v15  ;;  %v17117_v43 = vpop.f32.mrb[90].mxu1  ;;  %v23285_v15 = vsel %vm1118_vm5, %v9015_v58, %v9017_v12  ;;  %v23343_v58 = vsel %vm1505_vm4, %v9228_v22, %v9229_v28  ;;  %v9243_v22 = vrot.slane %v23168_v53, 2 }
 0x782   :  { %17303 = vmatmul.mubr.msk.f32.gmra.mrb[100].mxu1 %vm1150_vm6, %v23140_v17  ;;  %v7448_v46 = vadd.f32 %v23132_v4, %v17117_v43  ;;  %v7416_v27 = vpop.f32.mrb[91].mxu1  ;;  %v9023_v43 = vrot.slane %v23190_v36, 1 }
 0x783   :  { %17305 = vmatprep.mubr.msk.f32.mxu1 %vm1150_vm6, %v23146_v45  ;;  %v7447_v13 = vadd.f32 %v23132_v4, %v7416_v27  ;;  %v9025_v27 = vrot.slane %v23206_v60, 1 }
 0x784   :  { %14488 = vst [vmem:[%s24746_s7 + $0x98] sm:$0xff] %v7448_v46  ;;  %v23293_v46 = vsel %vm1118_vm5, %v9017_v12, %v9019_v10  ;;  %v9235_v12 = vrot.slane %v23124_v44, 2 }
 0x785   :  { %14487 = vst [vmem:[%s24746_s7 + $0x90] sm:$0xff] %v7447_v13  ;;  %v17120_v16 = vpop.f32.mrb[92].mxu1  ;;  %v23297_v13 = vsel %vm1118_vm5, %v9019_v10, %v9021_v23  ;;  %v23350_v10 = vsel %vm1505_vm4, %v9229_v28, %v9231_v1  ;;  %v9245_v28 = vrot.slane %v23184_v5, 2 }
 0x786   :  { %17306 = vmatmul.mubr.msk.f32.gmra.mrb[102].mxu1 %vm1150_vm6, %v23162_v34  ;;  %v7450_v50 = vadd.f32 %v23132_v4, %v17120_v16  ;;  %v7426_v37 = vpop.f32.mrb[93].mxu1  ;;  %v9027_v16 = vrot.slane %v23212_v47, 1 }
 0x787   :  { %17308 = vmatprep.mubr.msk.f32.mxu1 %vm1150_vm6, %v23168_v53  ;;  %v7449_v31 = vadd.f32 %v23132_v4, %v7426_v37  ;;  %v9029_v37 = vrot.slane %v23227_v25, 1 }
 0x788   :  { %14490 = vst [vmem:[%s24746_s7 + $0xa8] sm:$0xff] %v7450_v50  ;;  %v23305_v50 = vsel %vm1118_vm5, %v9021_v23, %v9023_v43  ;;  %v9237_v23 = vrot.slane %v23140_v17, 2 }
 0x789   :  { %14489 = vst [vmem:[%s24746_s7 + $0xa0] sm:$0xff] %v7449_v31  ;;  %v17123_v7 = vpop.f32.mrb[94].mxu1  ;;  %v23309_v31 = vsel %vm1118_vm5, %v9023_v43, %v9025_v27  ;;  %v23354_v43 = vsel %vm1505_vm4, %v9231_v1, %v9233_v2 }
 0x78a   :  { %17309 = vmatmul.mubr.msk.f32.gmra.mrb[104].mxu1 %vm1150_vm6, %v23184_v5  ;;  %v7452_v14 = vadd.f32 %v23132_v4, %v17123_v7  ;;  %v7436_v9 = vpop.f32.mrb[95].mxu1  ;;  %v23314_v7 = vrot.slane %v23233_v8, 1 }
 0x78b   :  { %17311 = vmatprep.mubr.msk.f32.mxu1 %vm1150_vm6, %v23190_v36  ;;  %v7451_v59 = vadd.f32 %v23132_v4, %v7436_v9  ;;  %v9033_v9 = vrot.slane %v23244_v49, 1  ;;  %v9249_v4 = vrot.slane %v23206_v60, 2 }
 0x78c   :  { %14492 = vst [vmem:[%s24746_s7 + $0xb8] sm:$0x1f] %v7452_v14  ;;  %v23319_v14 = vsel %vm1118_vm5, %v9025_v27, %v9027_v16  ;;  %v23331_v38 = vsel %vm1118_vm5, %v9029_v37, %v23314_v7  ;;  %v9239_v27 = vrot.slane %v23146_v45, 2 }
 0x78d   :  { %14491 = vst [vmem:[%s24746_s7 + $0xb0] sm:$0xff] %v7451_v59  ;;  %v23323_v59 = vsel %vm1118_vm5, %v9027_v16, %v9029_v37  ;;  %v9034_v19 = vsel %vm1118_vm5, %v23314_v7, %v9033_v9  ;;  %v23362_v16 = vsel %vm1505_vm4, %v9233_v2, %v9235_v12  ;;  %v9241_v37 = vrot.slane %v23162_v34, 2 }
 0x78e   :  { %17312 = vmatmul.mubr.msk.f32.gmra.mrb[106].mxu1 %vm1150_vm6, %v23206_v60  ;;  %v9247_v2 = vrot.slane %v23190_v36, 2 }
 0x78f   :  { %17314 = vmatprep.mubr.msk.f32.mxu1 %vm1150_vm6, %v23212_v47  ;;  %v23378_v1 = vsel %vm1505_vm4, %v9239_v27, %v9241_v37 }
 0x790   :  { %24859 = vst [vmem:[#allocation9_spill] sm:$0xff] %v23378_v1 }
 0x792   :  { %17315 = vmatmul.mubr.msk.f32.gmra.mrb[108].mxu1 %vm1150_vm6, %v23227_v25 }
 0x793   :  { %17317 = vmatprep.mubr.msk.f32.mxu1 %vm1150_vm6, %v23233_v8 }
 0x796   :  { %17318 = vmatmul.mubr.msk.f32.gmra.mrb[110].mxu1 %vm1150_vm6, %v23244_v49 }
 0x797   :  { %17324 = vmatprep.mubr.msk.f32.mxu1 %vm1150_vm6, %v23248_v40 }
 0x79a   :  { %17325 = vmatmul.mubr.msk.f32.vlgmr.msra.gmra.mrb[96].mxu1 %vm1150_vm6, %v23256_v21 }
 0x79b   :  { %17327 = vmatprep.mubr.msk.f32.mxu1 %vm1150_vm6, %v23260_v6  ;;  %18325 = vmatpush3.bf16.msra.mxu1 %v24855_v26  ;;  %v23398_v26 = vsel %vm1505_vm4, %v9245_v28, %v9247_v2 }
 0x79c   :  { %24862 = vst [vmem:[#allocation12_spill] sm:$0xff] %v23398_v26 }
 0x79e   :  { %17328 = vmatmul.mubr.msk.f32.gmra.mrb[98].mxu1 %vm1150_vm6, %v23268_v62 }
 0x79f   :  { %17330 = vmatprep.mubr.msk.f32.mxu1 %vm1150_vm6, %v23273_v24 }
 0x7a2   :  { %17331 = vmatmul.mubr.msk.f32.gmra.mrb[100].mxu1 %vm1150_vm6, %v23281_v30 }
 0x7a3   :  { %17333 = vmatprep.mubr.msk.f32.mxu1 %vm1150_vm6, %v23285_v15 }
 0x7a6   :  { %17334 = vmatmul.mubr.msk.f32.gmra.mrb[102].mxu1 %vm1150_vm6, %v23293_v46 }
 0x7a7   :  { %17336 = vmatprep.mubr.msk.f32.mxu1 %vm1150_vm6, %v23297_v13 }
 0x7aa   :  { %17337 = vmatmul.mubr.msk.f32.gmra.mrb[104].mxu1 %vm1150_vm6, %v23305_v50 }
 0x7ab   :  { %17339 = vmatprep.mubr.msk.f32.mxu1 %vm1150_vm6, %v23309_v31 }
 0x7ae   :  { %17340 = vmatmul.mubr.msk.f32.gmra.mrb[106].mxu1 %vm1150_vm6, %v23319_v14 }
 0x7af   :  { %17342 = vmatprep.mubr.msk.f32.mxu1 %vm1150_vm6, %v23323_v59 }
 0x7b2   :  { %17343 = vmatmul.mubr.msk.f32.gmra.mrb[108].mxu1 %vm1150_vm6, %v23331_v38 }
 0x7b3   :  { %17345 = vmatprep.mubr.msk.f32.mxu1 %vm1150_vm6, %v9034_v19  ;;  %v23374_v19 = vsel %vm1505_vm4, %v9237_v23, %v9239_v27  ;;  %v9251_v27 = vrot.slane %v23212_v47, 2 }
 0x7b5   :  { %v23412_v33 = vsel %vm1505_vm4, %v9249_v4, %v9251_v27  ;;  %v23416_v29 = vsel %vm1505_vm4, %v9251_v27, %v9253_v20 }
 0x7b6   :  { %17346 = vmatmul.mubr.msk.f32.gmra.mrb[110].mxu1 %vm1150_vm6, %v9033_v9  ;;  %v23366_v9 = vsel %vm1505_vm4, %v9235_v12, %v9237_v23  ;;  %v23386_v12 = vsel %vm1505_vm4, %v9241_v37, %v9243_v22  ;;  %v23390_v23 = vsel %vm1505_vm4, %v9243_v22, %v9245_v28  ;;  %v23402_v37 = vsel %vm1505_vm4, %v9247_v2, %v9249_v4 }
 0x7b7   :  { %17352 = vmatprep.mubr.msk.f32.mxu1 %vm1150_vm6, %v23343_v58  ;;  %24860 = vst [vmem:[#allocation7_spill] sm:$0xff] %v23386_v12  ;;  %24861 = vst [vmem:[#allocation10_spill] sm:$0xff] %v23390_v23  ;;  %v23407_v22 = vrot.slane %v23233_v8, 2  ;;  %v9257_v28 = vrot.slane %v23244_v49, 2 }
 0x7b8   :  { %24863 = vst [vmem:[#allocation14_spill] sm:$0xff] %v23402_v37  ;;  %24865 = vst [vmem:[#allocation13_spill] sm:$0xff] %v23412_v33 }
 0x7b9   :  { %24864 = vst [vmem:[#allocation15_spill] sm:$0xff] %v23407_v22  ;;  %24866 = vst [vmem:[#allocation16_spill] sm:$0xff] %v23416_v29  ;;  %v23424_v2 = vsel %vm1505_vm4, %v9253_v20, %v23407_v22 }
 0x7ba   :  { %17353 = vmatmul.mubr.msk.f32.vlgmr.msra.gmra.mrb[96].mxu1 %vm1150_vm6, %v23350_v10  ;;  %24867 = vst [vmem:[#allocation6_spill] sm:$0xff] %v23424_v2 }
 0x7bb   :  { %17355 = vmatprep.mubr.msk.f32.mxu1 %vm1150_vm6, %v23354_v43 }
 0x7be   :  { %17356 = vmatmul.mubr.msk.f32.gmra.mrb[98].mxu1 %vm1150_vm6, %v23362_v16 }
 0x7bf   :  { %17358 = vmatprep.mubr.msk.f32.mxu1 %vm1150_vm6, %v23366_v9 }
 0x7c2   :  { %17359 = vmatmul.mubr.msk.f32.gmra.mrb[100].mxu1 %vm1150_vm6, %v23374_v19 }
 0x7c3   :  { %17361 = vmatprep.mubr.msk.f32.mxu1 %vm1150_vm6, %v23378_v1 }
 0x7c6   :  { %17362 = vmatmul.mubr.msk.f32.gmra.mrb[102].mxu1 %vm1150_vm6, %v23386_v12 }
 0x7c7   :  { %17364 = vmatprep.mubr.msk.f32.mxu1 %vm1150_vm6, %v23390_v23 }
 0x7ca   :  { %17365 = vmatmul.mubr.msk.f32.gmra.mrb[104].mxu1 %vm1150_vm6, %v23398_v26 }
 0x7cb   :  { %17367 = vmatprep.mubr.msk.f32.mxu1 %vm1150_vm6, %v23402_v37  ;;  %v9258_v37 = vsel %vm1505_vm4, %v23407_v22, %v9257_v28 }
 0x7ce   :  { %17368 = vmatmul.mubr.msk.f32.gmra.mrb[106].mxu1 %vm1150_vm6, %v23412_v33 }
 0x7cf   :  { %17370 = vmatprep.mubr.msk.f32.mxu1 %vm1150_vm6, %v23416_v29 }
 0x7d2   :  { %17371 = vmatmul.mubr.msk.f32.gmra.mrb[108].mxu1 %vm1150_vm6, %v23424_v2 }
 0x7d3   :  { %17373 = vmatprep.mubr.msk.f32.mxu1 %vm1150_vm6, %v9258_v37 }
 0x7d6   :  { %17374 = vmatmul.mubr.msk.f32.gmra.mrb[110].mxu1 %vm1150_vm6, %v9257_v28 }
 0x7d7   :  { %17704 = vmatprep.mubr.msk.f32.mxu1 %vm3078_vm8, %v24857_v32 }
 0x88d   :  { %v17354_v4 = vpop.f32.mrb[96].mxu1 }
 0x88e   :  { %v9357_v49 = vpop.f32.mrb[97].mxu1 }
 0x88f   :  { %v18326_v27 = vpack.c.bf16 %v17354_v4, %v9357_v49 }
 0x891   :  { %v17357_v29 = vpop.f32.mrb[98].mxu1  ;;  %18327 = vmatprep.subr.bf16.mxu0 %v18326_v27 }
 0x892   :  { %v9367_v20 = vpop.f32.mrb[99].mxu1  ;;  %18329 = vmatpush3.bf16.msra.mxu0 %v18326_v27 }
 0x893   :  { %v18330_v33 = vpack.c.bf16 %v17357_v29, %v9367_v20 }
 0x895   :  { %v17360_v26 = vpop.f32.mrb[100].mxu1  ;;  %18331 = vmatprep.subr.bf16.mxu0 %v18330_v33 }
 0x896   :  { %v9377_v22 = vpop.f32.mrb[101].mxu1  ;;  %18333 = vmatpush3.bf16.msra.mxu0 %v18330_v33 }
 0x897   :  { %v18334_v2 = vpack.c.bf16 %v17360_v26, %v9377_v22 }
 0x899   :  { %v17363_v23 = vpop.f32.mrb[102].mxu1  ;;  %18335 = vmatprep.subr.bf16.mxu0 %v18334_v2 }
 0x89a   :  { %v9387_v37 = vpop.f32.mrb[103].mxu1  ;;  %18337 = vmatpush3.bf16.msra.mxu0 %v18334_v2 }
 0x89b   :  { %v18338_v28 = vpack.c.bf16 %v17363_v23, %v9387_v37 }
 0x89d   :  { %v17366_v12 = vpop.f32.mrb[104].mxu1  ;;  %18339 = vmatprep.subr.bf16.mxu0 %v18338_v28 }
 0x89e   :  { %v9397_v32 = vpop.f32.mrb[105].mxu1  ;;  %18341 = vmatpush3.bf16.msra.mxu0 %v18338_v28 }
 0x89f   :  { %v18342_v4 = vpack.c.bf16 %v17366_v12, %v9397_v32  ;;  %v14717_v32 = vld [vmem:[%s24742_s1 + $0x578] sm:$0x7] }
 0x8a1   :  { %v17369_v49 = vpop.f32.mrb[106].mxu1  ;;  %18343 = vmatprep.subr.bf16.mxu0 %v18342_v4 }
 0x8a2   :  { %v9407_v1 = vpop.f32.mrb[107].mxu1  ;;  %18345 = vmatpush3.bf16.msra.mxu0 %v18342_v4 }
 0x8a3   :  { %v18346_v29 = vpack.c.bf16 %v17369_v49, %v9407_v1 }
 0x8a5   :  { %v17372_v27 = vpop.f32.mrb[108].mxu1  ;;  %18347 = vmatprep.subr.bf16.mxu0 %v18346_v29 }
 0x8a6   :  { %v9417_v20 = vpop.f32.mrb[109].mxu1  ;;  %18349 = vmatpush3.bf16.msra.mxu0 %v18346_v29  ;;  %v24878_v29 = vld [vmem:[#allocation3_spill] sm:$0xff] }
 0x8a7   :  { %v18350_v33 = vpack.c.bf16 %v17372_v27, %v9417_v20 }
 0x8a9   :  { %v17375_v26 = vpop.f32.mrb[110].mxu1  ;;  %18351 = vmatprep.subr.bf16.mxu0 %v18350_v33 }
 0x8aa   :  { %v9427_v22 = vpop.f32.mrb[111].mxu1  ;;  %18353 = vmatpush3.bf16.msra.mxu0 %v18350_v33 }
 0x8ab   :  { %v18354_v23 = vpack.c.bf16 %v17375_v26, %v9427_v22 }
 0x8ad   :  { %18356 = vmatprep.subr.msk.bf16.mxu0 %vm21098_vm11, %v18354_v23 }
 0x8ae   :  { %18359 = vmatpush3.bf16.msk.msra.mxu0 %vm21098_vm11, %v18354_v23 }
 0x8af   :  { %18361 = vmatprep.subr.bf16.mxu0 %v19458_v52 }
 0x8b1   :  { %17409 = vmatmul.mubr.msk.f32.vlgmr.msra.gmra.mrb[104].mxu0 %vm3078_vm8, %v21120_v0 }
 0x8b2   :  { %17411 = vmatprep.mubr.msk.f32.mxu0 %vm3078_vm8, %v21123_v3  ;;  %18363 = vmatpush3.bf16.msra.mxu0 %v19458_v52 }
 0x8b3   :  { %18365 = vmatprep.subr.bf16.mxu0 %v19508_v63 }
 0x8b5   :  { %17412 = vmatmul.mubr.msk.f32.gmra.mrb[106].mxu0 %vm3078_vm8, %v21143_v48 }
 0x8b6   :  { %17414 = vmatprep.mubr.msk.f32.mxu0 %vm3078_vm8, %v21147_v54 }
 0x8b9   :  { %17415 = vmatmul.mubr.msk.f32.gmra.mrb[108].mxu0 %vm3078_vm8, %v21166_v18 }
 0x8ba   :  { %17417 = vmatprep.mubr.msk.f32.mxu0 %vm3078_vm8, %v21169_v56 }
 0x8bd   :  { %17418 = vmatmul.mubr.msk.f32.gmra.mrb[110].mxu0 %vm3078_vm8, %v21186_v55 }
 0x8be   :  { %17424 = vmatprep.mubr.msk.f32.mxu0 %vm1150_vm6, %v23248_v40  ;;  %v9638_v40 = vrot.slane %v14717_v32, 1 }
 0x8c1   :  { %17425 = vmatmul.mubr.msk.f32.vlgmr.msra.gmra.mrb[112].mxu0 %vm1150_vm6, %v23256_v21  ;;  %v9639_v21 = vsel %vm1118_vm5, %v23314_v7, %v9638_v40  ;;  %v23646_v7 = vld [vmem:[%s24742_s1 + $0x5e0] sm:$0xff] }
 0x8c2   :  { %17427 = vmatprep.mubr.msk.f32.mxu0 %vm1150_vm6, %v23260_v6  ;;  %18367 = vmatpush3.bf16.msra.mxu0 %v19508_v63  ;;  %v23589_v6 = vld [vmem:[%s24742_s1 + $0x5a0] sm:$0xff] }
 0x8c3   :  { %18369 = vmatprep.subr.bf16.mxu0 %v19791_v42 }
 0x8c5   :  { %17428 = vmatmul.mubr.msk.f32.gmra.mrb[114].mxu0 %vm1150_vm6, %v23268_v62  ;;  %v24877_v62 = vld [vmem:[#allocation2_spill] sm:$0xff] }
 0x8c6   :  { %17430 = vmatprep.mubr.msk.f32.mxu0 %vm1150_vm6, %v23273_v24  ;;  %v23599_v24 = vld [vmem:[%s24742_s1 + $0x5a8] sm:$0xff] }
 0x8c7   :  { %v10453_v12 = vrot.slane %v23599_v24, 1 }
 0x8c9   :  { %17431 = vmatmul.mubr.msk.f32.gmra.mrb[116].mxu0 %vm1150_vm6, %v23281_v30  ;;  %v23604_v30 = vld [vmem:[%s24742_s1 + $0x5b0] sm:$0xff] }
 0x8ca   :  { %17433 = vmatprep.mubr.msk.f32.mxu0 %vm1150_vm6, %v23285_v15  ;;  %v23613_v15 = vld [vmem:[%s24742_s1 + $0x5b8] sm:$0xff]  ;;  %v10455_v37 = vrot.slane %v23604_v30, 1 }
 0x8cb   :  { %v10457_v4 = vrot.slane %v23613_v15, 1 }
 0x8cc   :  { %v10456_v20 = vsel %vm1118_vm5, %v10453_v12, %v10455_v37 }
 0x8cd   :  { %17434 = vmatmul.mubr.msk.f32.gmra.mrb[118].mxu0 %vm1150_vm6, %v23293_v46  ;;  %v23618_v46 = vld [vmem:[%s24742_s1 + $0x5c0] sm:$0xff]  ;;  %v10458_v26 = vsel %vm1118_vm5, %v10455_v37, %v10457_v4 }
 0x8ce   :  { %17436 = vmatprep.mubr.msk.f32.mxu0 %vm1150_vm6, %v23297_v13  ;;  %v23627_v13 = vld [vmem:[%s24742_s1 + $0x5c8] sm:$0xff]  ;;  %v10459_v27 = vrot.slane %v23618_v46, 1 }
 0x8cf   :  { %v10461_v33 = vrot.slane %v23627_v13, 1 }
 0x8d0   :  { %v10460_v23 = vsel %vm1118_vm5, %v10457_v4, %v10459_v27  ;;  %v10691_v4 = vrot.slane %v23646_v7, 2 }
 0x8d1   :  { %17437 = vmatmul.mubr.msk.f32.gmra.mrb[120].mxu0 %vm1150_vm6, %v23305_v50  ;;  %v23632_v50 = vld [vmem:[%s24742_s1 + $0x5d0] sm:$0xff] }
 0x8d2   :  { %17439 = vmatprep.mubr.msk.f32.mxu0 %vm1150_vm6, %v23309_v31  ;;  %v23641_v31 = vld [vmem:[%s24742_s1 + $0x5d8] sm:$0xff]  ;;  %v10463_v22 = vrot.slane %v23632_v50, 1 }
 0x8d5   :  { %17440 = vmatmul.mubr.msk.f32.gmra.mrb[122].mxu0 %vm1150_vm6, %v23319_v14  ;;  %v23655_v14 = vld [vmem:[%s24742_s1 + $0x5e8] sm:$0xff] }
 0x8d6   :  { %17442 = vmatprep.mubr.msk.f32.mxu0 %vm1150_vm6, %v23323_v59 }
 0x8d9   :  { %17443 = vmatmul.mubr.msk.f32.gmra.mrb[124].mxu0 %vm1150_vm6, %v23331_v38  ;;  %v23661_v38 = vld [vmem:[%s24742_s1 + $0x5f0] sm:$0xff] }
 0x8da   :  { %17445 = vmatprep.mubr.msk.f32.mxu0 %vm1150_vm6, %v9639_v21  ;;  %v10467_v21 = vrot.slane %v23646_v7, 1 }
 0x8dd   :  { %17446 = vmatmul.mubr.msk.f32.gmra.mrb[126].mxu0 %vm1150_vm6, %v9638_v40  ;;  %v10462_v40 = vsel %vm1118_vm5, %v10459_v27, %v10461_v33  ;;  %v10695_v27 = vrot.slane %v23661_v38, 2 }
 0x8de   :  { %17452 = vmatprep.mubr.msk.f32.mxu0 %vm1150_vm6, %v23096_v39  ;;  %v24868_v39 = vld [vmem:[#allocation9_spill] sm:$0xff] }
 0x8e1   :  { %17453 = vmatmul.mubr.msk.f32.vlgmr.msra.gmra.mrb[112].mxu0 %vm1150_vm6, %v23104_v57  ;;  %v24869_v57 = vld [vmem:[#allocation7_spill] sm:$0xff] }
 0x8e2   :  { %17455 = vmatprep.mubr.msk.f32.mxu0 %vm1150_vm6, %v23109_v41  ;;  %18371 = vmatpush3.bf16.msra.mxu0 %v19791_v42  ;;  %v24870_v41 = vld [vmem:[#allocation10_spill] sm:$0xff] }
 0x8e3   :  { %18373 = vmatprep.subr.bf16.mxu0 %v19840_v35 }
 0x8e5   :  { %17456 = vmatmul.mubr.msk.f32.gmra.mrb[114].mxu0 %vm1150_vm6, %v23118_v61  ;;  %v24871_v61 = vld [vmem:[#allocation12_spill] sm:$0xff] }
 0x8e6   :  { %17458 = vmatprep.mubr.msk.f32.mxu0 %vm1150_vm6, %v23124_v44  ;;  %v24872_v44 = vld [vmem:[#allocation14_spill] sm:$0xff] }
 0x8e9   :  { %17459 = vmatmul.mubr.msk.f32.gmra.mrb[116].mxu0 %vm1150_vm6, %v23140_v17  ;;  %v10023_v17 = vrot.slane %v14717_v32, 2 }
 0x8ea   :  { %17461 = vmatprep.mubr.msk.f32.mxu0 %vm1150_vm6, %v23146_v45  ;;  %v24873_v45 = vld [vmem:[#allocation13_spill] sm:$0xff] }
 0x8ed   :  { %17462 = vmatmul.mubr.msk.f32.gmra.mrb[118].mxu0 %vm1150_vm6, %v23162_v34  ;;  %v24874_v34 = vld [vmem:[#allocation16_spill] sm:$0xff] }
 0x8ee   :  { %17464 = vmatprep.mubr.msk.f32.mxu0 %vm1150_vm6, %v23168_v53  ;;  %v24875_v53 = vld [vmem:[#allocation15_spill] sm:$0xff] }
 0x8f1   :  { %17465 = vmatmul.mubr.msk.f32.gmra.mrb[120].mxu0 %vm1150_vm6, %v23184_v5  ;;  %v10024_v5 = vsel %vm1505_vm4, %v24875_v53, %v10023_v17 }
 0x8f2   :  { %17467 = vmatprep.mubr.msk.f32.mxu0 %vm1150_vm6, %v23190_v36  ;;  %v24876_v36 = vld [vmem:[#allocation6_spill] sm:$0xff] }
 0x8f5   :  { %17468 = vmatmul.mubr.msk.f32.gmra.mrb[122].mxu0 %vm1150_vm6, %v23206_v60  ;;  %v23561_v60 = vld [vmem:[%s24742_s1 + $0x580] sm:$0xff] }
 0x8f6   :  { %17470 = vmatprep.mubr.msk.f32.mxu0 %vm1150_vm6, %v23212_v47  ;;  %v23569_v47 = vld [vmem:[%s24742_s1 + $0x588] sm:$0xff]  ;;  %v10444_v59 = vrot.slane %v23561_v60, 1  ;;  %v10668_v53 = vrot.slane %v23561_v60, 2 }
 0x8f9   :  { %17471 = vmatmul.mubr.msk.f32.gmra.mrb[124].mxu0 %vm1150_vm6, %v23227_v25  ;;  %v23574_v25 = vld [vmem:[%s24742_s1 + $0x590] sm:$0xff] }
 0x8fa   :  { %17473 = vmatprep.mubr.msk.f32.mxu0 %vm1150_vm6, %v23233_v8  ;;  %v23583_v8 = vld [vmem:[%s24742_s1 + $0x598] sm:$0xff] }
 0x8fd   :  { %17474 = vmatmul.mubr.msk.f32.gmra.mrb[126].mxu0 %vm1150_vm6, %v14717_v32  ;;  %v10465_v32 = vrot.slane %v23641_v31, 1 }
 0x8fe   :  { %17480 = vmatprep.mubr.msk.f32.mxu0 %vm1150_vm6, %v23343_v58  ;;  %v10445_v58 = vrot.slane %v23569_v47, 1 }
 0x901   :  { %17481 = vmatmul.mubr.msk.f32.vlgmr.msra.gmra.mrb[112].mxu0 %vm1150_vm6, %v23350_v10  ;;  %v10447_v10 = vrot.slane %v23574_v25, 1 }
 0x902   :  { %17483 = vmatprep.mubr.msk.f32.mxu0 %vm1150_vm6, %v23354_v43  ;;  %18375 = vmatpush3.bf16.msra.mxu0 %v19840_v35  ;;  %v23672_v43 = vld [vmem:[%s24742_s1 + $0x5f8] sm:$0x7] }
 0x903   :  { %18377 = vmatprep.subr.bf16.mxu0 %v19882_v11  ;;  %v10448_v1 = vsel %vm1118_vm5, %v10445_v58, %v10447_v10 }
 0x905   :  { %17484 = vmatmul.mubr.msk.f32.gmra.mrb[114].mxu0 %vm1150_vm6, %v23362_v16  ;;  %v10449_v16 = vrot.slane %v23583_v8, 1 }
 0x906   :  { %17486 = vmatprep.mubr.msk.f32.mxu0 %vm1150_vm6, %v23366_v9  ;;  %v10446_v9 = vsel %vm1118_vm5, %v10444_v59, %v10445_v58  ;;  %v10671_v59 = vrot.slane %v23574_v25, 2  ;;  %v10673_v58 = vrot.slane %v23583_v8, 2 }
 0x907   :  { %v10450_v2 = vsel %vm1118_vm5, %v10447_v10, %v10449_v16 }
 0x909   :  { %17487 = vmatmul.mubr.msk.f32.gmra.mrb[116].mxu0 %vm1150_vm6, %v23374_v19  ;;  %v10451_v19 = vrot.slane %v23589_v6, 1 }
 0x90a   :  { %17489 = vmatprep.mubr.msk.f32.mxu0 %vm1150_vm6, %v24868_v39  ;;  %v10464_v39 = vsel %vm1118_vm5, %v10461_v33, %v10463_v22 }
 0x90b   :  { %v10452_v28 = vsel %vm1118_vm5, %v10449_v16, %v10451_v19  ;;  %v10454_v49 = vsel %vm1118_vm5, %v10451_v19, %v10453_v12  ;;  %v10675_v16 = vrot.slane %v23589_v6, 2  ;;  %v10685_v12 = vrot.slane %v23627_v13, 2 }
 0x90d   :  { %17490 = vmatmul.mubr.msk.f32.gmra.mrb[118].mxu0 %vm1150_vm6, %v24869_v57  ;;  %v10469_v57 = vrot.slane %v23655_v14, 1 }
 0x90e   :  { %17492 = vmatprep.mubr.msk.f32.mxu0 %vm1150_vm6, %v24870_v41  ;;  %v10466_v41 = vsel %vm1118_vm5, %v10463_v22, %v10465_v32  ;;  %v23795_v22 = vld [vmem:[%s24742_s1 + $0x618] sm:$0xff] }
 0x911   :  { %17493 = vmatmul.mubr.msk.f32.gmra.mrb[120].mxu0 %vm1150_vm6, %v24871_v61  ;;  %v10471_v61 = vrot.slane %v23661_v38, 1 }
 0x912   :  { %17495 = vmatprep.mubr.msk.f32.mxu0 %vm1150_vm6, %v24872_v44  ;;  %v10468_v44 = vsel %vm1118_vm5, %v10465_v32, %v10467_v21  ;;  %v24880_v32 = vld [vmem:[#allocation5_spill] sm:$0xff] }
 0x915   :  { %17496 = vmatmul.mubr.msk.f32.gmra.mrb[122].mxu0 %vm1150_vm6, %v24873_v45  ;;  %v10470_v45 = vsel %vm1118_vm5, %v10467_v21, %v10469_v57  ;;  %v24881_v21 = vld [vmem:[#allocation8_spill] sm:$0xff] }
 0x916   :  { %17498 = vmatprep.mubr.msk.f32.mxu0 %vm1150_vm6, %v24874_v34  ;;  %v10472_v34 = vsel %vm1118_vm5, %v10469_v57, %v10471_v61 }
 0x919   :  { %17499 = vmatmul.mubr.msk.f32.gmra.mrb[124].mxu0 %vm1150_vm6, %v24876_v36  ;;  %v10669_v36 = vrot.slane %v23569_v47, 2 }
 0x91a   :  { %17501 = vmatprep.mubr.msk.f32.mxu0 %vm1150_vm6, %v10024_v5 }
 0x91b   :  { %v10670_v10 = vsel %vm1505_vm4, %v10668_v53, %v10669_v36  ;;  %v23834_v53 = vld [vmem:[%s24742_s1 + $0x638] sm:$0xff] }
 0x91d   :  { %17502 = vmatmul.mubr.msk.f32.gmra.mrb[126].mxu0 %vm1150_vm6, %v10023_v17  ;;  %v10473_v17 = vrot.slane %v23672_v43, 1 }
 0x91e   :  { %17508 = vmatprep.mubr.msk.f32.mxu0 %vm1150_vm6, %v23561_v60  ;;  %v10672_v60 = vsel %vm1505_vm4, %v10669_v36, %v10671_v59  ;;  %v23840_v36 = vld [vmem:[%s24742_s1 + $0x640] sm:$0xff] }
 0x91f   :  { %v10474_v5 = vsel %vm1118_vm5, %v10471_v61, %v10473_v17 }
 0x921   :  { %17509 = vmatmul.mubr.msk.f32.vlgmr.msra.gmra.mrb[112].mxu0 %vm1150_vm6, %v23569_v47  ;;  %v10677_v47 = vrot.slane %v23599_v24, 2 }
 0x922   :  { %17511 = vmatprep.mubr.msk.f32.mxu0 %vm1150_vm6, %v23574_v25  ;;  %18379 = vmatpush3.bf16.msra.mxu0 %v19882_v11  ;;  %v10679_v25 = vrot.slane %v23604_v30, 2 }
 0x923   :  { %18381 = vmatprep.subr.bf16.mxu0 %v24877_v62  ;;  %v10678_v19 = vsel %vm1505_vm4, %v10675_v16, %v10677_v47 }
 0x925   :  { %17512 = vmatmul.mubr.msk.f32.gmra.mrb[114].mxu0 %vm1150_vm6, %v23583_v8  ;;  %v10676_v8 = vsel %vm1505_vm4, %v10673_v58, %v10675_v16  ;;  %v23856_v16 = vld [vmem:[%s24742_s1 + $0x648] sm:$0xff] }
 0x926   :  { %17514 = vmatprep.mubr.msk.f32.mxu0 %vm1150_vm6, %v23589_v6  ;;  %v10681_v6 = vrot.slane %v23613_v15, 2 }
 0x929   :  { %17515 = vmatmul.mubr.msk.f32.gmra.mrb[116].mxu0 %vm1150_vm6, %v23599_v24  ;;  %v10683_v24 = vrot.slane %v23618_v46, 2 }
 0x92a   :  { %17517 = vmatprep.mubr.msk.f32.mxu0 %vm1150_vm6, %v23604_v30  ;;  %v10680_v30 = vsel %vm1505_vm4, %v10677_v47, %v10679_v25  ;;  %v23862_v47 = vld [vmem:[%s24742_s1 + $0x650] sm:$0xff] }
 0x92b   :  { %v10684_v37 = vsel %vm1505_vm4, %v10681_v6, %v10683_v24 }
 0x92d   :  { %17518 = vmatmul.mubr.msk.f32.gmra.mrb[118].mxu0 %vm1150_vm6, %v23613_v15  ;;  %v10687_v15 = vrot.slane %v23632_v50, 2 }
 0x92e   :  { %17520 = vmatprep.mubr.msk.f32.mxu0 %vm1150_vm6, %v23618_v46  ;;  %v10686_v46 = vsel %vm1505_vm4, %v10683_v24, %v10685_v12  ;;  %v23884_v24 = vld [vmem:[%s24742_s1 + $0x660] sm:$0xff] }
 0x931   :  { %17521 = vmatmul.mubr.msk.f32.gmra.mrb[120].mxu0 %vm1150_vm6, %v23627_v13  ;;  %v10688_v13 = vsel %vm1505_vm4, %v10685_v12, %v10687_v15 }
 0x932   :  { %17523 = vmatprep.mubr.msk.f32.mxu0 %vm1150_vm6, %v23632_v50 }
 0x935   :  { %17524 = vmatmul.mubr.msk.f32.gmra.mrb[122].mxu0 %vm1150_vm6, %v23641_v31 }
 0x936   :  { %17526 = vmatprep.mubr.msk.f32.mxu0 %vm1150_vm6, %v23646_v7 }
 0x939   :  { %17527 = vmatmul.mubr.msk.f32.gmra.mrb[124].mxu0 %vm1150_vm6, %v23655_v14 }
 0x93a   :  { %17529 = vmatprep.mubr.msk.f32.mxu0 %vm1150_vm6, %v23661_v38  ;;  %v23773_v38 = vld [vmem:[%s24742_s1 + $0x600] sm:$0xff] }
 0x93b   :  { %v11118_v12 = vrot.slane %v23773_v38, 1 }
 0x93d   :  { %17530 = vmatmul.mubr.msk.f32.gmra.mrb[126].mxu0 %vm1150_vm6, %v23672_v43 }
 0x93e   :  { %17536 = vmatprep.mubr.msk.f32.mxu0 %vm1150_vm6, %v10446_v9  ;;  %v10674_v9 = vsel %vm1505_vm4, %v10671_v59, %v10673_v58 }
 0x941   :  { %17537 = vmatmul.mubr.msk.f32.vlgmr.msra.gmra.mrb[112].mxu0 %vm1150_vm6, %v10448_v1  ;;  %v24879_v1 = vld [vmem:[#allocation4_spill] sm:$0xff] }
 0x942   :  { %17539 = vmatprep.mubr.msk.f32.mxu0 %vm1150_vm6, %v10450_v2  ;;  %18383 = vmatpush3.bf16.msra.mxu0 %v24877_v62  ;;  %v10682_v2 = vsel %vm1505_vm4, %v10679_v25, %v10681_v6  ;;  %v23878_v6 = vld [vmem:[%s24742_s1 + $0x658] sm:$0xff] }
 0x943   :  { %18385 = vmatprep.subr.bf16.mxu0 %v24878_v29 }
 0x945   :  { %17540 = vmatmul.mubr.msk.f32.gmra.mrb[114].mxu0 %vm1150_vm6, %v10452_v28  ;;  %v10689_v28 = vrot.slane %v23641_v31, 2 }
 0x946   :  { %17542 = vmatprep.mubr.msk.f32.mxu0 %vm1150_vm6, %v10454_v49  ;;  %v10693_v49 = vrot.slane %v23655_v14, 2 }
 0x947   :  { %v10690_v50 = vsel %vm1505_vm4, %v10687_v15, %v10689_v28  ;;  %v10692_v31 = vsel %vm1505_vm4, %v10689_v28, %v10691_v4  ;;  %v23916_v28 = vld [vmem:[%s24742_s1 + $0x678] sm:$0x7] }
 0x948   :  { %v10694_v7 = vsel %vm1505_vm4, %v10691_v4, %v10693_v49  ;;  %v10696_v14 = vsel %vm1505_vm4, %v10693_v49, %v10695_v27 }
 0x949   :  { %17543 = vmatmul.mubr.msk.f32.gmra.mrb[116].mxu0 %vm1150_vm6, %v10456_v20  ;;  %v10697_v20 = vrot.slane %v23672_v43, 2  ;;  %v23781_v43 = vld [vmem:[%s24742_s1 + $0x608] sm:$0xff] }
 0x94a   :  { %17545 = vmatprep.mubr.msk.f32.mxu0 %vm1150_vm6, %v10458_v26  ;;  %v23786_v26 = vld [vmem:[%s24742_s1 + $0x610] sm:$0xff]  ;;  %v11119_v15 = vrot.slane %v23781_v43, 1 }
 0x94b   :  { %v10698_v33 = vsel %vm1505_vm4, %v10695_v27, %v10697_v20 }
 0x94c   :  { %v23920_v4 = vsel %vm1118_vm5, %v11118_v12, %v11119_v15 }
 0x94d   :  { %17546 = vmatmul.mubr.msk.f32.gmra.mrb[118].mxu0 %vm1150_vm6, %v10460_v23  ;;  %v23801_v23 = vld [vmem:[%s24742_s1 + $0x620] sm:$0xff] }
 0x94e   :  { %17548 = vmatprep.mubr.msk.f32.mxu0 %vm1150_vm6, %v10462_v40 }
 0x951   :  { %17549 = vmatmul.mubr.msk.f32.gmra.mrb[120].mxu0 %vm1150_vm6, %v10464_v39 }
 0x952   :  { %17551 = vmatprep.mubr.msk.f32.mxu0 %vm1150_vm6, %v10466_v41  ;;  %v23812_v41 = vld [vmem:[%s24742_s1 + $0x628] sm:$0xff] }
 0x955   :  { %17552 = vmatmul.mubr.msk.f32.gmra.mrb[122].mxu0 %vm1150_vm6, %v10468_v44  ;;  %v23818_v44 = vld [vmem:[%s24742_s1 + $0x630] sm:$0xff] }
 0x956   :  { %17554 = vmatprep.mubr.msk.f32.mxu0 %vm1150_vm6, %v10470_v45 }
 0x959   :  { %17555 = vmatmul.mubr.msk.f32.gmra.mrb[124].mxu0 %vm1150_vm6, %v10472_v34 }
 0x95a   :  { %17557 = vmatprep.mubr.msk.f32.mxu0 %vm1150_vm6, %v10474_v5 }
 0x95d   :  { %17558 = vmatmul.mubr.msk.f32.gmra.mrb[126].mxu0 %vm1150_vm6, %v10473_v17 }
 0x95e   :  { %17564 = vmatprep.mubr.msk.f32.mxu0 %vm1150_vm6, %v10670_v10 }
 0x961   :  { %17565 = vmatmul.mubr.msk.f32.vlgmr.msra.gmra.mrb[112].mxu0 %vm1150_vm6, %v10672_v60 }
 0x962   :  { %17567 = vmatprep.mubr.msk.f32.mxu0 %vm1150_vm6, %v10674_v9  ;;  %18387 = vmatpush3.bf16.msra.mxu0 %v24878_v29 }
 0x963   :  { %18389 = vmatprep.subr.bf16.mxu0 %v24879_v1 }
 0x965   :  { %17568 = vmatmul.mubr.msk.f32.gmra.mrb[114].mxu0 %vm1150_vm6, %v10676_v8 }
 0x966   :  { %17570 = vmatprep.mubr.msk.f32.mxu0 %vm1150_vm6, %v10678_v19 }
 0x969   :  { %17571 = vmatmul.mubr.msk.f32.gmra.mrb[116].mxu0 %vm1150_vm6, %v10680_v30  ;;  %v23899_v30 = vld [vmem:[%s24742_s1 + $0x668] sm:$0xff] }
 0x96a   :  { %17573 = vmatprep.mubr.msk.f32.mxu0 %vm1150_vm6, %v10682_v2  ;;  %v23905_v2 = vld [vmem:[%s24742_s1 + $0x670] sm:$0xff] }
 0x96d   :  { %17574 = vmatmul.mubr.msk.f32.gmra.mrb[118].mxu0 %vm1150_vm6, %v10684_v37  ;;  %v11121_v37 = vrot.slane %v23786_v26, 1 }
 0x96e   :  { %17576 = vmatprep.mubr.msk.f32.mxu0 %vm1150_vm6, %v10686_v46  ;;  %v11123_v46 = vrot.slane %v23795_v22, 1 }
 0x96f   :  { %v23928_v49 = vsel %vm1118_vm5, %v11119_v15, %v11121_v37  ;;  %v11343_v15 = vrot.slane %v23781_v43, 2 }
 0x970   :  { %v23932_v27 = vsel %vm1118_vm5, %v11121_v37, %v11123_v46  ;;  %v11345_v37 = vrot.slane %v23786_v26, 2 }
 0x971   :  { %17577 = vmatmul.mubr.msk.f32.gmra.mrb[120].mxu0 %vm1150_vm6, %v10688_v13  ;;  %v11125_v13 = vrot.slane %v23801_v23, 1 }
 0x972   :  { %17579 = vmatprep.mubr.msk.f32.mxu0 %vm1150_vm6, %v10690_v50  ;;  %v11127_v50 = vrot.slane %v23812_v41, 1 }
 0x975   :  { %17580 = vmatmul.mubr.msk.f32.gmra.mrb[122].mxu0 %vm1150_vm6, %v10692_v31  ;;  %v11129_v31 = vrot.slane %v23818_v44, 1 }
 0x976   :  { %17582 = vmatprep.mubr.msk.f32.mxu0 %vm1150_vm6, %v10694_v7  ;;  %v11131_v7 = vrot.slane %v23834_v53, 1 }
 0x979   :  { %17583 = vmatmul.mubr.msk.f32.gmra.mrb[124].mxu0 %vm1150_vm6, %v10696_v14  ;;  %v23945_v14 = vsel %vm1118_vm5, %v11125_v13, %v11127_v50 }
 0x97a   :  { %17585 = vmatprep.mubr.msk.f32.mxu0 %vm1150_vm6, %v10698_v33  ;;  %v11133_v33 = vrot.slane %v23840_v36, 1 }
 0x97d   :  { %17586 = vmatmul.mubr.msk.f32.gmra.mrb[126].mxu0 %vm1150_vm6, %v10697_v20  ;;  %v23940_v20 = vsel %vm1118_vm5, %v11123_v46, %v11125_v13  ;;  %v11347_v46 = vrot.slane %v23795_v22, 2 }
 0x97e   :  { %17592 = vmatprep.mubr.msk.f32.mxu0 %vm1150_vm6, %v23773_v38 }
 0x981   :  { %17593 = vmatmul.mubr.msk.f32.vlgmr.msra.gmra.mrb[112].mxu0 %vm1150_vm6, %v23781_v43 }
 0x982   :  { %17595 = vmatprep.mubr.msk.f32.mxu0 %vm1150_vm6, %v23786_v26  ;;  %18391 = vmatpush3.bf16.msra.mxu0 %v24879_v1 }
 0x983   :  { %18393 = vmatprep.subr.bf16.mxu0 %v24880_v32 }
 0x984   :  { %v17410_v40 = vpop.f32.mrb[104].mxu0 }
 0x985   :  { %17596 = vmatmul.mubr.msk.f32.gmra.mrb[114].mxu0 %vm1150_vm6, %v23795_v22  ;;  %v9561_v39 = vadd.f32 %v24881_v21, %v17410_v40  ;;  %v9521_v57 = vpop.f32.mrb[105].mxu0  ;;  %v23953_v40 = vsel %vm1118_vm5, %v11127_v50, %v11129_v31  ;;  %v11349_v50 = vrot.slane %v23801_v23, 2 }
 0x986   :  { %17598 = vmatprep.mubr.msk.f32.mxu0 %vm1150_vm6, %v23801_v23  ;;  %v9560_v61 = vadd.f32 %v24881_v21, %v9521_v57  ;;  %v11137_v57 = vrot.slane %v23862_v47, 1 }
 0x987   :  { %14695 = vst [vmem:[%s24746_s7 + $0xc8] sm:$0xff] %v9561_v39  ;;  %v23957_v39 = vsel %vm1118_vm5, %v11129_v31, %v11131_v7  ;;  %v24022_v31 = vsel %vm1505_vm4, %v11343_v15, %v11345_v37 }
 0x988   :  { %14694 = vst [vmem:[%s24746_s7 + $0xc0] sm:$0xff] %v9560_v61  ;;  %v17413_v17 = vpop.f32.mrb[106].mxu0  ;;  %v23965_v61 = vsel %vm1118_vm5, %v11131_v7, %v11133_v33  ;;  %v11351_v7 = vrot.slane %v23812_v41, 2 }
 0x989   :  { %17599 = vmatmul.mubr.msk.f32.gmra.mrb[116].mxu0 %vm1150_vm6, %v23812_v41  ;;  %v9563_v45 = vadd.f32 %v24881_v21, %v17413_v17  ;;  %v9531_v34 = vpop.f32.mrb[107].mxu0  ;;  %v11139_v17 = vrot.slane %v23878_v6, 1 }
 0x98a   :  { %17601 = vmatprep.mubr.msk.f32.mxu0 %vm1150_vm6, %v23818_v44  ;;  %v9562_v5 = vadd.f32 %v24881_v21, %v9531_v34  ;;  %v11141_v34 = vrot.slane %v23884_v24, 1 }
 0x98b   :  { %14697 = vst [vmem:[%s24746_s7 + $0xd8] sm:$0xff] %v9563_v45 }
 0x98c   :  { %14696 = vst [vmem:[%s24746_s7 + $0xd0] sm:$0xff] %v9562_v5  ;;  %v17416_v59 = vpop.f32.mrb[108].mxu0 }
 0x98d   :  { %17602 = vmatmul.mubr.msk.f32.gmra.mrb[118].mxu0 %vm1150_vm6, %v23834_v53  ;;  %v9565_v58 = vadd.f32 %v24881_v21, %v17416_v59  ;;  %v9541_v10 = vpop.f32.mrb[109].mxu0  ;;  %v11143_v59 = vrot.slane %v23899_v30, 1 }
 0x98e   :  { %17604 = vmatprep.mubr.msk.f32.mxu0 %vm1150_vm6, %v23840_v36  ;;  %v9564_v60 = vadd.f32 %v24881_v21, %v9541_v10  ;;  %v23986_v10 = vrot.slane %v23905_v2, 1 }
 0x98f   :  { %14699 = vst [vmem:[%s24746_s7 + $0xe8] sm:$0xff] %v9565_v58  ;;  %v23981_v58 = vsel %vm1118_vm5, %v11137_v57, %v11139_v17 }
 0x990   :  { %14698 = vst [vmem:[%s24746_s7 + $0xe0] sm:$0xff] %v9564_v60  ;;  %v17419_v9 = vpop.f32.mrb[110].mxu0  ;;  %v23991_v60 = vsel %vm1118_vm5, %v11139_v17, %v11141_v34  ;;  %v11355_v17 = vrot.slane %v23834_v53, 2 }
 0x991   :  { %17605 = vmatmul.mubr.msk.f32.gmra.mrb[120].mxu0 %vm1150_vm6, %v23856_v16  ;;  %v9567_v25 = vadd.f32 %v24881_v21, %v17419_v9  ;;  %v9551_v8 = vpop.f32.mrb[111].mxu0  ;;  %v11147_v9 = vrot.slane %v23916_v28, 1 }
 0x992   :  { %17607 = vmatprep.mubr.msk.f32.mxu0 %vm1150_vm6, %v23862_v47  ;;  %v9566_v19 = vadd.f32 %v24881_v21, %v9551_v8  ;;  %v11135_v21 = vrot.slane %v23856_v16, 1  ;;  %v24003_v8 = vsel %vm1118_vm5, %v11143_v59, %v23986_v10 }
 0x993   :  { %14701 = vst [vmem:[%s24746_s7 + $0xf8] sm:$0x1f] %v9567_v25  ;;  %v23995_v25 = vsel %vm1118_vm5, %v11141_v34, %v11143_v59  ;;  %v11148_v12 = vsel %vm1118_vm5, %v23986_v10, %v11147_v9  ;;  %v24038_v34 = vsel %vm1505_vm4, %v11349_v50, %v11351_v7  ;;  %v11357_v59 = vrot.slane %v23840_v36, 2 }
 0x994   :  { %14700 = vst [vmem:[%s24746_s7 + $0xf0] sm:$0xff] %v9566_v19  ;;  %v23969_v45 = vsel %vm1118_vm5, %v11133_v33, %v11135_v21  ;;  %v23977_v5 = vsel %vm1118_vm5, %v11135_v21, %v11137_v57  ;;  %v11342_v19 = vrot.slane %v23773_v38, 2  ;;  %v24026_v33 = vsel %vm1505_vm4, %v11345_v37, %v11347_v46 }
 0x995   :  { %17608 = vmatmul.mubr.msk.f32.gmra.mrb[122].mxu0 %vm1150_vm6, %v23878_v6  ;;  %v11353_v21 = vrot.slane %v23818_v44, 2  ;;  %v24034_v57 = vsel %vm1505_vm4, %v11347_v46, %v11349_v50  ;;  %v24058_v37 = vsel %vm1505_vm4, %v11355_v17, %v11357_v59  ;;  %v11363_v46 = vrot.slane %v23878_v6, 2 }
 0x996   :  { %17610 = vmatprep.mubr.msk.f32.mxu0 %vm1150_vm6, %v23884_v24  ;;  %v24015_v13 = vsel %vm1505_vm4, %v11342_v19, %v11343_v15  ;;  %v11359_v19 = vrot.slane %v23856_v16, 2  ;;  %v11361_v15 = vrot.slane %v23862_v47, 2  ;;  %24883 = vst [vmem:[#allocation7_spill] sm:$0xff] %v24058_v37 }
 0x998   :  { %v24062_v50 = vsel %vm1505_vm4, %v11357_v59, %v11359_v19  ;;  %v24079_v59 = vrot.slane %v23905_v2, 2 }
 0x999   :  { %17611 = vmatmul.mubr.msk.f32.gmra.mrb[124].mxu0 %vm1150_vm6, %v23899_v30  ;;  %24884 = vst [vmem:[#allocation10_spill] sm:$0xff] %v24062_v50 }
 0x99a   :  { %17613 = vmatprep.mubr.msk.f32.mxu0 %vm1150_vm6, %v23905_v2  ;;  %24887 = vst [vmem:[#allocation13_spill] sm:$0xff] %v24079_v59 }
 0x99d   :  { %17614 = vmatmul.mubr.msk.f32.gmra.mrb[126].mxu0 %vm1150_vm6, %v23916_v28 }
 0x99e   :  { %17620 = vmatprep.mubr.msk.f32.mxu0 %vm1150_vm6, %v23920_v4 }
 0x9a1   :  { %17621 = vmatmul.mubr.msk.f32.vlgmr.msra.gmra.mrb[112].mxu0 %vm1150_vm6, %v23928_v49 }
 0x9a2   :  { %17623 = vmatprep.mubr.msk.f32.mxu0 %vm1150_vm6, %v23932_v27  ;;  %18395 = vmatpush3.bf16.msra.mxu0 %v24880_v32  ;;  %v11367_v32 = vrot.slane %v23899_v30, 2 }
 0x9a5   :  { %17624 = vmatmul.mubr.msk.f32.gmra.mrb[114].mxu0 %vm1150_vm6, %v23940_v20 }
 0x9a6   :  { %17626 = vmatprep.mubr.msk.f32.mxu0 %vm1150_vm6, %v23945_v14 }
 0x9a9   :  { %17627 = vmatmul.mubr.msk.f32.gmra.mrb[116].mxu0 %vm1150_vm6, %v23953_v40 }
 0x9aa   :  { %17629 = vmatprep.mubr.msk.f32.mxu0 %vm1150_vm6, %v23957_v39 }
 0x9ad   :  { %17630 = vmatmul.mubr.msk.f32.gmra.mrb[118].mxu0 %vm1150_vm6, %v23965_v61 }
 0x9ae   :  { %17632 = vmatprep.mubr.msk.f32.mxu0 %vm1150_vm6, %v23969_v45 }
 0x9b1   :  { %17633 = vmatmul.mubr.msk.f32.gmra.mrb[120].mxu0 %vm1150_vm6, %v23977_v5 }
 0x9b2   :  { %17635 = vmatprep.mubr.msk.f32.mxu0 %vm1150_vm6, %v23981_v58 }
 0x9b5   :  { %17636 = vmatmul.mubr.msk.f32.gmra.mrb[122].mxu0 %vm1150_vm6, %v23991_v60 }
 0x9b6   :  { %17638 = vmatprep.mubr.msk.f32.mxu0 %vm1150_vm6, %v23995_v25 }
 0x9b9   :  { %17639 = vmatmul.mubr.msk.f32.gmra.mrb[124].mxu0 %vm1150_vm6, %v24003_v8 }
 0x9ba   :  { %17641 = vmatprep.mubr.msk.f32.mxu0 %vm1150_vm6, %v11148_v12  ;;  %v24050_v12 = vsel %vm1505_vm4, %v11353_v21, %v11355_v17  ;;  %v24074_v17 = vsel %vm1505_vm4, %v11361_v15, %v11363_v46 }
 0x9bb   :  { %24882 = vst [vmem:[#allocation9_spill] sm:$0xff] %v24050_v12  ;;  %24886 = vst [vmem:[#allocation14_spill] sm:$0xff] %v24074_v17 }
 0x9bd   :  { %17642 = vmatmul.mubr.msk.f32.gmra.mrb[126].mxu0 %vm1150_vm6, %v11147_v9  ;;  %v24046_v9 = vsel %vm1505_vm4, %v11351_v7, %v11353_v21  ;;  %v11365_v7 = vrot.slane %v23884_v24, 2  ;;  %v24070_v21 = vsel %vm1505_vm4, %v11359_v19, %v11361_v15  ;;  %v11371_v19 = vrot.slane %v23916_v28, 2  ;;  %v24891_v28 = vld [vmem:[#allocation11_spill] sm:$0xff] }
 0x9be   :  { %17648 = vmatprep.mubr.msk.f32.mxu0 %vm1150_vm6, %v24015_v13  ;;  %24885 = vst [vmem:[#allocation12_spill] sm:$0xff] %v24070_v21  ;;  %v24096_v15 = vsel %vm1505_vm4, %v11367_v32, %v24079_v59 }
 0x9bf   :  { %v24084_v1 = vsel %vm1505_vm4, %v11363_v46, %v11365_v7  ;;  %v24088_v29 = vsel %vm1505_vm4, %v11365_v7, %v11367_v32  ;;  %24890 = vst [vmem:[#allocation6_spill] sm:$0xff] %v24096_v15  ;;  %v11372_v62 = vsel %vm1505_vm4, %v24079_v59, %v11371_v19 }
 0x9c0   :  { %24888 = vst [vmem:[#allocation16_spill] sm:$0xff] %v24084_v1  ;;  %24889 = vst [vmem:[#allocation15_spill] sm:$0xff] %v24088_v29 }
 0x9c1   :  { %17649 = vmatmul.mubr.msk.f32.vlgmr.msra.gmra.mrb[112].mxu0 %vm1150_vm6, %v24022_v31 }
 0x9c2   :  { %17651 = vmatprep.mubr.msk.f32.mxu0 %vm1150_vm6, %v24026_v33 }
 0x9c5   :  { %17652 = vmatmul.mubr.msk.f32.gmra.mrb[114].mxu0 %vm1150_vm6, %v24034_v57 }
 0x9c6   :  { %17654 = vmatprep.mubr.msk.f32.mxu0 %vm1150_vm6, %v24038_v34 }
 0x9c9   :  { %17655 = vmatmul.mubr.msk.f32.gmra.mrb[116].mxu0 %vm1150_vm6, %v24046_v9 }
 0x9ca   :  { %17657 = vmatprep.mubr.msk.f32.mxu0 %vm1150_vm6, %v24050_v12 }
 0x9cd   :  { %17658 = vmatmul.mubr.msk.f32.gmra.mrb[118].mxu0 %vm1150_vm6, %v24058_v37 }
 0x9ce   :  { %17660 = vmatprep.mubr.msk.f32.mxu0 %vm1150_vm6, %v24062_v50 }
 0x9d1   :  { %17661 = vmatmul.mubr.msk.f32.gmra.mrb[120].mxu0 %vm1150_vm6, %v24070_v21 }
 0x9d2   :  { %17663 = vmatprep.mubr.msk.f32.mxu0 %vm1150_vm6, %v24074_v17 }
 0x9d5   :  { %17664 = vmatmul.mubr.msk.f32.gmra.mrb[122].mxu0 %vm1150_vm6, %v24084_v1 }
 0x9d6   :  { %17666 = vmatprep.mubr.msk.f32.mxu0 %vm1150_vm6, %v24088_v29 }
 0x9d9   :  { %17667 = vmatmul.mubr.msk.f32.gmra.mrb[124].mxu0 %vm1150_vm6, %v24096_v15 }
 0x9da   :  { %17669 = vmatprep.mubr.msk.f32.mxu0 %vm1150_vm6, %v11372_v62 }
 0x9dd   :  { %17670 = vmatmul.mubr.msk.f32.gmra.mrb[126].mxu0 %vm1150_vm6, %v11371_v19 }
 0x9de   :  { %18000 = vmatprep.mubr.msk.f32.mxu0 %vm3078_vm8, %v24891_v28 }
 0xa94   :  { %v17650_v46 = vpop.f32.mrb[112].mxu0 }
 0xa95   :  { %v11471_v7 = vpop.f32.mrb[113].mxu0 }
 0xa96   :  { %v18396_v29 = vpack.c.bf16 %v17650_v46, %v11471_v7 }
 0xa98   :  { %v17653_v1 = vpop.f32.mrb[114].mxu0  ;;  %18397 = vmatprep.subr.bf16.mxu1 %v18396_v29 }
 0xa99   :  { %v11481_v32 = vpop.f32.mrb[115].mxu0  ;;  %18399 = vmatpush3.bf16.msra.mxu1 %v18396_v29 }
 0xa9a   :  { %v18400_v17 = vpack.c.bf16 %v17653_v1, %v11481_v32 }
 0xa9c   :  { %v17656_v21 = vpop.f32.mrb[116].mxu0  ;;  %18401 = vmatprep.subr.bf16.mxu1 %v18400_v17 }
 0xa9d   :  { %v11491_v59 = vpop.f32.mrb[117].mxu0  ;;  %18403 = vmatpush3.bf16.msra.mxu1 %v18400_v17 }
 0xa9e   :  { %v18404_v15 = vpack.c.bf16 %v17656_v21, %v11491_v59 }
 0xaa0   :  { %v17659_v50 = vpop.f32.mrb[118].mxu0  ;;  %18405 = vmatprep.subr.bf16.mxu1 %v18404_v15 }
 0xaa1   :  { %v11501_v62 = vpop.f32.mrb[119].mxu0  ;;  %18407 = vmatpush3.bf16.msra.mxu1 %v18404_v15 }
 0xaa2   :  { %v18408_v19 = vpack.c.bf16 %v17659_v50, %v11501_v62  ;;  %v24902_v62 = vld [vmem:[#allocation3_spill] sm:$0xff] }
 0xaa4   :  { %v17662_v37 = vpop.f32.mrb[120].mxu0  ;;  %18409 = vmatprep.subr.bf16.mxu1 %v18408_v19 }
 0xaa5   :  { %v11511_v28 = vpop.f32.mrb[121].mxu0  ;;  %18411 = vmatpush3.bf16.msra.mxu1 %v18408_v19 }
 0xaa6   :  { %v18412_v46 = vpack.c.bf16 %v17662_v37, %v11511_v28 }
 0xaa8   :  { %v17665_v7 = vpop.f32.mrb[122].mxu0  ;;  %18413 = vmatprep.subr.bf16.mxu1 %v18412_v46 }
 0xaa9   :  { %v11521_v12 = vpop.f32.mrb[123].mxu0  ;;  %18415 = vmatpush3.bf16.msra.mxu1 %v18412_v46 }
 0xaaa   :  { %v18416_v29 = vpack.c.bf16 %v17665_v7, %v11521_v12 }
 0xaac   :  { %v17668_v1 = vpop.f32.mrb[124].mxu0  ;;  %18417 = vmatprep.subr.bf16.mxu1 %v18416_v29 }
 0xaad   :  { %v11531_v32 = vpop.f32.mrb[125].mxu0  ;;  %18419 = vmatpush3.bf16.msra.mxu1 %v18416_v29 }
 0xaae   :  { %v18420_v21 = vpack.c.bf16 %v17668_v1, %v11531_v32 }
 0xab0   :  { %v17671_v17 = vpop.f32.mrb[126].mxu0  ;;  %18421 = vmatprep.subr.bf16.mxu1 %v18420_v21 }
 0xab1   :  { %v11541_v59 = vpop.f32.mrb[127].mxu0  ;;  %18423 = vmatpush3.bf16.msra.mxu1 %v18420_v21 }
 0xab2   :  { %v18424_v50 = vpack.c.bf16 %v17671_v17, %v11541_v59 }
 0xab4   :  { %18426 = vmatprep.subr.msk.bf16.mxu1 %vm21098_vm11, %v18424_v50 }
 0xab5   :  { %18429 = vmatpush3.bf16.msk.msra.mxu1 %vm21098_vm11, %v18424_v50 }
 0xab6   :  { %18431 = vmatprep.subr.bf16.mxu1 %v19458_v52 }
 0xab8   :  { %17705 = vmatmul.mubr.msk.f32.vlgmr.msra.gmra.mrb[112].mxu1 %vm3078_vm8, %v21120_v0 }
 0xab9   :  { %17707 = vmatprep.mubr.msk.f32.mxu1 %vm3078_vm8, %v21123_v3  ;;  %18433 = vmatpush3.bf16.msra.mxu1 %v19458_v52  ;;  %v14926_v52 = vld [vmem:[%s24742_s1 + $0x678] sm:$0x7] }
 0xaba   :  { %18435 = vmatprep.subr.bf16.mxu1 %v19508_v63 }
 0xabc   :  { %17708 = vmatmul.mubr.msk.f32.gmra.mrb[114].mxu1 %vm3078_vm8, %v21143_v48 }
 0xabd   :  { %17710 = vmatprep.mubr.msk.f32.mxu1 %vm3078_vm8, %v21147_v54 }
 0xac0   :  { %17711 = vmatmul.mubr.msk.f32.gmra.mrb[116].mxu1 %vm3078_vm8, %v21166_v18 }
 0xac1   :  { %17713 = vmatprep.mubr.msk.f32.mxu1 %vm3078_vm8, %v21169_v56 }
 0xac4   :  { %17714 = vmatmul.mubr.msk.f32.gmra.mrb[118].mxu1 %vm3078_vm8, %v21186_v55 }
 0xac5   :  { %17720 = vmatprep.mubr.msk.f32.mxu1 %vm1150_vm6, %v23920_v4 }
 0xac8   :  { %17721 = vmatmul.mubr.msk.f32.vlgmr.msra.gmra.mrb[120].mxu1 %vm1150_vm6, %v23928_v49  ;;  %v24271_v49 = vld [vmem:[%s24742_s1 + $0x6a8] sm:$0xff] }
 0xac9   :  { %17723 = vmatprep.mubr.msk.f32.mxu1 %vm1150_vm6, %v23932_v27  ;;  %18437 = vmatpush3.bf16.msra.mxu1 %v19508_v63  ;;  %v11752_v63 = vrot.slane %v14926_v52, 1  ;;  %v24285_v27 = vld [vmem:[%s24742_s1 + $0x6b8] sm:$0xff] }
 0xaca   :  { %18439 = vmatprep.subr.bf16.mxu1 %v19791_v42  ;;  %v12571_v37 = vrot.slane %v24285_v27, 1 }
 0xacb   :  { %v11753_v4 = vsel %vm1118_vm5, %v23986_v10, %v11752_v63 }
 0xacc   :  { %17724 = vmatmul.mubr.msk.f32.gmra.mrb[122].mxu1 %vm1150_vm6, %v23940_v20  ;;  %v24290_v20 = vld [vmem:[%s24742_s1 + $0x6c0] sm:$0xff] }
 0xacd   :  { %17726 = vmatprep.mubr.msk.f32.mxu1 %vm1150_vm6, %v23945_v14  ;;  %v24299_v14 = vld [vmem:[%s24742_s1 + $0x6c8] sm:$0xff]  ;;  %v12573_v19 = vrot.slane %v24290_v20, 1 }
 0xace   :  { %v12575_v46 = vrot.slane %v24299_v14, 1 }
 0xacf   :  { %v12574_v1 = vsel %vm1118_vm5, %v12571_v37, %v12573_v19 }
 0xad0   :  { %17727 = vmatmul.mubr.msk.f32.gmra.mrb[124].mxu1 %vm1150_vm6, %v23953_v40  ;;  %v24304_v40 = vld [vmem:[%s24742_s1 + $0x6d0] sm:$0xff]  ;;  %v12576_v21 = vsel %vm1118_vm5, %v12573_v19, %v12575_v46 }
 0xad1   :  { %17729 = vmatprep.mubr.msk.f32.mxu1 %vm1150_vm6, %v23957_v39  ;;  %v24313_v39 = vld [vmem:[%s24742_s1 + $0x6d8] sm:$0xff]  ;;  %v12577_v29 = vrot.slane %v24304_v40, 1 }
 0xad2   :  { %v12579_v32 = vrot.slane %v24313_v39, 1 }
 0xad3   :  { %v12578_v59 = vsel %vm1118_vm5, %v12575_v46, %v12577_v29 }
 0xad4   :  { %17730 = vmatmul.mubr.msk.f32.gmra.mrb[126].mxu1 %vm1150_vm6, %v23965_v61  ;;  %v24318_v61 = vld [vmem:[%s24742_s1 + $0x6e0] sm:$0xff] }
 0xad5   :  { %17732 = vmatprep.mubr.msk.f32.mxu1 %vm1150_vm6, %v23969_v45  ;;  %v24327_v45 = vld [vmem:[%s24742_s1 + $0x6e8] sm:$0xff]  ;;  %v12581_v17 = vrot.slane %v24318_v61, 1 }
 0xad6   :  { %v12583_v50 = vrot.slane %v24327_v45, 1 }
 0xad8   :  { %17733 = vmatmul.mubr.msk.f32.gmra.mrb[128].mxu1 %vm1150_vm6, %v23977_v5 }
 0xad9   :  { %17735 = vmatprep.mubr.msk.f32.mxu1 %vm1150_vm6, %v23981_v58  ;;  %v24333_v58 = vld [vmem:[%s24742_s1 + $0x6f0] sm:$0xff] }
 0xadc   :  { %17736 = vmatmul.mubr.msk.f32.gmra.mrb[130].mxu1 %vm1150_vm6, %v23991_v60 }
 0xadd   :  { %17738 = vmatprep.mubr.msk.f32.mxu1 %vm1150_vm6, %v23995_v25  ;;  %v24344_v25 = vld [vmem:[%s24742_s1 + $0x6f8] sm:$0x7] }
 0xae0   :  { %17739 = vmatmul.mubr.msk.f32.gmra.mrb[132].mxu1 %vm1150_vm6, %v24003_v8 }
 0xae1   :  { %17741 = vmatprep.mubr.msk.f32.mxu1 %vm1150_vm6, %v11753_v4  ;;  %v12582_v4 = vsel %vm1118_vm5, %v12579_v32, %v12581_v17 }
 0xae4   :  { %17742 = vmatmul.mubr.msk.f32.gmra.mrb[134].mxu1 %vm1150_vm6, %v11752_v63  ;;  %v12585_v63 = vrot.slane %v24333_v58, 1 }
 0xae5   :  { %17748 = vmatprep.mubr.msk.f32.mxu1 %vm1150_vm6, %v23773_v38  ;;  %v24893_v38 = vld [vmem:[#allocation7_spill] sm:$0xff] }
 0xae8   :  { %17749 = vmatmul.mubr.msk.f32.vlgmr.msra.gmra.mrb[120].mxu1 %vm1150_vm6, %v23781_v43  ;;  %v24894_v43 = vld [vmem:[#allocation10_spill] sm:$0xff] }
 0xae9   :  { %17751 = vmatprep.mubr.msk.f32.mxu1 %vm1150_vm6, %v23786_v26  ;;  %18441 = vmatpush3.bf16.msra.mxu1 %v19791_v42  ;;  %v24892_v42 = vld [vmem:[#allocation9_spill] sm:$0xff]  ;;  %v24896_v26 = vld [vmem:[#allocation14_spill] sm:$0xff] }
 0xaea   :  { %18443 = vmatprep.subr.bf16.mxu1 %v19840_v35 }
 0xaec   :  { %17752 = vmatmul.mubr.msk.f32.gmra.mrb[122].mxu1 %vm1150_vm6, %v23795_v22  ;;  %v12137_v22 = vrot.slane %v14926_v52, 2 }
 0xaed   :  { %17754 = vmatprep.mubr.msk.f32.mxu1 %vm1150_vm6, %v23801_v23  ;;  %v24897_v23 = vld [vmem:[#allocation16_spill] sm:$0xff] }
 0xaf0   :  { %17755 = vmatmul.mubr.msk.f32.gmra.mrb[124].mxu1 %vm1150_vm6, %v23812_v41  ;;  %v24898_v41 = vld [vmem:[#allocation15_spill] sm:$0xff] }
 0xaf1   :  { %17757 = vmatprep.mubr.msk.f32.mxu1 %vm1150_vm6, %v23818_v44  ;;  %v24899_v44 = vld [vmem:[#allocation13_spill] sm:$0xff] }
 0xaf4   :  { %17758 = vmatmul.mubr.msk.f32.gmra.mrb[126].mxu1 %vm1150_vm6, %v23834_v53  ;;  %v12138_v53 = vsel %vm1505_vm4, %v24899_v44, %v12137_v22 }
 0xaf5   :  { %17760 = vmatprep.mubr.msk.f32.mxu1 %vm1150_vm6, %v23840_v36  ;;  %v24900_v36 = vld [vmem:[#allocation6_spill] sm:$0xff] }
 0xaf8   :  { %17761 = vmatmul.mubr.msk.f32.gmra.mrb[128].mxu1 %vm1150_vm6, %v23856_v16  ;;  %v24233_v16 = vld [vmem:[%s24742_s1 + $0x680] sm:$0xff] }
 0xaf9   :  { %17763 = vmatprep.mubr.msk.f32.mxu1 %vm1150_vm6, %v23862_v47  ;;  %v24241_v47 = vld [vmem:[%s24742_s1 + $0x688] sm:$0xff]  ;;  %v12558_v5 = vrot.slane %v24233_v16, 1 }
 0xafa   :  { %v12559_v10 = vrot.slane %v24241_v47, 1 }
 0xafc   :  { %17764 = vmatmul.mubr.msk.f32.gmra.mrb[130].mxu1 %vm1150_vm6, %v23878_v6  ;;  %v24246_v6 = vld [vmem:[%s24742_s1 + $0x690] sm:$0xff] }
 0xafd   :  { %17766 = vmatprep.mubr.msk.f32.mxu1 %vm1150_vm6, %v23884_v24  ;;  %v24255_v24 = vld [vmem:[%s24742_s1 + $0x698] sm:$0xff]  ;;  %v12561_v60 = vrot.slane %v24246_v6, 1 }
 0xafe   :  { %v12563_v8 = vrot.slane %v24255_v24, 1 }
 0xb00   :  { %17767 = vmatmul.mubr.msk.f32.gmra.mrb[132].mxu1 %vm1150_vm6, %v23899_v30  ;;  %v24261_v30 = vld [vmem:[%s24742_s1 + $0x6a0] sm:$0xff] }
 0xb01   :  { %17769 = vmatprep.mubr.msk.f32.mxu1 %vm1150_vm6, %v23905_v2  ;;  %v24901_v2 = vld [vmem:[#allocation2_spill] sm:$0xff] }
 0xb04   :  { %17770 = vmatmul.mubr.msk.f32.gmra.mrb[134].mxu1 %vm1150_vm6, %v14926_v52  ;;  %v12580_v52 = vsel %vm1118_vm5, %v12577_v29, %v12579_v32  ;;  %v24489_v29 = vld [vmem:[%s24742_s1 + $0x728] sm:$0xff]  ;;  %v24495_v32 = vld [vmem:[%s24742_s1 + $0x730] sm:$0xff] }
 0xb05   :  { %17776 = vmatprep.mubr.msk.f32.mxu1 %vm1150_vm6, %v24015_v13  ;;  %v12560_v13 = vsel %vm1118_vm5, %v12558_v5, %v12559_v10  ;;  %v24903_v5 = vld [vmem:[#allocation4_spill] sm:$0xff] }
 0xb08   :  { %17777 = vmatmul.mubr.msk.f32.vlgmr.msra.gmra.mrb[120].mxu1 %vm1150_vm6, %v24022_v31  ;;  %v12565_v31 = vrot.slane %v24261_v30, 1 }
 0xb09   :  { %17779 = vmatprep.mubr.msk.f32.mxu1 %vm1150_vm6, %v24026_v33  ;;  %18445 = vmatpush3.bf16.msra.mxu1 %v19840_v35  ;;  %v24895_v35 = vld [vmem:[#allocation12_spill] sm:$0xff]  ;;  %v12562_v33 = vsel %vm1118_vm5, %v12559_v10, %v12561_v60  ;;  %v12799_v10 = vrot.slane %v24299_v14, 2 }
 0xb0a   :  { %18447 = vmatprep.subr.bf16.mxu1 %v19882_v11  ;;  %v12566_v12 = vsel %vm1118_vm5, %v12563_v8, %v12565_v31 }
 0xb0c   :  { %17780 = vmatmul.mubr.msk.f32.gmra.mrb[122].mxu1 %vm1150_vm6, %v24034_v57  ;;  %v12567_v57 = vrot.slane %v24271_v49, 1 }
 0xb0d   :  { %17782 = vmatprep.mubr.msk.f32.mxu1 %vm1150_vm6, %v24038_v34  ;;  %v12564_v34 = vsel %vm1118_vm5, %v12561_v60, %v12563_v8 }
 0xb0e   :  { %v12568_v15 = vsel %vm1118_vm5, %v12565_v31, %v12567_v57  ;;  %v12805_v31 = vrot.slane %v24318_v61, 2 }
 0xb10   :  { %17783 = vmatmul.mubr.msk.f32.gmra.mrb[124].mxu1 %vm1150_vm6, %v24046_v9 }
 0xb11   :  { %17785 = vmatprep.mubr.msk.f32.mxu1 %vm1150_vm6, %v24892_v42  ;;  %v12587_v42 = vrot.slane %v24344_v25, 1 }
 0xb14   :  { %17786 = vmatmul.mubr.msk.f32.gmra.mrb[126].mxu1 %vm1150_vm6, %v24893_v38  ;;  %v12584_v38 = vsel %vm1118_vm5, %v12581_v17, %v12583_v50 }
 0xb15   :  { %17788 = vmatprep.mubr.msk.f32.mxu1 %vm1150_vm6, %v24894_v43  ;;  %v12586_v43 = vsel %vm1118_vm5, %v12583_v50, %v12585_v63  ;;  %v24511_v50 = vld [vmem:[%s24742_s1 + $0x738] sm:$0xff] }
 0xb18   :  { %17789 = vmatmul.mubr.msk.f32.gmra.mrb[128].mxu1 %vm1150_vm6, %v24895_v35  ;;  %v12782_v35 = vrot.slane %v24233_v16, 2 }
 0xb19   :  { %17791 = vmatprep.mubr.msk.f32.mxu1 %vm1150_vm6, %v24896_v26  ;;  %v12588_v26 = vsel %vm1118_vm5, %v12585_v63, %v12587_v42  ;;  %v24517_v63 = vld [vmem:[%s24742_s1 + $0x740] sm:$0xff] }
 0xb1c   :  { %17792 = vmatmul.mubr.msk.f32.gmra.mrb[130].mxu1 %vm1150_vm6, %v24897_v23  ;;  %v12785_v23 = vrot.slane %v24246_v6, 2 }
 0xb1d   :  { %17794 = vmatprep.mubr.msk.f32.mxu1 %vm1150_vm6, %v24898_v41  ;;  %v12787_v41 = vrot.slane %v24255_v24, 2 }
 0xb20   :  { %17795 = vmatmul.mubr.msk.f32.gmra.mrb[132].mxu1 %vm1150_vm6, %v24900_v36 }
 0xb21   :  { %17797 = vmatprep.mubr.msk.f32.mxu1 %vm1150_vm6, %v12138_v53  ;;  %v12789_v53 = vrot.slane %v24261_v30, 2 }
 0xb24   :  { %17798 = vmatmul.mubr.msk.f32.gmra.mrb[134].mxu1 %vm1150_vm6, %v12137_v22  ;;  %v12783_v22 = vrot.slane %v24241_v47, 2 }
 0xb25   :  { %17804 = vmatprep.mubr.msk.f32.mxu1 %vm1150_vm6, %v24233_v16  ;;  %v12791_v16 = vrot.slane %v24271_v49, 2 }
 0xb26   :  { %v12784_v44 = vsel %vm1505_vm4, %v12782_v35, %v12783_v22  ;;  %v12786_v36 = vsel %vm1505_vm4, %v12783_v22, %v12785_v23 }
 0xb28   :  { %17805 = vmatmul.mubr.msk.f32.vlgmr.msra.gmra.mrb[120].mxu1 %vm1150_vm6, %v24241_v47  ;;  %v12788_v47 = vsel %vm1505_vm4, %v12785_v23, %v12787_v41 }
 0xb29   :  { %17807 = vmatprep.mubr.msk.f32.mxu1 %vm1150_vm6, %v24246_v6  ;;  %18449 = vmatpush3.bf16.msra.mxu1 %v19882_v11  ;;  %v24276_v11 = vld [vmem:[%s24742_s1 + $0x6b0] sm:$0xff] }
 0xb2a   :  { %18451 = vmatprep.subr.bf16.mxu1 %v24901_v2  ;;  %v12569_v9 = vrot.slane %v24276_v11, 1  ;;  %v12793_v6 = vrot.slane %v24276_v11, 2 }
 0xb2c   :  { %17808 = vmatmul.mubr.msk.f32.gmra.mrb[122].mxu1 %vm1150_vm6, %v24255_v24  ;;  %v12570_v28 = vsel %vm1118_vm5, %v12567_v57, %v12569_v9  ;;  %v12572_v7 = vsel %vm1118_vm5, %v12569_v9, %v12571_v37  ;;  %v12790_v24 = vsel %vm1505_vm4, %v12787_v41, %v12789_v53  ;;  %v12809_v57 = vrot.slane %v24333_v58, 2  ;;  %v24467_v37 = vld [vmem:[%s24742_s1 + $0x718] sm:$0xff] }
 0xb2d   :  { %17810 = vmatprep.mubr.msk.f32.mxu1 %vm1150_vm6, %v24261_v30  ;;  %v12795_v30 = vrot.slane %v24285_v27, 2 }
 0xb2f   :  { %v12796_v60 = vsel %vm1505_vm4, %v12793_v6, %v12795_v30 }
 0xb30   :  { %17811 = vmatmul.mubr.msk.f32.gmra.mrb[124].mxu1 %vm1150_vm6, %v24271_v49  ;;  %v12797_v49 = vrot.slane %v24290_v20, 2 }
 0xb31   :  { %17813 = vmatprep.mubr.msk.f32.mxu1 %vm1150_vm6, %v24276_v11  ;;  %v12794_v11 = vsel %vm1505_vm4, %v12791_v16, %v12793_v6  ;;  %v24582_v6 = vld [vmem:[%s24742_s1 + $0x770] sm:$0xff] }
 0xb32   :  { %v12798_v8 = vsel %vm1505_vm4, %v12795_v30, %v12797_v49 }
 0xb34   :  { %17814 = vmatmul.mubr.msk.f32.gmra.mrb[126].mxu1 %vm1150_vm6, %v24285_v27  ;;  %v12801_v27 = vrot.slane %v24304_v40, 2 }
 0xb35   :  { %17816 = vmatprep.mubr.msk.f32.mxu1 %vm1150_vm6, %v24290_v20  ;;  %v12800_v20 = vsel %vm1505_vm4, %v12797_v49, %v12799_v10 }
 0xb38   :  { %17817 = vmatmul.mubr.msk.f32.gmra.mrb[128].mxu1 %vm1150_vm6, %v24299_v14  ;;  %v12802_v14 = vsel %vm1505_vm4, %v12799_v10, %v12801_v27 }
 0xb39   :  { %17819 = vmatprep.mubr.msk.f32.mxu1 %vm1150_vm6, %v24304_v40 }
 0xb3c   :  { %17820 = vmatmul.mubr.msk.f32.gmra.mrb[130].mxu1 %vm1150_vm6, %v24313_v39 }
 0xb3d   :  { %17822 = vmatprep.mubr.msk.f32.mxu1 %vm1150_vm6, %v24318_v61 }
 0xb40   :  { %17823 = vmatmul.mubr.msk.f32.gmra.mrb[132].mxu1 %vm1150_vm6, %v24327_v45 }
 0xb41   :  { %17825 = vmatprep.mubr.msk.f32.mxu1 %vm1150_vm6, %v24333_v58  ;;  %v24445_v58 = vld [vmem:[%s24742_s1 + $0x700] sm:$0xff] }
 0xb44   :  { %17826 = vmatmul.mubr.msk.f32.gmra.mrb[134].mxu1 %vm1150_vm6, %v24344_v25 }
 0xb45   :  { %17832 = vmatprep.mubr.msk.f32.mxu1 %vm1150_vm6, %v12560_v13  ;;  %v12803_v13 = vrot.slane %v24313_v39, 2 }
 0xb47   :  { %v12804_v40 = vsel %vm1505_vm4, %v12801_v27, %v12803_v13  ;;  %v12806_v39 = vsel %vm1505_vm4, %v12803_v13, %v12805_v31 }
 0xb48   :  { %17833 = vmatmul.mubr.msk.f32.vlgmr.msra.gmra.mrb[120].mxu1 %vm1150_vm6, %v12562_v33  ;;  %v12807_v33 = vrot.slane %v24327_v45, 2 }
 0xb49   :  { %17835 = vmatprep.mubr.msk.f32.mxu1 %vm1150_vm6, %v12564_v34  ;;  %18453 = vmatpush3.bf16.msra.mxu1 %v24901_v2  ;;  %v12792_v2 = vsel %vm1505_vm4, %v12789_v53, %v12791_v16  ;;  %v12811_v34 = vrot.slane %v24344_v25, 2  ;;  %v24453_v25 = vld [vmem:[%s24742_s1 + $0x708] sm:$0xff] }
 0xb4a   :  { %18455 = vmatprep.subr.bf16.mxu1 %v24902_v62  ;;  %v12808_v61 = vsel %vm1505_vm4, %v12805_v31, %v12807_v33  ;;  %v12810_v45 = vsel %vm1505_vm4, %v12807_v33, %v12809_v57  ;;  %v24576_v16 = vld [vmem:[%s24742_s1 + $0x768] sm:$0xff] }
 0xb4b   :  { %v12812_v9 = vsel %vm1505_vm4, %v12809_v57, %v12811_v34 }
 0xb4c   :  { %17836 = vmatmul.mubr.msk.f32.gmra.mrb[122].mxu1 %vm1150_vm6, %v12566_v12  ;;  %v24458_v12 = vld [vmem:[%s24742_s1 + $0x710] sm:$0xff] }
 0xb4d   :  { %17838 = vmatprep.mubr.msk.f32.mxu1 %vm1150_vm6, %v12568_v15  ;;  %v24473_v15 = vld [vmem:[%s24742_s1 + $0x720] sm:$0xff]  ;;  %v13235_v30 = vrot.slane %v24458_v12, 1 }
 0xb50   :  { %17839 = vmatmul.mubr.msk.f32.gmra.mrb[124].mxu1 %vm1150_vm6, %v12570_v28  ;;  %v24481_v28 = vld [vmem:[%s24745_s5] ss:$0 sm:$0xff] }
 0xb51   :  { %17841 = vmatprep.mubr.msk.f32.mxu1 %vm1150_vm6, %v12572_v7 }
 0xb54   :  { %17842 = vmatmul.mubr.msk.f32.gmra.mrb[126].mxu1 %vm1150_vm6, %v12574_v1 }
 0xb55   :  { %17844 = vmatprep.mubr.msk.f32.mxu1 %vm1150_vm6, %v12576_v21 }
 0xb58   :  { %17845 = vmatmul.mubr.msk.f32.gmra.mrb[128].mxu1 %vm1150_vm6, %v12578_v59 }
 0xb59   :  { %17847 = vmatprep.mubr.msk.f32.mxu1 %vm1150_vm6, %v12580_v52 }
 0xb5c   :  { %17848 = vmatmul.mubr.msk.f32.gmra.mrb[130].mxu1 %vm1150_vm6, %v12582_v4 }
 0xb5d   :  { %17850 = vmatprep.mubr.msk.f32.mxu1 %vm1150_vm6, %v12584_v38 }
 0xb60   :  { %17851 = vmatmul.mubr.msk.f32.gmra.mrb[132].mxu1 %vm1150_vm6, %v12586_v43  ;;  %v24533_v43 = vld [vmem:[%s24742_s1 + $0x748] sm:$0xff] }
 0xb61   :  { %17853 = vmatprep.mubr.msk.f32.mxu1 %vm1150_vm6, %v12588_v26  ;;  %v24539_v26 = vld [vmem:[%s24742_s1 + $0x750] sm:$0xff] }
 0xb64   :  { %17854 = vmatmul.mubr.msk.f32.gmra.mrb[134].mxu1 %vm1150_vm6, %v12587_v42 }
 0xb65   :  { %17860 = vmatprep.mubr.msk.f32.mxu1 %vm1150_vm6, %v12784_v44  ;;  %v24555_v44 = vld [vmem:[%s24742_s1 + $0x758] sm:$0xff] }
 0xb68   :  { %17861 = vmatmul.mubr.msk.f32.vlgmr.msra.gmra.mrb[120].mxu1 %vm1150_vm6, %v12786_v36  ;;  %v24561_v36 = vld [vmem:[%s24742_s1 + $0x760] sm:$0xff] }
 0xb69   :  { %17863 = vmatprep.mubr.msk.f32.mxu1 %vm1150_vm6, %v12788_v47  ;;  %18457 = vmatpush3.bf16.msra.mxu1 %v24902_v62  ;;  %v24904_v62 = vld [vmem:[#allocation5_spill] sm:$0xff]  ;;  %v13232_v47 = vrot.slane %v24445_v58, 1 }
 0xb6a   :  { %18459 = vmatprep.subr.bf16.mxu1 %v24903_v5 }
 0xb6c   :  { %17864 = vmatmul.mubr.msk.f32.gmra.mrb[122].mxu1 %vm1150_vm6, %v12790_v24  ;;  %v13233_v24 = vrot.slane %v24453_v25, 1 }
 0xb6d   :  { %17866 = vmatprep.mubr.msk.f32.mxu1 %vm1150_vm6, %v12792_v2  ;;  %v24593_v2 = vld [vmem:[%s24742_s1 + $0x778] sm:$0x7] }
 0xb6e   :  { %v13234_v49 = vsel %vm1118_vm5, %v13232_v47, %v13233_v24  ;;  %v13236_v10 = vsel %vm1118_vm5, %v13233_v24, %v13235_v30  ;;  %v13471_v47 = vrot.slane %v24517_v63, 2  ;;  %v13473_v24 = vrot.slane %v24533_v43, 2 }
 0xb70   :  { %17867 = vmatmul.mubr.msk.f32.gmra.mrb[124].mxu1 %vm1150_vm6, %v12794_v11  ;;  %v13239_v11 = vrot.slane %v24473_v15, 1 }
 0xb71   :  { %17869 = vmatprep.mubr.msk.f32.mxu1 %vm1150_vm6, %v12796_v60  ;;  %v13241_v60 = vrot.slane %v24489_v29, 1 }
 0xb73   :  { %v13242_v31 = vsel %vm1118_vm5, %v13239_v11, %v13241_v60 }
 0xb74   :  { %17870 = vmatmul.mubr.msk.f32.gmra.mrb[126].mxu1 %vm1150_vm6, %v12798_v8  ;;  %v13243_v8 = vrot.slane %v24495_v32, 1 }
 0xb75   :  { %17872 = vmatprep.mubr.msk.f32.mxu1 %vm1150_vm6, %v12800_v20  ;;  %v13245_v20 = vrot.slane %v24511_v50, 1 }
 0xb76   :  { %v13244_v33 = vsel %vm1118_vm5, %v13241_v60, %v13243_v8  ;;  %v13485_v60 = vrot.slane %v24593_v2, 2 }
 0xb77   :  { %v13246_v57 = vsel %vm1118_vm5, %v13243_v8, %v13245_v20 }
 0xb78   :  { %17873 = vmatmul.mubr.msk.f32.gmra.mrb[128].mxu1 %vm1150_vm6, %v12802_v14  ;;  %v13247_v14 = vrot.slane %v24517_v63, 1 }
 0xb79   :  { %17875 = vmatprep.mubr.msk.f32.mxu1 %vm1150_vm6, %v12804_v40  ;;  %v13249_v40 = vrot.slane %v24533_v43, 1 }
 0xb7c   :  { %17876 = vmatmul.mubr.msk.f32.gmra.mrb[130].mxu1 %vm1150_vm6, %v12806_v39  ;;  %v13251_v39 = vrot.slane %v24539_v26, 1 }
 0xb7d   :  { %17878 = vmatprep.mubr.msk.f32.mxu1 %vm1150_vm6, %v12808_v61  ;;  %v13253_v61 = vrot.slane %v24555_v44, 1 }
 0xb80   :  { %17879 = vmatmul.mubr.msk.f32.gmra.mrb[132].mxu1 %vm1150_vm6, %v12810_v45  ;;  %v13250_v45 = vsel %vm1118_vm5, %v13247_v14, %v13249_v40 }
 0xb81   :  { %17881 = vmatprep.mubr.msk.f32.mxu1 %vm1150_vm6, %v12812_v9  ;;  %v13255_v9 = vrot.slane %v24561_v36, 1 }
 0xb84   :  { %17882 = vmatmul.mubr.msk.f32.gmra.mrb[134].mxu1 %vm1150_vm6, %v12811_v34  ;;  %v13248_v34 = vsel %vm1118_vm5, %v13245_v20, %v13247_v14 }
 0xb85   :  { %17888 = vmatprep.mubr.msk.f32.mxu1 %vm1150_vm6, %v24445_v58 }
 0xb88   :  { %17889 = vmatmul.mubr.msk.f32.vlgmr.msra.gmra.mrb[120].mxu1 %vm1150_vm6, %v24453_v25 }
 0xb89   :  { %17891 = vmatprep.mubr.msk.f32.mxu1 %vm1150_vm6, %v24458_v12  ;;  %18461 = vmatpush3.bf16.msra.mxu1 %v24903_v5  ;;  %v13237_v5 = vrot.slane %v24467_v37, 1 }
 0xb8a   :  { %18463 = vmatprep.subr.bf16.mxu1 %v24904_v62 }
 0xb8b   :  { %v17706_v19 = vpop.f32.mrb[112].mxu1  ;;  %v13238_v27 = vsel %vm1118_vm5, %v13235_v30, %v13237_v5  ;;  %v13240_v13 = vsel %vm1118_vm5, %v13237_v5, %v13239_v11  ;;  %v13475_v30 = vrot.slane %v24539_v26, 2  ;;  %v13477_v5 = vrot.slane %v24555_v44, 2 }
 0xb8c   :  { %17892 = vmatmul.mubr.msk.f32.gmra.mrb[122].mxu1 %vm1150_vm6, %v24467_v37  ;;  %v11675_v46 = vadd.f32 %v24481_v28, %v17706_v19  ;;  %v11635_v7 = vpop.f32.mrb[113].mxu1  ;;  %v13257_v19 = vrot.slane %v24576_v16, 1  ;;  %v13481_v11 = vrot.slane %v24576_v16, 2 }
 0xb8d   :  { %17894 = vmatprep.mubr.msk.f32.mxu1 %vm1150_vm6, %v24473_v15  ;;  %v11674_v1 = vadd.f32 %v24481_v28, %v11635_v7  ;;  %v13259_v7 = vrot.slane %v24582_v6, 1 }
 0xb8e   :  { %14904 = vst [vmem:[%s24746_s7 + $0x108] sm:$0xff] %v11675_v46  ;;  %v13254_v46 = vsel %vm1118_vm5, %v13251_v39, %v13253_v61 }
 0xb8f   :  { %14903 = vst [vmem:[%s24746_s7 + $0x100] sm:$0xff] %v11674_v1  ;;  %v17709_v21 = vpop.f32.mrb[114].mxu1  ;;  %v13256_v1 = vsel %vm1118_vm5, %v13253_v61, %v13255_v9 }
 0xb90   :  { %17895 = vmatmul.mubr.msk.f32.gmra.mrb[124].mxu1 %vm1150_vm6, %v24489_v29  ;;  %v11677_v17 = vadd.f32 %v24481_v28, %v17709_v21  ;;  %v11645_v59 = vpop.f32.mrb[115].mxu1  ;;  %v13261_v21 = vrot.slane %v24593_v2, 1 }
 0xb91   :  { %17897 = vmatprep.mubr.msk.f32.mxu1 %vm1150_vm6, %v24495_v32  ;;  %v11676_v52 = vadd.f32 %v24481_v28, %v11645_v59  ;;  %v13260_v59 = vsel %vm1118_vm5, %v13257_v19, %v13259_v7 }
 0xb92   :  { %14906 = vst [vmem:[%s24746_s7 + $0x118] sm:$0xff] %v11677_v17  ;;  %v13258_v17 = vsel %vm1118_vm5, %v13255_v9, %v13257_v19 }
 0xb93   :  { %14905 = vst [vmem:[%s24746_s7 + $0x110] sm:$0xff] %v11676_v52  ;;  %v17712_v4 = vpop.f32.mrb[116].mxu1  ;;  %v13456_v52 = vrot.slane %v24445_v58, 2 }
 0xb94   :  { %17898 = vmatmul.mubr.msk.f32.gmra.mrb[126].mxu1 %vm1150_vm6, %v24511_v50  ;;  %v11679_v42 = vadd.f32 %v24481_v28, %v17712_v4  ;;  %v11655_v38 = vpop.f32.mrb[117].mxu1  ;;  %v13262_v4 = vsel %vm1118_vm5, %v13259_v7, %v13261_v21 }
 0xb95   :  { %17900 = vmatprep.mubr.msk.f32.mxu1 %vm1150_vm6, %v24517_v63  ;;  %v11678_v35 = vadd.f32 %v24481_v28, %v11655_v38  ;;  %v13459_v38 = vrot.slane %v24458_v12, 2  ;;  %v13467_v12 = vrot.slane %v24495_v32, 2  ;;  %v13474_v63 = vsel %vm1505_vm4, %v13471_v47, %v13473_v24 }
 0xb96   :  { %14908 = vst [vmem:[%s24746_s7 + $0x128] sm:$0xff] %v11679_v42  ;;  %v13457_v42 = vrot.slane %v24453_v25, 2  ;;  %v13465_v25 = vrot.slane %v24489_v29, 2 }
 0xb97   :  { %14907 = vst [vmem:[%s24746_s7 + $0x120] sm:$0xff] %v11678_v35  ;;  %v17715_v22 = vpop.f32.mrb[118].mxu1  ;;  %v13461_v35 = vrot.slane %v24467_v37, 2 }
 0xb98   :  { %17901 = vmatmul.mubr.msk.f32.gmra.mrb[128].mxu1 %vm1150_vm6, %v24533_v43  ;;  %v11681_v23 = vadd.f32 %v24481_v28, %v17715_v22  ;;  %v11665_v41 = vpop.f32.mrb[119].mxu1  ;;  %v13458_v22 = vsel %vm1505_vm4, %v13456_v52, %v13457_v42  ;;  %v13460_v58 = vsel %vm1505_vm4, %v13457_v42, %v13459_v38  ;;  %v13468_v29 = vsel %vm1505_vm4, %v13465_v25, %v13467_v12 }
 0xb99   :  { %17903 = vmatprep.mubr.msk.f32.mxu1 %vm1150_vm6, %v24539_v26  ;;  %v11680_v53 = vadd.f32 %v24481_v28, %v11665_v41  ;;  %v13462_v41 = vsel %vm1505_vm4, %v13459_v38, %v13461_v35  ;;  %v13476_v43 = vsel %vm1505_vm4, %v13473_v24, %v13475_v30  ;;  %v13478_v26 = vsel %vm1505_vm4, %v13475_v30, %v13477_v5 }
 0xb9a   :  { %14910 = vst [vmem:[%s24746_s7 + $0x138] sm:$0x1f] %v11681_v23  ;;  %v13463_v23 = vrot.slane %v24473_v15, 2 }
 0xb9b   :  { %14909 = vst [vmem:[%s24746_s7 + $0x130] sm:$0xff] %v11680_v53  ;;  %v13469_v53 = vrot.slane %v24511_v50, 2 }
 0xb9c   :  { %17904 = vmatmul.mubr.msk.f32.gmra.mrb[130].mxu1 %vm1150_vm6, %v24555_v44  ;;  %v13464_v37 = vsel %vm1505_vm4, %v13461_v35, %v13463_v23  ;;  %v13466_v15 = vsel %vm1505_vm4, %v13463_v23, %v13465_v25 }
 0xb9d   :  { %17906 = vmatprep.mubr.msk.f32.mxu1 %vm1150_vm6, %v24561_v36  ;;  %v13470_v32 = vsel %vm1505_vm4, %v13467_v12, %v13469_v53  ;;  %v13472_v50 = vsel %vm1505_vm4, %v13469_v53, %v13471_v47 }
 0xba0   :  { %17907 = vmatmul.mubr.msk.f32.gmra.mrb[132].mxu1 %vm1150_vm6, %v24576_v16 }
 0xba1   :  { %17909 = vmatprep.mubr.msk.f32.mxu1 %vm1150_vm6, %v24582_v6 }
 0xba4   :  { %17910 = vmatmul.mubr.msk.f32.gmra.mrb[134].mxu1 %vm1150_vm6, %v24593_v2 }
 0xba5   :  { %17916 = vmatprep.mubr.msk.f32.mxu1 %vm1150_vm6, %v13234_v49  ;;  %v13479_v49 = vrot.slane %v24561_v36, 2 }
 0xba7   :  { %v13480_v44 = vsel %vm1505_vm4, %v13477_v5, %v13479_v49  ;;  %v13482_v36 = vsel %vm1505_vm4, %v13479_v49, %v13481_v11 }
 0xba8   :  { %17917 = vmatmul.mubr.msk.f32.vlgmr.msra.gmra.mrb[120].mxu1 %vm1150_vm6, %v13236_v10  ;;  %v13483_v10 = vrot.slane %v24582_v6, 2 }
 0xba9   :  { %17919 = vmatprep.mubr.msk.f32.mxu1 %vm1150_vm6, %v13238_v27  ;;  %18465 = vmatpush3.bf16.msra.mxu1 %v24904_v62  ;;  %v13252_v62 = vsel %vm1118_vm5, %v13249_v40, %v13251_v39 }
 0xbaa   :  { %v13484_v16 = vsel %vm1505_vm4, %v13481_v11, %v13483_v10  ;;  %v13486_v27 = vsel %vm1505_vm4, %v13483_v10, %v13485_v60 }
 0xbac   :  { %17920 = vmatmul.mubr.msk.f32.gmra.mrb[122].mxu1 %vm1150_vm6, %v13240_v13 }
 0xbad   :  { %17922 = vmatprep.mubr.msk.f32.mxu1 %vm1150_vm6, %v13242_v31 }
 0xbb0   :  { %17923 = vmatmul.mubr.msk.f32.gmra.mrb[124].mxu1 %vm1150_vm6, %v13244_v33 }
 0xbb1   :  { %17925 = vmatprep.mubr.msk.f32.mxu1 %vm1150_vm6, %v13246_v57 }
 0xbb4   :  { %17926 = vmatmul.mubr.msk.f32.gmra.mrb[126].mxu1 %vm1150_vm6, %v13248_v34 }
 0xbb5   :  { %17928 = vmatprep.mubr.msk.f32.mxu1 %vm1150_vm6, %v13250_v45 }
 0xbb8   :  { %17929 = vmatmul.mubr.msk.f32.gmra.mrb[128].mxu1 %vm1150_vm6, %v13252_v62 }
 0xbb9   :  { %17931 = vmatprep.mubr.msk.f32.mxu1 %vm1150_vm6, %v13254_v46 }
 0xbbc   :  { %17932 = vmatmul.mubr.msk.f32.gmra.mrb[130].mxu1 %vm1150_vm6, %v13256_v1 }
 0xbbd   :  { %17934 = vmatprep.mubr.msk.f32.mxu1 %vm1150_vm6, %v13258_v17 }
 0xbc0   :  { %17935 = vmatmul.mubr.msk.f32.gmra.mrb[132].mxu1 %vm1150_vm6, %v13260_v59 }
 0xbc1   :  { %17937 = vmatprep.mubr.msk.f32.mxu1 %vm1150_vm6, %v13262_v4 }
 0xbc4   :  { %17938 = vmatmul.mubr.msk.f32.gmra.mrb[134].mxu1 %vm1150_vm6, %v13261_v21 }
 0xbc5   :  { %17944 = vmatprep.mubr.msk.f32.mxu1 %vm1150_vm6, %v13458_v22 }
 0xbc8   :  { %17945 = vmatmul.mubr.msk.f32.vlgmr.msra.gmra.mrb[120].mxu1 %vm1150_vm6, %v13460_v58 }
 0xbc9   :  { %17947 = vmatprep.mubr.msk.f32.mxu1 %vm1150_vm6, %v13462_v41 }
 0xbcc   :  { %17948 = vmatmul.mubr.msk.f32.gmra.mrb[122].mxu1 %vm1150_vm6, %v13464_v37 }
 0xbcd   :  { %17950 = vmatprep.mubr.msk.f32.mxu1 %vm1150_vm6, %v13466_v15 }
 0xbd0   :  { %17951 = vmatmul.mubr.msk.f32.gmra.mrb[124].mxu1 %vm1150_vm6, %v13468_v29 }
 0xbd1   :  { %17953 = vmatprep.mubr.msk.f32.mxu1 %vm1150_vm6, %v13470_v32 }
 0xbd4   :  { %17954 = vmatmul.mubr.msk.f32.gmra.mrb[126].mxu1 %vm1150_vm6, %v13472_v50 }
 0xbd5   :  { %17956 = vmatprep.mubr.msk.f32.mxu1 %vm1150_vm6, %v13474_v63 }
 0xbd8   :  { %17957 = vmatmul.mubr.msk.f32.gmra.mrb[128].mxu1 %vm1150_vm6, %v13476_v43 }
 0xbd9   :  { %17959 = vmatprep.mubr.msk.f32.mxu1 %vm1150_vm6, %v13478_v26 }
 0xbdc   :  { %17960 = vmatmul.mubr.msk.f32.gmra.mrb[130].mxu1 %vm1150_vm6, %v13480_v44 }
 0xbdd   :  { %17962 = vmatprep.mubr.msk.f32.mxu1 %vm1150_vm6, %v13482_v36 }
 0xbe0   :  { %17963 = vmatmul.mubr.msk.f32.gmra.mrb[132].mxu1 %vm1150_vm6, %v13484_v16 }
 0xbe1   :  { %17965 = vmatprep.mubr.msk.f32.mxu1 %vm1150_vm6, %v13486_v27 }
 0xbe4   :  { %17966 = vmatmul.mubr.msk.f32.gmra.mrb[134].mxu1 %vm1150_vm6, %v13485_v60 }
 0xc9b   :  { %v17946_v6 = vpop.f32.mrb[120].mxu1 }
 0xc9c   :  { %v13585_v8 = vpop.f32.mrb[121].mxu1 }
 0xc9d   :  { %v18466_v13 = vpack.c.bf16 %v17946_v6, %v13585_v8 }
 0xc9f   :  { %v17949_v2 = vpop.f32.mrb[122].mxu1  ;;  %18467 = vmatprep.subr.bf16.mxu0 %v18466_v13 }
 0xca0   :  { %v13595_v20 = vpop.f32.mrb[123].mxu1  ;;  %18469 = vmatpush3.bf16.msra.mxu0 %v18466_v13 }
 0xca1   :  { %v18470_v31 = vpack.c.bf16 %v17949_v2, %v13595_v20 }
 0xca3   :  { %v17952_v14 = vpop.f32.mrb[124].mxu1  ;;  %18471 = vmatprep.subr.bf16.mxu0 %v18470_v31 }
 0xca4   :  { %v13605_v33 = vpop.f32.mrb[125].mxu1  ;;  %18473 = vmatpush3.bf16.msra.mxu0 %v18470_v31 }
 0xca5   :  { %v18474_v40 = vpack.c.bf16 %v17952_v14, %v13605_v33 }
 0xca7   :  { %v17955_v57 = vpop.f32.mrb[126].mxu1  ;;  %18475 = vmatprep.subr.bf16.mxu0 %v18474_v40 }
 0xca8   :  { %v13615_v39 = vpop.f32.mrb[127].mxu1  ;;  %18477 = vmatpush3.bf16.msra.mxu0 %v18474_v40 }
 0xca9   :  { %v18478_v34 = vpack.c.bf16 %v17955_v57, %v13615_v39 }
 0xcab   :  { %v17958_v61 = vpop.f32.mrb[128].mxu1  ;;  %18479 = vmatprep.subr.bf16.mxu0 %v18478_v34 }
 0xcac   :  { %v13625_v45 = vpop.f32.mrb[129].mxu1  ;;  %18481 = vmatpush3.bf16.msra.mxu0 %v18478_v34 }
 0xcad   :  { %v18482_v9 = vpack.c.bf16 %v17958_v61, %v13625_v45 }
 0xcaf   :  { %v17961_v62 = vpop.f32.mrb[130].mxu1  ;;  %18483 = vmatprep.subr.bf16.mxu0 %v18482_v9 }
 0xcb0   :  { %v13635_v19 = vpop.f32.mrb[131].mxu1  ;;  %18485 = vmatpush3.bf16.msra.mxu0 %v18482_v9 }
 0xcb1   :  { %v18486_v46 = vpack.c.bf16 %v17961_v62, %v13635_v19 }
 0xcb3   :  { %v17964_v7 = vpop.f32.mrb[132].mxu1  ;;  %18487 = vmatprep.subr.bf16.mxu0 %v18486_v46 }
 0xcb4   :  { %v13645_v1 = vpop.f32.mrb[133].mxu1  ;;  %18489 = vmatpush3.bf16.msra.mxu0 %v18486_v46 }
 0xcb5   :  { %v18490_v21 = vpack.c.bf16 %v17964_v7, %v13645_v1 }
 0xcb7   :  { %v17967_v17 = vpop.f32.mrb[134].mxu1  ;;  %18491 = vmatprep.subr.bf16.mxu0 %v18490_v21 }
 0xcb8   :  { %v13655_v59 = vpop.f32.mrb[135].mxu1  ;;  %18493 = vmatpush3.bf16.msra.mxu0 %v18490_v21 }
 0xcb9   :  { %v18494_v52 = vpack.c.bf16 %v17967_v17, %v13655_v59 }
 0xcbb   :  { %18496 = vmatprep.subr.msk.bf16.mxu0 %vm21098_vm11, %v18494_v52 }
 0xcbc   :  { %18499 = vmatpush3.bf16.msk.msra.mxu0 %vm21098_vm11, %v18494_v52 }
 0xcbf   :  { %18001 = vmatmul.mubr.msk.f32.vlgmr.msra.gmra.mrb[128].mxu0 %vm3078_vm8, %v21120_v0 }
 0xcc0   :  { %18003 = vmatprep.mubr.msk.f32.mxu0 %vm3078_vm8, %v21123_v3 }
 0xcc3   :  { %18004 = vmatmul.mubr.msk.f32.gmra.mrb[130].mxu0 %vm3078_vm8, %v21143_v48 }
 0xcc4   :  { %18006 = vmatprep.mubr.msk.f32.mxu0 %vm3078_vm8, %v21147_v54 }
 0xcc7   :  { %18007 = vmatmul.mubr.msk.f32.gmra.mrb[132].mxu0 %vm3078_vm8, %v21166_v18 }
 0xcc8   :  { %18009 = vmatprep.mubr.msk.f32.mxu0 %vm3078_vm8, %v21169_v56 }
 0xccb   :  { %18010 = vmatmul.mubr.msk.f32.gmra.mrb[134].mxu0 %vm3078_vm8, %v21186_v55 }
 0xd92   :  { %v18002_v51 = vpop.f32.mrb[128].mxu0 }
 0xd93   :  { %v13789_v0 = vadd.f32 %v24481_v28, %v18002_v51  ;;  %v13749_v4 = vpop.f32.mrb[129].mxu0 }
 0xd94   :  { %v13788_v3 = vadd.f32 %v24481_v28, %v13749_v4 }
 0xd95   :  { %15113 = vst [vmem:[%s24746_s7 + $0x148] sm:$0xff] %v13789_v0 }
 0xd96   :  { %15112 = vst [vmem:[%s24746_s7 + $0x140] sm:$0xff] %v13788_v3  ;;  %v18005_v48 = vpop.f32.mrb[130].mxu0 }
 0xd97   :  { %v13791_v54 = vadd.f32 %v24481_v28, %v18005_v48  ;;  %v13759_v18 = vpop.f32.mrb[131].mxu0 }
 0xd98   :  { %v13790_v56 = vadd.f32 %v24481_v28, %v13759_v18 }
 0xd99   :  { %15115 = vst [vmem:[%s24746_s7 + $0x158] sm:$0xff] %v13791_v54 }
 0xd9a   :  { %15114 = vst [vmem:[%s24746_s7 + $0x150] sm:$0xff] %v13790_v56  ;;  %v18008_v55 = vpop.f32.mrb[132].mxu0 }
 0xd9b   :  { %v13793_v42 = vadd.f32 %v24481_v28, %v18008_v55  ;;  %v13769_v38 = vpop.f32.mrb[133].mxu0 }
 0xd9c   :  { %v13792_v35 = vadd.f32 %v24481_v28, %v13769_v38 }
 0xd9d   :  { %15117 = vst [vmem:[%s24746_s7 + $0x168] sm:$0xff] %v13793_v42 }
 0xd9e   :  { %15116 = vst [vmem:[%s24746_s7 + $0x160] sm:$0xff] %v13792_v35  ;;  %v18011_v22 = vpop.f32.mrb[134].mxu0 }
 0xd9f   :  { %v13795_v23 = vadd.f32 %v24481_v28, %v18011_v22  ;;  %v13779_v58 = vpop.f32.mrb[135].mxu0 }
 0xda0   :  { %v13794_v25 = vadd.f32 %v24481_v28, %v13779_v58 }
 0xda1   :  { %15119 = vst [vmem:[%s24746_s7 + $0x178] sm:$0x1f] %v13795_v23 }
 0xda2   :  { %15118 = vst [vmem:[%s24746_s7 + $0x170] sm:$0xff] %v13794_v25 }

</bundles_post_ra>
